<compile_context>
chip_gen: v7x
topology: tpu7x:2x2x1
jax: 0.10.0
libtpu: 0.0.40
codegen_flags: <defaults>
</compile_context>

<pallas_src>
import functools

import numpy as np

import jax
import jax.numpy as jnp
from jax.experimental import pallas as pl
from jax.experimental.pallas import tpu as pltpu

_VMEM_LIMIT = 48 * 1024 * 1024          # safe on v5e/v6e (128 MiB) and v7x (64 MiB)


def _round_up(v, m):
    return ((v + m - 1) // m) * m


def _pick_tile(n, cap=512):
    """Row-tile size: >=2 grid steps when possible (feeds both v7x TCs),
    8-row sublane alignment, capped at `cap` rows (~85% HBM roofline)."""
    if n <= 16:
        return n                        # single full block (alignment-exempt)
    return min(cap, _round_up((n + 1) // 2, 8))


# ----------------------------- Pallas kernels ------------------------------

def _gelu_tanh(x):
    # tanh-approx GELU: tanh runs on the EUP slot, so the epilogue no longer
    # VALU-binds the fc1 kernel on v6e/v7x. |err| vs erf-GELU ~3e-3, below the
    # bf16 activation-carry precision.
    c = jnp.float32(0.7978845608028654)  # sqrt(2/pi)
    return 0.5 * x * (1.0 + jnp.tanh(c * (x + 0.044715 * x * x * x)))


def _apply_act(y, act):
    if act == "relu":
        return jnp.maximum(y, 0.0)
    if act == "gelu":
        return _gelu_tanh(y)
    return y


def _mm_kernel(x_ref, w_ref, shift_ref, *rest, act, has_res):
    # y = act(x @ w + shift) [+ residual]; bf16 MXU operands, f32 accumulation
    # and epilogue, bf16 store.
    o_ref = rest[-1]
    y = jnp.dot(x_ref[...], w_ref[...], preferred_element_type=jnp.float32)
    y = _apply_act(y + shift_ref[...], act)
    if has_res:
        y = y + rest[0][...].astype(jnp.float32)
    o_ref[...] = y.astype(o_ref.dtype)


def _sum_all(x):
    # full-tensor sum as two single-axis keepdims reductions -> (1, 1)
    return jnp.sum(jnp.sum(x, axis=1, keepdims=True), axis=0, keepdims=True)


def _gn_stats_kernel(x_ref, o_ref, *, eps, inv_n):
    # Per-sample GroupNorm(1, C) statistics -> SMEM [B, 2] = (mean, rstd).
    b = pl.program_id(0)
    x = x_ref[...].astype(jnp.float32)                  # (HW, C)
    mean = _sum_all(x) * inv_n                          # (1, 1)
    var = _sum_all(jnp.square(x - mean)) * inv_n        # biased var (torch)
    inv = jax.lax.rsqrt(var + eps)
    o_ref[b, 0] = mean[0, 0]
    o_ref[b, 1] = inv[0, 0]


def _gn_norm_kernel(stats_ref, x_ref, g_ref, b_ref, o_ref):
    # Standalone GroupNorm(1, C): normalize + per-channel affine, HW-tiled.
    b = pl.program_id(0)
    mean = stats_ref[b, 0]
    inv = stats_ref[b, 1]
    x = x_ref[...].astype(jnp.float32)
    o_ref[...] = ((x - mean) * inv * g_ref[...] + b_ref[...]).astype(o_ref.dtype)


def _gn_mm_kernel(stats_ref, x_ref, w_ref, shift_ref, *rest, act, has_res):
    # Fused GroupNorm(1, C) + 1x1 conv (+act) (+residual), HW-tiled.
    # gamma folded into w, beta (and conv bias) into shift by the wrapper.
    o_ref = rest[-1]
    b = pl.program_id(0)
    mean = stats_ref[b, 0]
    inv = stats_ref[b, 1]
    x = x_ref[...].astype(jnp.float32)
    xhat = ((x - mean) * inv).astype(jnp.bfloat16)
    y = jnp.dot(xhat, w_ref[...], preferred_element_type=jnp.float32)
    y = _apply_act(y + shift_ref[...], act)
    if has_res:
        y = y + rest[0][...].astype(jnp.float32)
    o_ref[...] = y.astype(o_ref.dtype)


# ----------------------------- kernel wrappers ------------------------------

def _gn_stats(xr, eps):
    """Per-sample mean/rstd of a (B, HW, C) bf16 tensor -> (B, 2) f32."""
    B, HW, C = xr.shape
    return pl.pallas_call(
        functools.partial(_gn_stats_kernel, eps=eps, inv_n=1.0 / (HW * C)),
        out_shape=jax.ShapeDtypeStruct((B, 2), jnp.float32),
        grid=(B,),
        in_specs=[pl.BlockSpec((None, HW, C), lambda b: (b, 0, 0))],
        out_specs=pl.BlockSpec(memory_space=pltpu.MemorySpace.SMEM),
        compiler_params=pltpu.CompilerParams(
            dimension_semantics=("arbitrary",),     # shared SMEM output
            vmem_limit_bytes=_VMEM_LIMIT),
        cost_estimate=pl.CostEstimate(flops=4 * B * HW * C, transcendentals=0,
                                      bytes_accessed=B * HW * C * 2 + B * 8),
    )(xr)


def matmul_bias_act(x, w, shift, act="none", residual=None):
    """act(x @ w + shift) [+ residual]; bf16 MXU operands, f32 acc, bf16 out."""
    M, K = x.shape
    N = w.shape[1]
    tm = _pick_tile(M)
    grid = (pl.cdiv(M, tm),)
    has_res = residual is not None
    in_specs = [
        pl.BlockSpec((tm, K), lambda i: (i, 0)),
        pl.BlockSpec((K, N), lambda i: (0, 0)),       # weight resident across grid
        pl.BlockSpec((1, N), lambda i: (0, 0)),
    ]
    args = [x.astype(jnp.bfloat16), w.astype(jnp.bfloat16),
            shift.reshape(1, N).astype(jnp.float32)]
    if has_res:
        in_specs.append(pl.BlockSpec((tm, N), lambda i: (i, 0)))
        args.append(residual.astype(jnp.bfloat16))
    flops = 2 * M * K * N
    trans = M * N if act == "gelu" else 0
    bytes_accessed = (M * K * 2 + K * N * 2 + N * 4
                      + M * N * 2 * (2 if has_res else 1))
    return pl.pallas_call(
        functools.partial(_mm_kernel, act=act, has_res=has_res),
        out_shape=jax.ShapeDtypeStruct((M, N), jnp.bfloat16),
        grid=grid,
        in_specs=in_specs,
        out_specs=pl.BlockSpec((tm, N), lambda i: (i, 0)),
        compiler_params=pltpu.CompilerParams(
            dimension_semantics=("parallel",),
            vmem_limit_bytes=_VMEM_LIMIT),
        cost_estimate=pl.CostEstimate(flops=flops, transcendentals=trans,
                                      bytes_accessed=bytes_accessed),
    )(*args)


def gn_conv1x1(x, gn_w, gn_b, conv_w, conv_b=None, act="none", eps=1e-5,
               residual=None, shuffle_groups=None):
    """Fused nn.GroupNorm(1,C) + 1x1 Conv2d (+act) (+residual add) on NHWC.
    Two-pass: tiny per-sample stats kernel, then an HW-tiled normalize+matmul
    (fits v7x's 64 MiB VMEM at dense-prediction resolutions, gives >=2 parallel
    grid steps, real pipelining). An optional channel_shuffle preceding the
    norm is folded into the weight rows at trace time."""
    B, H, W, C = x.shape
    HW = H * W
    Cout = conv_w.shape[0]
    wm = conv_w.reshape(Cout, C).T.astype(jnp.float32)       # [C, Cout]
    shift = gn_b.astype(jnp.float32) @ wm                    # beta @ W  (+ bias)
    if conv_b is not None:
        shift = shift + conv_b.astype(jnp.float32)
    w_fold = wm * gn_w.astype(jnp.float32)[:, None]          # gamma folded into W
    if shuffle_groups is not None:
        # shuffle∘GN∘conv1x1 == GN∘conv1x1 with row-permuted (gamma-folded)
        # weight: GN(1,C) stats are permutation-invariant; zero runtime cost.
        cpg = C // shuffle_groups
        o = np.arange(C)
        src = (o % shuffle_groups) * cpg + (o // shuffle_groups)
        w_fold = w_fold[np.argsort(src)]
    w_fold = w_fold.astype(jnp.bfloat16)

    xr = x.reshape(B, HW, C).astype(jnp.bfloat16)
    stats = _gn_stats(xr, eps)

    thw = _pick_tile(HW)
    grid = (B, pl.cdiv(HW, thw))
    has_res = residual is not None
    in_specs = [
        pl.BlockSpec(memory_space=pltpu.MemorySpace.SMEM),       # (B, 2) stats
        pl.BlockSpec((None, thw, C), lambda b, t: (b, t, 0)),
        pl.BlockSpec((C, Cout), lambda b, t: (0, 0)),
        pl.BlockSpec((1, Cout), lambda b, t: (0, 0)),
    ]
    args = [stats, xr, w_fold, shift.reshape(1, Cout).astype(jnp.float32)]
    if has_res:
        in_specs.append(pl.BlockSpec((None, thw, Cout), lambda b, t: (b, t, 0)))
        args.append(residual.reshape(B, HW, Cout).astype(jnp.bfloat16))
    flops = 2 * B * HW * C * Cout + 6 * B * HW * C
    trans = B * HW * Cout if act == "gelu" else 0
    bytes_accessed = (B * HW * C * 2 + C * Cout * 2 + Cout * 4 + B * 8
                      + B * HW * Cout * 2 * (2 if has_res else 1))
    out = pl.pallas_call(
        functools.partial(_gn_mm_kernel, act=act, has_res=has_res),
        out_shape=jax.ShapeDtypeStruct((B, HW, Cout), jnp.bfloat16),
        grid=grid,
        in_specs=in_specs,
        out_specs=pl.BlockSpec((None, thw, Cout), lambda b, t: (b, t, 0)),
        compiler_params=pltpu.CompilerParams(
            dimension_semantics=("parallel", "parallel"),
            vmem_limit_bytes=_VMEM_LIMIT),
        cost_estimate=pl.CostEstimate(flops=flops, transcendentals=trans,
                                      bytes_accessed=bytes_accessed),
    )(*args)
    return out.reshape(B, H, W, Cout)


def group_norm(x, weight, bias, eps=1e-5):
    """nn.GroupNorm(1, C) on an NHWC tensor (stats pass + HW-tiled normalize)."""
    B, H, W, C = x.shape
    HW = H * W
    xr = x.reshape(B, HW, C).astype(jnp.bfloat16)
    stats = _gn_stats(xr, eps)
    thw = _pick_tile(HW)
    out = pl.pallas_call(
        _gn_norm_kernel,
        out_shape=jax.ShapeDtypeStruct((B, HW, C), jnp.bfloat16),
        grid=(B, pl.cdiv(HW, thw)),
        in_specs=[
            pl.BlockSpec(memory_space=pltpu.MemorySpace.SMEM),
            pl.BlockSpec((None, thw, C), lambda b, t: (b, t, 0)),
            pl.BlockSpec((1, C), lambda b, t: (0, 0)),
            pl.BlockSpec((1, C), lambda b, t: (0, 0)),
        ],
        out_specs=pl.BlockSpec((None, thw, C), lambda b, t: (b, t, 0)),
        compiler_params=pltpu.CompilerParams(
            dimension_semantics=("parallel", "parallel"),
            vmem_limit_bytes=_VMEM_LIMIT),
        cost_estimate=pl.CostEstimate(
            flops=4 * B * HW * C, transcendentals=0,
            bytes_accessed=4 * B * HW * C + 2 * C * 4 + B * 8),
    )(stats, xr, weight.reshape(1, C).astype(jnp.float32),
      bias.reshape(1, C).astype(jnp.float32))
    return out.reshape(B, H, W, C)


# --------------------------- conv (NHWC) via matmul --------------------------

def conv2d(x, w, bias=None, stride=1, pad=0, bn=None, act="none", eps=1e-5,
           residual=None):
    """torch-style Conv2d on an NHWC tensor via the Pallas matmul. Eval-mode
    BatchNorm (running stats), activation and an optional residual add are
    fused into the matmul epilogue (scale folded into the weight, shift into
    the bias). Weight `w` keeps torch layout (Cout, Cin, kh, kw)."""
    Cout, Cin, kh, kw = w.shape
    B = x.shape[0]
    w = w.astype(jnp.float32)
    if bn is not None:
        gamma, beta, rmean, rvar = bn
        scale = gamma / jnp.sqrt(rvar + eps)
        shift = beta - rmean * scale
        if bias is not None:
            shift = shift + bias * scale
        w = w * scale[:, None, None, None]
    else:
        shift = bias if bias is not None else jnp.zeros((Cout,), jnp.float32)

    if kh == 1 and kw == 1 and stride == 1 and pad == 0:
        Ho, Wo = x.shape[1], x.shape[2]
        xm = x.reshape(B * Ho * Wo, Cin)                    # free reshape (NHWC)
        wm = w.reshape(Cout, Cin).T
    else:
        # TODO(synk): replace this HBM-materialized im2col with in-kernel tap
        # accumulation (kh*kw 'arbitrary' grid axis + VMEM f32 accumulator); at
        # production resolutions im2col inflates patch-embed traffic ~k^2.
        if pad:
            x = jnp.pad(x, ((0, 0), (pad, pad), (pad, pad), (0, 0)))
        Hp, Wp = x.shape[1], x.shape[2]
        Ho = (Hp - kh) // stride + 1
        Wo = (Wp - kw) // stride + 1
        cols = []
        for dy in range(kh):
            for dx in range(kw):
                cols.append(x[:, dy:dy + stride * Ho:stride,
                              dx:dx + stride * Wo:stride, :])
        patches = jnp.concatenate(cols, axis=-1)            # [B,Ho,Wo,kh*kw*Cin]
        xm = patches.reshape(B * Ho * Wo, kh * kw * Cin)
        wm = w.transpose(2, 3, 1, 0).reshape(kh * kw * Cin, Cout)

    res = None if residual is None else residual.reshape(B * Ho * Wo, Cout)
    y = matmul_bias_act(xm, wm, shift, act=act, residual=res)
    return y.reshape(B, Ho, Wo, Cout)


# ------------------------------ model modules -------------------------------

def axial_shift(x):
    # Functional equivalent of Cascaded_MLP.shift on NHWC: +-1 shift along W/H
    # per channel quarter; border rows/cols keep their original values (matches
    # the in-place torch slice assignments).
    # TODO(synk): fuse into the following 1x1-conv kernel via pltpu.roll +
    # border select, and pad the sub-128 cascade channel counts to a lane
    # multiple (lane-dense stores).
    B, H, W, c = x.shape
    g1, g2, g3 = c // 4, c // 2, c * 3 // 4
    p1, p2, p3, p4 = x[..., :g1], x[..., g1:g2], x[..., g2:g3], x[..., g3:]
    p1 = jnp.concatenate([p1[:, :, :1, :], p1[:, :, :W - 1, :]], axis=2)   # shift right (W)
    p2 = jnp.concatenate([p2[:, :, 1:, :], p2[:, :, W - 1:, :]], axis=2)   # shift left  (W)
    p3 = jnp.concatenate([p3[:, :1, :, :], p3[:, :H - 1, :, :]], axis=1)   # shift down  (H)
    p4 = jnp.concatenate([p4[:, 1:, :, :], p4[:, H - 1:, :, :]], axis=1)   # shift up    (H)
    return jnp.concatenate([p1, p2, p3, p4], axis=-1)


def cascaded_mlp_forward(p, x, residual, k=4, groups=2):
    B, H, W, C = x.shape
    ec = C // k
    x_split = [x[..., i * ec:(i + 1) * ec] for i in range(k)]
    out = []
    x_out_1 = None
    for i in range(1, k):
        if i == 1:
            inp = axial_shift(x_split[1])
        else:
            inp = axial_shift(jnp.concatenate([x_split[i], x_out_1], axis=-1))
        cp = p['conv'][i - 1]
        x_out = conv2d(inp, cp['w'], cp['b'])
        if i == k - 1:
            out.append(x_out)
        else:
            half = x_out.shape[-1] // 2
            x_out_1, x_out_2 = x_out[..., :half], x_out[..., half:]
            out.append(x_out_2)
    merged = jnp.concatenate(out + [x_split[0]], axis=-1)
    # channel_shuffle + norm1 + conv2 + residual add fused into one kernel
    # (shuffle folded into the weight's input-channel rows at trace time).
    return gn_conv1x1(merged, p['norm1_w'], p['norm1_b'],
                      p['conv2_w'], p['conv2_b'],
                      residual=residual, shuffle_groups=groups)


def block_forward(p, x):
    shortcut = x
    xn = group_norm(x, p['norm1_w'], p['norm1_b'])
    # x = shortcut + Cascaded_MLP(norm1(x))   (residual add fused in-kernel;
    # drop_path = identity in eval)
    x = cascaded_mlp_forward(p['cascaded'], xn, residual=shortcut)
    # mlp: norm2 + fc1 + GELU fused; fc2 + second residual add fused (drop=0)
    h = gn_conv1x1(x, p['norm2_w'], p['norm2_b'],
                   p['mlp']['fc1_w'], p['mlp']['fc1_b'], act="gelu")
    return conv2d(h, p['mlp']['fc2_w'], p['mlp']['fc2_b'], residual=x)


def patch_merging_forward(p, x):
    # TODO(synk): fuse the 4-way strided slice + concat into the kernel input
    # DMA (stride-2 gather) to avoid materializing the 4C tensor in HBM.
    x0 = x[:, 0::2, 0::2, :]
    x1 = x[:, 1::2, 0::2, :]
    x2 = x[:, 0::2, 1::2, :]
    x3 = x[:, 1::2, 1::2, :]
    x = jnp.concatenate([x0, x1, x2, x3], axis=-1)
    # norm + 1x1 reduction (bias=False) fused into one kernel
    return gn_conv1x1(x, p['norm_w'], p['norm_b'], p['red_w'], None)


def patch_embed_forward(p, x):
    x = conv2d(x, p['conv1_w'], None, stride=2, pad=3, bn=p['bn1'], act="relu")
    x = conv2d(x, p['conv2_w'], None, stride=1, pad=1, bn=p['bn2'], act="relu")
    x = conv2d(x, p['conv3_w'], None, stride=1, pad=1, bn=p['bn3'], act="relu")
    x = conv2d(x, p['proj_w'], p['proj_b'], stride=2, pad=0)
    x = group_norm(x, p['norm_w'], p['norm_b'])
    return x


def as_mlp_forward(params, x_nchw):
    # forward_features with semnc=True: returns per-stage feature maps (NCHW,
    # matching the PyTorch reference). Internally everything is NHWC bf16.
    x = jnp.transpose(x_nchw, (0, 2, 3, 1)).astype(jnp.bfloat16)
    x = patch_embed_forward(params['patch_embed'], x)   # pos_drop = identity
    outs = []
    for layer_p in params['layers']:
        if layer_p['downsample'] is not None:
            x = patch_merging_forward(layer_p['downsample'], x)
        for blk_p in layer_p['blocks']:
            x = block_forward(blk_p, x)
        outs.append(jnp.transpose(x, (0, 3, 1, 2)).astype(jnp.float32))
    return outs


# --------------------------- deterministic params ---------------------------

def _kg(key):
    c = [0]
    def nxt():
        c[0] += 1
        return jax.random.fold_in(key, c[0])
    return nxt


def _w(k, *shape):
    return 0.02 * jax.random.normal(k, shape, jnp.float32)


def _bn(dim):
    # (gamma, beta, running_mean, running_var) -- eval-mode BatchNorm stats.
    return (jnp.ones((dim,), jnp.float32), jnp.zeros((dim,), jnp.float32),
            jnp.zeros((dim,), jnp.float32), jnp.ones((dim,), jnp.float32))


def init_cascaded(kg, dim, k=4):
    ec = dim // k
    convs = []
    for i in range(1, k):
        ch = int(ec * ((2 ** (i - 1) - 1) / 2 ** (i - 1) + 1))
        convs.append({'w': _w(kg(), ch, ch, 1, 1), 'b': _w(kg(), ch)})
    return {
        'conv': convs,
        'conv2_w': _w(kg(), dim, dim, 1, 1), 'conv2_b': _w(kg(), dim),
        'norm1_w': jnp.ones((dim,), jnp.float32),
        'norm1_b': jnp.zeros((dim,), jnp.float32),
    }


def init_block(kg, dim, mlp_ratio):
    hidden = int(dim * mlp_ratio)
    return {
        'norm1_w': jnp.ones((dim,), jnp.float32),
        'norm1_b': jnp.zeros((dim,), jnp.float32),
        'cascaded': init_cascaded(kg, dim),
        'norm2_w': jnp.ones((dim,), jnp.float32),
        'norm2_b': jnp.zeros((dim,), jnp.float32),
        'mlp': {
            'fc1_w': _w(kg(), hidden, dim, 1, 1), 'fc1_b': _w(kg(), hidden),
            'fc2_w': _w(kg(), dim, hidden, 1, 1), 'fc2_b': _w(kg(), dim),
        },
    }


def init_as_mlp_params(key, patch_size=4, in_chans=3, embed_dim=16,
                       depths=(1, 1, 1, 1), mlp_ratio=4.0):
    kg = _kg(key)
    params = {
        'patch_embed': {
            'conv1_w': _w(kg(), 96, in_chans, 7, 7), 'bn1': _bn(96),
            'conv2_w': _w(kg(), 96, 96, 3, 3),       'bn2': _bn(96),
            'conv3_w': _w(kg(), 96, 96, 3, 3),       'bn3': _bn(96),
            'proj_w': _w(kg(), embed_dim, 96, patch_size // 2, patch_size // 2),
            'proj_b': _w(kg(), embed_dim),
            'norm_w': jnp.ones((embed_dim,), jnp.float32),
            'norm_b': jnp.zeros((embed_dim,), jnp.float32),
        }
    }
    layers = []
    for i_layer in range(len(depths)):
        dim_in = int(embed_dim * 2 ** (i_layer - 1)) if i_layer > 0 else embed_dim
        dimblock = int(embed_dim * 2 ** i_layer) if i_layer > 0 else embed_dim
        if i_layer > 0:
            downsample = {
                'norm_w': jnp.ones((4 * dim_in,), jnp.float32),
                'norm_b': jnp.zeros((4 * dim_in,), jnp.float32),
                'red_w': _w(kg(), 2 * dim_in, 4 * dim_in, 1, 1),   # bias=False
            }
        else:
            downsample = None
        blocks = [init_block(kg, dimblock, mlp_ratio) for _ in range(depths[i_layer])]
        layers.append({'downsample': downsample, 'blocks': blocks})
    params['layers'] = layers
    return params


# ----------------------------------- main ------------------------------------

if __name__ == "__main__":
    # Small, consistent config: img 32x32, patch 4 -> 8x8 patches; stages at
    # resolutions 8,4,2,1 with dims 16,32,64,128; depths (1,1,1,1).
    key = jax.random.PRNGKey(0)
    params = init_as_mlp_params(key, patch_size=4, in_chans=3,
                                embed_dim=16, depths=(1, 1, 1, 1), mlp_ratio=4.0)
    x = jax.random.normal(jax.random.fold_in(key, 12345), (2, 3, 32, 32), jnp.float32)

    fwd = jax.jit(as_mlp_forward)
    outs = fwd(params, x)
    outs = jax.block_until_ready(outs)
    # outs shapes: (2,16,8,8), (2,32,4,4), (2,64,2,2), (2,128,1,1)
    assert [o.shape for o in outs] == [(2, 16, 8, 8), (2, 32, 4, 4),
                                       (2, 64, 2, 2), (2, 128, 1, 1)]
    print("KERNEL_OK")
</pallas_src>

<mosaic_0001>
module attributes {stable_mosaic.version = 11 : i64} {
  func.func @_mm_kernel(%arg0: i32, %arg1: memref<256x147xbf16, #tpu.memory_space<vmem>>, %arg2: memref<147x96xbf16, #tpu.memory_space<vmem>>, %arg3: memref<1x96xf32, #tpu.memory_space<vmem>>, %arg4: memref<256x96xbf16, #tpu.memory_space<vmem>>) attributes {dimension_semantics = [#tpu.dimension_semantics<parallel>], iteration_bounds = array<i64: 2>, scalar_prefetch = 0 : i64, scratch_operands = 0 : i64, tpu.core_type = #tpu.core_type<tc>, window_params = [{transform_indices = @transform_0, window_bounds = array<i64: 256, 147>}, {pipeline_mode = #tpu.pipeline_mode<synchronous>, transform_indices = @transform_1, window_bounds = array<i64: 147, 96>}, {pipeline_mode = #tpu.pipeline_mode<synchronous>, transform_indices = @transform_2, window_bounds = array<i64: 1, 96>}, {transform_indices = @transform_3, window_bounds = array<i64: 256, 96>}]} {
    %c0 = arith.constant 0 : index
    %c0_0 = arith.constant 0 : index
    %0 = vector.load %arg1[%c0, %c0_0] : memref<256x147xbf16, #tpu.memory_space<vmem>>, vector<256x147xbf16>
    %c0_1 = arith.constant 0 : index
    %c0_2 = arith.constant 0 : index
    %1 = vector.load %arg2[%c0_1, %c0_2] : memref<147x96xbf16, #tpu.memory_space<vmem>>, vector<147x96xbf16>
    %cst = arith.constant dense<0.000000e+00> : vector<256x96xf32>
    %2 = tpu.matmul %0, %1, %cst {dimension_numbers = #tpu.dot_dimension_numbers<[1], [0], [0], [1], [0, 0, 1, 1], [], []>} : vector<256x147xbf16>, vector<147x96xbf16>, vector<256x96xf32> -> vector<256x96xf32>
    %c0_3 = arith.constant 0 : index
    %c0_4 = arith.constant 0 : index
    %3 = vector.load %arg3[%c0_3, %c0_4] : memref<1x96xf32, #tpu.memory_space<vmem>>, vector<1x96xf32>
    %4 = vector.broadcast %3 : vector<1x96xf32> to vector<256x96xf32>
    %5 = arith.addf %2, %4 : vector<256x96xf32>
    %cst_5 = arith.constant 0.000000e+00 : f32
    %6 = vector.broadcast %cst_5 : f32 to vector<256x96xf32>
    %7 = arith.maximumf %5, %6 : vector<256x96xf32>
    %8 = arith.truncf %7 : vector<256x96xf32> to vector<256x96xbf16>
    %c0_6 = arith.constant 0 : index
    %c0_7 = arith.constant 0 : index
    %9 = vector.load %arg4[%c0_6, %c0_7] : memref<256x96xbf16, #tpu.memory_space<vmem>>, vector<256x96xbf16>
    tpu.vector_store %arg4[%c0_6, %c0_7], %8 {strides = array<i32>} : memref<256x96xbf16, #tpu.memory_space<vmem>>, vector<256x96xbf16>,
    return
  }
  func.func @transform_0(%arg0: i32) -> (i32, i32) {
    %c0_i32 = arith.constant 0 : i32
    %c0_i32_0 = arith.constant 0 : i32
    return %arg0, %c0_i32 : i32, i32
  }
  func.func @transform_1(%arg0: i32) -> (i32, i32) {
    %c0_i32 = arith.constant 0 : i32
    %c0_i32_0 = arith.constant 0 : i32
    %c0_i32_1 = arith.constant 0 : i32
    return %c0_i32, %c0_i32_0 : i32, i32
  }
  func.func @transform_2(%arg0: i32) -> (i32, i32) {
    %c0_i32 = arith.constant 0 : i32
    %c0_i32_0 = arith.constant 0 : i32
    %c0_i32_1 = arith.constant 0 : i32
    return %c0_i32, %c0_i32_0 : i32, i32
  }
  func.func @transform_3(%arg0: i32) -> (i32, i32) {
    %c0_i32 = arith.constant 0 : i32
    %c0_i32_0 = arith.constant 0 : i32
    return %arg0, %c0_i32 : i32, i32
  }
}

module attributes {stable_mosaic.version = 11 : i64} {
  func.func @_mm_kernel(%arg0: i32, %arg1: memref<256x864xbf16, #tpu.memory_space<vmem>>, %arg2: memref<864x96xbf16, #tpu.memory_space<vmem>>, %arg3: memref<1x96xf32, #tpu.memory_space<vmem>>, %arg4: memref<256x96xbf16, #tpu.memory_space<vmem>>) attributes {dimension_semantics = [#tpu.dimension_semantics<parallel>], iteration_bounds = array<i64: 2>, scalar_prefetch = 0 : i64, scratch_operands = 0 : i64, tpu.core_type = #tpu.core_type<tc>, window_params = [{transform_indices = @transform_0, window_bounds = array<i64: 256, 864>}, {pipeline_mode = #tpu.pipeline_mode<synchronous>, transform_indices = @transform_1, window_bounds = array<i64: 864, 96>}, {pipeline_mode = #tpu.pipeline_mode<synchronous>, transform_indices = @transform_2, window_bounds = array<i64: 1, 96>}, {transform_indices = @transform_3, window_bounds = array<i64: 256, 96>}]} {
    %c0 = arith.constant 0 : index
    %c0_0 = arith.constant 0 : index
    %0 = vector.load %arg1[%c0, %c0_0] : memref<256x864xbf16, #tpu.memory_space<vmem>>, vector<256x864xbf16>
    %c0_1 = arith.constant 0 : index
    %c0_2 = arith.constant 0 : index
    %1 = vector.load %arg2[%c0_1, %c0_2] : memref<864x96xbf16, #tpu.memory_space<vmem>>, vector<864x96xbf16>
    %cst = arith.constant dense<0.000000e+00> : vector<256x96xf32>
    %2 = tpu.matmul %0, %1, %cst {dimension_numbers = #tpu.dot_dimension_numbers<[1], [0], [0], [1], [0, 0, 1, 1], [], []>} : vector<256x864xbf16>, vector<864x96xbf16>, vector<256x96xf32> -> vector<256x96xf32>
    %c0_3 = arith.constant 0 : index
    %c0_4 = arith.constant 0 : index
    %3 = vector.load %arg3[%c0_3, %c0_4] : memref<1x96xf32, #tpu.memory_space<vmem>>, vector<1x96xf32>
    %4 = vector.broadcast %3 : vector<1x96xf32> to vector<256x96xf32>
    %5 = arith.addf %2, %4 : vector<256x96xf32>
    %cst_5 = arith.constant 0.000000e+00 : f32
    %6 = vector.broadcast %cst_5 : f32 to vector<256x96xf32>
    %7 = arith.maximumf %5, %6 : vector<256x96xf32>
    %8 = arith.truncf %7 : vector<256x96xf32> to vector<256x96xbf16>
    %c0_6 = arith.constant 0 : index
    %c0_7 = arith.constant 0 : index
    %9 = vector.load %arg4[%c0_6, %c0_7] : memref<256x96xbf16, #tpu.memory_space<vmem>>, vector<256x96xbf16>
    tpu.vector_store %arg4[%c0_6, %c0_7], %8 {strides = array<i32>} : memref<256x96xbf16, #tpu.memory_space<vmem>>, vector<256x96xbf16>,
    return
  }
  func.func @transform_0(%arg0: i32) -> (i32, i32) {
    %c0_i32 = arith.constant 0 : i32
    %c0_i32_0 = arith.constant 0 : i32
    return %arg0, %c0_i32 : i32, i32
  }
  func.func @transform_1(%arg0: i32) -> (i32, i32) {
    %c0_i32 = arith.constant 0 : i32
    %c0_i32_0 = arith.constant 0 : i32
    %c0_i32_1 = arith.constant 0 : i32
    return %c0_i32, %c0_i32_0 : i32, i32
  }
  func.func @transform_2(%arg0: i32) -> (i32, i32) {
    %c0_i32 = arith.constant 0 : i32
    %c0_i32_0 = arith.constant 0 : i32
    %c0_i32_1 = arith.constant 0 : i32
    return %c0_i32, %c0_i32_0 : i32, i32
  }
  func.func @transform_3(%arg0: i32) -> (i32, i32) {
    %c0_i32 = arith.constant 0 : i32
    %c0_i32_0 = arith.constant 0 : i32
    return %arg0, %c0_i32 : i32, i32
  }
}

module attributes {stable_mosaic.version = 11 : i64} {
  func.func @_mm_kernel(%arg0: i32, %arg1: memref<64x384xbf16, #tpu.memory_space<vmem>>, %arg2: memref<384x16xbf16, #tpu.memory_space<vmem>>, %arg3: memref<1x16xf32, #tpu.memory_space<vmem>>, %arg4: memref<64x16xbf16, #tpu.memory_space<vmem>>) attributes {dimension_semantics = [#tpu.dimension_semantics<parallel>], iteration_bounds = array<i64: 2>, scalar_prefetch = 0 : i64, scratch_operands = 0 : i64, tpu.core_type = #tpu.core_type<tc>, window_params = [{transform_indices = @transform_0, window_bounds = array<i64: 64, 384>}, {pipeline_mode = #tpu.pipeline_mode<synchronous>, transform_indices = @transform_1, window_bounds = array<i64: 384, 16>}, {pipeline_mode = #tpu.pipeline_mode<synchronous>, transform_indices = @transform_2, window_bounds = array<i64: 1, 16>}, {transform_indices = @transform_3, window_bounds = array<i64: 64, 16>}]} {
    %c0 = arith.constant 0 : index
    %c0_0 = arith.constant 0 : index
    %0 = vector.load %arg1[%c0, %c0_0] : memref<64x384xbf16, #tpu.memory_space<vmem>>, vector<64x384xbf16>
    %c0_1 = arith.constant 0 : index
    %c0_2 = arith.constant 0 : index
    %1 = vector.load %arg2[%c0_1, %c0_2] : memref<384x16xbf16, #tpu.memory_space<vmem>>, vector<384x16xbf16>
    %cst = arith.constant dense<0.000000e+00> : vector<64x16xf32>
    %2 = tpu.matmul %0, %1, %cst {dimension_numbers = #tpu.dot_dimension_numbers<[1], [0], [0], [1], [0, 0, 1, 1], [], []>} : vector<64x384xbf16>, vector<384x16xbf16>, vector<64x16xf32> -> vector<64x16xf32>
    %c0_3 = arith.constant 0 : index
    %c0_4 = arith.constant 0 : index
    %3 = vector.load %arg3[%c0_3, %c0_4] : memref<1x16xf32, #tpu.memory_space<vmem>>, vector<1x16xf32>
    %4 = vector.broadcast %3 : vector<1x16xf32> to vector<64x16xf32>
    %5 = arith.addf %2, %4 : vector<64x16xf32>
    %6 = arith.truncf %5 : vector<64x16xf32> to vector<64x16xbf16>
    %c0_5 = arith.constant 0 : index
    %c0_6 = arith.constant 0 : index
    %7 = vector.load %arg4[%c0_5, %c0_6] : memref<64x16xbf16, #tpu.memory_space<vmem>>, vector<64x16xbf16>
    tpu.vector_store %arg4[%c0_5, %c0_6], %6 {strides = array<i32>} : memref<64x16xbf16, #tpu.memory_space<vmem>>, vector<64x16xbf16>,
    return
  }
  func.func @transform_0(%arg0: i32) -> (i32, i32) {
    %c0_i32 = arith.constant 0 : i32
    %c0_i32_0 = arith.constant 0 : i32
    return %arg0, %c0_i32 : i32, i32
  }
  func.func @transform_1(%arg0: i32) -> (i32, i32) {
    %c0_i32 = arith.constant 0 : i32
    %c0_i32_0 = arith.constant 0 : i32
    %c0_i32_1 = arith.constant 0 : i32
    return %c0_i32, %c0_i32_0 : i32, i32
  }
  func.func @transform_2(%arg0: i32) -> (i32, i32) {
    %c0_i32 = arith.constant 0 : i32
    %c0_i32_0 = arith.constant 0 : i32
    %c0_i32_1 = arith.constant 0 : i32
    return %c0_i32, %c0_i32_0 : i32, i32
  }
  func.func @transform_3(%arg0: i32) -> (i32, i32) {
    %c0_i32 = arith.constant 0 : i32
    %c0_i32_0 = arith.constant 0 : i32
    return %arg0, %c0_i32 : i32, i32
  }
}

module attributes {stable_mosaic.version = 11 : i64} {
  func.func @_gn_stats_kernel(%arg0: i32, %arg1: memref<1x64x16xbf16, #tpu.memory_space<vmem>>, %arg2: memref<2x2xf32, #tpu.memory_space<smem>>) attributes {dimension_semantics = [#tpu.dimension_semantics<arbitrary>], iteration_bounds = array<i64: 2>, scalar_prefetch = 0 : i64, scratch_operands = 0 : i64, tpu.core_type = #tpu.core_type<tc>, window_params = [{transform_indices = @transform_0, window_bounds = array<i64: 1, 64, 16>}, {transform_indices = @transform_1, window_bounds = array<i64: 2, 2>}]} {
    %c0 = arith.constant 0 : index
    %c0_0 = arith.constant 0 : index
    %c0_1 = arith.constant 0 : index
    %0 = vector.load %arg1[%c0, %c0_0, %c0_1] : memref<1x64x16xbf16, #tpu.memory_space<vmem>>, vector<1x64x16xbf16>
    %1 = vector.shape_cast %0 : vector<1x64x16xbf16> to vector<64x16xbf16>
    %2 = arith.extf %1 : vector<64x16xbf16> to vector<64x16xf32>
    %cst = arith.constant dense<0.000000e+00> : vector<64xf32>
    %3 = vector.multi_reduction <add>, %2, %cst [1] : vector<64x16xf32> to vector<64xf32>
    %4 = vector.shape_cast %3 : vector<64xf32> to vector<64x1xf32>
    %cst_2 = arith.constant dense<0.000000e+00> : vector<1xf32>
    %5 = vector.multi_reduction <add>, %4, %cst_2 [0] : vector<64x1xf32> to vector<1xf32>
    %6 = vector.shape_cast %5 : vector<1xf32> to vector<1x1xf32>
    %cst_3 = arith.constant 9.765625E-4 : f32
    %7 = vector.broadcast %cst_3 : f32 to vector<1x1xf32>
    %8 = arith.mulf %6, %7 : vector<1x1xf32>
    %9 = vector.broadcast %8 : vector<1x1xf32> to vector<64x16xf32>
    %10 = arith.subf %2, %9 : vector<64x16xf32>
    %11 = arith.mulf %10, %10 : vector<64x16xf32>
    %cst_4 = arith.constant dense<0.000000e+00> : vector<64xf32>
    %12 = vector.multi_reduction <add>, %11, %cst_4 [1] : vector<64x16xf32> to vector<64xf32>
    %13 = vector.shape_cast %12 : vector<64xf32> to vector<64x1xf32>
    %cst_5 = arith.constant dense<0.000000e+00> : vector<1xf32>
    %14 = vector.multi_reduction <add>, %13, %cst_5 [0] : vector<64x1xf32> to vector<1xf32>
    %15 = vector.shape_cast %14 : vector<1xf32> to vector<1x1xf32>
    %cst_6 = arith.constant 9.765625E-4 : f32
    %16 = vector.broadcast %cst_6 : f32 to vector<1x1xf32>
    %17 = arith.mulf %15, %16 : vector<1x1xf32>
    %cst_7 = arith.constant 9.99999974E-6 : f32
    %18 = vector.broadcast %cst_7 : f32 to vector<1x1xf32>
    %19 = arith.addf %17, %18 : vector<1x1xf32>
    %20 = math.rsqrt %19 : vector<1x1xf32>
    %21 = vector.extract %8[0, 0] : f32 from vector<1x1xf32>
    %22 = arith.index_cast %arg0 : i32 to index
    %c0_8 = arith.constant 0 : index
    %23 = memref.load %arg2[%22, %c0_8] : memref<2x2xf32, #tpu.memory_space<smem>>
    memref.store %21, %arg2[%22, %c0_8] : memref<2x2xf32, #tpu.memory_space<smem>>
    %24 = vector.extract %20[0, 0] : f32 from vector<1x1xf32>
    %25 = arith.index_cast %arg0 : i32 to index
    %c1 = arith.constant 1 : index
    %26 = memref.load %arg2[%25, %c1] : memref<2x2xf32, #tpu.memory_space<smem>>
    memref.store %24, %arg2[%25, %c1] : memref<2x2xf32, #tpu.memory_space<smem>>
    return
  }
  func.func @transform_0(%arg0: i32) -> (i32, i32, i32) {
    %c0_i32 = arith.constant 0 : i32
    %c0_i32_0 = arith.constant 0 : i32
    %c0_i32_1 = arith.constant 0 : i32
    return %arg0, %c0_i32, %c0_i32_0 : i32, i32, i32
  }
  func.func @transform_1(%arg0: i32) -> (i32, i32) {
    %c0_i32 = arith.constant 0 : i32
    %c0_i32_0 = arith.constant 0 : i32
    %c0_i32_1 = arith.constant 0 : i32
    return %c0_i32, %c0_i32_0 : i32, i32
  }
}

module attributes {stable_mosaic.version = 11 : i64} {
  func.func @_gn_norm_kernel(%arg0: i32, %arg1: i32, %arg2: memref<2x2xf32, #tpu.memory_space<smem>>, %arg3: memref<1x32x16xbf16, #tpu.memory_space<vmem>>, %arg4: memref<1x16xf32, #tpu.memory_space<vmem>>, %arg5: memref<1x16xf32, #tpu.memory_space<vmem>>, %arg6: memref<1x32x16xbf16, #tpu.memory_space<vmem>>) attributes {dimension_semantics = [#tpu.dimension_semantics<parallel>, #tpu.dimension_semantics<parallel>], iteration_bounds = array<i64: 2, 2>, scalar_prefetch = 0 : i64, scratch_operands = 0 : i64, tpu.core_type = #tpu.core_type<tc>, window_params = [{transform_indices = @transform_0, window_bounds = array<i64: 2, 2>}, {transform_indices = @transform_1, window_bounds = array<i64: 1, 32, 16>}, {pipeline_mode = #tpu.pipeline_mode<synchronous>, transform_indices = @transform_2, window_bounds = array<i64: 1, 16>}, {pipeline_mode = #tpu.pipeline_mode<synchronous>, transform_indices = @transform_3, window_bounds = array<i64: 1, 16>}, {transform_indices = @transform_4, window_bounds = array<i64: 1, 32, 16>}]} {
    %0 = arith.index_cast %arg0 : i32 to index
    %c0 = arith.constant 0 : index
    %1 = memref.load %arg2[%0, %c0] : memref<2x2xf32, #tpu.memory_space<smem>>
    %2 = arith.index_cast %arg0 : i32 to index
    %c1 = arith.constant 1 : index
    %3 = memref.load %arg2[%2, %c1] : memref<2x2xf32, #tpu.memory_space<smem>>
    %c0_0 = arith.constant 0 : index
    %c0_1 = arith.constant 0 : index
    %c0_2 = arith.constant 0 : index
    %4 = vector.load %arg3[%c0_0, %c0_1, %c0_2] : memref<1x32x16xbf16, #tpu.memory_space<vmem>>, vector<1x32x16xbf16>
    %5 = vector.shape_cast %4 : vector<1x32x16xbf16> to vector<32x16xbf16>
    %6 = arith.extf %5 : vector<32x16xbf16> to vector<32x16xf32>
    %7 = vector.broadcast %1 : f32 to vector<32x16xf32>
    %8 = arith.subf %6, %7 : vector<32x16xf32>
    %9 = vector.broadcast %3 : f32 to vector<32x16xf32>
    %10 = arith.mulf %8, %9 : vector<32x16xf32>
    %c0_3 = arith.constant 0 : index
    %c0_4 = arith.constant 0 : index
    %11 = vector.load %arg4[%c0_3, %c0_4] : memref<1x16xf32, #tpu.memory_space<vmem>>, vector<1x16xf32>
    %12 = vector.broadcast %11 : vector<1x16xf32> to vector<32x16xf32>
    %13 = arith.mulf %10, %12 : vector<32x16xf32>
    %c0_5 = arith.constant 0 : index
    %c0_6 = arith.constant 0 : index
    %14 = vector.load %arg5[%c0_5, %c0_6] : memref<1x16xf32, #tpu.memory_space<vmem>>, vector<1x16xf32>
    %15 = vector.broadcast %14 : vector<1x16xf32> to vector<32x16xf32>
    %16 = arith.addf %13, %15 : vector<32x16xf32>
    %17 = arith.truncf %16 : vector<32x16xf32> to vector<32x16xbf16>
    %c0_7 = arith.constant 0 : index
    %c0_8 = arith.constant 0 : index
    %c0_9 = arith.constant 0 : index
    %18 = vector.load %arg6[%c0_7, %c0_8, %c0_9] : memref<1x32x16xbf16, #tpu.memory_space<vmem>>, vector<1x32x16xbf16>
    %19 = vector.shape_cast %18 : vector<1x32x16xbf16> to vector<32x16xbf16>
    %20 = vector.shape_cast %17 : vector<32x16xbf16> to vector<1x32x16xbf16>
    tpu.vector_store %arg6[%c0_7, %c0_8, %c0_9], %20 {strides = array<i32>} : memref<1x32x16xbf16, #tpu.memory_space<vmem>>, vector<1x32x16xbf16>,
    return
  }
  func.func @transform_0(%arg0: i32, %arg1: i32) -> (i32, i32) {
    %c0_i32 = arith.constant 0 : i32
    %c0_i32_0 = arith.constant 0 : i32
    %c0_i32_1 = arith.constant 0 : i32
    return %c0_i32, %c0_i32_0 : i32, i32
  }
  func.func @transform_1(%arg0: i32, %arg1: i32) -> (i32, i32, i32) {
    %c0_i32 = arith.constant 0 : i32
    %c0_i32_0 = arith.constant 0 : i32
    return %arg0, %arg1, %c0_i32 : i32, i32, i32
  }
  func.func @transform_2(%arg0: i32, %arg1: i32) -> (i32, i32) {
    %c0_i32 = arith.constant 0 : i32
    %c0_i32_0 = arith.constant 0 : i32
    %c0_i32_1 = arith.constant 0 : i32
    return %c0_i32, %c0_i32_0 : i32, i32
  }
  func.func @transform_3(%arg0: i32, %arg1: i32) -> (i32, i32) {
    %c0_i32 = arith.constant 0 : i32
    %c0_i32_0 = arith.constant 0 : i32
    %c0_i32_1 = arith.constant 0 : i32
    return %c0_i32, %c0_i32_0 : i32, i32
  }
  func.func @transform_4(%arg0: i32, %arg1: i32) -> (i32, i32, i32) {
    %c0_i32 = arith.constant 0 : i32
    %c0_i32_0 = arith.constant 0 : i32
    return %arg0, %arg1, %c0_i32 : i32, i32, i32
  }
}

module attributes {stable_mosaic.version = 11 : i64} {
  func.func @_mm_kernel(%arg0: i32, %arg1: memref<64x4xbf16, #tpu.memory_space<vmem>>, %arg2: memref<4x4xbf16, #tpu.memory_space<vmem>>, %arg3: memref<1x4xf32, #tpu.memory_space<vmem>>, %arg4: memref<64x4xbf16, #tpu.memory_space<vmem>>) attributes {dimension_semantics = [#tpu.dimension_semantics<parallel>], iteration_bounds = array<i64: 2>, scalar_prefetch = 0 : i64, scratch_operands = 0 : i64, tpu.core_type = #tpu.core_type<tc>, window_params = [{transform_indices = @transform_0, window_bounds = array<i64: 64, 4>}, {pipeline_mode = #tpu.pipeline_mode<synchronous>, transform_indices = @transform_1, window_bounds = array<i64: 4, 4>}, {pipeline_mode = #tpu.pipeline_mode<synchronous>, transform_indices = @transform_2, window_bounds = array<i64: 1, 4>}, {transform_indices = @transform_3, window_bounds = array<i64: 64, 4>}]} {
    %c0 = arith.constant 0 : index
    %c0_0 = arith.constant 0 : index
    %0 = vector.load %arg1[%c0, %c0_0] : memref<64x4xbf16, #tpu.memory_space<vmem>>, vector<64x4xbf16>
    %c0_1 = arith.constant 0 : index
    %c0_2 = arith.constant 0 : index
    %1 = vector.load %arg2[%c0_1, %c0_2] : memref<4x4xbf16, #tpu.memory_space<vmem>>, vector<4x4xbf16>
    %cst = arith.constant dense<0.000000e+00> : vector<64x4xf32>
    %2 = tpu.matmul %0, %1, %cst {dimension_numbers = #tpu.dot_dimension_numbers<[1], [0], [0], [1], [0, 0, 1, 1], [], []>} : vector<64x4xbf16>, vector<4x4xbf16>, vector<64x4xf32> -> vector<64x4xf32>
    %c0_3 = arith.constant 0 : index
    %c0_4 = arith.constant 0 : index
    %3 = vector.load %arg3[%c0_3, %c0_4] : memref<1x4xf32, #tpu.memory_space<vmem>>, vector<1x4xf32>
    %4 = vector.broadcast %3 : vector<1x4xf32> to vector<64x4xf32>
    %5 = arith.addf %2, %4 : vector<64x4xf32>
    %6 = arith.truncf %5 : vector<64x4xf32> to vector<64x4xbf16>
    %c0_5 = arith.constant 0 : index
    %c0_6 = arith.constant 0 : index
    %7 = vector.load %arg4[%c0_5, %c0_6] : memref<64x4xbf16, #tpu.memory_space<vmem>>, vector<64x4xbf16>
    tpu.vector_store %arg4[%c0_5, %c0_6], %6 {strides = array<i32>} : memref<64x4xbf16, #tpu.memory_space<vmem>>, vector<64x4xbf16>,
    return
  }
  func.func @transform_0(%arg0: i32) -> (i32, i32) {
    %c0_i32 = arith.constant 0 : i32
    %c0_i32_0 = arith.constant 0 : i32
    return %arg0, %c0_i32 : i32, i32
  }
  func.func @transform_1(%arg0: i32) -> (i32, i32) {
    %c0_i32 = arith.constant 0 : i32
    %c0_i32_0 = arith.constant 0 : i32
    %c0_i32_1 = arith.constant 0 : i32
    return %c0_i32, %c0_i32_0 : i32, i32
  }
  func.func @transform_2(%arg0: i32) -> (i32, i32) {
    %c0_i32 = arith.constant 0 : i32
    %c0_i32_0 = arith.constant 0 : i32
    %c0_i32_1 = arith.constant 0 : i32
    return %c0_i32, %c0_i32_0 : i32, i32
  }
  func.func @transform_3(%arg0: i32) -> (i32, i32) {
    %c0_i32 = arith.constant 0 : i32
    %c0_i32_0 = arith.constant 0 : i32
    return %arg0, %c0_i32 : i32, i32
  }
}

module attributes {stable_mosaic.version = 11 : i64} {
  func.func @_mm_kernel(%arg0: i32, %arg1: memref<64x6xbf16, #tpu.memory_space<vmem>>, %arg2: memref<6x6xbf16, #tpu.memory_space<vmem>>, %arg3: memref<1x6xf32, #tpu.memory_space<vmem>>, %arg4: memref<64x6xbf16, #tpu.memory_space<vmem>>) attributes {dimension_semantics = [#tpu.dimension_semantics<parallel>], iteration_bounds = array<i64: 2>, scalar_prefetch = 0 : i64, scratch_operands = 0 : i64, tpu.core_type = #tpu.core_type<tc>, window_params = [{transform_indices = @transform_0, window_bounds = array<i64: 64, 6>}, {pipeline_mode = #tpu.pipeline_mode<synchronous>, transform_indices = @transform_1, window_bounds = array<i64: 6, 6>}, {pipeline_mode = #tpu.pipeline_mode<synchronous>, transform_indices = @transform_2, window_bounds = array<i64: 1, 6>}, {transform_indices = @transform_3, window_bounds = array<i64: 64, 6>}]} {
    %c0 = arith.constant 0 : index
    %c0_0 = arith.constant 0 : index
    %0 = vector.load %arg1[%c0, %c0_0] : memref<64x6xbf16, #tpu.memory_space<vmem>>, vector<64x6xbf16>
    %c0_1 = arith.constant 0 : index
    %c0_2 = arith.constant 0 : index
    %1 = vector.load %arg2[%c0_1, %c0_2] : memref<6x6xbf16, #tpu.memory_space<vmem>>, vector<6x6xbf16>
    %cst = arith.constant dense<0.000000e+00> : vector<64x6xf32>
    %2 = tpu.matmul %0, %1, %cst {dimension_numbers = #tpu.dot_dimension_numbers<[1], [0], [0], [1], [0, 0, 1, 1], [], []>} : vector<64x6xbf16>, vector<6x6xbf16>, vector<64x6xf32> -> vector<64x6xf32>
    %c0_3 = arith.constant 0 : index
    %c0_4 = arith.constant 0 : index
    %3 = vector.load %arg3[%c0_3, %c0_4] : memref<1x6xf32, #tpu.memory_space<vmem>>, vector<1x6xf32>
    %4 = vector.broadcast %3 : vector<1x6xf32> to vector<64x6xf32>
    %5 = arith.addf %2, %4 : vector<64x6xf32>
    %6 = arith.truncf %5 : vector<64x6xf32> to vector<64x6xbf16>
    %c0_5 = arith.constant 0 : index
    %c0_6 = arith.constant 0 : index
    %7 = vector.load %arg4[%c0_5, %c0_6] : memref<64x6xbf16, #tpu.memory_space<vmem>>, vector<64x6xbf16>
    tpu.vector_store %arg4[%c0_5, %c0_6], %6 {strides = array<i32>} : memref<64x6xbf16, #tpu.memory_space<vmem>>, vector<64x6xbf16>,
    return
  }
  func.func @transform_0(%arg0: i32) -> (i32, i32) {
    %c0_i32 = arith.constant 0 : i32
    %c0_i32_0 = arith.constant 0 : i32
    return %arg0, %c0_i32 : i32, i32
  }
  func.func @transform_1(%arg0: i32) -> (i32, i32) {
    %c0_i32 = arith.constant 0 : i32
    %c0_i32_0 = arith.constant 0 : i32
    %c0_i32_1 = arith.constant 0 : i32
    return %c0_i32, %c0_i32_0 : i32, i32
  }
  func.func @transform_2(%arg0: i32) -> (i32, i32) {
    %c0_i32 = arith.constant 0 : i32
    %c0_i32_0 = arith.constant 0 : i32
    %c0_i32_1 = arith.constant 0 : i32
    return %c0_i32, %c0_i32_0 : i32, i32
  }
  func.func @transform_3(%arg0: i32) -> (i32, i32) {
    %c0_i32 = arith.constant 0 : i32
    %c0_i32_0 = arith.constant 0 : i32
    return %arg0, %c0_i32 : i32, i32
  }
}

module attributes {stable_mosaic.version = 11 : i64} {
  func.func @_mm_kernel(%arg0: i32, %arg1: memref<64x7xbf16, #tpu.memory_space<vmem>>, %arg2: memref<7x7xbf16, #tpu.memory_space<vmem>>, %arg3: memref<1x7xf32, #tpu.memory_space<vmem>>, %arg4: memref<64x7xbf16, #tpu.memory_space<vmem>>) attributes {dimension_semantics = [#tpu.dimension_semantics<parallel>], iteration_bounds = array<i64: 2>, scalar_prefetch = 0 : i64, scratch_operands = 0 : i64, tpu.core_type = #tpu.core_type<tc>, window_params = [{transform_indices = @transform_0, window_bounds = array<i64: 64, 7>}, {pipeline_mode = #tpu.pipeline_mode<synchronous>, transform_indices = @transform_1, window_bounds = array<i64: 7, 7>}, {pipeline_mode = #tpu.pipeline_mode<synchronous>, transform_indices = @transform_2, window_bounds = array<i64: 1, 7>}, {transform_indices = @transform_3, window_bounds = array<i64: 64, 7>}]} {
    %c0 = arith.constant 0 : index
    %c0_0 = arith.constant 0 : index
    %0 = vector.load %arg1[%c0, %c0_0] : memref<64x7xbf16, #tpu.memory_space<vmem>>, vector<64x7xbf16>
    %c0_1 = arith.constant 0 : index
    %c0_2 = arith.constant 0 : index
    %1 = vector.load %arg2[%c0_1, %c0_2] : memref<7x7xbf16, #tpu.memory_space<vmem>>, vector<7x7xbf16>
    %cst = arith.constant dense<0.000000e+00> : vector<64x7xf32>
    %2 = tpu.matmul %0, %1, %cst {dimension_numbers = #tpu.dot_dimension_numbers<[1], [0], [0], [1], [0, 0, 1, 1], [], []>} : vector<64x7xbf16>, vector<7x7xbf16>, vector<64x7xf32> -> vector<64x7xf32>
    %c0_3 = arith.constant 0 : index
    %c0_4 = arith.constant 0 : index
    %3 = vector.load %arg3[%c0_3, %c0_4] : memref<1x7xf32, #tpu.memory_space<vmem>>, vector<1x7xf32>
    %4 = vector.broadcast %3 : vector<1x7xf32> to vector<64x7xf32>
    %5 = arith.addf %2, %4 : vector<64x7xf32>
    %6 = arith.truncf %5 : vector<64x7xf32> to vector<64x7xbf16>
    %c0_5 = arith.constant 0 : index
    %c0_6 = arith.constant 0 : index
    %7 = vector.load %arg4[%c0_5, %c0_6] : memref<64x7xbf16, #tpu.memory_space<vmem>>, vector<64x7xbf16>
    tpu.vector_store %arg4[%c0_5, %c0_6], %6 {strides = array<i32>} : memref<64x7xbf16, #tpu.memory_space<vmem>>, vector<64x7xbf16>,
    return
  }
  func.func @transform_0(%arg0: i32) -> (i32, i32) {
    %c0_i32 = arith.constant 0 : i32
    %c0_i32_0 = arith.constant 0 : i32
    return %arg0, %c0_i32 : i32, i32
  }
  func.func @transform_1(%arg0: i32) -> (i32, i32) {
    %c0_i32 = arith.constant 0 : i32
    %c0_i32_0 = arith.constant 0 : i32
    %c0_i32_1 = arith.constant 0 : i32
    return %c0_i32, %c0_i32_0 : i32, i32
  }
  func.func @transform_2(%arg0: i32) -> (i32, i32) {
    %c0_i32 = arith.constant 0 : i32
    %c0_i32_0 = arith.constant 0 : i32
    %c0_i32_1 = arith.constant 0 : i32
    return %c0_i32, %c0_i32_0 : i32, i32
  }
  func.func @transform_3(%arg0: i32) -> (i32, i32) {
    %c0_i32 = arith.constant 0 : i32
    %c0_i32_0 = arith.constant 0 : i32
    return %arg0, %c0_i32 : i32, i32
  }
}

module attributes {stable_mosaic.version = 11 : i64} {
  func.func @_gn_mm_kernel(%arg0: i32, %arg1: i32, %arg2: memref<2x2xf32, #tpu.memory_space<smem>>, %arg3: memref<1x32x16xbf16, #tpu.memory_space<vmem>>, %arg4: memref<16x16xbf16, #tpu.memory_space<vmem>>, %arg5: memref<1x16xf32, #tpu.memory_space<vmem>>, %arg6: memref<1x32x16xbf16, #tpu.memory_space<vmem>>, %arg7: memref<1x32x16xbf16, #tpu.memory_space<vmem>>) attributes {dimension_semantics = [#tpu.dimension_semantics<parallel>, #tpu.dimension_semantics<parallel>], iteration_bounds = array<i64: 2, 2>, scalar_prefetch = 0 : i64, scratch_operands = 0 : i64, tpu.core_type = #tpu.core_type<tc>, window_params = [{transform_indices = @transform_0, window_bounds = array<i64: 2, 2>}, {transform_indices = @transform_1, window_bounds = array<i64: 1, 32, 16>}, {pipeline_mode = #tpu.pipeline_mode<synchronous>, transform_indices = @transform_2, window_bounds = array<i64: 16, 16>}, {pipeline_mode = #tpu.pipeline_mode<synchronous>, transform_indices = @transform_3, window_bounds = array<i64: 1, 16>}, {transform_indices = @transform_4, window_bounds = array<i64: 1, 32, 16>}, {transform_indices = @transform_5, window_bounds = array<i64: 1, 32, 16>}]} {
    %0 = arith.index_cast %arg0 : i32 to index
    %c0 = arith.constant 0 : index
    %1 = memref.load %arg2[%0, %c0] : memref<2x2xf32, #tpu.memory_space<smem>>
    %2 = arith.index_cast %arg0 : i32 to index
    %c1 = arith.constant 1 : index
    %3 = memref.load %arg2[%2, %c1] : memref<2x2xf32, #tpu.memory_space<smem>>
    %c0_0 = arith.constant 0 : index
    %c0_1 = arith.constant 0 : index
    %c0_2 = arith.constant 0 : index
    %4 = vector.load %arg3[%c0_0, %c0_1, %c0_2] : memref<1x32x16xbf16, #tpu.memory_space<vmem>>, vector<1x32x16xbf16>
    %5 = vector.shape_cast %4 : vector<1x32x16xbf16> to vector<32x16xbf16>
    %6 = arith.extf %5 : vector<32x16xbf16> to vector<32x16xf32>
    %7 = vector.broadcast %1 : f32 to vector<32x16xf32>
    %8 = arith.subf %6, %7 : vector<32x16xf32>
    %9 = vector.broadcast %3 : f32 to vector<32x16xf32>
    %10 = arith.mulf %8, %9 : vector<32x16xf32>
    %11 = arith.truncf %10 : vector<32x16xf32> to vector<32x16xbf16>
    %c0_3 = arith.constant 0 : index
    %c0_4 = arith.constant 0 : index
    %12 = vector.load %arg4[%c0_3, %c0_4] : memref<16x16xbf16, #tpu.memory_space<vmem>>, vector<16x16xbf16>
    %cst = arith.constant dense<0.000000e+00> : vector<32x16xf32>
    %13 = tpu.matmul %11, %12, %cst {dimension_numbers = #tpu.dot_dimension_numbers<[1], [0], [0], [1], [0, 0, 1, 1], [], []>} : vector<32x16xbf16>, vector<16x16xbf16>, vector<32x16xf32> -> vector<32x16xf32>
    %c0_5 = arith.constant 0 : index
    %c0_6 = arith.constant 0 : index
    %14 = vector.load %arg5[%c0_5, %c0_6] : memref<1x16xf32, #tpu.memory_space<vmem>>, vector<1x16xf32>
    %15 = vector.broadcast %14 : vector<1x16xf32> to vector<32x16xf32>
    %16 = arith.addf %13, %15 : vector<32x16xf32>
    %c0_7 = arith.constant 0 : index
    %c0_8 = arith.constant 0 : index
    %c0_9 = arith.constant 0 : index
    %17 = vector.load %arg6[%c0_7, %c0_8, %c0_9] : memref<1x32x16xbf16, #tpu.memory_space<vmem>>, vector<1x32x16xbf16>
    %18 = vector.shape_cast %17 : vector<1x32x16xbf16> to vector<32x16xbf16>
    %19 = arith.extf %18 : vector<32x16xbf16> to vector<32x16xf32>
    %20 = arith.addf %16, %19 : vector<32x16xf32>
    %21 = arith.truncf %20 : vector<32x16xf32> to vector<32x16xbf16>
    %c0_10 = arith.constant 0 : index
    %c0_11 = arith.constant 0 : index
    %c0_12 = arith.constant 0 : index
    %22 = vector.load %arg7[%c0_10, %c0_11, %c0_12] : memref<1x32x16xbf16, #tpu.memory_space<vmem>>, vector<1x32x16xbf16>
    %23 = vector.shape_cast %22 : vector<1x32x16xbf16> to vector<32x16xbf16>
    %24 = vector.shape_cast %21 : vector<32x16xbf16> to vector<1x32x16xbf16>
    tpu.vector_store %arg7[%c0_10, %c0_11, %c0_12], %24 {strides = array<i32>} : memref<1x32x16xbf16, #tpu.memory_space<vmem>>, vector<1x32x16xbf16>,
    return
  }
  func.func @transform_0(%arg0: i32, %arg1: i32) -> (i32, i32) {
    %c0_i32 = arith.constant 0 : i32
    %c0_i32_0 = arith.constant 0 : i32
    %c0_i32_1 = arith.constant 0 : i32
    return %c0_i32, %c0_i32_0 : i32, i32
  }
  func.func @transform_1(%arg0: i32, %arg1: i32) -> (i32, i32, i32) {
    %c0_i32 = arith.constant 0 : i32
    %c0_i32_0 = arith.constant 0 : i32
    return %arg0, %arg1, %c0_i32 : i32, i32, i32
  }
  func.func @transform_2(%arg0: i32, %arg1: i32) -> (i32, i32) {
    %c0_i32 = arith.constant 0 : i32
    %c0_i32_0 = arith.constant 0 : i32
    %c0_i32_1 = arith.constant 0 : i32
    return %c0_i32, %c0_i32_0 : i32, i32
  }
  func.func @transform_3(%arg0: i32, %arg1: i32) -> (i32, i32) {
    %c0_i32 = arith.constant 0 : i32
    %c0_i32_0 = arith.constant 0 : i32
    %c0_i32_1 = arith.constant 0 : i32
    return %c0_i32, %c0_i32_0 : i32, i32
  }
  func.func @transform_4(%arg0: i32, %arg1: i32) -> (i32, i32, i32) {
    %c0_i32 = arith.constant 0 : i32
    %c0_i32_0 = arith.constant 0 : i32
    return %arg0, %arg1, %c0_i32 : i32, i32, i32
  }
  func.func @transform_5(%arg0: i32, %arg1: i32) -> (i32, i32, i32) {
    %c0_i32 = arith.constant 0 : i32
    %c0_i32_0 = arith.constant 0 : i32
    return %arg0, %arg1, %c0_i32 : i32, i32, i32
  }
}

module attributes {stable_mosaic.version = 11 : i64} {
  func.func @_mm_kernel(%arg0: i32, %arg1: memref<64x64xbf16, #tpu.memory_space<vmem>>, %arg2: memref<64x16xbf16, #tpu.memory_space<vmem>>, %arg3: memref<1x16xf32, #tpu.memory_space<vmem>>, %arg4: memref<64x16xbf16, #tpu.memory_space<vmem>>, %arg5: memref<64x16xbf16, #tpu.memory_space<vmem>>) attributes {dimension_semantics = [#tpu.dimension_semantics<parallel>], iteration_bounds = array<i64: 2>, scalar_prefetch = 0 : i64, scratch_operands = 0 : i64, tpu.core_type = #tpu.core_type<tc>, window_params = [{transform_indices = @transform_0, window_bounds = array<i64: 64, 64>}, {pipeline_mode = #tpu.pipeline_mode<synchronous>, transform_indices = @transform_1, window_bounds = array<i64: 64, 16>}, {pipeline_mode = #tpu.pipeline_mode<synchronous>, transform_indices = @transform_2, window_bounds = array<i64: 1, 16>}, {transform_indices = @transform_3, window_bounds = array<i64: 64, 16>}, {transform_indices = @transform_4, window_bounds = array<i64: 64, 16>}]} {
    %c0 = arith.constant 0 : index
    %c0_0 = arith.constant 0 : index
    %0 = vector.load %arg1[%c0, %c0_0] : memref<64x64xbf16, #tpu.memory_space<vmem>>, vector<64x64xbf16>
    %c0_1 = arith.constant 0 : index
    %c0_2 = arith.constant 0 : index
    %1 = vector.load %arg2[%c0_1, %c0_2] : memref<64x16xbf16, #tpu.memory_space<vmem>>, vector<64x16xbf16>
    %cst = arith.constant dense<0.000000e+00> : vector<64x16xf32>
    %2 = tpu.matmul %0, %1, %cst {dimension_numbers = #tpu.dot_dimension_numbers<[1], [0], [0], [1], [0, 0, 1, 1], [], []>} : vector<64x64xbf16>, vector<64x16xbf16>, vector<64x16xf32> -> vector<64x16xf32>
    %c0_3 = arith.constant 0 : index
    %c0_4 = arith.constant 0 : index
    %3 = vector.load %arg3[%c0_3, %c0_4] : memref<1x16xf32, #tpu.memory_space<vmem>>, vector<1x16xf32>
    %4 = vector.broadcast %3 : vector<1x16xf32> to vector<64x16xf32>
    %5 = arith.addf %2, %4 : vector<64x16xf32>
    %c0_5 = arith.constant 0 : index
    %c0_6 = arith.constant 0 : index
    %6 = vector.load %arg4[%c0_5, %c0_6] : memref<64x16xbf16, #tpu.memory_space<vmem>>, vector<64x16xbf16>
    %7 = arith.extf %6 : vector<64x16xbf16> to vector<64x16xf32>
    %8 = arith.addf %5, %7 : vector<64x16xf32>
    %9 = arith.truncf %8 : vector<64x16xf32> to vector<64x16xbf16>
    %c0_7 = arith.constant 0 : index
    %c0_8 = arith.constant 0 : index
    %10 = vector.load %arg5[%c0_7, %c0_8] : memref<64x16xbf16, #tpu.memory_space<vmem>>, vector<64x16xbf16>
    tpu.vector_store %arg5[%c0_7, %c0_8], %9 {strides = array<i32>} : memref<64x16xbf16, #tpu.memory_space<vmem>>, vector<64x16xbf16>,
    return
  }
  func.func @transform_0(%arg0: i32) -> (i32, i32) {
    %c0_i32 = arith.constant 0 : i32
    %c0_i32_0 = arith.constant 0 : i32
    return %arg0, %c0_i32 : i32, i32
  }
  func.func @transform_1(%arg0: i32) -> (i32, i32) {
    %c0_i32 = arith.constant 0 : i32
    %c0_i32_0 = arith.constant 0 : i32
    %c0_i32_1 = arith.constant 0 : i32
    return %c0_i32, %c0_i32_0 : i32, i32
  }
  func.func @transform_2(%arg0: i32) -> (i32, i32) {
    %c0_i32 = arith.constant 0 : i32
    %c0_i32_0 = arith.constant 0 : i32
    %c0_i32_1 = arith.constant 0 : i32
    return %c0_i32, %c0_i32_0 : i32, i32
  }
  func.func @transform_3(%arg0: i32) -> (i32, i32) {
    %c0_i32 = arith.constant 0 : i32
    %c0_i32_0 = arith.constant 0 : i32
    return %arg0, %c0_i32 : i32, i32
  }
  func.func @transform_4(%arg0: i32) -> (i32, i32) {
    %c0_i32 = arith.constant 0 : i32
    %c0_i32_0 = arith.constant 0 : i32
    return %arg0, %c0_i32 : i32, i32
  }
}

module attributes {stable_mosaic.version = 11 : i64} {
  func.func @_gn_mm_kernel(%arg0: i32, %arg1: i32, %arg2: memref<2x2xf32, #tpu.memory_space<smem>>, %arg3: memref<1x32x16xbf16, #tpu.memory_space<vmem>>, %arg4: memref<16x64xbf16, #tpu.memory_space<vmem>>, %arg5: memref<1x64xf32, #tpu.memory_space<vmem>>, %arg6: memref<1x32x64xbf16, #tpu.memory_space<vmem>>) attributes {dimension_semantics = [#tpu.dimension_semantics<parallel>, #tpu.dimension_semantics<parallel>], iteration_bounds = array<i64: 2, 2>, scalar_prefetch = 0 : i64, scratch_operands = 0 : i64, tpu.core_type = #tpu.core_type<tc>, window_params = [{transform_indices = @transform_0, window_bounds = array<i64: 2, 2>}, {transform_indices = @transform_1, window_bounds = array<i64: 1, 32, 16>}, {pipeline_mode = #tpu.pipeline_mode<synchronous>, transform_indices = @transform_2, window_bounds = array<i64: 16, 64>}, {pipeline_mode = #tpu.pipeline_mode<synchronous>, transform_indices = @transform_3, window_bounds = array<i64: 1, 64>}, {transform_indices = @transform_4, window_bounds = array<i64: 1, 32, 64>}]} {
    %0 = arith.index_cast %arg0 : i32 to index
    %c0 = arith.constant 0 : index
    %1 = memref.load %arg2[%0, %c0] : memref<2x2xf32, #tpu.memory_space<smem>>
    %2 = arith.index_cast %arg0 : i32 to index
    %c1 = arith.constant 1 : index
    %3 = memref.load %arg2[%2, %c1] : memref<2x2xf32, #tpu.memory_space<smem>>
    %c0_0 = arith.constant 0 : index
    %c0_1 = arith.constant 0 : index
    %c0_2 = arith.constant 0 : index
    %4 = vector.load %arg3[%c0_0, %c0_1, %c0_2] : memref<1x32x16xbf16, #tpu.memory_space<vmem>>, vector<1x32x16xbf16>
    %5 = vector.shape_cast %4 : vector<1x32x16xbf16> to vector<32x16xbf16>
    %6 = arith.extf %5 : vector<32x16xbf16> to vector<32x16xf32>
    %7 = vector.broadcast %1 : f32 to vector<32x16xf32>
    %8 = arith.subf %6, %7 : vector<32x16xf32>
    %9 = vector.broadcast %3 : f32 to vector<32x16xf32>
    %10 = arith.mulf %8, %9 : vector<32x16xf32>
    %11 = arith.truncf %10 : vector<32x16xf32> to vector<32x16xbf16>
    %c0_3 = arith.constant 0 : index
    %c0_4 = arith.constant 0 : index
    %12 = vector.load %arg4[%c0_3, %c0_4] : memref<16x64xbf16, #tpu.memory_space<vmem>>, vector<16x64xbf16>
    %cst = arith.constant dense<0.000000e+00> : vector<32x64xf32>
    %13 = tpu.matmul %11, %12, %cst {dimension_numbers = #tpu.dot_dimension_numbers<[1], [0], [0], [1], [0, 0, 1, 1], [], []>} : vector<32x16xbf16>, vector<16x64xbf16>, vector<32x64xf32> -> vector<32x64xf32>
    %c0_5 = arith.constant 0 : index
    %c0_6 = arith.constant 0 : index
    %14 = vector.load %arg5[%c0_5, %c0_6] : memref<1x64xf32, #tpu.memory_space<vmem>>, vector<1x64xf32>
    %15 = vector.broadcast %14 : vector<1x64xf32> to vector<32x64xf32>
    %16 = arith.addf %13, %15 : vector<32x64xf32>
    %cst_7 = arith.constant 5.000000e-01 : f32
    %17 = vector.broadcast %cst_7 : f32 to vector<32x64xf32>
    %18 = arith.mulf %17, %16 : vector<32x64xf32>
    %cst_8 = arith.constant 4.471500e-02 : f32
    %19 = vector.broadcast %cst_8 : f32 to vector<32x64xf32>
    %20 = arith.mulf %19, %16 : vector<32x64xf32>
    %21 = arith.mulf %20, %16 : vector<32x64xf32>
    %22 = arith.mulf %21, %16 : vector<32x64xf32>
    %23 = arith.addf %16, %22 : vector<32x64xf32>
    %cst_9 = arith.constant 0.797884583 : f32
    %24 = vector.broadcast %cst_9 : f32 to vector<32x64xf32>
    %25 = arith.mulf %24, %23 : vector<32x64xf32>
    %26 = math.tanh %25 : vector<32x64xf32>
    %cst_10 = arith.constant 1.000000e+00 : f32
    %27 = vector.broadcast %cst_10 : f32 to vector<32x64xf32>
    %28 = arith.addf %27, %26 : vector<32x64xf32>
    %29 = arith.mulf %18, %28 : vector<32x64xf32>
    %30 = arith.truncf %29 : vector<32x64xf32> to vector<32x64xbf16>
    %c0_11 = arith.constant 0 : index
    %c0_12 = arith.constant 0 : index
    %c0_13 = arith.constant 0 : index
    %31 = vector.load %arg6[%c0_11, %c0_12, %c0_13] : memref<1x32x64xbf16, #tpu.memory_space<vmem>>, vector<1x32x64xbf16>
    %32 = vector.shape_cast %31 : vector<1x32x64xbf16> to vector<32x64xbf16>
    %33 = vector.shape_cast %30 : vector<32x64xbf16> to vector<1x32x64xbf16>
    tpu.vector_store %arg6[%c0_11, %c0_12, %c0_13], %33 {strides = array<i32>} : memref<1x32x64xbf16, #tpu.memory_space<vmem>>, vector<1x32x64xbf16>,
    return
  }
  func.func @transform_0(%arg0: i32, %arg1: i32) -> (i32, i32) {
    %c0_i32 = arith.constant 0 : i32
    %c0_i32_0 = arith.constant 0 : i32
    %c0_i32_1 = arith.constant 0 : i32
    return %c0_i32, %c0_i32_0 : i32, i32
  }
  func.func @transform_1(%arg0: i32, %arg1: i32) -> (i32, i32, i32) {
    %c0_i32 = arith.constant 0 : i32
    %c0_i32_0 = arith.constant 0 : i32
    return %arg0, %arg1, %c0_i32 : i32, i32, i32
  }
  func.func @transform_2(%arg0: i32, %arg1: i32) -> (i32, i32) {
    %c0_i32 = arith.constant 0 : i32
    %c0_i32_0 = arith.constant 0 : i32
    %c0_i32_1 = arith.constant 0 : i32
    return %c0_i32, %c0_i32_0 : i32, i32
  }
  func.func @transform_3(%arg0: i32, %arg1: i32) -> (i32, i32) {
    %c0_i32 = arith.constant 0 : i32
    %c0_i32_0 = arith.constant 0 : i32
    %c0_i32_1 = arith.constant 0 : i32
    return %c0_i32, %c0_i32_0 : i32, i32
  }
  func.func @transform_4(%arg0: i32, %arg1: i32) -> (i32, i32, i32) {
    %c0_i32 = arith.constant 0 : i32
    %c0_i32_0 = arith.constant 0 : i32
    return %arg0, %arg1, %c0_i32 : i32, i32, i32
  }
}

module attributes {stable_mosaic.version = 11 : i64} {
  func.func @_gn_stats_kernel(%arg0: i32, %arg1: memref<1x16x64xbf16, #tpu.memory_space<vmem>>, %arg2: memref<2x2xf32, #tpu.memory_space<smem>>) attributes {dimension_semantics = [#tpu.dimension_semantics<arbitrary>], iteration_bounds = array<i64: 2>, scalar_prefetch = 0 : i64, scratch_operands = 0 : i64, tpu.core_type = #tpu.core_type<tc>, window_params = [{transform_indices = @transform_0, window_bounds = array<i64: 1, 16, 64>}, {transform_indices = @transform_1, window_bounds = array<i64: 2, 2>}]} {
    %c0 = arith.constant 0 : index
    %c0_0 = arith.constant 0 : index
    %c0_1 = arith.constant 0 : index
    %0 = vector.load %arg1[%c0, %c0_0, %c0_1] : memref<1x16x64xbf16, #tpu.memory_space<vmem>>, vector<1x16x64xbf16>
    %1 = vector.shape_cast %0 : vector<1x16x64xbf16> to vector<16x64xbf16>
    %2 = arith.extf %1 : vector<16x64xbf16> to vector<16x64xf32>
    %cst = arith.constant dense<0.000000e+00> : vector<16xf32>
    %3 = vector.multi_reduction <add>, %2, %cst [1] : vector<16x64xf32> to vector<16xf32>
    %4 = vector.shape_cast %3 : vector<16xf32> to vector<16x1xf32>
    %cst_2 = arith.constant dense<0.000000e+00> : vector<1xf32>
    %5 = vector.multi_reduction <add>, %4, %cst_2 [0] : vector<16x1xf32> to vector<1xf32>
    %6 = vector.shape_cast %5 : vector<1xf32> to vector<1x1xf32>
    %cst_3 = arith.constant 9.765625E-4 : f32
    %7 = vector.broadcast %cst_3 : f32 to vector<1x1xf32>
    %8 = arith.mulf %6, %7 : vector<1x1xf32>
    %9 = vector.broadcast %8 : vector<1x1xf32> to vector<16x64xf32>
    %10 = arith.subf %2, %9 : vector<16x64xf32>
    %11 = arith.mulf %10, %10 : vector<16x64xf32>
    %cst_4 = arith.constant dense<0.000000e+00> : vector<16xf32>
    %12 = vector.multi_reduction <add>, %11, %cst_4 [1] : vector<16x64xf32> to vector<16xf32>
    %13 = vector.shape_cast %12 : vector<16xf32> to vector<16x1xf32>
    %cst_5 = arith.constant dense<0.000000e+00> : vector<1xf32>
    %14 = vector.multi_reduction <add>, %13, %cst_5 [0] : vector<16x1xf32> to vector<1xf32>
    %15 = vector.shape_cast %14 : vector<1xf32> to vector<1x1xf32>
    %cst_6 = arith.constant 9.765625E-4 : f32
    %16 = vector.broadcast %cst_6 : f32 to vector<1x1xf32>
    %17 = arith.mulf %15, %16 : vector<1x1xf32>
    %cst_7 = arith.constant 9.99999974E-6 : f32
    %18 = vector.broadcast %cst_7 : f32 to vector<1x1xf32>
    %19 = arith.addf %17, %18 : vector<1x1xf32>
    %20 = math.rsqrt %19 : vector<1x1xf32>
    %21 = vector.extract %8[0, 0] : f32 from vector<1x1xf32>
    %22 = arith.index_cast %arg0 : i32 to index
    %c0_8 = arith.constant 0 : index
    %23 = memref.load %arg2[%22, %c0_8] : memref<2x2xf32, #tpu.memory_space<smem>>
    memref.store %21, %arg2[%22, %c0_8] : memref<2x2xf32, #tpu.memory_space<smem>>
    %24 = vector.extract %20[0, 0] : f32 from vector<1x1xf32>
    %25 = arith.index_cast %arg0 : i32 to index
    %c1 = arith.constant 1 : index
    %26 = memref.load %arg2[%25, %c1] : memref<2x2xf32, #tpu.memory_space<smem>>
    memref.store %24, %arg2[%25, %c1] : memref<2x2xf32, #tpu.memory_space<smem>>
    return
  }
  func.func @transform_0(%arg0: i32) -> (i32, i32, i32) {
    %c0_i32 = arith.constant 0 : i32
    %c0_i32_0 = arith.constant 0 : i32
    %c0_i32_1 = arith.constant 0 : i32
    return %arg0, %c0_i32, %c0_i32_0 : i32, i32, i32
  }
  func.func @transform_1(%arg0: i32) -> (i32, i32) {
    %c0_i32 = arith.constant 0 : i32
    %c0_i32_0 = arith.constant 0 : i32
    %c0_i32_1 = arith.constant 0 : i32
    return %c0_i32, %c0_i32_0 : i32, i32
  }
}

module attributes {stable_mosaic.version = 11 : i64} {
  func.func @_gn_mm_kernel(%arg0: i32, %arg1: i32, %arg2: memref<2x2xf32, #tpu.memory_space<smem>>, %arg3: memref<1x16x64xbf16, #tpu.memory_space<vmem>>, %arg4: memref<64x32xbf16, #tpu.memory_space<vmem>>, %arg5: memref<1x32xf32, #tpu.memory_space<vmem>>, %arg6: memref<1x16x32xbf16, #tpu.memory_space<vmem>>) attributes {dimension_semantics = [#tpu.dimension_semantics<parallel>, #tpu.dimension_semantics<parallel>], iteration_bounds = array<i64: 2, 1>, scalar_prefetch = 0 : i64, scratch_operands = 0 : i64, tpu.core_type = #tpu.core_type<tc>, window_params = [{transform_indices = @transform_0, window_bounds = array<i64: 2, 2>}, {transform_indices = @transform_1, window_bounds = array<i64: 1, 16, 64>}, {pipeline_mode = #tpu.pipeline_mode<synchronous>, transform_indices = @transform_2, window_bounds = array<i64: 64, 32>}, {pipeline_mode = #tpu.pipeline_mode<synchronous>, transform_indices = @transform_3, window_bounds = array<i64: 1, 32>}, {transform_indices = @transform_4, window_bounds = array<i64: 1, 16, 32>}]} {
    %0 = arith.index_cast %arg0 : i32 to index
    %c0 = arith.constant 0 : index
    %1 = memref.load %arg2[%0, %c0] : memref<2x2xf32, #tpu.memory_space<smem>>
    %2 = arith.index_cast %arg0 : i32 to index
    %c1 = arith.constant 1 : index
    %3 = memref.load %arg2[%2, %c1] : memref<2x2xf32, #tpu.memory_space<smem>>
    %c0_0 = arith.constant 0 : index
    %c0_1 = arith.constant 0 : index
    %c0_2 = arith.constant 0 : index
    %4 = vector.load %arg3[%c0_0, %c0_1, %c0_2] : memref<1x16x64xbf16, #tpu.memory_space<vmem>>, vector<1x16x64xbf16>
    %5 = vector.shape_cast %4 : vector<1x16x64xbf16> to vector<16x64xbf16>
    %6 = arith.extf %5 : vector<16x64xbf16> to vector<16x64xf32>
    %7 = vector.broadcast %1 : f32 to vector<16x64xf32>
    %8 = arith.subf %6, %7 : vector<16x64xf32>
    %9 = vector.broadcast %3 : f32 to vector<16x64xf32>
    %10 = arith.mulf %8, %9 : vector<16x64xf32>
    %11 = arith.truncf %10 : vector<16x64xf32> to vector<16x64xbf16>
    %c0_3 = arith.constant 0 : index
    %c0_4 = arith.constant 0 : index
    %12 = vector.load %arg4[%c0_3, %c0_4] : memref<64x32xbf16, #tpu.memory_space<vmem>>, vector<64x32xbf16>
    %cst = arith.constant dense<0.000000e+00> : vector<16x32xf32>
    %13 = tpu.matmul %11, %12, %cst {dimension_numbers = #tpu.dot_dimension_numbers<[1], [0], [0], [1], [0, 0, 1, 1], [], []>} : vector<16x64xbf16>, vector<64x32xbf16>, vector<16x32xf32> -> vector<16x32xf32>
    %c0_5 = arith.constant 0 : index
    %c0_6 = arith.constant 0 : index
    %14 = vector.load %arg5[%c0_5, %c0_6] : memref<1x32xf32, #tpu.memory_space<vmem>>, vector<1x32xf32>
    %15 = vector.broadcast %14 : vector<1x32xf32> to vector<16x32xf32>
    %16 = arith.addf %13, %15 : vector<16x32xf32>
    %17 = arith.truncf %16 : vector<16x32xf32> to vector<16x32xbf16>
    %c0_7 = arith.constant 0 : index
    %c0_8 = arith.constant 0 : index
    %c0_9 = arith.constant 0 : index
    %18 = vector.load %arg6[%c0_7, %c0_8, %c0_9] : memref<1x16x32xbf16, #tpu.memory_space<vmem>>, vector<1x16x32xbf16>
    %19 = vector.shape_cast %18 : vector<1x16x32xbf16> to vector<16x32xbf16>
    %20 = vector.shape_cast %17 : vector<16x32xbf16> to vector<1x16x32xbf16>
    tpu.vector_store %arg6[%c0_7, %c0_8, %c0_9], %20 {strides = array<i32>} : memref<1x16x32xbf16, #tpu.memory_space<vmem>>, vector<1x16x32xbf16>,
    return
  }
  func.func @transform_0(%arg0: i32, %arg1: i32) -> (i32, i32) {
    %c0_i32 = arith.constant 0 : i32
    %c0_i32_0 = arith.constant 0 : i32
    %c0_i32_1 = arith.constant 0 : i32
    return %c0_i32, %c0_i32_0 : i32, i32
  }
  func.func @transform_1(%arg0: i32, %arg1: i32) -> (i32, i32, i32) {
    %c0_i32 = arith.constant 0 : i32
    %c0_i32_0 = arith.constant 0 : i32
    return %arg0, %arg1, %c0_i32 : i32, i32, i32
  }
  func.func @transform_2(%arg0: i32, %arg1: i32) -> (i32, i32) {
    %c0_i32 = arith.constant 0 : i32
    %c0_i32_0 = arith.constant 0 : i32
    %c0_i32_1 = arith.constant 0 : i32
    return %c0_i32, %c0_i32_0 : i32, i32
  }
  func.func @transform_3(%arg0: i32, %arg1: i32) -> (i32, i32) {
    %c0_i32 = arith.constant 0 : i32
    %c0_i32_0 = arith.constant 0 : i32
    %c0_i32_1 = arith.constant 0 : i32
    return %c0_i32, %c0_i32_0 : i32, i32
  }
  func.func @transform_4(%arg0: i32, %arg1: i32) -> (i32, i32, i32) {
    %c0_i32 = arith.constant 0 : i32
    %c0_i32_0 = arith.constant 0 : i32
    return %arg0, %arg1, %c0_i32 : i32, i32, i32
  }
}

module attributes {stable_mosaic.version = 11 : i64} {
  func.func @_gn_stats_kernel(%arg0: i32, %arg1: memref<1x16x32xbf16, #tpu.memory_space<vmem>>, %arg2: memref<2x2xf32, #tpu.memory_space<smem>>) attributes {dimension_semantics = [#tpu.dimension_semantics<arbitrary>], iteration_bounds = array<i64: 2>, scalar_prefetch = 0 : i64, scratch_operands = 0 : i64, tpu.core_type = #tpu.core_type<tc>, window_params = [{transform_indices = @transform_0, window_bounds = array<i64: 1, 16, 32>}, {transform_indices = @transform_1, window_bounds = array<i64: 2, 2>}]} {
    %c0 = arith.constant 0 : index
    %c0_0 = arith.constant 0 : index
    %c0_1 = arith.constant 0 : index
    %0 = vector.load %arg1[%c0, %c0_0, %c0_1] : memref<1x16x32xbf16, #tpu.memory_space<vmem>>, vector<1x16x32xbf16>
    %1 = vector.shape_cast %0 : vector<1x16x32xbf16> to vector<16x32xbf16>
    %2 = arith.extf %1 : vector<16x32xbf16> to vector<16x32xf32>
    %cst = arith.constant dense<0.000000e+00> : vector<16xf32>
    %3 = vector.multi_reduction <add>, %2, %cst [1] : vector<16x32xf32> to vector<16xf32>
    %4 = vector.shape_cast %3 : vector<16xf32> to vector<16x1xf32>
    %cst_2 = arith.constant dense<0.000000e+00> : vector<1xf32>
    %5 = vector.multi_reduction <add>, %4, %cst_2 [0] : vector<16x1xf32> to vector<1xf32>
    %6 = vector.shape_cast %5 : vector<1xf32> to vector<1x1xf32>
    %cst_3 = arith.constant 0.001953125 : f32
    %7 = vector.broadcast %cst_3 : f32 to vector<1x1xf32>
    %8 = arith.mulf %6, %7 : vector<1x1xf32>
    %9 = vector.broadcast %8 : vector<1x1xf32> to vector<16x32xf32>
    %10 = arith.subf %2, %9 : vector<16x32xf32>
    %11 = arith.mulf %10, %10 : vector<16x32xf32>
    %cst_4 = arith.constant dense<0.000000e+00> : vector<16xf32>
    %12 = vector.multi_reduction <add>, %11, %cst_4 [1] : vector<16x32xf32> to vector<16xf32>
    %13 = vector.shape_cast %12 : vector<16xf32> to vector<16x1xf32>
    %cst_5 = arith.constant dense<0.000000e+00> : vector<1xf32>
    %14 = vector.multi_reduction <add>, %13, %cst_5 [0] : vector<16x1xf32> to vector<1xf32>
    %15 = vector.shape_cast %14 : vector<1xf32> to vector<1x1xf32>
    %cst_6 = arith.constant 0.001953125 : f32
    %16 = vector.broadcast %cst_6 : f32 to vector<1x1xf32>
    %17 = arith.mulf %15, %16 : vector<1x1xf32>
    %cst_7 = arith.constant 9.99999974E-6 : f32
    %18 = vector.broadcast %cst_7 : f32 to vector<1x1xf32>
    %19 = arith.addf %17, %18 : vector<1x1xf32>
    %20 = math.rsqrt %19 : vector<1x1xf32>
    %21 = vector.extract %8[0, 0] : f32 from vector<1x1xf32>
    %22 = arith.index_cast %arg0 : i32 to index
    %c0_8 = arith.constant 0 : index
    %23 = memref.load %arg2[%22, %c0_8] : memref<2x2xf32, #tpu.memory_space<smem>>
    memref.store %21, %arg2[%22, %c0_8] : memref<2x2xf32, #tpu.memory_space<smem>>
    %24 = vector.extract %20[0, 0] : f32 from vector<1x1xf32>
    %25 = arith.index_cast %arg0 : i32 to index
    %c1 = arith.constant 1 : index
    %26 = memref.load %arg2[%25, %c1] : memref<2x2xf32, #tpu.memory_space<smem>>
    memref.store %24, %arg2[%25, %c1] : memref<2x2xf32, #tpu.memory_space<smem>>
    return
  }
  func.func @transform_0(%arg0: i32) -> (i32, i32, i32) {
    %c0_i32 = arith.constant 0 : i32
    %c0_i32_0 = arith.constant 0 : i32
    %c0_i32_1 = arith.constant 0 : i32
    return %arg0, %c0_i32, %c0_i32_0 : i32, i32, i32
  }
  func.func @transform_1(%arg0: i32) -> (i32, i32) {
    %c0_i32 = arith.constant 0 : i32
    %c0_i32_0 = arith.constant 0 : i32
    %c0_i32_1 = arith.constant 0 : i32
    return %c0_i32, %c0_i32_0 : i32, i32
  }
}

module attributes {stable_mosaic.version = 11 : i64} {
  func.func @_gn_norm_kernel(%arg0: i32, %arg1: i32, %arg2: memref<2x2xf32, #tpu.memory_space<smem>>, %arg3: memref<1x16x32xbf16, #tpu.memory_space<vmem>>, %arg4: memref<1x32xf32, #tpu.memory_space<vmem>>, %arg5: memref<1x32xf32, #tpu.memory_space<vmem>>, %arg6: memref<1x16x32xbf16, #tpu.memory_space<vmem>>) attributes {dimension_semantics = [#tpu.dimension_semantics<parallel>, #tpu.dimension_semantics<parallel>], iteration_bounds = array<i64: 2, 1>, scalar_prefetch = 0 : i64, scratch_operands = 0 : i64, tpu.core_type = #tpu.core_type<tc>, window_params = [{transform_indices = @transform_0, window_bounds = array<i64: 2, 2>}, {transform_indices = @transform_1, window_bounds = array<i64: 1, 16, 32>}, {pipeline_mode = #tpu.pipeline_mode<synchronous>, transform_indices = @transform_2, window_bounds = array<i64: 1, 32>}, {pipeline_mode = #tpu.pipeline_mode<synchronous>, transform_indices = @transform_3, window_bounds = array<i64: 1, 32>}, {transform_indices = @transform_4, window_bounds = array<i64: 1, 16, 32>}]} {
    %0 = arith.index_cast %arg0 : i32 to index
    %c0 = arith.constant 0 : index
    %1 = memref.load %arg2[%0, %c0] : memref<2x2xf32, #tpu.memory_space<smem>>
    %2 = arith.index_cast %arg0 : i32 to index
    %c1 = arith.constant 1 : index
    %3 = memref.load %arg2[%2, %c1] : memref<2x2xf32, #tpu.memory_space<smem>>
    %c0_0 = arith.constant 0 : index
    %c0_1 = arith.constant 0 : index
    %c0_2 = arith.constant 0 : index
    %4 = vector.load %arg3[%c0_0, %c0_1, %c0_2] : memref<1x16x32xbf16, #tpu.memory_space<vmem>>, vector<1x16x32xbf16>
    %5 = vector.shape_cast %4 : vector<1x16x32xbf16> to vector<16x32xbf16>
    %6 = arith.extf %5 : vector<16x32xbf16> to vector<16x32xf32>
    %7 = vector.broadcast %1 : f32 to vector<16x32xf32>
    %8 = arith.subf %6, %7 : vector<16x32xf32>
    %9 = vector.broadcast %3 : f32 to vector<16x32xf32>
    %10 = arith.mulf %8, %9 : vector<16x32xf32>
    %c0_3 = arith.constant 0 : index
    %c0_4 = arith.constant 0 : index
    %11 = vector.load %arg4[%c0_3, %c0_4] : memref<1x32xf32, #tpu.memory_space<vmem>>, vector<1x32xf32>
    %12 = vector.broadcast %11 : vector<1x32xf32> to vector<16x32xf32>
    %13 = arith.mulf %10, %12 : vector<16x32xf32>
    %c0_5 = arith.constant 0 : index
    %c0_6 = arith.constant 0 : index
    %14 = vector.load %arg5[%c0_5, %c0_6] : memref<1x32xf32, #tpu.memory_space<vmem>>, vector<1x32xf32>
    %15 = vector.broadcast %14 : vector<1x32xf32> to vector<16x32xf32>
    %16 = arith.addf %13, %15 : vector<16x32xf32>
    %17 = arith.truncf %16 : vector<16x32xf32> to vector<16x32xbf16>
    %c0_7 = arith.constant 0 : index
    %c0_8 = arith.constant 0 : index
    %c0_9 = arith.constant 0 : index
    %18 = vector.load %arg6[%c0_7, %c0_8, %c0_9] : memref<1x16x32xbf16, #tpu.memory_space<vmem>>, vector<1x16x32xbf16>
    %19 = vector.shape_cast %18 : vector<1x16x32xbf16> to vector<16x32xbf16>
    %20 = vector.shape_cast %17 : vector<16x32xbf16> to vector<1x16x32xbf16>
    tpu.vector_store %arg6[%c0_7, %c0_8, %c0_9], %20 {strides = array<i32>} : memref<1x16x32xbf16, #tpu.memory_space<vmem>>, vector<1x16x32xbf16>,
    return
  }
  func.func @transform_0(%arg0: i32, %arg1: i32) -> (i32, i32) {
    %c0_i32 = arith.constant 0 : i32
    %c0_i32_0 = arith.constant 0 : i32
    %c0_i32_1 = arith.constant 0 : i32
    return %c0_i32, %c0_i32_0 : i32, i32
  }
  func.func @transform_1(%arg0: i32, %arg1: i32) -> (i32, i32, i32) {
    %c0_i32 = arith.constant 0 : i32
    %c0_i32_0 = arith.constant 0 : i32
    return %arg0, %arg1, %c0_i32 : i32, i32, i32
  }
  func.func @transform_2(%arg0: i32, %arg1: i32) -> (i32, i32) {
    %c0_i32 = arith.constant 0 : i32
    %c0_i32_0 = arith.constant 0 : i32
    %c0_i32_1 = arith.constant 0 : i32
    return %c0_i32, %c0_i32_0 : i32, i32
  }
  func.func @transform_3(%arg0: i32, %arg1: i32) -> (i32, i32) {
    %c0_i32 = arith.constant 0 : i32
    %c0_i32_0 = arith.constant 0 : i32
    %c0_i32_1 = arith.constant 0 : i32
    return %c0_i32, %c0_i32_0 : i32, i32
  }
  func.func @transform_4(%arg0: i32, %arg1: i32) -> (i32, i32, i32) {
    %c0_i32 = arith.constant 0 : i32
    %c0_i32_0 = arith.constant 0 : i32
    return %arg0, %arg1, %c0_i32 : i32, i32, i32
  }
}

module attributes {stable_mosaic.version = 11 : i64} {
  func.func @_mm_kernel(%arg0: i32, %arg1: memref<16x8xbf16, #tpu.memory_space<vmem>>, %arg2: memref<8x8xbf16, #tpu.memory_space<vmem>>, %arg3: memref<1x8xf32, #tpu.memory_space<vmem>>, %arg4: memref<16x8xbf16, #tpu.memory_space<vmem>>) attributes {dimension_semantics = [#tpu.dimension_semantics<parallel>], iteration_bounds = array<i64: 2>, scalar_prefetch = 0 : i64, scratch_operands = 0 : i64, tpu.core_type = #tpu.core_type<tc>, window_params = [{transform_indices = @transform_0, window_bounds = array<i64: 16, 8>}, {pipeline_mode = #tpu.pipeline_mode<synchronous>, transform_indices = @transform_1, window_bounds = array<i64: 8, 8>}, {pipeline_mode = #tpu.pipeline_mode<synchronous>, transform_indices = @transform_2, window_bounds = array<i64: 1, 8>}, {transform_indices = @transform_3, window_bounds = array<i64: 16, 8>}]} {
    %c0 = arith.constant 0 : index
    %c0_0 = arith.constant 0 : index
    %0 = vector.load %arg1[%c0, %c0_0] : memref<16x8xbf16, #tpu.memory_space<vmem>>, vector<16x8xbf16>
    %c0_1 = arith.constant 0 : index
    %c0_2 = arith.constant 0 : index
    %1 = vector.load %arg2[%c0_1, %c0_2] : memref<8x8xbf16, #tpu.memory_space<vmem>>, vector<8x8xbf16>
    %cst = arith.constant dense<0.000000e+00> : vector<16x8xf32>
    %2 = tpu.matmul %0, %1, %cst {dimension_numbers = #tpu.dot_dimension_numbers<[1], [0], [0], [1], [0, 0, 1, 1], [], []>} : vector<16x8xbf16>, vector<8x8xbf16>, vector<16x8xf32> -> vector<16x8xf32>
    %c0_3 = arith.constant 0 : index
    %c0_4 = arith.constant 0 : index
    %3 = vector.load %arg3[%c0_3, %c0_4] : memref<1x8xf32, #tpu.memory_space<vmem>>, vector<1x8xf32>
    %4 = vector.broadcast %3 : vector<1x8xf32> to vector<16x8xf32>
    %5 = arith.addf %2, %4 : vector<16x8xf32>
    %6 = arith.truncf %5 : vector<16x8xf32> to vector<16x8xbf16>
    %c0_5 = arith.constant 0 : index
    %c0_6 = arith.constant 0 : index
    %7 = vector.load %arg4[%c0_5, %c0_6] : memref<16x8xbf16, #tpu.memory_space<vmem>>, vector<16x8xbf16>
    tpu.vector_store %arg4[%c0_5, %c0_6], %6 {strides = array<i32>} : memref<16x8xbf16, #tpu.memory_space<vmem>>, vector<16x8xbf16>,
    return
  }
  func.func @transform_0(%arg0: i32) -> (i32, i32) {
    %c0_i32 = arith.constant 0 : i32
    %c0_i32_0 = arith.constant 0 : i32
    return %arg0, %c0_i32 : i32, i32
  }
  func.func @transform_1(%arg0: i32) -> (i32, i32) {
    %c0_i32 = arith.constant 0 : i32
    %c0_i32_0 = arith.constant 0 : i32
    %c0_i32_1 = arith.constant 0 : i32
    return %c0_i32, %c0_i32_0 : i32, i32
  }
  func.func @transform_2(%arg0: i32) -> (i32, i32) {
    %c0_i32 = arith.constant 0 : i32
    %c0_i32_0 = arith.constant 0 : i32
    %c0_i32_1 = arith.constant 0 : i32
    return %c0_i32, %c0_i32_0 : i32, i32
  }
  func.func @transform_3(%arg0: i32) -> (i32, i32) {
    %c0_i32 = arith.constant 0 : i32
    %c0_i32_0 = arith.constant 0 : i32
    return %arg0, %c0_i32 : i32, i32
  }
}

module attributes {stable_mosaic.version = 11 : i64} {
  func.func @_mm_kernel(%arg0: i32, %arg1: memref<16x12xbf16, #tpu.memory_space<vmem>>, %arg2: memref<12x12xbf16, #tpu.memory_space<vmem>>, %arg3: memref<1x12xf32, #tpu.memory_space<vmem>>, %arg4: memref<16x12xbf16, #tpu.memory_space<vmem>>) attributes {dimension_semantics = [#tpu.dimension_semantics<parallel>], iteration_bounds = array<i64: 2>, scalar_prefetch = 0 : i64, scratch_operands = 0 : i64, tpu.core_type = #tpu.core_type<tc>, window_params = [{transform_indices = @transform_0, window_bounds = array<i64: 16, 12>}, {pipeline_mode = #tpu.pipeline_mode<synchronous>, transform_indices = @transform_1, window_bounds = array<i64: 12, 12>}, {pipeline_mode = #tpu.pipeline_mode<synchronous>, transform_indices = @transform_2, window_bounds = array<i64: 1, 12>}, {transform_indices = @transform_3, window_bounds = array<i64: 16, 12>}]} {
    %c0 = arith.constant 0 : index
    %c0_0 = arith.constant 0 : index
    %0 = vector.load %arg1[%c0, %c0_0] : memref<16x12xbf16, #tpu.memory_space<vmem>>, vector<16x12xbf16>
    %c0_1 = arith.constant 0 : index
    %c0_2 = arith.constant 0 : index
    %1 = vector.load %arg2[%c0_1, %c0_2] : memref<12x12xbf16, #tpu.memory_space<vmem>>, vector<12x12xbf16>
    %cst = arith.constant dense<0.000000e+00> : vector<16x12xf32>
    %2 = tpu.matmul %0, %1, %cst {dimension_numbers = #tpu.dot_dimension_numbers<[1], [0], [0], [1], [0, 0, 1, 1], [], []>} : vector<16x12xbf16>, vector<12x12xbf16>, vector<16x12xf32> -> vector<16x12xf32>
    %c0_3 = arith.constant 0 : index
    %c0_4 = arith.constant 0 : index
    %3 = vector.load %arg3[%c0_3, %c0_4] : memref<1x12xf32, #tpu.memory_space<vmem>>, vector<1x12xf32>
    %4 = vector.broadcast %3 : vector<1x12xf32> to vector<16x12xf32>
    %5 = arith.addf %2, %4 : vector<16x12xf32>
    %6 = arith.truncf %5 : vector<16x12xf32> to vector<16x12xbf16>
    %c0_5 = arith.constant 0 : index
    %c0_6 = arith.constant 0 : index
    %7 = vector.load %arg4[%c0_5, %c0_6] : memref<16x12xbf16, #tpu.memory_space<vmem>>, vector<16x12xbf16>
    tpu.vector_store %arg4[%c0_5, %c0_6], %6 {strides = array<i32>} : memref<16x12xbf16, #tpu.memory_space<vmem>>, vector<16x12xbf16>,
    return
  }
  func.func @transform_0(%arg0: i32) -> (i32, i32) {
    %c0_i32 = arith.constant 0 : i32
    %c0_i32_0 = arith.constant 0 : i32
    return %arg0, %c0_i32 : i32, i32
  }
  func.func @transform_1(%arg0: i32) -> (i32, i32) {
    %c0_i32 = arith.constant 0 : i32
    %c0_i32_0 = arith.constant 0 : i32
    %c0_i32_1 = arith.constant 0 : i32
    return %c0_i32, %c0_i32_0 : i32, i32
  }
  func.func @transform_2(%arg0: i32) -> (i32, i32) {
    %c0_i32 = arith.constant 0 : i32
    %c0_i32_0 = arith.constant 0 : i32
    %c0_i32_1 = arith.constant 0 : i32
    return %c0_i32, %c0_i32_0 : i32, i32
  }
  func.func @transform_3(%arg0: i32) -> (i32, i32) {
    %c0_i32 = arith.constant 0 : i32
    %c0_i32_0 = arith.constant 0 : i32
    return %arg0, %c0_i32 : i32, i32
  }
}

module attributes {stable_mosaic.version = 11 : i64} {
  func.func @_mm_kernel(%arg0: i32, %arg1: memref<16x14xbf16, #tpu.memory_space<vmem>>, %arg2: memref<14x14xbf16, #tpu.memory_space<vmem>>, %arg3: memref<1x14xf32, #tpu.memory_space<vmem>>, %arg4: memref<16x14xbf16, #tpu.memory_space<vmem>>) attributes {dimension_semantics = [#tpu.dimension_semantics<parallel>], iteration_bounds = array<i64: 2>, scalar_prefetch = 0 : i64, scratch_operands = 0 : i64, tpu.core_type = #tpu.core_type<tc>, window_params = [{transform_indices = @transform_0, window_bounds = array<i64: 16, 14>}, {pipeline_mode = #tpu.pipeline_mode<synchronous>, transform_indices = @transform_1, window_bounds = array<i64: 14, 14>}, {pipeline_mode = #tpu.pipeline_mode<synchronous>, transform_indices = @transform_2, window_bounds = array<i64: 1, 14>}, {transform_indices = @transform_3, window_bounds = array<i64: 16, 14>}]} {
    %c0 = arith.constant 0 : index
    %c0_0 = arith.constant 0 : index
    %0 = vector.load %arg1[%c0, %c0_0] : memref<16x14xbf16, #tpu.memory_space<vmem>>, vector<16x14xbf16>
    %c0_1 = arith.constant 0 : index
    %c0_2 = arith.constant 0 : index
    %1 = vector.load %arg2[%c0_1, %c0_2] : memref<14x14xbf16, #tpu.memory_space<vmem>>, vector<14x14xbf16>
    %cst = arith.constant dense<0.000000e+00> : vector<16x14xf32>
    %2 = tpu.matmul %0, %1, %cst {dimension_numbers = #tpu.dot_dimension_numbers<[1], [0], [0], [1], [0, 0, 1, 1], [], []>} : vector<16x14xbf16>, vector<14x14xbf16>, vector<16x14xf32> -> vector<16x14xf32>
    %c0_3 = arith.constant 0 : index
    %c0_4 = arith.constant 0 : index
    %3 = vector.load %arg3[%c0_3, %c0_4] : memref<1x14xf32, #tpu.memory_space<vmem>>, vector<1x14xf32>
    %4 = vector.broadcast %3 : vector<1x14xf32> to vector<16x14xf32>
    %5 = arith.addf %2, %4 : vector<16x14xf32>
    %6 = arith.truncf %5 : vector<16x14xf32> to vector<16x14xbf16>
    %c0_5 = arith.constant 0 : index
    %c0_6 = arith.constant 0 : index
    %7 = vector.load %arg4[%c0_5, %c0_6] : memref<16x14xbf16, #tpu.memory_space<vmem>>, vector<16x14xbf16>
    tpu.vector_store %arg4[%c0_5, %c0_6], %6 {strides = array<i32>} : memref<16x14xbf16, #tpu.memory_space<vmem>>, vector<16x14xbf16>,
    return
  }
  func.func @transform_0(%arg0: i32) -> (i32, i32) {
    %c0_i32 = arith.constant 0 : i32
    %c0_i32_0 = arith.constant 0 : i32
    return %arg0, %c0_i32 : i32, i32
  }
  func.func @transform_1(%arg0: i32) -> (i32, i32) {
    %c0_i32 = arith.constant 0 : i32
    %c0_i32_0 = arith.constant 0 : i32
    %c0_i32_1 = arith.constant 0 : i32
    return %c0_i32, %c0_i32_0 : i32, i32
  }
  func.func @transform_2(%arg0: i32) -> (i32, i32) {
    %c0_i32 = arith.constant 0 : i32
    %c0_i32_0 = arith.constant 0 : i32
    %c0_i32_1 = arith.constant 0 : i32
    return %c0_i32, %c0_i32_0 : i32, i32
  }
  func.func @transform_3(%arg0: i32) -> (i32, i32) {
    %c0_i32 = arith.constant 0 : i32
    %c0_i32_0 = arith.constant 0 : i32
    return %arg0, %c0_i32 : i32, i32
  }
}

module attributes {stable_mosaic.version = 11 : i64} {
  func.func @_gn_mm_kernel(%arg0: i32, %arg1: i32, %arg2: memref<2x2xf32, #tpu.memory_space<smem>>, %arg3: memref<1x16x32xbf16, #tpu.memory_space<vmem>>, %arg4: memref<32x32xbf16, #tpu.memory_space<vmem>>, %arg5: memref<1x32xf32, #tpu.memory_space<vmem>>, %arg6: memref<1x16x32xbf16, #tpu.memory_space<vmem>>, %arg7: memref<1x16x32xbf16, #tpu.memory_space<vmem>>) attributes {dimension_semantics = [#tpu.dimension_semantics<parallel>, #tpu.dimension_semantics<parallel>], iteration_bounds = array<i64: 2, 1>, scalar_prefetch = 0 : i64, scratch_operands = 0 : i64, tpu.core_type = #tpu.core_type<tc>, window_params = [{transform_indices = @transform_0, window_bounds = array<i64: 2, 2>}, {transform_indices = @transform_1, window_bounds = array<i64: 1, 16, 32>}, {pipeline_mode = #tpu.pipeline_mode<synchronous>, transform_indices = @transform_2, window_bounds = array<i64: 32, 32>}, {pipeline_mode = #tpu.pipeline_mode<synchronous>, transform_indices = @transform_3, window_bounds = array<i64: 1, 32>}, {transform_indices = @transform_4, window_bounds = array<i64: 1, 16, 32>}, {transform_indices = @transform_5, window_bounds = array<i64: 1, 16, 32>}]} {
    %0 = arith.index_cast %arg0 : i32 to index
    %c0 = arith.constant 0 : index
    %1 = memref.load %arg2[%0, %c0] : memref<2x2xf32, #tpu.memory_space<smem>>
    %2 = arith.index_cast %arg0 : i32 to index
    %c1 = arith.constant 1 : index
    %3 = memref.load %arg2[%2, %c1] : memref<2x2xf32, #tpu.memory_space<smem>>
    %c0_0 = arith.constant 0 : index
    %c0_1 = arith.constant 0 : index
    %c0_2 = arith.constant 0 : index
    %4 = vector.load %arg3[%c0_0, %c0_1, %c0_2] : memref<1x16x32xbf16, #tpu.memory_space<vmem>>, vector<1x16x32xbf16>
    %5 = vector.shape_cast %4 : vector<1x16x32xbf16> to vector<16x32xbf16>
    %6 = arith.extf %5 : vector<16x32xbf16> to vector<16x32xf32>
    %7 = vector.broadcast %1 : f32 to vector<16x32xf32>
    %8 = arith.subf %6, %7 : vector<16x32xf32>
    %9 = vector.broadcast %3 : f32 to vector<16x32xf32>
    %10 = arith.mulf %8, %9 : vector<16x32xf32>
    %11 = arith.truncf %10 : vector<16x32xf32> to vector<16x32xbf16>
    %c0_3 = arith.constant 0 : index
    %c0_4 = arith.constant 0 : index
    %12 = vector.load %arg4[%c0_3, %c0_4] : memref<32x32xbf16, #tpu.memory_space<vmem>>, vector<32x32xbf16>
    %cst = arith.constant dense<0.000000e+00> : vector<16x32xf32>
    %13 = tpu.matmul %11, %12, %cst {dimension_numbers = #tpu.dot_dimension_numbers<[1], [0], [0], [1], [0, 0, 1, 1], [], []>} : vector<16x32xbf16>, vector<32x32xbf16>, vector<16x32xf32> -> vector<16x32xf32>
    %c0_5 = arith.constant 0 : index
    %c0_6 = arith.constant 0 : index
    %14 = vector.load %arg5[%c0_5, %c0_6] : memref<1x32xf32, #tpu.memory_space<vmem>>, vector<1x32xf32>
    %15 = vector.broadcast %14 : vector<1x32xf32> to vector<16x32xf32>
    %16 = arith.addf %13, %15 : vector<16x32xf32>
    %c0_7 = arith.constant 0 : index
    %c0_8 = arith.constant 0 : index
    %c0_9 = arith.constant 0 : index
    %17 = vector.load %arg6[%c0_7, %c0_8, %c0_9] : memref<1x16x32xbf16, #tpu.memory_space<vmem>>, vector<1x16x32xbf16>
    %18 = vector.shape_cast %17 : vector<1x16x32xbf16> to vector<16x32xbf16>
    %19 = arith.extf %18 : vector<16x32xbf16> to vector<16x32xf32>
    %20 = arith.addf %16, %19 : vector<16x32xf32>
    %21 = arith.truncf %20 : vector<16x32xf32> to vector<16x32xbf16>
    %c0_10 = arith.constant 0 : index
    %c0_11 = arith.constant 0 : index
    %c0_12 = arith.constant 0 : index
    %22 = vector.load %arg7[%c0_10, %c0_11, %c0_12] : memref<1x16x32xbf16, #tpu.memory_space<vmem>>, vector<1x16x32xbf16>
    %23 = vector.shape_cast %22 : vector<1x16x32xbf16> to vector<16x32xbf16>
    %24 = vector.shape_cast %21 : vector<16x32xbf16> to vector<1x16x32xbf16>
    tpu.vector_store %arg7[%c0_10, %c0_11, %c0_12], %24 {strides = array<i32>} : memref<1x16x32xbf16, #tpu.memory_space<vmem>>, vector<1x16x32xbf16>,
    return
  }
  func.func @transform_0(%arg0: i32, %arg1: i32) -> (i32, i32) {
    %c0_i32 = arith.constant 0 : i32
    %c0_i32_0 = arith.constant 0 : i32
    %c0_i32_1 = arith.constant 0 : i32
    return %c0_i32, %c0_i32_0 : i32, i32
  }
  func.func @transform_1(%arg0: i32, %arg1: i32) -> (i32, i32, i32) {
    %c0_i32 = arith.constant 0 : i32
    %c0_i32_0 = arith.constant 0 : i32
    return %arg0, %arg1, %c0_i32 : i32, i32, i32
  }
  func.func @transform_2(%arg0: i32, %arg1: i32) -> (i32, i32) {
    %c0_i32 = arith.constant 0 : i32
    %c0_i32_0 = arith.constant 0 : i32
    %c0_i32_1 = arith.constant 0 : i32
    return %c0_i32, %c0_i32_0 : i32, i32
  }
  func.func @transform_3(%arg0: i32, %arg1: i32) -> (i32, i32) {
    %c0_i32 = arith.constant 0 : i32
    %c0_i32_0 = arith.constant 0 : i32
    %c0_i32_1 = arith.constant 0 : i32
    return %c0_i32, %c0_i32_0 : i32, i32
  }
  func.func @transform_4(%arg0: i32, %arg1: i32) -> (i32, i32, i32) {
    %c0_i32 = arith.constant 0 : i32
    %c0_i32_0 = arith.constant 0 : i32
    return %arg0, %arg1, %c0_i32 : i32, i32, i32
  }
  func.func @transform_5(%arg0: i32, %arg1: i32) -> (i32, i32, i32) {
    %c0_i32 = arith.constant 0 : i32
    %c0_i32_0 = arith.constant 0 : i32
    return %arg0, %arg1, %c0_i32 : i32, i32, i32
  }
}

module attributes {stable_mosaic.version = 11 : i64} {
  func.func @_mm_kernel(%arg0: i32, %arg1: memref<16x128xbf16, #tpu.memory_space<vmem>>, %arg2: memref<128x32xbf16, #tpu.memory_space<vmem>>, %arg3: memref<1x32xf32, #tpu.memory_space<vmem>>, %arg4: memref<16x32xbf16, #tpu.memory_space<vmem>>, %arg5: memref<16x32xbf16, #tpu.memory_space<vmem>>) attributes {dimension_semantics = [#tpu.dimension_semantics<parallel>], iteration_bounds = array<i64: 2>, scalar_prefetch = 0 : i64, scratch_operands = 0 : i64, tpu.core_type = #tpu.core_type<tc>, window_params = [{transform_indices = @transform_0, window_bounds = array<i64: 16, 128>}, {pipeline_mode = #tpu.pipeline_mode<synchronous>, transform_indices = @transform_1, window_bounds = array<i64: 128, 32>}, {pipeline_mode = #tpu.pipeline_mode<synchronous>, transform_indices = @transform_2, window_bounds = array<i64: 1, 32>}, {transform_indices = @transform_3, window_bounds = array<i64: 16, 32>}, {transform_indices = @transform_4, window_bounds = array<i64: 16, 32>}]} {
    %c0 = arith.constant 0 : index
    %c0_0 = arith.constant 0 : index
    %0 = vector.load %arg1[%c0, %c0_0] : memref<16x128xbf16, #tpu.memory_space<vmem>>, vector<16x128xbf16>
    %c0_1 = arith.constant 0 : index
    %c0_2 = arith.constant 0 : index
    %1 = vector.load %arg2[%c0_1, %c0_2] : memref<128x32xbf16, #tpu.memory_space<vmem>>, vector<128x32xbf16>
    %cst = arith.constant dense<0.000000e+00> : vector<16x32xf32>
    %2 = tpu.matmul %0, %1, %cst {dimension_numbers = #tpu.dot_dimension_numbers<[1], [0], [0], [1], [0, 0, 1, 1], [], []>} : vector<16x128xbf16>, vector<128x32xbf16>, vector<16x32xf32> -> vector<16x32xf32>
    %c0_3 = arith.constant 0 : index
    %c0_4 = arith.constant 0 : index
    %3 = vector.load %arg3[%c0_3, %c0_4] : memref<1x32xf32, #tpu.memory_space<vmem>>, vector<1x32xf32>
    %4 = vector.broadcast %3 : vector<1x32xf32> to vector<16x32xf32>
    %5 = arith.addf %2, %4 : vector<16x32xf32>
    %c0_5 = arith.constant 0 : index
    %c0_6 = arith.constant 0 : index
    %6 = vector.load %arg4[%c0_5, %c0_6] : memref<16x32xbf16, #tpu.memory_space<vmem>>, vector<16x32xbf16>
    %7 = arith.extf %6 : vector<16x32xbf16> to vector<16x32xf32>
    %8 = arith.addf %5, %7 : vector<16x32xf32>
    %9 = arith.truncf %8 : vector<16x32xf32> to vector<16x32xbf16>
    %c0_7 = arith.constant 0 : index
    %c0_8 = arith.constant 0 : index
    %10 = vector.load %arg5[%c0_7, %c0_8] : memref<16x32xbf16, #tpu.memory_space<vmem>>, vector<16x32xbf16>
    tpu.vector_store %arg5[%c0_7, %c0_8], %9 {strides = array<i32>} : memref<16x32xbf16, #tpu.memory_space<vmem>>, vector<16x32xbf16>,
    return
  }
  func.func @transform_0(%arg0: i32) -> (i32, i32) {
    %c0_i32 = arith.constant 0 : i32
    %c0_i32_0 = arith.constant 0 : i32
    return %arg0, %c0_i32 : i32, i32
  }
  func.func @transform_1(%arg0: i32) -> (i32, i32) {
    %c0_i32 = arith.constant 0 : i32
    %c0_i32_0 = arith.constant 0 : i32
    %c0_i32_1 = arith.constant 0 : i32
    return %c0_i32, %c0_i32_0 : i32, i32
  }
  func.func @transform_2(%arg0: i32) -> (i32, i32) {
    %c0_i32 = arith.constant 0 : i32
    %c0_i32_0 = arith.constant 0 : i32
    %c0_i32_1 = arith.constant 0 : i32
    return %c0_i32, %c0_i32_0 : i32, i32
  }
  func.func @transform_3(%arg0: i32) -> (i32, i32) {
    %c0_i32 = arith.constant 0 : i32
    %c0_i32_0 = arith.constant 0 : i32
    return %arg0, %c0_i32 : i32, i32
  }
  func.func @transform_4(%arg0: i32) -> (i32, i32) {
    %c0_i32 = arith.constant 0 : i32
    %c0_i32_0 = arith.constant 0 : i32
    return %arg0, %c0_i32 : i32, i32
  }
}

module attributes {stable_mosaic.version = 11 : i64} {
  func.func @_gn_mm_kernel(%arg0: i32, %arg1: i32, %arg2: memref<2x2xf32, #tpu.memory_space<smem>>, %arg3: memref<1x16x32xbf16, #tpu.memory_space<vmem>>, %arg4: memref<32x128xbf16, #tpu.memory_space<vmem>>, %arg5: memref<1x128xf32, #tpu.memory_space<vmem>>, %arg6: memref<1x16x128xbf16, #tpu.memory_space<vmem>>) attributes {dimension_semantics = [#tpu.dimension_semantics<parallel>, #tpu.dimension_semantics<parallel>], iteration_bounds = array<i64: 2, 1>, scalar_prefetch = 0 : i64, scratch_operands = 0 : i64, tpu.core_type = #tpu.core_type<tc>, window_params = [{transform_indices = @transform_0, window_bounds = array<i64: 2, 2>}, {transform_indices = @transform_1, window_bounds = array<i64: 1, 16, 32>}, {pipeline_mode = #tpu.pipeline_mode<synchronous>, transform_indices = @transform_2, window_bounds = array<i64: 32, 128>}, {pipeline_mode = #tpu.pipeline_mode<synchronous>, transform_indices = @transform_3, window_bounds = array<i64: 1, 128>}, {transform_indices = @transform_4, window_bounds = array<i64: 1, 16, 128>}]} {
    %0 = arith.index_cast %arg0 : i32 to index
    %c0 = arith.constant 0 : index
    %1 = memref.load %arg2[%0, %c0] : memref<2x2xf32, #tpu.memory_space<smem>>
    %2 = arith.index_cast %arg0 : i32 to index
    %c1 = arith.constant 1 : index
    %3 = memref.load %arg2[%2, %c1] : memref<2x2xf32, #tpu.memory_space<smem>>
    %c0_0 = arith.constant 0 : index
    %c0_1 = arith.constant 0 : index
    %c0_2 = arith.constant 0 : index
    %4 = vector.load %arg3[%c0_0, %c0_1, %c0_2] : memref<1x16x32xbf16, #tpu.memory_space<vmem>>, vector<1x16x32xbf16>
    %5 = vector.shape_cast %4 : vector<1x16x32xbf16> to vector<16x32xbf16>
    %6 = arith.extf %5 : vector<16x32xbf16> to vector<16x32xf32>
    %7 = vector.broadcast %1 : f32 to vector<16x32xf32>
    %8 = arith.subf %6, %7 : vector<16x32xf32>
    %9 = vector.broadcast %3 : f32 to vector<16x32xf32>
    %10 = arith.mulf %8, %9 : vector<16x32xf32>
    %11 = arith.truncf %10 : vector<16x32xf32> to vector<16x32xbf16>
    %c0_3 = arith.constant 0 : index
    %c0_4 = arith.constant 0 : index
    %12 = vector.load %arg4[%c0_3, %c0_4] : memref<32x128xbf16, #tpu.memory_space<vmem>>, vector<32x128xbf16>
    %cst = arith.constant dense<0.000000e+00> : vector<16x128xf32>
    %13 = tpu.matmul %11, %12, %cst {dimension_numbers = #tpu.dot_dimension_numbers<[1], [0], [0], [1], [0, 0, 1, 1], [], []>} : vector<16x32xbf16>, vector<32x128xbf16>, vector<16x128xf32> -> vector<16x128xf32>
    %c0_5 = arith.constant 0 : index
    %c0_6 = arith.constant 0 : index
    %14 = vector.load %arg5[%c0_5, %c0_6] : memref<1x128xf32, #tpu.memory_space<vmem>>, vector<1x128xf32>
    %15 = vector.broadcast %14 : vector<1x128xf32> to vector<16x128xf32>
    %16 = arith.addf %13, %15 : vector<16x128xf32>
    %cst_7 = arith.constant 5.000000e-01 : f32
    %17 = vector.broadcast %cst_7 : f32 to vector<16x128xf32>
    %18 = arith.mulf %17, %16 : vector<16x128xf32>
    %cst_8 = arith.constant 4.471500e-02 : f32
    %19 = vector.broadcast %cst_8 : f32 to vector<16x128xf32>
    %20 = arith.mulf %19, %16 : vector<16x128xf32>
    %21 = arith.mulf %20, %16 : vector<16x128xf32>
    %22 = arith.mulf %21, %16 : vector<16x128xf32>
    %23 = arith.addf %16, %22 : vector<16x128xf32>
    %cst_9 = arith.constant 0.797884583 : f32
    %24 = vector.broadcast %cst_9 : f32 to vector<16x128xf32>
    %25 = arith.mulf %24, %23 : vector<16x128xf32>
    %26 = math.tanh %25 : vector<16x128xf32>
    %cst_10 = arith.constant 1.000000e+00 : f32
    %27 = vector.broadcast %cst_10 : f32 to vector<16x128xf32>
    %28 = arith.addf %27, %26 : vector<16x128xf32>
    %29 = arith.mulf %18, %28 : vector<16x128xf32>
    %30 = arith.truncf %29 : vector<16x128xf32> to vector<16x128xbf16>
    %c0_11 = arith.constant 0 : index
    %c0_12 = arith.constant 0 : index
    %c0_13 = arith.constant 0 : index
    %31 = vector.load %arg6[%c0_11, %c0_12, %c0_13] : memref<1x16x128xbf16, #tpu.memory_space<vmem>>, vector<1x16x128xbf16>
    %32 = vector.shape_cast %31 : vector<1x16x128xbf16> to vector<16x128xbf16>
    %33 = vector.shape_cast %30 : vector<16x128xbf16> to vector<1x16x128xbf16>
    tpu.vector_store %arg6[%c0_11, %c0_12, %c0_13], %33 {strides = array<i32>} : memref<1x16x128xbf16, #tpu.memory_space<vmem>>, vector<1x16x128xbf16>,
    return
  }
  func.func @transform_0(%arg0: i32, %arg1: i32) -> (i32, i32) {
    %c0_i32 = arith.constant 0 : i32
    %c0_i32_0 = arith.constant 0 : i32
    %c0_i32_1 = arith.constant 0 : i32
    return %c0_i32, %c0_i32_0 : i32, i32
  }
  func.func @transform_1(%arg0: i32, %arg1: i32) -> (i32, i32, i32) {
    %c0_i32 = arith.constant 0 : i32
    %c0_i32_0 = arith.constant 0 : i32
    return %arg0, %arg1, %c0_i32 : i32, i32, i32
  }
  func.func @transform_2(%arg0: i32, %arg1: i32) -> (i32, i32) {
    %c0_i32 = arith.constant 0 : i32
    %c0_i32_0 = arith.constant 0 : i32
    %c0_i32_1 = arith.constant 0 : i32
    return %c0_i32, %c0_i32_0 : i32, i32
  }
  func.func @transform_3(%arg0: i32, %arg1: i32) -> (i32, i32) {
    %c0_i32 = arith.constant 0 : i32
    %c0_i32_0 = arith.constant 0 : i32
    %c0_i32_1 = arith.constant 0 : i32
    return %c0_i32, %c0_i32_0 : i32, i32
  }
  func.func @transform_4(%arg0: i32, %arg1: i32) -> (i32, i32, i32) {
    %c0_i32 = arith.constant 0 : i32
    %c0_i32_0 = arith.constant 0 : i32
    return %arg0, %arg1, %c0_i32 : i32, i32, i32
  }
}

module attributes {stable_mosaic.version = 11 : i64} {
  func.func @_gn_stats_kernel(%arg0: i32, %arg1: memref<1x4x128xbf16, #tpu.memory_space<vmem>>, %arg2: memref<2x2xf32, #tpu.memory_space<smem>>) attributes {dimension_semantics = [#tpu.dimension_semantics<arbitrary>], iteration_bounds = array<i64: 2>, scalar_prefetch = 0 : i64, scratch_operands = 0 : i64, tpu.core_type = #tpu.core_type<tc>, window_params = [{transform_indices = @transform_0, window_bounds = array<i64: 1, 4, 128>}, {transform_indices = @transform_1, window_bounds = array<i64: 2, 2>}]} {
    %c0 = arith.constant 0 : index
    %c0_0 = arith.constant 0 : index
    %c0_1 = arith.constant 0 : index
    %0 = vector.load %arg1[%c0, %c0_0, %c0_1] : memref<1x4x128xbf16, #tpu.memory_space<vmem>>, vector<1x4x128xbf16>
    %1 = vector.shape_cast %0 : vector<1x4x128xbf16> to vector<4x128xbf16>
    %2 = arith.extf %1 : vector<4x128xbf16> to vector<4x128xf32>
    %cst = arith.constant dense<0.000000e+00> : vector<4xf32>
    %3 = vector.multi_reduction <add>, %2, %cst [1] : vector<4x128xf32> to vector<4xf32>
    %4 = vector.shape_cast %3 : vector<4xf32> to vector<4x1xf32>
    %cst_2 = arith.constant dense<0.000000e+00> : vector<1xf32>
    %5 = vector.multi_reduction <add>, %4, %cst_2 [0] : vector<4x1xf32> to vector<1xf32>
    %6 = vector.shape_cast %5 : vector<1xf32> to vector<1x1xf32>
    %cst_3 = arith.constant 0.001953125 : f32
    %7 = vector.broadcast %cst_3 : f32 to vector<1x1xf32>
    %8 = arith.mulf %6, %7 : vector<1x1xf32>
    %9 = vector.broadcast %8 : vector<1x1xf32> to vector<4x128xf32>
    %10 = arith.subf %2, %9 : vector<4x128xf32>
    %11 = arith.mulf %10, %10 : vector<4x128xf32>
    %cst_4 = arith.constant dense<0.000000e+00> : vector<4xf32>
    %12 = vector.multi_reduction <add>, %11, %cst_4 [1] : vector<4x128xf32> to vector<4xf32>
    %13 = vector.shape_cast %12 : vector<4xf32> to vector<4x1xf32>
    %cst_5 = arith.constant dense<0.000000e+00> : vector<1xf32>
    %14 = vector.multi_reduction <add>, %13, %cst_5 [0] : vector<4x1xf32> to vector<1xf32>
    %15 = vector.shape_cast %14 : vector<1xf32> to vector<1x1xf32>
    %cst_6 = arith.constant 0.001953125 : f32
    %16 = vector.broadcast %cst_6 : f32 to vector<1x1xf32>
    %17 = arith.mulf %15, %16 : vector<1x1xf32>
    %cst_7 = arith.constant 9.99999974E-6 : f32
    %18 = vector.broadcast %cst_7 : f32 to vector<1x1xf32>
    %19 = arith.addf %17, %18 : vector<1x1xf32>
    %20 = math.rsqrt %19 : vector<1x1xf32>
    %21 = vector.extract %8[0, 0] : f32 from vector<1x1xf32>
    %22 = arith.index_cast %arg0 : i32 to index
    %c0_8 = arith.constant 0 : index
    %23 = memref.load %arg2[%22, %c0_8] : memref<2x2xf32, #tpu.memory_space<smem>>
    memref.store %21, %arg2[%22, %c0_8] : memref<2x2xf32, #tpu.memory_space<smem>>
    %24 = vector.extract %20[0, 0] : f32 from vector<1x1xf32>
    %25 = arith.index_cast %arg0 : i32 to index
    %c1 = arith.constant 1 : index
    %26 = memref.load %arg2[%25, %c1] : memref<2x2xf32, #tpu.memory_space<smem>>
    memref.store %24, %arg2[%25, %c1] : memref<2x2xf32, #tpu.memory_space<smem>>
    return
  }
  func.func @transform_0(%arg0: i32) -> (i32, i32, i32) {
    %c0_i32 = arith.constant 0 : i32
    %c0_i32_0 = arith.constant 0 : i32
    %c0_i32_1 = arith.constant 0 : i32
    return %arg0, %c0_i32, %c0_i32_0 : i32, i32, i32
  }
  func.func @transform_1(%arg0: i32) -> (i32, i32) {
    %c0_i32 = arith.constant 0 : i32
    %c0_i32_0 = arith.constant 0 : i32
    %c0_i32_1 = arith.constant 0 : i32
    return %c0_i32, %c0_i32_0 : i32, i32
  }
}

module attributes {stable_mosaic.version = 11 : i64} {
  func.func @_gn_mm_kernel(%arg0: i32, %arg1: i32, %arg2: memref<2x2xf32, #tpu.memory_space<smem>>, %arg3: memref<1x4x128xbf16, #tpu.memory_space<vmem>>, %arg4: memref<128x64xbf16, #tpu.memory_space<vmem>>, %arg5: memref<1x64xf32, #tpu.memory_space<vmem>>, %arg6: memref<1x4x64xbf16, #tpu.memory_space<vmem>>) attributes {dimension_semantics = [#tpu.dimension_semantics<parallel>, #tpu.dimension_semantics<parallel>], iteration_bounds = array<i64: 2, 1>, scalar_prefetch = 0 : i64, scratch_operands = 0 : i64, tpu.core_type = #tpu.core_type<tc>, window_params = [{transform_indices = @transform_0, window_bounds = array<i64: 2, 2>}, {transform_indices = @transform_1, window_bounds = array<i64: 1, 4, 128>}, {pipeline_mode = #tpu.pipeline_mode<synchronous>, transform_indices = @transform_2, window_bounds = array<i64: 128, 64>}, {pipeline_mode = #tpu.pipeline_mode<synchronous>, transform_indices = @transform_3, window_bounds = array<i64: 1, 64>}, {transform_indices = @transform_4, window_bounds = array<i64: 1, 4, 64>}]} {
    %0 = arith.index_cast %arg0 : i32 to index
    %c0 = arith.constant 0 : index
    %1 = memref.load %arg2[%0, %c0] : memref<2x2xf32, #tpu.memory_space<smem>>
    %2 = arith.index_cast %arg0 : i32 to index
    %c1 = arith.constant 1 : index
    %3 = memref.load %arg2[%2, %c1] : memref<2x2xf32, #tpu.memory_space<smem>>
    %c0_0 = arith.constant 0 : index
    %c0_1 = arith.constant 0 : index
    %c0_2 = arith.constant 0 : index
    %4 = vector.load %arg3[%c0_0, %c0_1, %c0_2] : memref<1x4x128xbf16, #tpu.memory_space<vmem>>, vector<1x4x128xbf16>
    %5 = vector.shape_cast %4 : vector<1x4x128xbf16> to vector<4x128xbf16>
    %6 = arith.extf %5 : vector<4x128xbf16> to vector<4x128xf32>
    %7 = vector.broadcast %1 : f32 to vector<4x128xf32>
    %8 = arith.subf %6, %7 : vector<4x128xf32>
    %9 = vector.broadcast %3 : f32 to vector<4x128xf32>
    %10 = arith.mulf %8, %9 : vector<4x128xf32>
    %11 = arith.truncf %10 : vector<4x128xf32> to vector<4x128xbf16>
    %c0_3 = arith.constant 0 : index
    %c0_4 = arith.constant 0 : index
    %12 = vector.load %arg4[%c0_3, %c0_4] : memref<128x64xbf16, #tpu.memory_space<vmem>>, vector<128x64xbf16>
    %cst = arith.constant dense<0.000000e+00> : vector<4x64xf32>
    %13 = tpu.matmul %11, %12, %cst {dimension_numbers = #tpu.dot_dimension_numbers<[1], [0], [0], [1], [0, 0, 1, 1], [], []>} : vector<4x128xbf16>, vector<128x64xbf16>, vector<4x64xf32> -> vector<4x64xf32>
    %c0_5 = arith.constant 0 : index
    %c0_6 = arith.constant 0 : index
    %14 = vector.load %arg5[%c0_5, %c0_6] : memref<1x64xf32, #tpu.memory_space<vmem>>, vector<1x64xf32>
    %15 = vector.broadcast %14 : vector<1x64xf32> to vector<4x64xf32>
    %16 = arith.addf %13, %15 : vector<4x64xf32>
    %17 = arith.truncf %16 : vector<4x64xf32> to vector<4x64xbf16>
    %c0_7 = arith.constant 0 : index
    %c0_8 = arith.constant 0 : index
    %c0_9 = arith.constant 0 : index
    %18 = vector.load %arg6[%c0_7, %c0_8, %c0_9] : memref<1x4x64xbf16, #tpu.memory_space<vmem>>, vector<1x4x64xbf16>
    %19 = vector.shape_cast %18 : vector<1x4x64xbf16> to vector<4x64xbf16>
    %20 = vector.shape_cast %17 : vector<4x64xbf16> to vector<1x4x64xbf16>
    tpu.vector_store %arg6[%c0_7, %c0_8, %c0_9], %20 {strides = array<i32>} : memref<1x4x64xbf16, #tpu.memory_space<vmem>>, vector<1x4x64xbf16>,
    return
  }
  func.func @transform_0(%arg0: i32, %arg1: i32) -> (i32, i32) {
    %c0_i32 = arith.constant 0 : i32
    %c0_i32_0 = arith.constant 0 : i32
    %c0_i32_1 = arith.constant 0 : i32
    return %c0_i32, %c0_i32_0 : i32, i32
  }
  func.func @transform_1(%arg0: i32, %arg1: i32) -> (i32, i32, i32) {
    %c0_i32 = arith.constant 0 : i32
    %c0_i32_0 = arith.constant 0 : i32
    return %arg0, %arg1, %c0_i32 : i32, i32, i32
  }
  func.func @transform_2(%arg0: i32, %arg1: i32) -> (i32, i32) {
    %c0_i32 = arith.constant 0 : i32
    %c0_i32_0 = arith.constant 0 : i32
    %c0_i32_1 = arith.constant 0 : i32
    return %c0_i32, %c0_i32_0 : i32, i32
  }
  func.func @transform_3(%arg0: i32, %arg1: i32) -> (i32, i32) {
    %c0_i32 = arith.constant 0 : i32
    %c0_i32_0 = arith.constant 0 : i32
    %c0_i32_1 = arith.constant 0 : i32
    return %c0_i32, %c0_i32_0 : i32, i32
  }
  func.func @transform_4(%arg0: i32, %arg1: i32) -> (i32, i32, i32) {
    %c0_i32 = arith.constant 0 : i32
    %c0_i32_0 = arith.constant 0 : i32
    return %arg0, %arg1, %c0_i32 : i32, i32, i32
  }
}

module attributes {stable_mosaic.version = 11 : i64} {
  func.func @_gn_stats_kernel(%arg0: i32, %arg1: memref<1x4x64xbf16, #tpu.memory_space<vmem>>, %arg2: memref<2x2xf32, #tpu.memory_space<smem>>) attributes {dimension_semantics = [#tpu.dimension_semantics<arbitrary>], iteration_bounds = array<i64: 2>, scalar_prefetch = 0 : i64, scratch_operands = 0 : i64, tpu.core_type = #tpu.core_type<tc>, window_params = [{transform_indices = @transform_0, window_bounds = array<i64: 1, 4, 64>}, {transform_indices = @transform_1, window_bounds = array<i64: 2, 2>}]} {
    %c0 = arith.constant 0 : index
    %c0_0 = arith.constant 0 : index
    %c0_1 = arith.constant 0 : index
    %0 = vector.load %arg1[%c0, %c0_0, %c0_1] : memref<1x4x64xbf16, #tpu.memory_space<vmem>>, vector<1x4x64xbf16>
    %1 = vector.shape_cast %0 : vector<1x4x64xbf16> to vector<4x64xbf16>
    %2 = arith.extf %1 : vector<4x64xbf16> to vector<4x64xf32>
    %cst = arith.constant dense<0.000000e+00> : vector<4xf32>
    %3 = vector.multi_reduction <add>, %2, %cst [1] : vector<4x64xf32> to vector<4xf32>
    %4 = vector.shape_cast %3 : vector<4xf32> to vector<4x1xf32>
    %cst_2 = arith.constant dense<0.000000e+00> : vector<1xf32>
    %5 = vector.multi_reduction <add>, %4, %cst_2 [0] : vector<4x1xf32> to vector<1xf32>
    %6 = vector.shape_cast %5 : vector<1xf32> to vector<1x1xf32>
    %cst_3 = arith.constant 3.906250e-03 : f32
    %7 = vector.broadcast %cst_3 : f32 to vector<1x1xf32>
    %8 = arith.mulf %6, %7 : vector<1x1xf32>
    %9 = vector.broadcast %8 : vector<1x1xf32> to vector<4x64xf32>
    %10 = arith.subf %2, %9 : vector<4x64xf32>
    %11 = arith.mulf %10, %10 : vector<4x64xf32>
    %cst_4 = arith.constant dense<0.000000e+00> : vector<4xf32>
    %12 = vector.multi_reduction <add>, %11, %cst_4 [1] : vector<4x64xf32> to vector<4xf32>
    %13 = vector.shape_cast %12 : vector<4xf32> to vector<4x1xf32>
    %cst_5 = arith.constant dense<0.000000e+00> : vector<1xf32>
    %14 = vector.multi_reduction <add>, %13, %cst_5 [0] : vector<4x1xf32> to vector<1xf32>
    %15 = vector.shape_cast %14 : vector<1xf32> to vector<1x1xf32>
    %cst_6 = arith.constant 3.906250e-03 : f32
    %16 = vector.broadcast %cst_6 : f32 to vector<1x1xf32>
    %17 = arith.mulf %15, %16 : vector<1x1xf32>
    %cst_7 = arith.constant 9.99999974E-6 : f32
    %18 = vector.broadcast %cst_7 : f32 to vector<1x1xf32>
    %19 = arith.addf %17, %18 : vector<1x1xf32>
    %20 = math.rsqrt %19 : vector<1x1xf32>
    %21 = vector.extract %8[0, 0] : f32 from vector<1x1xf32>
    %22 = arith.index_cast %arg0 : i32 to index
    %c0_8 = arith.constant 0 : index
    %23 = memref.load %arg2[%22, %c0_8] : memref<2x2xf32, #tpu.memory_space<smem>>
    memref.store %21, %arg2[%22, %c0_8] : memref<2x2xf32, #tpu.memory_space<smem>>
    %24 = vector.extract %20[0, 0] : f32 from vector<1x1xf32>
    %25 = arith.index_cast %arg0 : i32 to index
    %c1 = arith.constant 1 : index
    %26 = memref.load %arg2[%25, %c1] : memref<2x2xf32, #tpu.memory_space<smem>>
    memref.store %24, %arg2[%25, %c1] : memref<2x2xf32, #tpu.memory_space<smem>>
    return
  }
  func.func @transform_0(%arg0: i32) -> (i32, i32, i32) {
    %c0_i32 = arith.constant 0 : i32
    %c0_i32_0 = arith.constant 0 : i32
    %c0_i32_1 = arith.constant 0 : i32
    return %arg0, %c0_i32, %c0_i32_0 : i32, i32, i32
  }
  func.func @transform_1(%arg0: i32) -> (i32, i32) {
    %c0_i32 = arith.constant 0 : i32
    %c0_i32_0 = arith.constant 0 : i32
    %c0_i32_1 = arith.constant 0 : i32
    return %c0_i32, %c0_i32_0 : i32, i32
  }
}

module attributes {stable_mosaic.version = 11 : i64} {
  func.func @_gn_norm_kernel(%arg0: i32, %arg1: i32, %arg2: memref<2x2xf32, #tpu.memory_space<smem>>, %arg3: memref<1x4x64xbf16, #tpu.memory_space<vmem>>, %arg4: memref<1x64xf32, #tpu.memory_space<vmem>>, %arg5: memref<1x64xf32, #tpu.memory_space<vmem>>, %arg6: memref<1x4x64xbf16, #tpu.memory_space<vmem>>) attributes {dimension_semantics = [#tpu.dimension_semantics<parallel>, #tpu.dimension_semantics<parallel>], iteration_bounds = array<i64: 2, 1>, scalar_prefetch = 0 : i64, scratch_operands = 0 : i64, tpu.core_type = #tpu.core_type<tc>, window_params = [{transform_indices = @transform_0, window_bounds = array<i64: 2, 2>}, {transform_indices = @transform_1, window_bounds = array<i64: 1, 4, 64>}, {pipeline_mode = #tpu.pipeline_mode<synchronous>, transform_indices = @transform_2, window_bounds = array<i64: 1, 64>}, {pipeline_mode = #tpu.pipeline_mode<synchronous>, transform_indices = @transform_3, window_bounds = array<i64: 1, 64>}, {transform_indices = @transform_4, window_bounds = array<i64: 1, 4, 64>}]} {
    %0 = arith.index_cast %arg0 : i32 to index
    %c0 = arith.constant 0 : index
    %1 = memref.load %arg2[%0, %c0] : memref<2x2xf32, #tpu.memory_space<smem>>
    %2 = arith.index_cast %arg0 : i32 to index
    %c1 = arith.constant 1 : index
    %3 = memref.load %arg2[%2, %c1] : memref<2x2xf32, #tpu.memory_space<smem>>
    %c0_0 = arith.constant 0 : index
    %c0_1 = arith.constant 0 : index
    %c0_2 = arith.constant 0 : index
    %4 = vector.load %arg3[%c0_0, %c0_1, %c0_2] : memref<1x4x64xbf16, #tpu.memory_space<vmem>>, vector<1x4x64xbf16>
    %5 = vector.shape_cast %4 : vector<1x4x64xbf16> to vector<4x64xbf16>
    %6 = arith.extf %5 : vector<4x64xbf16> to vector<4x64xf32>
    %7 = vector.broadcast %1 : f32 to vector<4x64xf32>
    %8 = arith.subf %6, %7 : vector<4x64xf32>
    %9 = vector.broadcast %3 : f32 to vector<4x64xf32>
    %10 = arith.mulf %8, %9 : vector<4x64xf32>
    %c0_3 = arith.constant 0 : index
    %c0_4 = arith.constant 0 : index
    %11 = vector.load %arg4[%c0_3, %c0_4] : memref<1x64xf32, #tpu.memory_space<vmem>>, vector<1x64xf32>
    %12 = vector.broadcast %11 : vector<1x64xf32> to vector<4x64xf32>
    %13 = arith.mulf %10, %12 : vector<4x64xf32>
    %c0_5 = arith.constant 0 : index
    %c0_6 = arith.constant 0 : index
    %14 = vector.load %arg5[%c0_5, %c0_6] : memref<1x64xf32, #tpu.memory_space<vmem>>, vector<1x64xf32>
    %15 = vector.broadcast %14 : vector<1x64xf32> to vector<4x64xf32>
    %16 = arith.addf %13, %15 : vector<4x64xf32>
    %17 = arith.truncf %16 : vector<4x64xf32> to vector<4x64xbf16>
    %c0_7 = arith.constant 0 : index
    %c0_8 = arith.constant 0 : index
    %c0_9 = arith.constant 0 : index
    %18 = vector.load %arg6[%c0_7, %c0_8, %c0_9] : memref<1x4x64xbf16, #tpu.memory_space<vmem>>, vector<1x4x64xbf16>
    %19 = vector.shape_cast %18 : vector<1x4x64xbf16> to vector<4x64xbf16>
    %20 = vector.shape_cast %17 : vector<4x64xbf16> to vector<1x4x64xbf16>
    tpu.vector_store %arg6[%c0_7, %c0_8, %c0_9], %20 {strides = array<i32>} : memref<1x4x64xbf16, #tpu.memory_space<vmem>>, vector<1x4x64xbf16>,
    return
  }
  func.func @transform_0(%arg0: i32, %arg1: i32) -> (i32, i32) {
    %c0_i32 = arith.constant 0 : i32
    %c0_i32_0 = arith.constant 0 : i32
    %c0_i32_1 = arith.constant 0 : i32
    return %c0_i32, %c0_i32_0 : i32, i32
  }
  func.func @transform_1(%arg0: i32, %arg1: i32) -> (i32, i32, i32) {
    %c0_i32 = arith.constant 0 : i32
    %c0_i32_0 = arith.constant 0 : i32
    return %arg0, %arg1, %c0_i32 : i32, i32, i32
  }
  func.func @transform_2(%arg0: i32, %arg1: i32) -> (i32, i32) {
    %c0_i32 = arith.constant 0 : i32
    %c0_i32_0 = arith.constant 0 : i32
    %c0_i32_1 = arith.constant 0 : i32
    return %c0_i32, %c0_i32_0 : i32, i32
  }
  func.func @transform_3(%arg0: i32, %arg1: i32) -> (i32, i32) {
    %c0_i32 = arith.constant 0 : i32
    %c0_i32_0 = arith.constant 0 : i32
    %c0_i32_1 = arith.constant 0 : i32
    return %c0_i32, %c0_i32_0 : i32, i32
  }
  func.func @transform_4(%arg0: i32, %arg1: i32) -> (i32, i32, i32) {
    %c0_i32 = arith.constant 0 : i32
    %c0_i32_0 = arith.constant 0 : i32
    return %arg0, %arg1, %c0_i32 : i32, i32, i32
  }
}

module attributes {stable_mosaic.version = 11 : i64} {
  func.func @_mm_kernel(%arg0: i32, %arg1: memref<8x16xbf16, #tpu.memory_space<vmem>>, %arg2: memref<16x16xbf16, #tpu.memory_space<vmem>>, %arg3: memref<1x16xf32, #tpu.memory_space<vmem>>, %arg4: memref<8x16xbf16, #tpu.memory_space<vmem>>) attributes {dimension_semantics = [#tpu.dimension_semantics<parallel>], iteration_bounds = array<i64: 1>, scalar_prefetch = 0 : i64, scratch_operands = 0 : i64, tpu.core_type = #tpu.core_type<tc>, window_params = [{transform_indices = @transform_0, window_bounds = array<i64: 8, 16>}, {pipeline_mode = #tpu.pipeline_mode<synchronous>, transform_indices = @transform_1, window_bounds = array<i64: 16, 16>}, {pipeline_mode = #tpu.pipeline_mode<synchronous>, transform_indices = @transform_2, window_bounds = array<i64: 1, 16>}, {transform_indices = @transform_3, window_bounds = array<i64: 8, 16>}]} {
    %c0 = arith.constant 0 : index
    %c0_0 = arith.constant 0 : index
    %0 = vector.load %arg1[%c0, %c0_0] : memref<8x16xbf16, #tpu.memory_space<vmem>>, vector<8x16xbf16>
    %c0_1 = arith.constant 0 : index
    %c0_2 = arith.constant 0 : index
    %1 = vector.load %arg2[%c0_1, %c0_2] : memref<16x16xbf16, #tpu.memory_space<vmem>>, vector<16x16xbf16>
    %cst = arith.constant dense<0.000000e+00> : vector<8x16xf32>
    %2 = tpu.matmul %0, %1, %cst {dimension_numbers = #tpu.dot_dimension_numbers<[1], [0], [0], [1], [0, 0, 1, 1], [], []>} : vector<8x16xbf16>, vector<16x16xbf16>, vector<8x16xf32> -> vector<8x16xf32>
    %c0_3 = arith.constant 0 : index
    %c0_4 = arith.constant 0 : index
    %3 = vector.load %arg3[%c0_3, %c0_4] : memref<1x16xf32, #tpu.memory_space<vmem>>, vector<1x16xf32>
    %4 = vector.broadcast %3 : vector<1x16xf32> to vector<8x16xf32>
    %5 = arith.addf %2, %4 : vector<8x16xf32>
    %6 = arith.truncf %5 : vector<8x16xf32> to vector<8x16xbf16>
    %c0_5 = arith.constant 0 : index
    %c0_6 = arith.constant 0 : index
    %7 = vector.load %arg4[%c0_5, %c0_6] : memref<8x16xbf16, #tpu.memory_space<vmem>>, vector<8x16xbf16>
    tpu.vector_store %arg4[%c0_5, %c0_6], %6 {strides = array<i32>} : memref<8x16xbf16, #tpu.memory_space<vmem>>, vector<8x16xbf16>,
    return
  }
  func.func @transform_0(%arg0: i32) -> (i32, i32) {
    %c0_i32 = arith.constant 0 : i32
    %c0_i32_0 = arith.constant 0 : i32
    return %arg0, %c0_i32 : i32, i32
  }
  func.func @transform_1(%arg0: i32) -> (i32, i32) {
    %c0_i32 = arith.constant 0 : i32
    %c0_i32_0 = arith.constant 0 : i32
    %c0_i32_1 = arith.constant 0 : i32
    return %c0_i32, %c0_i32_0 : i32, i32
  }
  func.func @transform_2(%arg0: i32) -> (i32, i32) {
    %c0_i32 = arith.constant 0 : i32
    %c0_i32_0 = arith.constant 0 : i32
    %c0_i32_1 = arith.constant 0 : i32
    return %c0_i32, %c0_i32_0 : i32, i32
  }
  func.func @transform_3(%arg0: i32) -> (i32, i32) {
    %c0_i32 = arith.constant 0 : i32
    %c0_i32_0 = arith.constant 0 : i32
    return %arg0, %c0_i32 : i32, i32
  }
}

module attributes {stable_mosaic.version = 11 : i64} {
  func.func @_mm_kernel(%arg0: i32, %arg1: memref<8x24xbf16, #tpu.memory_space<vmem>>, %arg2: memref<24x24xbf16, #tpu.memory_space<vmem>>, %arg3: memref<1x24xf32, #tpu.memory_space<vmem>>, %arg4: memref<8x24xbf16, #tpu.memory_space<vmem>>) attributes {dimension_semantics = [#tpu.dimension_semantics<parallel>], iteration_bounds = array<i64: 1>, scalar_prefetch = 0 : i64, scratch_operands = 0 : i64, tpu.core_type = #tpu.core_type<tc>, window_params = [{transform_indices = @transform_0, window_bounds = array<i64: 8, 24>}, {pipeline_mode = #tpu.pipeline_mode<synchronous>, transform_indices = @transform_1, window_bounds = array<i64: 24, 24>}, {pipeline_mode = #tpu.pipeline_mode<synchronous>, transform_indices = @transform_2, window_bounds = array<i64: 1, 24>}, {transform_indices = @transform_3, window_bounds = array<i64: 8, 24>}]} {
    %c0 = arith.constant 0 : index
    %c0_0 = arith.constant 0 : index
    %0 = vector.load %arg1[%c0, %c0_0] : memref<8x24xbf16, #tpu.memory_space<vmem>>, vector<8x24xbf16>
    %c0_1 = arith.constant 0 : index
    %c0_2 = arith.constant 0 : index
    %1 = vector.load %arg2[%c0_1, %c0_2] : memref<24x24xbf16, #tpu.memory_space<vmem>>, vector<24x24xbf16>
    %cst = arith.constant dense<0.000000e+00> : vector<8x24xf32>
    %2 = tpu.matmul %0, %1, %cst {dimension_numbers = #tpu.dot_dimension_numbers<[1], [0], [0], [1], [0, 0, 1, 1], [], []>} : vector<8x24xbf16>, vector<24x24xbf16>, vector<8x24xf32> -> vector<8x24xf32>
    %c0_3 = arith.constant 0 : index
    %c0_4 = arith.constant 0 : index
    %3 = vector.load %arg3[%c0_3, %c0_4] : memref<1x24xf32, #tpu.memory_space<vmem>>, vector<1x24xf32>
    %4 = vector.broadcast %3 : vector<1x24xf32> to vector<8x24xf32>
    %5 = arith.addf %2, %4 : vector<8x24xf32>
    %6 = arith.truncf %5 : vector<8x24xf32> to vector<8x24xbf16>
    %c0_5 = arith.constant 0 : index
    %c0_6 = arith.constant 0 : index
    %7 = vector.load %arg4[%c0_5, %c0_6] : memref<8x24xbf16, #tpu.memory_space<vmem>>, vector<8x24xbf16>
    tpu.vector_store %arg4[%c0_5, %c0_6], %6 {strides = array<i32>} : memref<8x24xbf16, #tpu.memory_space<vmem>>, vector<8x24xbf16>,
    return
  }
  func.func @transform_0(%arg0: i32) -> (i32, i32) {
    %c0_i32 = arith.constant 0 : i32
    %c0_i32_0 = arith.constant 0 : i32
    return %arg0, %c0_i32 : i32, i32
  }
  func.func @transform_1(%arg0: i32) -> (i32, i32) {
    %c0_i32 = arith.constant 0 : i32
    %c0_i32_0 = arith.constant 0 : i32
    %c0_i32_1 = arith.constant 0 : i32
    return %c0_i32, %c0_i32_0 : i32, i32
  }
  func.func @transform_2(%arg0: i32) -> (i32, i32) {
    %c0_i32 = arith.constant 0 : i32
    %c0_i32_0 = arith.constant 0 : i32
    %c0_i32_1 = arith.constant 0 : i32
    return %c0_i32, %c0_i32_0 : i32, i32
  }
  func.func @transform_3(%arg0: i32) -> (i32, i32) {
    %c0_i32 = arith.constant 0 : i32
    %c0_i32_0 = arith.constant 0 : i32
    return %arg0, %c0_i32 : i32, i32
  }
}

module attributes {stable_mosaic.version = 11 : i64} {
  func.func @_mm_kernel(%arg0: i32, %arg1: memref<8x28xbf16, #tpu.memory_space<vmem>>, %arg2: memref<28x28xbf16, #tpu.memory_space<vmem>>, %arg3: memref<1x28xf32, #tpu.memory_space<vmem>>, %arg4: memref<8x28xbf16, #tpu.memory_space<vmem>>) attributes {dimension_semantics = [#tpu.dimension_semantics<parallel>], iteration_bounds = array<i64: 1>, scalar_prefetch = 0 : i64, scratch_operands = 0 : i64, tpu.core_type = #tpu.core_type<tc>, window_params = [{transform_indices = @transform_0, window_bounds = array<i64: 8, 28>}, {pipeline_mode = #tpu.pipeline_mode<synchronous>, transform_indices = @transform_1, window_bounds = array<i64: 28, 28>}, {pipeline_mode = #tpu.pipeline_mode<synchronous>, transform_indices = @transform_2, window_bounds = array<i64: 1, 28>}, {transform_indices = @transform_3, window_bounds = array<i64: 8, 28>}]} {
    %c0 = arith.constant 0 : index
    %c0_0 = arith.constant 0 : index
    %0 = vector.load %arg1[%c0, %c0_0] : memref<8x28xbf16, #tpu.memory_space<vmem>>, vector<8x28xbf16>
    %c0_1 = arith.constant 0 : index
    %c0_2 = arith.constant 0 : index
    %1 = vector.load %arg2[%c0_1, %c0_2] : memref<28x28xbf16, #tpu.memory_space<vmem>>, vector<28x28xbf16>
    %cst = arith.constant dense<0.000000e+00> : vector<8x28xf32>
    %2 = tpu.matmul %0, %1, %cst {dimension_numbers = #tpu.dot_dimension_numbers<[1], [0], [0], [1], [0, 0, 1, 1], [], []>} : vector<8x28xbf16>, vector<28x28xbf16>, vector<8x28xf32> -> vector<8x28xf32>
    %c0_3 = arith.constant 0 : index
    %c0_4 = arith.constant 0 : index
    %3 = vector.load %arg3[%c0_3, %c0_4] : memref<1x28xf32, #tpu.memory_space<vmem>>, vector<1x28xf32>
    %4 = vector.broadcast %3 : vector<1x28xf32> to vector<8x28xf32>
    %5 = arith.addf %2, %4 : vector<8x28xf32>
    %6 = arith.truncf %5 : vector<8x28xf32> to vector<8x28xbf16>
    %c0_5 = arith.constant 0 : index
    %c0_6 = arith.constant 0 : index
    %7 = vector.load %arg4[%c0_5, %c0_6] : memref<8x28xbf16, #tpu.memory_space<vmem>>, vector<8x28xbf16>
    tpu.vector_store %arg4[%c0_5, %c0_6], %6 {strides = array<i32>} : memref<8x28xbf16, #tpu.memory_space<vmem>>, vector<8x28xbf16>,
    return
  }
  func.func @transform_0(%arg0: i32) -> (i32, i32) {
    %c0_i32 = arith.constant 0 : i32
    %c0_i32_0 = arith.constant 0 : i32
    return %arg0, %c0_i32 : i32, i32
  }
  func.func @transform_1(%arg0: i32) -> (i32, i32) {
    %c0_i32 = arith.constant 0 : i32
    %c0_i32_0 = arith.constant 0 : i32
    %c0_i32_1 = arith.constant 0 : i32
    return %c0_i32, %c0_i32_0 : i32, i32
  }
  func.func @transform_2(%arg0: i32) -> (i32, i32) {
    %c0_i32 = arith.constant 0 : i32
    %c0_i32_0 = arith.constant 0 : i32
    %c0_i32_1 = arith.constant 0 : i32
    return %c0_i32, %c0_i32_0 : i32, i32
  }
  func.func @transform_3(%arg0: i32) -> (i32, i32) {
    %c0_i32 = arith.constant 0 : i32
    %c0_i32_0 = arith.constant 0 : i32
    return %arg0, %c0_i32 : i32, i32
  }
}

module attributes {stable_mosaic.version = 11 : i64} {
  func.func @_gn_mm_kernel(%arg0: i32, %arg1: i32, %arg2: memref<2x2xf32, #tpu.memory_space<smem>>, %arg3: memref<1x4x64xbf16, #tpu.memory_space<vmem>>, %arg4: memref<64x64xbf16, #tpu.memory_space<vmem>>, %arg5: memref<1x64xf32, #tpu.memory_space<vmem>>, %arg6: memref<1x4x64xbf16, #tpu.memory_space<vmem>>, %arg7: memref<1x4x64xbf16, #tpu.memory_space<vmem>>) attributes {dimension_semantics = [#tpu.dimension_semantics<parallel>, #tpu.dimension_semantics<parallel>], iteration_bounds = array<i64: 2, 1>, scalar_prefetch = 0 : i64, scratch_operands = 0 : i64, tpu.core_type = #tpu.core_type<tc>, window_params = [{transform_indices = @transform_0, window_bounds = array<i64: 2, 2>}, {transform_indices = @transform_1, window_bounds = array<i64: 1, 4, 64>}, {pipeline_mode = #tpu.pipeline_mode<synchronous>, transform_indices = @transform_2, window_bounds = array<i64: 64, 64>}, {pipeline_mode = #tpu.pipeline_mode<synchronous>, transform_indices = @transform_3, window_bounds = array<i64: 1, 64>}, {transform_indices = @transform_4, window_bounds = array<i64: 1, 4, 64>}, {transform_indices = @transform_5, window_bounds = array<i64: 1, 4, 64>}]} {
    %0 = arith.index_cast %arg0 : i32 to index
    %c0 = arith.constant 0 : index
    %1 = memref.load %arg2[%0, %c0] : memref<2x2xf32, #tpu.memory_space<smem>>
    %2 = arith.index_cast %arg0 : i32 to index
    %c1 = arith.constant 1 : index
    %3 = memref.load %arg2[%2, %c1] : memref<2x2xf32, #tpu.memory_space<smem>>
    %c0_0 = arith.constant 0 : index
    %c0_1 = arith.constant 0 : index
    %c0_2 = arith.constant 0 : index
    %4 = vector.load %arg3[%c0_0, %c0_1, %c0_2] : memref<1x4x64xbf16, #tpu.memory_space<vmem>>, vector<1x4x64xbf16>
    %5 = vector.shape_cast %4 : vector<1x4x64xbf16> to vector<4x64xbf16>
    %6 = arith.extf %5 : vector<4x64xbf16> to vector<4x64xf32>
    %7 = vector.broadcast %1 : f32 to vector<4x64xf32>
    %8 = arith.subf %6, %7 : vector<4x64xf32>
    %9 = vector.broadcast %3 : f32 to vector<4x64xf32>
    %10 = arith.mulf %8, %9 : vector<4x64xf32>
    %11 = arith.truncf %10 : vector<4x64xf32> to vector<4x64xbf16>
    %c0_3 = arith.constant 0 : index
    %c0_4 = arith.constant 0 : index
    %12 = vector.load %arg4[%c0_3, %c0_4] : memref<64x64xbf16, #tpu.memory_space<vmem>>, vector<64x64xbf16>
    %cst = arith.constant dense<0.000000e+00> : vector<4x64xf32>
    %13 = tpu.matmul %11, %12, %cst {dimension_numbers = #tpu.dot_dimension_numbers<[1], [0], [0], [1], [0, 0, 1, 1], [], []>} : vector<4x64xbf16>, vector<64x64xbf16>, vector<4x64xf32> -> vector<4x64xf32>
    %c0_5 = arith.constant 0 : index
    %c0_6 = arith.constant 0 : index
    %14 = vector.load %arg5[%c0_5, %c0_6] : memref<1x64xf32, #tpu.memory_space<vmem>>, vector<1x64xf32>
    %15 = vector.broadcast %14 : vector<1x64xf32> to vector<4x64xf32>
    %16 = arith.addf %13, %15 : vector<4x64xf32>
    %c0_7 = arith.constant 0 : index
    %c0_8 = arith.constant 0 : index
    %c0_9 = arith.constant 0 : index
    %17 = vector.load %arg6[%c0_7, %c0_8, %c0_9] : memref<1x4x64xbf16, #tpu.memory_space<vmem>>, vector<1x4x64xbf16>
    %18 = vector.shape_cast %17 : vector<1x4x64xbf16> to vector<4x64xbf16>
    %19 = arith.extf %18 : vector<4x64xbf16> to vector<4x64xf32>
    %20 = arith.addf %16, %19 : vector<4x64xf32>
    %21 = arith.truncf %20 : vector<4x64xf32> to vector<4x64xbf16>
    %c0_10 = arith.constant 0 : index
    %c0_11 = arith.constant 0 : index
    %c0_12 = arith.constant 0 : index
    %22 = vector.load %arg7[%c0_10, %c0_11, %c0_12] : memref<1x4x64xbf16, #tpu.memory_space<vmem>>, vector<1x4x64xbf16>
    %23 = vector.shape_cast %22 : vector<1x4x64xbf16> to vector<4x64xbf16>
    %24 = vector.shape_cast %21 : vector<4x64xbf16> to vector<1x4x64xbf16>
    tpu.vector_store %arg7[%c0_10, %c0_11, %c0_12], %24 {strides = array<i32>} : memref<1x4x64xbf16, #tpu.memory_space<vmem>>, vector<1x4x64xbf16>,
    return
  }
  func.func @transform_0(%arg0: i32, %arg1: i32) -> (i32, i32) {
    %c0_i32 = arith.constant 0 : i32
    %c0_i32_0 = arith.constant 0 : i32
    %c0_i32_1 = arith.constant 0 : i32
    return %c0_i32, %c0_i32_0 : i32, i32
  }
  func.func @transform_1(%arg0: i32, %arg1: i32) -> (i32, i32, i32) {
    %c0_i32 = arith.constant 0 : i32
    %c0_i32_0 = arith.constant 0 : i32
    return %arg0, %arg1, %c0_i32 : i32, i32, i32
  }
  func.func @transform_2(%arg0: i32, %arg1: i32) -> (i32, i32) {
    %c0_i32 = arith.constant 0 : i32
    %c0_i32_0 = arith.constant 0 : i32
    %c0_i32_1 = arith.constant 0 : i32
    return %c0_i32, %c0_i32_0 : i32, i32
  }
  func.func @transform_3(%arg0: i32, %arg1: i32) -> (i32, i32) {
    %c0_i32 = arith.constant 0 : i32
    %c0_i32_0 = arith.constant 0 : i32
    %c0_i32_1 = arith.constant 0 : i32
    return %c0_i32, %c0_i32_0 : i32, i32
  }
  func.func @transform_4(%arg0: i32, %arg1: i32) -> (i32, i32, i32) {
    %c0_i32 = arith.constant 0 : i32
    %c0_i32_0 = arith.constant 0 : i32
    return %arg0, %arg1, %c0_i32 : i32, i32, i32
  }
  func.func @transform_5(%arg0: i32, %arg1: i32) -> (i32, i32, i32) {
    %c0_i32 = arith.constant 0 : i32
    %c0_i32_0 = arith.constant 0 : i32
    return %arg0, %arg1, %c0_i32 : i32, i32, i32
  }
}

module attributes {stable_mosaic.version = 11 : i64} {
  func.func @_gn_mm_kernel(%arg0: i32, %arg1: i32, %arg2: memref<2x2xf32, #tpu.memory_space<smem>>, %arg3: memref<1x4x64xbf16, #tpu.memory_space<vmem>>, %arg4: memref<64x256xbf16, #tpu.memory_space<vmem>>, %arg5: memref<1x256xf32, #tpu.memory_space<vmem>>, %arg6: memref<1x4x256xbf16, #tpu.memory_space<vmem>>) attributes {dimension_semantics = [#tpu.dimension_semantics<parallel>, #tpu.dimension_semantics<parallel>], iteration_bounds = array<i64: 2, 1>, scalar_prefetch = 0 : i64, scratch_operands = 0 : i64, tpu.core_type = #tpu.core_type<tc>, window_params = [{transform_indices = @transform_0, window_bounds = array<i64: 2, 2>}, {transform_indices = @transform_1, window_bounds = array<i64: 1, 4, 64>}, {pipeline_mode = #tpu.pipeline_mode<synchronous>, transform_indices = @transform_2, window_bounds = array<i64: 64, 256>}, {pipeline_mode = #tpu.pipeline_mode<synchronous>, transform_indices = @transform_3, window_bounds = array<i64: 1, 256>}, {transform_indices = @transform_4, window_bounds = array<i64: 1, 4, 256>}]} {
    %0 = arith.index_cast %arg0 : i32 to index
    %c0 = arith.constant 0 : index
    %1 = memref.load %arg2[%0, %c0] : memref<2x2xf32, #tpu.memory_space<smem>>
    %2 = arith.index_cast %arg0 : i32 to index
    %c1 = arith.constant 1 : index
    %3 = memref.load %arg2[%2, %c1] : memref<2x2xf32, #tpu.memory_space<smem>>
    %c0_0 = arith.constant 0 : index
    %c0_1 = arith.constant 0 : index
    %c0_2 = arith.constant 0 : index
    %4 = vector.load %arg3[%c0_0, %c0_1, %c0_2] : memref<1x4x64xbf16, #tpu.memory_space<vmem>>, vector<1x4x64xbf16>
    %5 = vector.shape_cast %4 : vector<1x4x64xbf16> to vector<4x64xbf16>
    %6 = arith.extf %5 : vector<4x64xbf16> to vector<4x64xf32>
    %7 = vector.broadcast %1 : f32 to vector<4x64xf32>
    %8 = arith.subf %6, %7 : vector<4x64xf32>
    %9 = vector.broadcast %3 : f32 to vector<4x64xf32>
    %10 = arith.mulf %8, %9 : vector<4x64xf32>
    %11 = arith.truncf %10 : vector<4x64xf32> to vector<4x64xbf16>
    %c0_3 = arith.constant 0 : index
    %c0_4 = arith.constant 0 : index
    %12 = vector.load %arg4[%c0_3, %c0_4] : memref<64x256xbf16, #tpu.memory_space<vmem>>, vector<64x256xbf16>
    %cst = arith.constant dense<0.000000e+00> : vector<4x256xf32>
    %13 = tpu.matmul %11, %12, %cst {dimension_numbers = #tpu.dot_dimension_numbers<[1], [0], [0], [1], [0, 0, 1, 1], [], []>} : vector<4x64xbf16>, vector<64x256xbf16>, vector<4x256xf32> -> vector<4x256xf32>
    %c0_5 = arith.constant 0 : index
    %c0_6 = arith.constant 0 : index
    %14 = vector.load %arg5[%c0_5, %c0_6] : memref<1x256xf32, #tpu.memory_space<vmem>>, vector<1x256xf32>
    %15 = vector.broadcast %14 : vector<1x256xf32> to vector<4x256xf32>
    %16 = arith.addf %13, %15 : vector<4x256xf32>
    %cst_7 = arith.constant 5.000000e-01 : f32
    %17 = vector.broadcast %cst_7 : f32 to vector<4x256xf32>
    %18 = arith.mulf %17, %16 : vector<4x256xf32>
    %cst_8 = arith.constant 4.471500e-02 : f32
    %19 = vector.broadcast %cst_8 : f32 to vector<4x256xf32>
    %20 = arith.mulf %19, %16 : vector<4x256xf32>
    %21 = arith.mulf %20, %16 : vector<4x256xf32>
    %22 = arith.mulf %21, %16 : vector<4x256xf32>
    %23 = arith.addf %16, %22 : vector<4x256xf32>
    %cst_9 = arith.constant 0.797884583 : f32
    %24 = vector.broadcast %cst_9 : f32 to vector<4x256xf32>
    %25 = arith.mulf %24, %23 : vector<4x256xf32>
    %26 = math.tanh %25 : vector<4x256xf32>
    %cst_10 = arith.constant 1.000000e+00 : f32
    %27 = vector.broadcast %cst_10 : f32 to vector<4x256xf32>
    %28 = arith.addf %27, %26 : vector<4x256xf32>
    %29 = arith.mulf %18, %28 : vector<4x256xf32>
    %30 = arith.truncf %29 : vector<4x256xf32> to vector<4x256xbf16>
    %c0_11 = arith.constant 0 : index
    %c0_12 = arith.constant 0 : index
    %c0_13 = arith.constant 0 : index
    %31 = vector.load %arg6[%c0_11, %c0_12, %c0_13] : memref<1x4x256xbf16, #tpu.memory_space<vmem>>, vector<1x4x256xbf16>
    %32 = vector.shape_cast %31 : vector<1x4x256xbf16> to vector<4x256xbf16>
    %33 = vector.shape_cast %30 : vector<4x256xbf16> to vector<1x4x256xbf16>
    tpu.vector_store %arg6[%c0_11, %c0_12, %c0_13], %33 {strides = array<i32>} : memref<1x4x256xbf16, #tpu.memory_space<vmem>>, vector<1x4x256xbf16>,
    return
  }
  func.func @transform_0(%arg0: i32, %arg1: i32) -> (i32, i32) {
    %c0_i32 = arith.constant 0 : i32
    %c0_i32_0 = arith.constant 0 : i32
    %c0_i32_1 = arith.constant 0 : i32
    return %c0_i32, %c0_i32_0 : i32, i32
  }
  func.func @transform_1(%arg0: i32, %arg1: i32) -> (i32, i32, i32) {
    %c0_i32 = arith.constant 0 : i32
    %c0_i32_0 = arith.constant 0 : i32
    return %arg0, %arg1, %c0_i32 : i32, i32, i32
  }
  func.func @transform_2(%arg0: i32, %arg1: i32) -> (i32, i32) {
    %c0_i32 = arith.constant 0 : i32
    %c0_i32_0 = arith.constant 0 : i32
    %c0_i32_1 = arith.constant 0 : i32
    return %c0_i32, %c0_i32_0 : i32, i32
  }
  func.func @transform_3(%arg0: i32, %arg1: i32) -> (i32, i32) {
    %c0_i32 = arith.constant 0 : i32
    %c0_i32_0 = arith.constant 0 : i32
    %c0_i32_1 = arith.constant 0 : i32
    return %c0_i32, %c0_i32_0 : i32, i32
  }
  func.func @transform_4(%arg0: i32, %arg1: i32) -> (i32, i32, i32) {
    %c0_i32 = arith.constant 0 : i32
    %c0_i32_0 = arith.constant 0 : i32
    return %arg0, %arg1, %c0_i32 : i32, i32, i32
  }
}

module attributes {stable_mosaic.version = 11 : i64} {
  func.func @_mm_kernel(%arg0: i32, %arg1: memref<8x256xbf16, #tpu.memory_space<vmem>>, %arg2: memref<256x64xbf16, #tpu.memory_space<vmem>>, %arg3: memref<1x64xf32, #tpu.memory_space<vmem>>, %arg4: memref<8x64xbf16, #tpu.memory_space<vmem>>, %arg5: memref<8x64xbf16, #tpu.memory_space<vmem>>) attributes {dimension_semantics = [#tpu.dimension_semantics<parallel>], iteration_bounds = array<i64: 1>, scalar_prefetch = 0 : i64, scratch_operands = 0 : i64, tpu.core_type = #tpu.core_type<tc>, window_params = [{transform_indices = @transform_0, window_bounds = array<i64: 8, 256>}, {pipeline_mode = #tpu.pipeline_mode<synchronous>, transform_indices = @transform_1, window_bounds = array<i64: 256, 64>}, {pipeline_mode = #tpu.pipeline_mode<synchronous>, transform_indices = @transform_2, window_bounds = array<i64: 1, 64>}, {transform_indices = @transform_3, window_bounds = array<i64: 8, 64>}, {transform_indices = @transform_4, window_bounds = array<i64: 8, 64>}]} {
    %c0 = arith.constant 0 : index
    %c0_0 = arith.constant 0 : index
    %0 = vector.load %arg1[%c0, %c0_0] : memref<8x256xbf16, #tpu.memory_space<vmem>>, vector<8x256xbf16>
    %c0_1 = arith.constant 0 : index
    %c0_2 = arith.constant 0 : index
    %1 = vector.load %arg2[%c0_1, %c0_2] : memref<256x64xbf16, #tpu.memory_space<vmem>>, vector<256x64xbf16>
    %cst = arith.constant dense<0.000000e+00> : vector<8x64xf32>
    %2 = tpu.matmul %0, %1, %cst {dimension_numbers = #tpu.dot_dimension_numbers<[1], [0], [0], [1], [0, 0, 1, 1], [], []>} : vector<8x256xbf16>, vector<256x64xbf16>, vector<8x64xf32> -> vector<8x64xf32>
    %c0_3 = arith.constant 0 : index
    %c0_4 = arith.constant 0 : index
    %3 = vector.load %arg3[%c0_3, %c0_4] : memref<1x64xf32, #tpu.memory_space<vmem>>, vector<1x64xf32>
    %4 = vector.broadcast %3 : vector<1x64xf32> to vector<8x64xf32>
    %5 = arith.addf %2, %4 : vector<8x64xf32>
    %c0_5 = arith.constant 0 : index
    %c0_6 = arith.constant 0 : index
    %6 = vector.load %arg4[%c0_5, %c0_6] : memref<8x64xbf16, #tpu.memory_space<vmem>>, vector<8x64xbf16>
    %7 = arith.extf %6 : vector<8x64xbf16> to vector<8x64xf32>
    %8 = arith.addf %5, %7 : vector<8x64xf32>
    %9 = arith.truncf %8 : vector<8x64xf32> to vector<8x64xbf16>
    %c0_7 = arith.constant 0 : index
    %c0_8 = arith.constant 0 : index
    %10 = vector.load %arg5[%c0_7, %c0_8] : memref<8x64xbf16, #tpu.memory_space<vmem>>, vector<8x64xbf16>
    tpu.vector_store %arg5[%c0_7, %c0_8], %9 {strides = array<i32>} : memref<8x64xbf16, #tpu.memory_space<vmem>>, vector<8x64xbf16>,
    return
  }
  func.func @transform_0(%arg0: i32) -> (i32, i32) {
    %c0_i32 = arith.constant 0 : i32
    %c0_i32_0 = arith.constant 0 : i32
    return %arg0, %c0_i32 : i32, i32
  }
  func.func @transform_1(%arg0: i32) -> (i32, i32) {
    %c0_i32 = arith.constant 0 : i32
    %c0_i32_0 = arith.constant 0 : i32
    %c0_i32_1 = arith.constant 0 : i32
    return %c0_i32, %c0_i32_0 : i32, i32
  }
  func.func @transform_2(%arg0: i32) -> (i32, i32) {
    %c0_i32 = arith.constant 0 : i32
    %c0_i32_0 = arith.constant 0 : i32
    %c0_i32_1 = arith.constant 0 : i32
    return %c0_i32, %c0_i32_0 : i32, i32
  }
  func.func @transform_3(%arg0: i32) -> (i32, i32) {
    %c0_i32 = arith.constant 0 : i32
    %c0_i32_0 = arith.constant 0 : i32
    return %arg0, %c0_i32 : i32, i32
  }
  func.func @transform_4(%arg0: i32) -> (i32, i32) {
    %c0_i32 = arith.constant 0 : i32
    %c0_i32_0 = arith.constant 0 : i32
    return %arg0, %c0_i32 : i32, i32
  }
}

module attributes {stable_mosaic.version = 11 : i64} {
  func.func @_gn_stats_kernel(%arg0: i32, %arg1: memref<1x1x256xbf16, #tpu.memory_space<vmem>>, %arg2: memref<2x2xf32, #tpu.memory_space<smem>>) attributes {dimension_semantics = [#tpu.dimension_semantics<arbitrary>], iteration_bounds = array<i64: 2>, scalar_prefetch = 0 : i64, scratch_operands = 0 : i64, tpu.core_type = #tpu.core_type<tc>, window_params = [{transform_indices = @transform_0, window_bounds = array<i64: 1, 1, 256>}, {transform_indices = @transform_1, window_bounds = array<i64: 2, 2>}]} {
    %c0 = arith.constant 0 : index
    %c0_0 = arith.constant 0 : index
    %c0_1 = arith.constant 0 : index
    %0 = vector.load %arg1[%c0, %c0_0, %c0_1] : memref<1x1x256xbf16, #tpu.memory_space<vmem>>, vector<1x1x256xbf16>
    %1 = vector.shape_cast %0 : vector<1x1x256xbf16> to vector<1x256xbf16>
    %2 = arith.extf %1 : vector<1x256xbf16> to vector<1x256xf32>
    %cst = arith.constant dense<0.000000e+00> : vector<1xf32>
    %3 = vector.multi_reduction <add>, %2, %cst [1] : vector<1x256xf32> to vector<1xf32>
    %4 = vector.shape_cast %3 : vector<1xf32> to vector<1x1xf32>
    %cst_2 = arith.constant dense<0.000000e+00> : vector<1xf32>
    %5 = vector.multi_reduction <add>, %4, %cst_2 [0] : vector<1x1xf32> to vector<1xf32>
    %6 = vector.shape_cast %5 : vector<1xf32> to vector<1x1xf32>
    %cst_3 = arith.constant 3.906250e-03 : f32
    %7 = vector.broadcast %cst_3 : f32 to vector<1x1xf32>
    %8 = arith.mulf %6, %7 : vector<1x1xf32>
    %9 = vector.broadcast %8 : vector<1x1xf32> to vector<1x256xf32>
    %10 = arith.subf %2, %9 : vector<1x256xf32>
    %11 = arith.mulf %10, %10 : vector<1x256xf32>
    %cst_4 = arith.constant dense<0.000000e+00> : vector<1xf32>
    %12 = vector.multi_reduction <add>, %11, %cst_4 [1] : vector<1x256xf32> to vector<1xf32>
    %13 = vector.shape_cast %12 : vector<1xf32> to vector<1x1xf32>
    %cst_5 = arith.constant dense<0.000000e+00> : vector<1xf32>
    %14 = vector.multi_reduction <add>, %13, %cst_5 [0] : vector<1x1xf32> to vector<1xf32>
    %15 = vector.shape_cast %14 : vector<1xf32> to vector<1x1xf32>
    %cst_6 = arith.constant 3.906250e-03 : f32
    %16 = vector.broadcast %cst_6 : f32 to vector<1x1xf32>
    %17 = arith.mulf %15, %16 : vector<1x1xf32>
    %cst_7 = arith.constant 9.99999974E-6 : f32
    %18 = vector.broadcast %cst_7 : f32 to vector<1x1xf32>
    %19 = arith.addf %17, %18 : vector<1x1xf32>
    %20 = math.rsqrt %19 : vector<1x1xf32>
    %21 = vector.extract %8[0, 0] : f32 from vector<1x1xf32>
    %22 = arith.index_cast %arg0 : i32 to index
    %c0_8 = arith.constant 0 : index
    %23 = memref.load %arg2[%22, %c0_8] : memref<2x2xf32, #tpu.memory_space<smem>>
    memref.store %21, %arg2[%22, %c0_8] : memref<2x2xf32, #tpu.memory_space<smem>>
    %24 = vector.extract %20[0, 0] : f32 from vector<1x1xf32>
    %25 = arith.index_cast %arg0 : i32 to index
    %c1 = arith.constant 1 : index
    %26 = memref.load %arg2[%25, %c1] : memref<2x2xf32, #tpu.memory_space<smem>>
    memref.store %24, %arg2[%25, %c1] : memref<2x2xf32, #tpu.memory_space<smem>>
    return
  }
  func.func @transform_0(%arg0: i32) -> (i32, i32, i32) {
    %c0_i32 = arith.constant 0 : i32
    %c0_i32_0 = arith.constant 0 : i32
    %c0_i32_1 = arith.constant 0 : i32
    return %arg0, %c0_i32, %c0_i32_0 : i32, i32, i32
  }
  func.func @transform_1(%arg0: i32) -> (i32, i32) {
    %c0_i32 = arith.constant 0 : i32
    %c0_i32_0 = arith.constant 0 : i32
    %c0_i32_1 = arith.constant 0 : i32
    return %c0_i32, %c0_i32_0 : i32, i32
  }
}

module attributes {stable_mosaic.version = 11 : i64} {
  func.func @_gn_stats_kernel(%arg0: i32, %arg1: memref<1x1x128xbf16, #tpu.memory_space<vmem>>, %arg2: memref<2x2xf32, #tpu.memory_space<smem>>) attributes {dimension_semantics = [#tpu.dimension_semantics<arbitrary>], iteration_bounds = array<i64: 2>, scalar_prefetch = 0 : i64, scratch_operands = 0 : i64, tpu.core_type = #tpu.core_type<tc>, window_params = [{transform_indices = @transform_0, window_bounds = array<i64: 1, 1, 128>}, {transform_indices = @transform_1, window_bounds = array<i64: 2, 2>}]} {
    %c0 = arith.constant 0 : index
    %c0_0 = arith.constant 0 : index
    %c0_1 = arith.constant 0 : index
    %0 = vector.load %arg1[%c0, %c0_0, %c0_1] : memref<1x1x128xbf16, #tpu.memory_space<vmem>>, vector<1x1x128xbf16>
    %1 = vector.shape_cast %0 : vector<1x1x128xbf16> to vector<1x128xbf16>
    %2 = arith.extf %1 : vector<1x128xbf16> to vector<1x128xf32>
    %cst = arith.constant dense<0.000000e+00> : vector<1xf32>
    %3 = vector.multi_reduction <add>, %2, %cst [1] : vector<1x128xf32> to vector<1xf32>
    %4 = vector.shape_cast %3 : vector<1xf32> to vector<1x1xf32>
    %cst_2 = arith.constant dense<0.000000e+00> : vector<1xf32>
    %5 = vector.multi_reduction <add>, %4, %cst_2 [0] : vector<1x1xf32> to vector<1xf32>
    %6 = vector.shape_cast %5 : vector<1xf32> to vector<1x1xf32>
    %cst_3 = arith.constant 7.812500e-03 : f32
    %7 = vector.broadcast %cst_3 : f32 to vector<1x1xf32>
    %8 = arith.mulf %6, %7 : vector<1x1xf32>
    %9 = vector.broadcast %8 : vector<1x1xf32> to vector<1x128xf32>
    %10 = arith.subf %2, %9 : vector<1x128xf32>
    %11 = arith.mulf %10, %10 : vector<1x128xf32>
    %cst_4 = arith.constant dense<0.000000e+00> : vector<1xf32>
    %12 = vector.multi_reduction <add>, %11, %cst_4 [1] : vector<1x128xf32> to vector<1xf32>
    %13 = vector.shape_cast %12 : vector<1xf32> to vector<1x1xf32>
    %cst_5 = arith.constant dense<0.000000e+00> : vector<1xf32>
    %14 = vector.multi_reduction <add>, %13, %cst_5 [0] : vector<1x1xf32> to vector<1xf32>
    %15 = vector.shape_cast %14 : vector<1xf32> to vector<1x1xf32>
    %cst_6 = arith.constant 7.812500e-03 : f32
    %16 = vector.broadcast %cst_6 : f32 to vector<1x1xf32>
    %17 = arith.mulf %15, %16 : vector<1x1xf32>
    %cst_7 = arith.constant 9.99999974E-6 : f32
    %18 = vector.broadcast %cst_7 : f32 to vector<1x1xf32>
    %19 = arith.addf %17, %18 : vector<1x1xf32>
    %20 = math.rsqrt %19 : vector<1x1xf32>
    %21 = vector.extract %8[0, 0] : f32 from vector<1x1xf32>
    %22 = arith.index_cast %arg0 : i32 to index
    %c0_8 = arith.constant 0 : index
    %23 = memref.load %arg2[%22, %c0_8] : memref<2x2xf32, #tpu.memory_space<smem>>
    memref.store %21, %arg2[%22, %c0_8] : memref<2x2xf32, #tpu.memory_space<smem>>
    %24 = vector.extract %20[0, 0] : f32 from vector<1x1xf32>
    %25 = arith.index_cast %arg0 : i32 to index
    %c1 = arith.constant 1 : index
    %26 = memref.load %arg2[%25, %c1] : memref<2x2xf32, #tpu.memory_space<smem>>
    memref.store %24, %arg2[%25, %c1] : memref<2x2xf32, #tpu.memory_space<smem>>
    return
  }
  func.func @transform_0(%arg0: i32) -> (i32, i32, i32) {
    %c0_i32 = arith.constant 0 : i32
    %c0_i32_0 = arith.constant 0 : i32
    %c0_i32_1 = arith.constant 0 : i32
    return %arg0, %c0_i32, %c0_i32_0 : i32, i32, i32
  }
  func.func @transform_1(%arg0: i32) -> (i32, i32) {
    %c0_i32 = arith.constant 0 : i32
    %c0_i32_0 = arith.constant 0 : i32
    %c0_i32_1 = arith.constant 0 : i32
    return %c0_i32, %c0_i32_0 : i32, i32
  }
}

module attributes {stable_mosaic.version = 11 : i64} {
  func.func @_gn_mm_kernel(%arg0: i32, %arg1: i32, %arg2: memref<2x2xf32, #tpu.memory_space<smem>>, %arg3: memref<1x1x256xbf16, #tpu.memory_space<vmem>>, %arg4: memref<256x128xbf16, #tpu.memory_space<vmem>>, %arg5: memref<1x128xf32, #tpu.memory_space<vmem>>, %arg6: memref<1x1x128xbf16, #tpu.memory_space<vmem>>) attributes {dimension_semantics = [#tpu.dimension_semantics<parallel>, #tpu.dimension_semantics<parallel>], iteration_bounds = array<i64: 2, 1>, scalar_prefetch = 0 : i64, scratch_operands = 0 : i64, tpu.core_type = #tpu.core_type<tc>, window_params = [{transform_indices = @transform_0, window_bounds = array<i64: 2, 2>}, {transform_indices = @transform_1, window_bounds = array<i64: 1, 1, 256>}, {pipeline_mode = #tpu.pipeline_mode<synchronous>, transform_indices = @transform_2, window_bounds = array<i64: 256, 128>}, {pipeline_mode = #tpu.pipeline_mode<synchronous>, transform_indices = @transform_3, window_bounds = array<i64: 1, 128>}, {transform_indices = @transform_4, window_bounds = array<i64: 1, 1, 128>}]} {
    %0 = arith.index_cast %arg0 : i32 to index
    %c0 = arith.constant 0 : index
    %1 = memref.load %arg2[%0, %c0] : memref<2x2xf32, #tpu.memory_space<smem>>
    %2 = arith.index_cast %arg0 : i32 to index
    %c1 = arith.constant 1 : index
    %3 = memref.load %arg2[%2, %c1] : memref<2x2xf32, #tpu.memory_space<smem>>
    %c0_0 = arith.constant 0 : index
    %c0_1 = arith.constant 0 : index
    %c0_2 = arith.constant 0 : index
    %4 = vector.load %arg3[%c0_0, %c0_1, %c0_2] : memref<1x1x256xbf16, #tpu.memory_space<vmem>>, vector<1x1x256xbf16>
    %5 = vector.shape_cast %4 : vector<1x1x256xbf16> to vector<1x256xbf16>
    %6 = arith.extf %5 : vector<1x256xbf16> to vector<1x256xf32>
    %7 = vector.broadcast %1 : f32 to vector<1x256xf32>
    %8 = arith.subf %6, %7 : vector<1x256xf32>
    %9 = vector.broadcast %3 : f32 to vector<1x256xf32>
    %10 = arith.mulf %8, %9 : vector<1x256xf32>
    %11 = arith.truncf %10 : vector<1x256xf32> to vector<1x256xbf16>
    %c0_3 = arith.constant 0 : index
    %c0_4 = arith.constant 0 : index
    %12 = vector.load %arg4[%c0_3, %c0_4] : memref<256x128xbf16, #tpu.memory_space<vmem>>, vector<256x128xbf16>
    %cst = arith.constant dense<0.000000e+00> : vector<1x128xf32>
    %13 = tpu.matmul %11, %12, %cst {dimension_numbers = #tpu.dot_dimension_numbers<[1], [0], [0], [1], [0, 0, 1, 1], [], []>} : vector<1x256xbf16>, vector<256x128xbf16>, vector<1x128xf32> -> vector<1x128xf32>
    %c0_5 = arith.constant 0 : index
    %c0_6 = arith.constant 0 : index
    %14 = vector.load %arg5[%c0_5, %c0_6] : memref<1x128xf32, #tpu.memory_space<vmem>>, vector<1x128xf32>
    %15 = arith.addf %13, %14 : vector<1x128xf32>
    %16 = arith.truncf %15 : vector<1x128xf32> to vector<1x128xbf16>
    %c0_7 = arith.constant 0 : index
    %c0_8 = arith.constant 0 : index
    %c0_9 = arith.constant 0 : index
    %17 = vector.load %arg6[%c0_7, %c0_8, %c0_9] : memref<1x1x128xbf16, #tpu.memory_space<vmem>>, vector<1x1x128xbf16>
    %18 = vector.shape_cast %17 : vector<1x1x128xbf16> to vector<1x128xbf16>
    %19 = vector.shape_cast %16 : vector<1x128xbf16> to vector<1x1x128xbf16>
    tpu.vector_store %arg6[%c0_7, %c0_8, %c0_9], %19 {strides = array<i32>} : memref<1x1x128xbf16, #tpu.memory_space<vmem>>, vector<1x1x128xbf16>,
    return
  }
  func.func @transform_0(%arg0: i32, %arg1: i32) -> (i32, i32) {
    %c0_i32 = arith.constant 0 : i32
    %c0_i32_0 = arith.constant 0 : i32
    %c0_i32_1 = arith.constant 0 : i32
    return %c0_i32, %c0_i32_0 : i32, i32
  }
  func.func @transform_1(%arg0: i32, %arg1: i32) -> (i32, i32, i32) {
    %c0_i32 = arith.constant 0 : i32
    %c0_i32_0 = arith.constant 0 : i32
    return %arg0, %arg1, %c0_i32 : i32, i32, i32
  }
  func.func @transform_2(%arg0: i32, %arg1: i32) -> (i32, i32) {
    %c0_i32 = arith.constant 0 : i32
    %c0_i32_0 = arith.constant 0 : i32
    %c0_i32_1 = arith.constant 0 : i32
    return %c0_i32, %c0_i32_0 : i32, i32
  }
  func.func @transform_3(%arg0: i32, %arg1: i32) -> (i32, i32) {
    %c0_i32 = arith.constant 0 : i32
    %c0_i32_0 = arith.constant 0 : i32
    %c0_i32_1 = arith.constant 0 : i32
    return %c0_i32, %c0_i32_0 : i32, i32
  }
  func.func @transform_4(%arg0: i32, %arg1: i32) -> (i32, i32, i32) {
    %c0_i32 = arith.constant 0 : i32
    %c0_i32_0 = arith.constant 0 : i32
    return %arg0, %arg1, %c0_i32 : i32, i32, i32
  }
}

module attributes {stable_mosaic.version = 11 : i64} {
  func.func @_gn_norm_kernel(%arg0: i32, %arg1: i32, %arg2: memref<2x2xf32, #tpu.memory_space<smem>>, %arg3: memref<1x1x128xbf16, #tpu.memory_space<vmem>>, %arg4: memref<1x128xf32, #tpu.memory_space<vmem>>, %arg5: memref<1x128xf32, #tpu.memory_space<vmem>>, %arg6: memref<1x1x128xbf16, #tpu.memory_space<vmem>>) attributes {dimension_semantics = [#tpu.dimension_semantics<parallel>, #tpu.dimension_semantics<parallel>], iteration_bounds = array<i64: 2, 1>, scalar_prefetch = 0 : i64, scratch_operands = 0 : i64, tpu.core_type = #tpu.core_type<tc>, window_params = [{transform_indices = @transform_0, window_bounds = array<i64: 2, 2>}, {transform_indices = @transform_1, window_bounds = array<i64: 1, 1, 128>}, {pipeline_mode = #tpu.pipeline_mode<synchronous>, transform_indices = @transform_2, window_bounds = array<i64: 1, 128>}, {pipeline_mode = #tpu.pipeline_mode<synchronous>, transform_indices = @transform_3, window_bounds = array<i64: 1, 128>}, {transform_indices = @transform_4, window_bounds = array<i64: 1, 1, 128>}]} {
    %0 = arith.index_cast %arg0 : i32 to index
    %c0 = arith.constant 0 : index
    %1 = memref.load %arg2[%0, %c0] : memref<2x2xf32, #tpu.memory_space<smem>>
    %2 = arith.index_cast %arg0 : i32 to index
    %c1 = arith.constant 1 : index
    %3 = memref.load %arg2[%2, %c1] : memref<2x2xf32, #tpu.memory_space<smem>>
    %c0_0 = arith.constant 0 : index
    %c0_1 = arith.constant 0 : index
    %c0_2 = arith.constant 0 : index
    %4 = vector.load %arg3[%c0_0, %c0_1, %c0_2] : memref<1x1x128xbf16, #tpu.memory_space<vmem>>, vector<1x1x128xbf16>
    %5 = vector.shape_cast %4 : vector<1x1x128xbf16> to vector<1x128xbf16>
    %6 = arith.extf %5 : vector<1x128xbf16> to vector<1x128xf32>
    %7 = vector.broadcast %1 : f32 to vector<1x128xf32>
    %8 = arith.subf %6, %7 : vector<1x128xf32>
    %9 = vector.broadcast %3 : f32 to vector<1x128xf32>
    %10 = arith.mulf %8, %9 : vector<1x128xf32>
    %c0_3 = arith.constant 0 : index
    %c0_4 = arith.constant 0 : index
    %11 = vector.load %arg4[%c0_3, %c0_4] : memref<1x128xf32, #tpu.memory_space<vmem>>, vector<1x128xf32>
    %12 = arith.mulf %10, %11 : vector<1x128xf32>
    %c0_5 = arith.constant 0 : index
    %c0_6 = arith.constant 0 : index
    %13 = vector.load %arg5[%c0_5, %c0_6] : memref<1x128xf32, #tpu.memory_space<vmem>>, vector<1x128xf32>
    %14 = arith.addf %12, %13 : vector<1x128xf32>
    %15 = arith.truncf %14 : vector<1x128xf32> to vector<1x128xbf16>
    %c0_7 = arith.constant 0 : index
    %c0_8 = arith.constant 0 : index
    %c0_9 = arith.constant 0 : index
    %16 = vector.load %arg6[%c0_7, %c0_8, %c0_9] : memref<1x1x128xbf16, #tpu.memory_space<vmem>>, vector<1x1x128xbf16>
    %17 = vector.shape_cast %16 : vector<1x1x128xbf16> to vector<1x128xbf16>
    %18 = vector.shape_cast %15 : vector<1x128xbf16> to vector<1x1x128xbf16>
    tpu.vector_store %arg6[%c0_7, %c0_8, %c0_9], %18 {strides = array<i32>} : memref<1x1x128xbf16, #tpu.memory_space<vmem>>, vector<1x1x128xbf16>,
    return
  }
  func.func @transform_0(%arg0: i32, %arg1: i32) -> (i32, i32) {
    %c0_i32 = arith.constant 0 : i32
    %c0_i32_0 = arith.constant 0 : i32
    %c0_i32_1 = arith.constant 0 : i32
    return %c0_i32, %c0_i32_0 : i32, i32
  }
  func.func @transform_1(%arg0: i32, %arg1: i32) -> (i32, i32, i32) {
    %c0_i32 = arith.constant 0 : i32
    %c0_i32_0 = arith.constant 0 : i32
    return %arg0, %arg1, %c0_i32 : i32, i32, i32
  }
  func.func @transform_2(%arg0: i32, %arg1: i32) -> (i32, i32) {
    %c0_i32 = arith.constant 0 : i32
    %c0_i32_0 = arith.constant 0 : i32
    %c0_i32_1 = arith.constant 0 : i32
    return %c0_i32, %c0_i32_0 : i32, i32
  }
  func.func @transform_3(%arg0: i32, %arg1: i32) -> (i32, i32) {
    %c0_i32 = arith.constant 0 : i32
    %c0_i32_0 = arith.constant 0 : i32
    %c0_i32_1 = arith.constant 0 : i32
    return %c0_i32, %c0_i32_0 : i32, i32
  }
  func.func @transform_4(%arg0: i32, %arg1: i32) -> (i32, i32, i32) {
    %c0_i32 = arith.constant 0 : i32
    %c0_i32_0 = arith.constant 0 : i32
    return %arg0, %arg1, %c0_i32 : i32, i32, i32
  }
}

module attributes {stable_mosaic.version = 11 : i64} {
  func.func @_mm_kernel(%arg0: i32, %arg1: memref<2x32xbf16, #tpu.memory_space<vmem>>, %arg2: memref<32x32xbf16, #tpu.memory_space<vmem>>, %arg3: memref<1x32xf32, #tpu.memory_space<vmem>>, %arg4: memref<2x32xbf16, #tpu.memory_space<vmem>>) attributes {dimension_semantics = [#tpu.dimension_semantics<parallel>], iteration_bounds = array<i64: 1>, scalar_prefetch = 0 : i64, scratch_operands = 0 : i64, tpu.core_type = #tpu.core_type<tc>, window_params = [{transform_indices = @transform_0, window_bounds = array<i64: 2, 32>}, {pipeline_mode = #tpu.pipeline_mode<synchronous>, transform_indices = @transform_1, window_bounds = array<i64: 32, 32>}, {pipeline_mode = #tpu.pipeline_mode<synchronous>, transform_indices = @transform_2, window_bounds = array<i64: 1, 32>}, {transform_indices = @transform_3, window_bounds = array<i64: 2, 32>}]} {
    %c0 = arith.constant 0 : index
    %c0_0 = arith.constant 0 : index
    %0 = vector.load %arg1[%c0, %c0_0] : memref<2x32xbf16, #tpu.memory_space<vmem>>, vector<2x32xbf16>
    %c0_1 = arith.constant 0 : index
    %c0_2 = arith.constant 0 : index
    %1 = vector.load %arg2[%c0_1, %c0_2] : memref<32x32xbf16, #tpu.memory_space<vmem>>, vector<32x32xbf16>
    %cst = arith.constant dense<0.000000e+00> : vector<2x32xf32>
    %2 = tpu.matmul %0, %1, %cst {dimension_numbers = #tpu.dot_dimension_numbers<[1], [0], [0], [1], [0, 0, 1, 1], [], []>} : vector<2x32xbf16>, vector<32x32xbf16>, vector<2x32xf32> -> vector<2x32xf32>
    %c0_3 = arith.constant 0 : index
    %c0_4 = arith.constant 0 : index
    %3 = vector.load %arg3[%c0_3, %c0_4] : memref<1x32xf32, #tpu.memory_space<vmem>>, vector<1x32xf32>
    %4 = vector.broadcast %3 : vector<1x32xf32> to vector<2x32xf32>
    %5 = arith.addf %2, %4 : vector<2x32xf32>
    %6 = arith.truncf %5 : vector<2x32xf32> to vector<2x32xbf16>
    %c0_5 = arith.constant 0 : index
    %c0_6 = arith.constant 0 : index
    %7 = vector.load %arg4[%c0_5, %c0_6] : memref<2x32xbf16, #tpu.memory_space<vmem>>, vector<2x32xbf16>
    tpu.vector_store %arg4[%c0_5, %c0_6], %6 {strides = array<i32>} : memref<2x32xbf16, #tpu.memory_space<vmem>>, vector<2x32xbf16>,
    return
  }
  func.func @transform_0(%arg0: i32) -> (i32, i32) {
    %c0_i32 = arith.constant 0 : i32
    %c0_i32_0 = arith.constant 0 : i32
    return %arg0, %c0_i32 : i32, i32
  }
  func.func @transform_1(%arg0: i32) -> (i32, i32) {
    %c0_i32 = arith.constant 0 : i32
    %c0_i32_0 = arith.constant 0 : i32
    %c0_i32_1 = arith.constant 0 : i32
    return %c0_i32, %c0_i32_0 : i32, i32
  }
  func.func @transform_2(%arg0: i32) -> (i32, i32) {
    %c0_i32 = arith.constant 0 : i32
    %c0_i32_0 = arith.constant 0 : i32
    %c0_i32_1 = arith.constant 0 : i32
    return %c0_i32, %c0_i32_0 : i32, i32
  }
  func.func @transform_3(%arg0: i32) -> (i32, i32) {
    %c0_i32 = arith.constant 0 : i32
    %c0_i32_0 = arith.constant 0 : i32
    return %arg0, %c0_i32 : i32, i32
  }
}

module attributes {stable_mosaic.version = 11 : i64} {
  func.func @_mm_kernel(%arg0: i32, %arg1: memref<2x48xbf16, #tpu.memory_space<vmem>>, %arg2: memref<48x48xbf16, #tpu.memory_space<vmem>>, %arg3: memref<1x48xf32, #tpu.memory_space<vmem>>, %arg4: memref<2x48xbf16, #tpu.memory_space<vmem>>) attributes {dimension_semantics = [#tpu.dimension_semantics<parallel>], iteration_bounds = array<i64: 1>, scalar_prefetch = 0 : i64, scratch_operands = 0 : i64, tpu.core_type = #tpu.core_type<tc>, window_params = [{transform_indices = @transform_0, window_bounds = array<i64: 2, 48>}, {pipeline_mode = #tpu.pipeline_mode<synchronous>, transform_indices = @transform_1, window_bounds = array<i64: 48, 48>}, {pipeline_mode = #tpu.pipeline_mode<synchronous>, transform_indices = @transform_2, window_bounds = array<i64: 1, 48>}, {transform_indices = @transform_3, window_bounds = array<i64: 2, 48>}]} {
    %c0 = arith.constant 0 : index
    %c0_0 = arith.constant 0 : index
    %0 = vector.load %arg1[%c0, %c0_0] : memref<2x48xbf16, #tpu.memory_space<vmem>>, vector<2x48xbf16>
    %c0_1 = arith.constant 0 : index
    %c0_2 = arith.constant 0 : index
    %1 = vector.load %arg2[%c0_1, %c0_2] : memref<48x48xbf16, #tpu.memory_space<vmem>>, vector<48x48xbf16>
    %cst = arith.constant dense<0.000000e+00> : vector<2x48xf32>
    %2 = tpu.matmul %0, %1, %cst {dimension_numbers = #tpu.dot_dimension_numbers<[1], [0], [0], [1], [0, 0, 1, 1], [], []>} : vector<2x48xbf16>, vector<48x48xbf16>, vector<2x48xf32> -> vector<2x48xf32>
    %c0_3 = arith.constant 0 : index
    %c0_4 = arith.constant 0 : index
    %3 = vector.load %arg3[%c0_3, %c0_4] : memref<1x48xf32, #tpu.memory_space<vmem>>, vector<1x48xf32>
    %4 = vector.broadcast %3 : vector<1x48xf32> to vector<2x48xf32>
    %5 = arith.addf %2, %4 : vector<2x48xf32>
    %6 = arith.truncf %5 : vector<2x48xf32> to vector<2x48xbf16>
    %c0_5 = arith.constant 0 : index
    %c0_6 = arith.constant 0 : index
    %7 = vector.load %arg4[%c0_5, %c0_6] : memref<2x48xbf16, #tpu.memory_space<vmem>>, vector<2x48xbf16>
    tpu.vector_store %arg4[%c0_5, %c0_6], %6 {strides = array<i32>} : memref<2x48xbf16, #tpu.memory_space<vmem>>, vector<2x48xbf16>,
    return
  }
  func.func @transform_0(%arg0: i32) -> (i32, i32) {
    %c0_i32 = arith.constant 0 : i32
    %c0_i32_0 = arith.constant 0 : i32
    return %arg0, %c0_i32 : i32, i32
  }
  func.func @transform_1(%arg0: i32) -> (i32, i32) {
    %c0_i32 = arith.constant 0 : i32
    %c0_i32_0 = arith.constant 0 : i32
    %c0_i32_1 = arith.constant 0 : i32
    return %c0_i32, %c0_i32_0 : i32, i32
  }
  func.func @transform_2(%arg0: i32) -> (i32, i32) {
    %c0_i32 = arith.constant 0 : i32
    %c0_i32_0 = arith.constant 0 : i32
    %c0_i32_1 = arith.constant 0 : i32
    return %c0_i32, %c0_i32_0 : i32, i32
  }
  func.func @transform_3(%arg0: i32) -> (i32, i32) {
    %c0_i32 = arith.constant 0 : i32
    %c0_i32_0 = arith.constant 0 : i32
    return %arg0, %c0_i32 : i32, i32
  }
}

module attributes {stable_mosaic.version = 11 : i64} {
  func.func @_mm_kernel(%arg0: i32, %arg1: memref<2x56xbf16, #tpu.memory_space<vmem>>, %arg2: memref<56x56xbf16, #tpu.memory_space<vmem>>, %arg3: memref<1x56xf32, #tpu.memory_space<vmem>>, %arg4: memref<2x56xbf16, #tpu.memory_space<vmem>>) attributes {dimension_semantics = [#tpu.dimension_semantics<parallel>], iteration_bounds = array<i64: 1>, scalar_prefetch = 0 : i64, scratch_operands = 0 : i64, tpu.core_type = #tpu.core_type<tc>, window_params = [{transform_indices = @transform_0, window_bounds = array<i64: 2, 56>}, {pipeline_mode = #tpu.pipeline_mode<synchronous>, transform_indices = @transform_1, window_bounds = array<i64: 56, 56>}, {pipeline_mode = #tpu.pipeline_mode<synchronous>, transform_indices = @transform_2, window_bounds = array<i64: 1, 56>}, {transform_indices = @transform_3, window_bounds = array<i64: 2, 56>}]} {
    %c0 = arith.constant 0 : index
    %c0_0 = arith.constant 0 : index
    %0 = vector.load %arg1[%c0, %c0_0] : memref<2x56xbf16, #tpu.memory_space<vmem>>, vector<2x56xbf16>
    %c0_1 = arith.constant 0 : index
    %c0_2 = arith.constant 0 : index
    %1 = vector.load %arg2[%c0_1, %c0_2] : memref<56x56xbf16, #tpu.memory_space<vmem>>, vector<56x56xbf16>
    %cst = arith.constant dense<0.000000e+00> : vector<2x56xf32>
    %2 = tpu.matmul %0, %1, %cst {dimension_numbers = #tpu.dot_dimension_numbers<[1], [0], [0], [1], [0, 0, 1, 1], [], []>} : vector<2x56xbf16>, vector<56x56xbf16>, vector<2x56xf32> -> vector<2x56xf32>
    %c0_3 = arith.constant 0 : index
    %c0_4 = arith.constant 0 : index
    %3 = vector.load %arg3[%c0_3, %c0_4] : memref<1x56xf32, #tpu.memory_space<vmem>>, vector<1x56xf32>
    %4 = vector.broadcast %3 : vector<1x56xf32> to vector<2x56xf32>
    %5 = arith.addf %2, %4 : vector<2x56xf32>
    %6 = arith.truncf %5 : vector<2x56xf32> to vector<2x56xbf16>
    %c0_5 = arith.constant 0 : index
    %c0_6 = arith.constant 0 : index
    %7 = vector.load %arg4[%c0_5, %c0_6] : memref<2x56xbf16, #tpu.memory_space<vmem>>, vector<2x56xbf16>
    tpu.vector_store %arg4[%c0_5, %c0_6], %6 {strides = array<i32>} : memref<2x56xbf16, #tpu.memory_space<vmem>>, vector<2x56xbf16>,
    return
  }
  func.func @transform_0(%arg0: i32) -> (i32, i32) {
    %c0_i32 = arith.constant 0 : i32
    %c0_i32_0 = arith.constant 0 : i32
    return %arg0, %c0_i32 : i32, i32
  }
  func.func @transform_1(%arg0: i32) -> (i32, i32) {
    %c0_i32 = arith.constant 0 : i32
    %c0_i32_0 = arith.constant 0 : i32
    %c0_i32_1 = arith.constant 0 : i32
    return %c0_i32, %c0_i32_0 : i32, i32
  }
  func.func @transform_2(%arg0: i32) -> (i32, i32) {
    %c0_i32 = arith.constant 0 : i32
    %c0_i32_0 = arith.constant 0 : i32
    %c0_i32_1 = arith.constant 0 : i32
    return %c0_i32, %c0_i32_0 : i32, i32
  }
  func.func @transform_3(%arg0: i32) -> (i32, i32) {
    %c0_i32 = arith.constant 0 : i32
    %c0_i32_0 = arith.constant 0 : i32
    return %arg0, %c0_i32 : i32, i32
  }
}

module attributes {stable_mosaic.version = 11 : i64} {
  func.func @_gn_mm_kernel(%arg0: i32, %arg1: i32, %arg2: memref<2x2xf32, #tpu.memory_space<smem>>, %arg3: memref<1x1x128xbf16, #tpu.memory_space<vmem>>, %arg4: memref<128x128xbf16, #tpu.memory_space<vmem>>, %arg5: memref<1x128xf32, #tpu.memory_space<vmem>>, %arg6: memref<1x1x128xbf16, #tpu.memory_space<vmem>>, %arg7: memref<1x1x128xbf16, #tpu.memory_space<vmem>>) attributes {dimension_semantics = [#tpu.dimension_semantics<parallel>, #tpu.dimension_semantics<parallel>], iteration_bounds = array<i64: 2, 1>, scalar_prefetch = 0 : i64, scratch_operands = 0 : i64, tpu.core_type = #tpu.core_type<tc>, window_params = [{transform_indices = @transform_0, window_bounds = array<i64: 2, 2>}, {transform_indices = @transform_1, window_bounds = array<i64: 1, 1, 128>}, {pipeline_mode = #tpu.pipeline_mode<synchronous>, transform_indices = @transform_2, window_bounds = array<i64: 128, 128>}, {pipeline_mode = #tpu.pipeline_mode<synchronous>, transform_indices = @transform_3, window_bounds = array<i64: 1, 128>}, {transform_indices = @transform_4, window_bounds = array<i64: 1, 1, 128>}, {transform_indices = @transform_5, window_bounds = array<i64: 1, 1, 128>}]} {
    %0 = arith.index_cast %arg0 : i32 to index
    %c0 = arith.constant 0 : index
    %1 = memref.load %arg2[%0, %c0] : memref<2x2xf32, #tpu.memory_space<smem>>
    %2 = arith.index_cast %arg0 : i32 to index
    %c1 = arith.constant 1 : index
    %3 = memref.load %arg2[%2, %c1] : memref<2x2xf32, #tpu.memory_space<smem>>
    %c0_0 = arith.constant 0 : index
    %c0_1 = arith.constant 0 : index
    %c0_2 = arith.constant 0 : index
    %4 = vector.load %arg3[%c0_0, %c0_1, %c0_2] : memref<1x1x128xbf16, #tpu.memory_space<vmem>>, vector<1x1x128xbf16>
    %5 = vector.shape_cast %4 : vector<1x1x128xbf16> to vector<1x128xbf16>
    %6 = arith.extf %5 : vector<1x128xbf16> to vector<1x128xf32>
    %7 = vector.broadcast %1 : f32 to vector<1x128xf32>
    %8 = arith.subf %6, %7 : vector<1x128xf32>
    %9 = vector.broadcast %3 : f32 to vector<1x128xf32>
    %10 = arith.mulf %8, %9 : vector<1x128xf32>
    %11 = arith.truncf %10 : vector<1x128xf32> to vector<1x128xbf16>
    %c0_3 = arith.constant 0 : index
    %c0_4 = arith.constant 0 : index
    %12 = vector.load %arg4[%c0_3, %c0_4] : memref<128x128xbf16, #tpu.memory_space<vmem>>, vector<128x128xbf16>
    %cst = arith.constant dense<0.000000e+00> : vector<1x128xf32>
    %13 = tpu.matmul %11, %12, %cst {dimension_numbers = #tpu.dot_dimension_numbers<[1], [0], [0], [1], [0, 0, 1, 1], [], []>} : vector<1x128xbf16>, vector<128x128xbf16>, vector<1x128xf32> -> vector<1x128xf32>
    %c0_5 = arith.constant 0 : index
    %c0_6 = arith.constant 0 : index
    %14 = vector.load %arg5[%c0_5, %c0_6] : memref<1x128xf32, #tpu.memory_space<vmem>>, vector<1x128xf32>
    %15 = arith.addf %13, %14 : vector<1x128xf32>
    %c0_7 = arith.constant 0 : index
    %c0_8 = arith.constant 0 : index
    %c0_9 = arith.constant 0 : index
    %16 = vector.load %arg6[%c0_7, %c0_8, %c0_9] : memref<1x1x128xbf16, #tpu.memory_space<vmem>>, vector<1x1x128xbf16>
    %17 = vector.shape_cast %16 : vector<1x1x128xbf16> to vector<1x128xbf16>
    %18 = arith.extf %17 : vector<1x128xbf16> to vector<1x128xf32>
    %19 = arith.addf %15, %18 : vector<1x128xf32>
    %20 = arith.truncf %19 : vector<1x128xf32> to vector<1x128xbf16>
    %c0_10 = arith.constant 0 : index
    %c0_11 = arith.constant 0 : index
    %c0_12 = arith.constant 0 : index
    %21 = vector.load %arg7[%c0_10, %c0_11, %c0_12] : memref<1x1x128xbf16, #tpu.memory_space<vmem>>, vector<1x1x128xbf16>
    %22 = vector.shape_cast %21 : vector<1x1x128xbf16> to vector<1x128xbf16>
    %23 = vector.shape_cast %20 : vector<1x128xbf16> to vector<1x1x128xbf16>
    tpu.vector_store %arg7[%c0_10, %c0_11, %c0_12], %23 {strides = array<i32>} : memref<1x1x128xbf16, #tpu.memory_space<vmem>>, vector<1x1x128xbf16>,
    return
  }
  func.func @transform_0(%arg0: i32, %arg1: i32) -> (i32, i32) {
    %c0_i32 = arith.constant 0 : i32
    %c0_i32_0 = arith.constant 0 : i32
    %c0_i32_1 = arith.constant 0 : i32
    return %c0_i32, %c0_i32_0 : i32, i32
  }
  func.func @transform_1(%arg0: i32, %arg1: i32) -> (i32, i32, i32) {
    %c0_i32 = arith.constant 0 : i32
    %c0_i32_0 = arith.constant 0 : i32
    return %arg0, %arg1, %c0_i32 : i32, i32, i32
  }
  func.func @transform_2(%arg0: i32, %arg1: i32) -> (i32, i32) {
    %c0_i32 = arith.constant 0 : i32
    %c0_i32_0 = arith.constant 0 : i32
    %c0_i32_1 = arith.constant 0 : i32
    return %c0_i32, %c0_i32_0 : i32, i32
  }
  func.func @transform_3(%arg0: i32, %arg1: i32) -> (i32, i32) {
    %c0_i32 = arith.constant 0 : i32
    %c0_i32_0 = arith.constant 0 : i32
    %c0_i32_1 = arith.constant 0 : i32
    return %c0_i32, %c0_i32_0 : i32, i32
  }
  func.func @transform_4(%arg0: i32, %arg1: i32) -> (i32, i32, i32) {
    %c0_i32 = arith.constant 0 : i32
    %c0_i32_0 = arith.constant 0 : i32
    return %arg0, %arg1, %c0_i32 : i32, i32, i32
  }
  func.func @transform_5(%arg0: i32, %arg1: i32) -> (i32, i32, i32) {
    %c0_i32 = arith.constant 0 : i32
    %c0_i32_0 = arith.constant 0 : i32
    return %arg0, %arg1, %c0_i32 : i32, i32, i32
  }
}

module attributes {stable_mosaic.version = 11 : i64} {
  func.func @_gn_mm_kernel(%arg0: i32, %arg1: i32, %arg2: memref<2x2xf32, #tpu.memory_space<smem>>, %arg3: memref<1x1x128xbf16, #tpu.memory_space<vmem>>, %arg4: memref<128x512xbf16, #tpu.memory_space<vmem>>, %arg5: memref<1x512xf32, #tpu.memory_space<vmem>>, %arg6: memref<1x1x512xbf16, #tpu.memory_space<vmem>>) attributes {dimension_semantics = [#tpu.dimension_semantics<parallel>, #tpu.dimension_semantics<parallel>], iteration_bounds = array<i64: 2, 1>, scalar_prefetch = 0 : i64, scratch_operands = 0 : i64, tpu.core_type = #tpu.core_type<tc>, window_params = [{transform_indices = @transform_0, window_bounds = array<i64: 2, 2>}, {transform_indices = @transform_1, window_bounds = array<i64: 1, 1, 128>}, {pipeline_mode = #tpu.pipeline_mode<synchronous>, transform_indices = @transform_2, window_bounds = array<i64: 128, 512>}, {pipeline_mode = #tpu.pipeline_mode<synchronous>, transform_indices = @transform_3, window_bounds = array<i64: 1, 512>}, {transform_indices = @transform_4, window_bounds = array<i64: 1, 1, 512>}]} {
    %0 = arith.index_cast %arg0 : i32 to index
    %c0 = arith.constant 0 : index
    %1 = memref.load %arg2[%0, %c0] : memref<2x2xf32, #tpu.memory_space<smem>>
    %2 = arith.index_cast %arg0 : i32 to index
    %c1 = arith.constant 1 : index
    %3 = memref.load %arg2[%2, %c1] : memref<2x2xf32, #tpu.memory_space<smem>>
    %c0_0 = arith.constant 0 : index
    %c0_1 = arith.constant 0 : index
    %c0_2 = arith.constant 0 : index
    %4 = vector.load %arg3[%c0_0, %c0_1, %c0_2] : memref<1x1x128xbf16, #tpu.memory_space<vmem>>, vector<1x1x128xbf16>
    %5 = vector.shape_cast %4 : vector<1x1x128xbf16> to vector<1x128xbf16>
    %6 = arith.extf %5 : vector<1x128xbf16> to vector<1x128xf32>
    %7 = vector.broadcast %1 : f32 to vector<1x128xf32>
    %8 = arith.subf %6, %7 : vector<1x128xf32>
    %9 = vector.broadcast %3 : f32 to vector<1x128xf32>
    %10 = arith.mulf %8, %9 : vector<1x128xf32>
    %11 = arith.truncf %10 : vector<1x128xf32> to vector<1x128xbf16>
    %c0_3 = arith.constant 0 : index
    %c0_4 = arith.constant 0 : index
    %12 = vector.load %arg4[%c0_3, %c0_4] : memref<128x512xbf16, #tpu.memory_space<vmem>>, vector<128x512xbf16>
    %cst = arith.constant dense<0.000000e+00> : vector<1x512xf32>
    %13 = tpu.matmul %11, %12, %cst {dimension_numbers = #tpu.dot_dimension_numbers<[1], [0], [0], [1], [0, 0, 1, 1], [], []>} : vector<1x128xbf16>, vector<128x512xbf16>, vector<1x512xf32> -> vector<1x512xf32>
    %c0_5 = arith.constant 0 : index
    %c0_6 = arith.constant 0 : index
    %14 = vector.load %arg5[%c0_5, %c0_6] : memref<1x512xf32, #tpu.memory_space<vmem>>, vector<1x512xf32>
    %15 = arith.addf %13, %14 : vector<1x512xf32>
    %cst_7 = arith.constant 5.000000e-01 : f32
    %16 = vector.broadcast %cst_7 : f32 to vector<1x512xf32>
    %17 = arith.mulf %16, %15 : vector<1x512xf32>
    %cst_8 = arith.constant 4.471500e-02 : f32
    %18 = vector.broadcast %cst_8 : f32 to vector<1x512xf32>
    %19 = arith.mulf %18, %15 : vector<1x512xf32>
    %20 = arith.mulf %19, %15 : vector<1x512xf32>
    %21 = arith.mulf %20, %15 : vector<1x512xf32>
    %22 = arith.addf %15, %21 : vector<1x512xf32>
    %cst_9 = arith.constant 0.797884583 : f32
    %23 = vector.broadcast %cst_9 : f32 to vector<1x512xf32>
    %24 = arith.mulf %23, %22 : vector<1x512xf32>
    %25 = math.tanh %24 : vector<1x512xf32>
    %cst_10 = arith.constant 1.000000e+00 : f32
    %26 = vector.broadcast %cst_10 : f32 to vector<1x512xf32>
    %27 = arith.addf %26, %25 : vector<1x512xf32>
    %28 = arith.mulf %17, %27 : vector<1x512xf32>
    %29 = arith.truncf %28 : vector<1x512xf32> to vector<1x512xbf16>
    %c0_11 = arith.constant 0 : index
    %c0_12 = arith.constant 0 : index
    %c0_13 = arith.constant 0 : index
    %30 = vector.load %arg6[%c0_11, %c0_12, %c0_13] : memref<1x1x512xbf16, #tpu.memory_space<vmem>>, vector<1x1x512xbf16>
    %31 = vector.shape_cast %30 : vector<1x1x512xbf16> to vector<1x512xbf16>
    %32 = vector.shape_cast %29 : vector<1x512xbf16> to vector<1x1x512xbf16>
    tpu.vector_store %arg6[%c0_11, %c0_12, %c0_13], %32 {strides = array<i32>} : memref<1x1x512xbf16, #tpu.memory_space<vmem>>, vector<1x1x512xbf16>,
    return
  }
  func.func @transform_0(%arg0: i32, %arg1: i32) -> (i32, i32) {
    %c0_i32 = arith.constant 0 : i32
    %c0_i32_0 = arith.constant 0 : i32
    %c0_i32_1 = arith.constant 0 : i32
    return %c0_i32, %c0_i32_0 : i32, i32
  }
  func.func @transform_1(%arg0: i32, %arg1: i32) -> (i32, i32, i32) {
    %c0_i32 = arith.constant 0 : i32
    %c0_i32_0 = arith.constant 0 : i32
    return %arg0, %arg1, %c0_i32 : i32, i32, i32
  }
  func.func @transform_2(%arg0: i32, %arg1: i32) -> (i32, i32) {
    %c0_i32 = arith.constant 0 : i32
    %c0_i32_0 = arith.constant 0 : i32
    %c0_i32_1 = arith.constant 0 : i32
    return %c0_i32, %c0_i32_0 : i32, i32
  }
  func.func @transform_3(%arg0: i32, %arg1: i32) -> (i32, i32) {
    %c0_i32 = arith.constant 0 : i32
    %c0_i32_0 = arith.constant 0 : i32
    %c0_i32_1 = arith.constant 0 : i32
    return %c0_i32, %c0_i32_0 : i32, i32
  }
  func.func @transform_4(%arg0: i32, %arg1: i32) -> (i32, i32, i32) {
    %c0_i32 = arith.constant 0 : i32
    %c0_i32_0 = arith.constant 0 : i32
    return %arg0, %arg1, %c0_i32 : i32, i32, i32
  }
}

module attributes {stable_mosaic.version = 11 : i64} {
  func.func @_mm_kernel(%arg0: i32, %arg1: memref<2x512xbf16, #tpu.memory_space<vmem>>, %arg2: memref<512x128xbf16, #tpu.memory_space<vmem>>, %arg3: memref<1x128xf32, #tpu.memory_space<vmem>>, %arg4: memref<2x128xbf16, #tpu.memory_space<vmem>>, %arg5: memref<2x128xbf16, #tpu.memory_space<vmem>>) attributes {dimension_semantics = [#tpu.dimension_semantics<parallel>], iteration_bounds = array<i64: 1>, scalar_prefetch = 0 : i64, scratch_operands = 0 : i64, tpu.core_type = #tpu.core_type<tc>, window_params = [{transform_indices = @transform_0, window_bounds = array<i64: 2, 512>}, {pipeline_mode = #tpu.pipeline_mode<synchronous>, transform_indices = @transform_1, window_bounds = array<i64: 512, 128>}, {pipeline_mode = #tpu.pipeline_mode<synchronous>, transform_indices = @transform_2, window_bounds = array<i64: 1, 128>}, {transform_indices = @transform_3, window_bounds = array<i64: 2, 128>}, {transform_indices = @transform_4, window_bounds = array<i64: 2, 128>}]} {
    %c0 = arith.constant 0 : index
    %c0_0 = arith.constant 0 : index
    %0 = vector.load %arg1[%c0, %c0_0] : memref<2x512xbf16, #tpu.memory_space<vmem>>, vector<2x512xbf16>
    %c0_1 = arith.constant 0 : index
    %c0_2 = arith.constant 0 : index
    %1 = vector.load %arg2[%c0_1, %c0_2] : memref<512x128xbf16, #tpu.memory_space<vmem>>, vector<512x128xbf16>
    %cst = arith.constant dense<0.000000e+00> : vector<2x128xf32>
    %2 = tpu.matmul %0, %1, %cst {dimension_numbers = #tpu.dot_dimension_numbers<[1], [0], [0], [1], [0, 0, 1, 1], [], []>} : vector<2x512xbf16>, vector<512x128xbf16>, vector<2x128xf32> -> vector<2x128xf32>
    %c0_3 = arith.constant 0 : index
    %c0_4 = arith.constant 0 : index
    %3 = vector.load %arg3[%c0_3, %c0_4] : memref<1x128xf32, #tpu.memory_space<vmem>>, vector<1x128xf32>
    %4 = vector.broadcast %3 : vector<1x128xf32> to vector<2x128xf32>
    %5 = arith.addf %2, %4 : vector<2x128xf32>
    %c0_5 = arith.constant 0 : index
    %c0_6 = arith.constant 0 : index
    %6 = vector.load %arg4[%c0_5, %c0_6] : memref<2x128xbf16, #tpu.memory_space<vmem>>, vector<2x128xbf16>
    %7 = arith.extf %6 : vector<2x128xbf16> to vector<2x128xf32>
    %8 = arith.addf %5, %7 : vector<2x128xf32>
    %9 = arith.truncf %8 : vector<2x128xf32> to vector<2x128xbf16>
    %c0_7 = arith.constant 0 : index
    %c0_8 = arith.constant 0 : index
    %10 = vector.load %arg5[%c0_7, %c0_8] : memref<2x128xbf16, #tpu.memory_space<vmem>>, vector<2x128xbf16>
    tpu.vector_store %arg5[%c0_7, %c0_8], %9 {strides = array<i32>} : memref<2x128xbf16, #tpu.memory_space<vmem>>, vector<2x128xbf16>,
    return
  }
  func.func @transform_0(%arg0: i32) -> (i32, i32) {
    %c0_i32 = arith.constant 0 : i32
    %c0_i32_0 = arith.constant 0 : i32
    return %arg0, %c0_i32 : i32, i32
  }
  func.func @transform_1(%arg0: i32) -> (i32, i32) {
    %c0_i32 = arith.constant 0 : i32
    %c0_i32_0 = arith.constant 0 : i32
    %c0_i32_1 = arith.constant 0 : i32
    return %c0_i32, %c0_i32_0 : i32, i32
  }
  func.func @transform_2(%arg0: i32) -> (i32, i32) {
    %c0_i32 = arith.constant 0 : i32
    %c0_i32_0 = arith.constant 0 : i32
    %c0_i32_1 = arith.constant 0 : i32
    return %c0_i32, %c0_i32_0 : i32, i32
  }
  func.func @transform_3(%arg0: i32) -> (i32, i32) {
    %c0_i32 = arith.constant 0 : i32
    %c0_i32_0 = arith.constant 0 : i32
    return %arg0, %c0_i32 : i32, i32
  }
  func.func @transform_4(%arg0: i32) -> (i32, i32) {
    %c0_i32 = arith.constant 0 : i32
    %c0_i32_0 = arith.constant 0 : i32
    return %arg0, %c0_i32 : i32, i32
  }
}

</mosaic_0001>

<bundles_post_ra>
// kernel: as_mlp_forward.52
= control target key start
LH: loop header
LB: loop body
LE: loop exit
PB: predicated region body
PF: predicated region fallthrough
CT: control target
= control target key end

     0   :  { %s1157_s12 = smov 0   ;;  %s1361_s0 = inlined_call_operand.vmem [shape: bf16[512,147], index: 0, kind: input, shape index: {}]   ;;  %s1362_s1 = inlined_call_operand.vmem [shape: bf16[147,96], index: 1, kind: input, shape index: {}]   ;;  %s1363_s2 = inlined_call_operand.vmem [shape: f32[1,96], index: 2, kind: input, shape index: {}]   ;;  %s1364_s3 = inlined_call_operand.vmem [shape: bf16[512,96], index: 3, kind: output, shape index: {}]  }
   0x1 LB: > { %s903_s13 = sadd.s32 4294967295, %s1133_s12   ;;  %p907_p0 = scmp.ge.s32.totalorder %s1133_s12, 1  ;;  %s1133_s12 = sphi %s1157_s12, %s13_s12  }
   0x2   : > { %p139_p1 = scmp.lt.s32.totalorder %s1133_s12, 3 }
   0x4   : > { %p140_p2 = pnand %p907_p0, %p139_p1 }
   0x5   : > { %v1069_v0 = vld [vmem:[%s1362_s1] sm:$0xff] (!%p140_p2)   ;;  %v1135_v1 = vmov (!%p140_p2), 0   ;;  %v1070_v2 = vld [vmem:[%s1362_s1 + $0x8] sm:$0xff] (!%p140_p2)   ;;  %v1071_v3 = vld [vmem:[%s1362_s1 + $0x10] sm:$0xff] (!%p140_p2)   ;;  %s908_s20 = sshll.u32 (!%p140_p2), %s903_s13, 5  ;;  %vm437_vm0 = vcmask (!%p140_p2), 154624  }
   0x6   : > { %143 = sbr.rel (%p140_p2) target bundleno = 323 (0x143), region = 32  ;;  %493 = vmatprep.subr.bf16.mxu0 (!%p140_p2), %v1135_v1  ;;  %1039 = vmatprep.subr.bf16.mxu1 (!%p140_p2), %v1135_v1  ;;  %p165_p3 = scmp.lt.s32.totalorder (!%p140_p2), %s908_s20, 63  ;;  %v1072_v4 = vld [vmem:[%s1362_s1 + $0x18] sm:$0xff] (!%p140_p2)   ;;  %v1073_v5 = vld [vmem:[%s1362_s1 + $0x20] sm:$0xff] (!%p140_p2)   ;;  %v1074_v8 = vld [vmem:[%s1362_s1 + $0x28] sm:$0xff] (!%p140_p2)   ;;  %vm486_vm1 = vcmask (!%p140_p2), 1040384  }
   0x7   : > { %494 = vmatpush1.bf16.msra.mxu0 (!%p140_p2), %v1069_v0  ;;  %1049 = vmatpush1.bf16.msra.mxu1 (!%p140_p2), %v1069_v0  ;;  %v1075_v9 = vld [vmem:[%s1362_s1 + $0x30] sm:$0xff] (!%p140_p2)   ;;  %v1076_v10 = vld [vmem:[%s1362_s1 + $0x38] sm:$0xff] (!%p140_p2)   ;;  %vm487_vm2 = vcmask (!%p140_p2), 1041408   ;;  %v1136_v11 = vmov (!%p140_p2), 65535   ;;  %v1077_v13 = vld [vmem:[%s1362_s1 + $0x40] sm:$0xff] (!%p140_p2)   ;;  %vm814_vm3 = vcmask (!%p140_p2), 781312  }
   0x8   : > { %495 = vmatprep.subr.bf16.mxu0 (!%p140_p2), %v1135_v1  ;;  %1040 = vmatprep.subr.bf16.mxu1 (!%p140_p2), %v1135_v1  ;;  %v488_v12 = vsel (!%p140_p2), %vm486_vm1, 4294967295, %v1136_v11  ;;  %v1078_v14 = vld [vmem:[%s1362_s1 + $0x48] ss:$0 sps:$4 sm:$0x33] (!%p140_p2)   ;;  %v1254_v47 = vld [vmem:[%s1363_s2] ss:$0 sm:$0xff] (!%p140_p2) }
   0x9   : > { %v489_v15 = vsel (!%p140_p2), %vm487_vm2, %v488_v12, 0 }
   0xa   : > { %v491_v16 = vand.u32 (!%p140_p2), %v1078_v14, %v489_v15 }
   0xb   : > { %496 = vmatpush1.bf16.msra.mxu0 (!%p140_p2), %v1070_v2  ;;  %1050 = vmatpush1.bf16.msra.mxu1 (!%p140_p2), %v1070_v2 }
   0xc   : > { %497 = vmatprep.subr.bf16.mxu0 (!%p140_p2), %v1135_v1  ;;  %1041 = vmatprep.subr.bf16.mxu1 (!%p140_p2), %v1135_v1 }
   0xd   : > { %s1366_s20 = smov (!%p165_p3, %s908_s20), 63 }
   0xe   : > { %s1006_s23 = sshll.u32 %s1366_s20, 3  ;;  %s912_s15 = sshll.u32 %s1366_s20, 2 }
   0xf   : > { %498 = vmatpush1.bf16.msra.mxu0 %v1071_v3  ;;  %1051 = vmatpush1.bf16.msra.mxu1 %v1071_v3  ;;  %s1183_s26 = scalar_lea.vmem %s1361_s0, %s1006_s23  ;;  %s1264_s18 = scalar_lea.vmem %s1364_s3, %s912_s15 }
  0x10   : > { %499 = vmatprep.subr.bf16.mxu0 %v1135_v1  ;;  %1042 = vmatprep.subr.bf16.mxu1 %v1135_v1  ;;  %v1081_v6 = vld [vmem:[%s1183_s26 + $0x4] ss:$8 sps:$4 sm:$0xff]   ;;  %v1079_v17 = vld [vmem:[%s1183_s26] ss:$8 sps:$4 sm:$0xff]   ;;  %v1085_v19 = vld [vmem:[%s1183_s26 + $0x14] ss:$8 sps:$4 sm:$0xff]  }
  0x11   : > { %v1084_v7 = vld [vmem:[%s1183_s26 + $0x84] ss:$8 sps:$4 sm:$0xff]   ;;  %956 = vmatprep.mubr.msk.bf16.mxu0 %vm437_vm0, %v1081_v6  ;;  %v1082_v18 = vld [vmem:[%s1183_s26 + $0x80] ss:$8 sps:$4 sm:$0xff]   ;;  %v1087_v20 = vld [vmem:[%s1183_s26 + $0x94] ss:$8 sps:$4 sm:$0xff]  }
  0x12   : > { %964 = vmatprep.mubr.msk.bf16.mxu1 %vm437_vm0, %v1084_v7  ;;  %v1089_v21 = vld [vmem:[%s1183_s26 + $0x10] ss:$8 sps:$4 sm:$0xff]   ;;  %v1091_v23 = vld [vmem:[%s1183_s26 + $0x24] ss:$8 sps:$4 sm:$0xff]   ;;  %v1095_v25 = vld [vmem:[%s1183_s26 + $0x20] ss:$8 sps:$4 sm:$0xff]  }
  0x13   : > { %500 = vmatpush1.bf16.msra.mxu0 %v1072_v4  ;;  %1052 = vmatpush1.bf16.msra.mxu1 %v1072_v4  ;;  %v1090_v22 = vld [vmem:[%s1183_s26 + $0x90] ss:$8 sps:$4 sm:$0xff]   ;;  %v1093_v24 = vld [vmem:[%s1183_s26 + $0xa4] ss:$8 sps:$4 sm:$0xff]   ;;  %v1096_v26 = vld [vmem:[%s1183_s26 + $0xa0] ss:$8 sps:$4 sm:$0xff]  }
  0x14   : > { %501 = vmatprep.subr.bf16.mxu0 %v1135_v1  ;;  %1043 = vmatprep.subr.bf16.mxu1 %v1135_v1  ;;  %v1097_v27 = vld [vmem:[%s1183_s26 + $0x34] ss:$8 sps:$4 sm:$0xff]   ;;  %v1101_v29 = vld [vmem:[%s1183_s26 + $0x30] ss:$8 sps:$4 sm:$0xff]   ;;  %v1103_v31 = vld [vmem:[%s1183_s26 + $0x44] ss:$8 sps:$4 sm:$0xff]  }
  0x15   : > { %v1099_v28 = vld [vmem:[%s1183_s26 + $0xb4] ss:$8 sps:$4 sm:$0xff]   ;;  %v1102_v30 = vld [vmem:[%s1183_s26 + $0xb0] ss:$8 sps:$4 sm:$0xff]   ;;  %v1105_v32 = vld [vmem:[%s1183_s26 + $0xc4] ss:$8 sps:$4 sm:$0xff]  }
  0x16   : > { %v1107_v33 = vld [vmem:[%s1183_s26 + $0x40] ss:$8 sps:$4 sm:$0xff]   ;;  %v1109_v35 = vld [vmem:[%s1183_s26 + $0x54] ss:$8 sps:$4 sm:$0xff]   ;;  %v1113_v37 = vld [vmem:[%s1183_s26 + $0x50] ss:$8 sps:$4 sm:$0xff]  }
  0x17   : > { %502 = vmatpush1.bf16.msra.mxu0 %v1073_v5  ;;  %1053 = vmatpush1.bf16.msra.mxu1 %v1073_v5  ;;  %v1108_v34 = vld [vmem:[%s1183_s26 + $0xc0] ss:$8 sps:$4 sm:$0xff]   ;;  %v1111_v36 = vld [vmem:[%s1183_s26 + $0xd4] ss:$8 sps:$4 sm:$0xff]   ;;  %v1114_v38 = vld [vmem:[%s1183_s26 + $0xd0] ss:$8 sps:$4 sm:$0xff]  }
  0x18   : > { %503 = vmatprep.subr.bf16.mxu0 %v1135_v1  ;;  %1044 = vmatprep.subr.bf16.mxu1 %v1135_v1  ;;  %v1115_v39 = vld [vmem:[%s1183_s26 + $0x64] ss:$8 sps:$4 sm:$0xff]   ;;  %v1119_v41 = vld [vmem:[%s1183_s26 + $0x60] ss:$8 sps:$4 sm:$0xff]   ;;  %v1121_v43 = vld [vmem:[%s1183_s26 + $0x74] ss:$8 sps:$4 sm:$0xff]  }
  0x19   : > { %v1117_v40 = vld [vmem:[%s1183_s26 + $0xe4] ss:$8 sps:$4 sm:$0xff]   ;;  %v1120_v42 = vld [vmem:[%s1183_s26 + $0xe0] ss:$8 sps:$4 sm:$0xff]   ;;  %v1123_v44 = vld [vmem:[%s1183_s26 + $0xf4] ss:$8 sps:$4 sm:$0xff]  }
  0x1a   : > { %v1125_v45 = vld [vmem:[%s1183_s26 + $0x70] ss:$8 sps:$4 sm:$0xff]  }
  0x1b   : > { %504 = vmatpush1.bf16.msra.mxu0 %v1074_v8  ;;  %1054 = vmatpush1.bf16.msra.mxu1 %v1074_v8  ;;  %v1126_v46 = vld [vmem:[%s1183_s26 + $0xf0] ss:$8 sps:$4 sm:$0xff]  }
  0x1c   : > { %505 = vmatprep.subr.bf16.mxu0 %v1135_v1  ;;  %1045 = vmatprep.subr.bf16.mxu1 %v1135_v1 }
  0x1f   : > { %506 = vmatpush1.bf16.msra.mxu0 %v1075_v9  ;;  %1055 = vmatpush1.bf16.msra.mxu1 %v1075_v9 }
  0x20   : > { %507 = vmatprep.subr.bf16.mxu0 %v1135_v1  ;;  %1046 = vmatprep.subr.bf16.mxu1 %v1135_v1 }
  0x23   : > { %508 = vmatpush1.bf16.msra.mxu0 %v1076_v10  ;;  %1056 = vmatpush1.bf16.msra.mxu1 %v1076_v10 }
  0x24   : > { %509 = vmatprep.subr.bf16.mxu0 %v1135_v1  ;;  %1047 = vmatprep.subr.bf16.mxu1 %v1135_v1 }
  0x27   : > { %510 = vmatpush1.bf16.msra.mxu0 %v1077_v13  ;;  %1057 = vmatpush1.bf16.msra.mxu1 %v1077_v13 }
  0x28   : > { %511 = vmatprep.subr.bf16.mxu0 %v1135_v1  ;;  %1048 = vmatprep.subr.bf16.mxu1 %v1135_v1 }
  0x2b   : > { %512 = vmatpush1.bf16.msra.mxu0 %v491_v16  ;;  %1058 = vmatpush1.bf16.msra.mxu1 %v491_v16 }
  0x2e   : > { %526 = vmatmul.mubr.bf16.vlgmr.msra.gmra.mrb[0].mxu0 %v1079_v17  ;;  %590 = vmatmul.mubr.bf16.vlgmr.msra.gmra.mrb[0].mxu1 %v1082_v18 }
  0x2f   : > { %957 = vmatprep.mubr.msk.bf16.mxu0 %vm437_vm0, %v1085_v19  ;;  %965 = vmatprep.mubr.msk.bf16.mxu1 %vm437_vm0, %v1087_v20 }
  0x36   : > { %534 = vmatmul.mubr.bf16.gmra.mrb[4].mxu0 %v1089_v21  ;;  %598 = vmatmul.mubr.bf16.gmra.mrb[4].mxu1 %v1090_v22 }
  0x37   : > { %958 = vmatprep.mubr.msk.bf16.mxu0 %vm437_vm0, %v1091_v23  ;;  %966 = vmatprep.mubr.msk.bf16.mxu1 %vm437_vm0, %v1093_v24 }
  0x3e   : > { %542 = vmatmul.mubr.bf16.gmra.mrb[8].mxu0 %v1095_v25  ;;  %606 = vmatmul.mubr.bf16.gmra.mrb[8].mxu1 %v1096_v26 }
  0x3f   : > { %959 = vmatprep.mubr.msk.bf16.mxu0 %vm437_vm0, %v1097_v27  ;;  %967 = vmatprep.mubr.msk.bf16.mxu1 %vm437_vm0, %v1099_v28 }
  0x46   : > { %550 = vmatmul.mubr.bf16.gmra.mrb[12].mxu0 %v1101_v29  ;;  %614 = vmatmul.mubr.bf16.gmra.mrb[12].mxu1 %v1102_v30 }
  0x47   : > { %960 = vmatprep.mubr.msk.bf16.mxu0 %vm437_vm0, %v1103_v31  ;;  %968 = vmatprep.mubr.msk.bf16.mxu1 %vm437_vm0, %v1105_v32 }
  0x4e   : > { %558 = vmatmul.mubr.bf16.gmra.mrb[16].mxu0 %v1107_v33  ;;  %622 = vmatmul.mubr.bf16.gmra.mrb[16].mxu1 %v1108_v34 }
  0x4f   : > { %961 = vmatprep.mubr.msk.bf16.mxu0 %vm437_vm0, %v1109_v35  ;;  %969 = vmatprep.mubr.msk.bf16.mxu1 %vm437_vm0, %v1111_v36 }
  0x56   : > { %566 = vmatmul.mubr.bf16.gmra.mrb[20].mxu0 %v1113_v37  ;;  %630 = vmatmul.mubr.bf16.gmra.mrb[20].mxu1 %v1114_v38 }
  0x57   : > { %962 = vmatprep.mubr.msk.bf16.mxu0 %vm437_vm0, %v1115_v39  ;;  %970 = vmatprep.mubr.msk.bf16.mxu1 %vm437_vm0, %v1117_v40 }
  0x5e   : > { %574 = vmatmul.mubr.bf16.gmra.mrb[24].mxu0 %v1119_v41  ;;  %638 = vmatmul.mubr.bf16.gmra.mrb[24].mxu1 %v1120_v42 }
  0x5f   : > { %963 = vmatprep.mubr.msk.bf16.mxu0 %vm437_vm0, %v1121_v43  ;;  %971 = vmatprep.mubr.msk.bf16.mxu1 %vm437_vm0, %v1123_v44 }
  0x66   : > { %582 = vmatmul.mubr.bf16.gmra.mrb[28].mxu0 %v1125_v45  ;;  %646 = vmatmul.mubr.bf16.gmra.mrb[28].mxu1 %v1126_v46 }
 0x101   : > { %v527_v48 = vpop.f32.mrb[0].mxu0  ;;  %v591_v49 = vpop.f32.mrb[0].mxu1 }
 0x102   : > { %v528_v50 = vadd.f32 %v1254_v47, %v527_v48  ;;  %v592_v51 = vadd.f32 %v1254_v47, %v591_v49  ;;  %v529_v52 = vpop.f32.mrb[1].mxu0  ;;  %v593_v53 = vpop.f32.mrb[1].mxu1 }
 0x103   : > { %v530_v54 = vpop.f32.mrb[2].mxu0  ;;  %v594_v55 = vpop.f32.mrb[2].mxu1 }
 0x104   : > { %v654_v56 = vmax.f32 %v528_v50, 0.0  ;;  %v670_v57 = vmax.f32 %v592_v51, 0.0  ;;  %v531_v58 = vadd.f32 %v1254_v47, %v530_v54  ;;  %v595_v59 = vadd.f32 %v1254_v47, %v594_v55  ;;  %v532_v60 = vpop.f32.mrb[3].mxu0  ;;  %v596_v61 = vpop.f32.mrb[3].mxu1 }
 0x106   : > { %v1007_v62 = vpack.c.bf16 %v654_v56, %v654_v56  ;;  %v1023_v63 = vpack.c.bf16 %v670_v57, %v670_v57  ;;  %v655_v0 = vmax.f32 %v531_v58, 0.0  ;;  %v671_v1 = vmax.f32 %v595_v59, 0.0 }
 0x108   : > { %815 = vst.msk [vmem:[%s1264_s18] sm:$0xf] %vm814_vm3, %v1007_v62  ;;  %831 = vst.msk [vmem:[%s1264_s18 + $0x40] sm:$0xf] %vm814_vm3, %v1023_v63  ;;  %v1008_v2 = vpack.c.bf16 %v655_v0, %v655_v0  ;;  %v1024_v3 = vpack.c.bf16 %v671_v1, %v671_v1 }
 0x109   : > { %v535_v4 = vpop.f32.mrb[4].mxu0  ;;  %v599_v5 = vpop.f32.mrb[4].mxu1 }
 0x10a   : > { %816 = vst.msk [vmem:[%s1264_s18 + $0x4] sm:$0xf] %vm814_vm3, %v1008_v2  ;;  %832 = vst.msk [vmem:[%s1264_s18 + $0x44] sm:$0xf] %vm814_vm3, %v1024_v3  ;;  %v536_v6 = vadd.f32 %v1254_v47, %v535_v4  ;;  %v600_v7 = vadd.f32 %v1254_v47, %v599_v5  ;;  %v537_v8 = vpop.f32.mrb[5].mxu0  ;;  %v601_v9 = vpop.f32.mrb[5].mxu1 }
 0x10b   : > { %v538_v10 = vpop.f32.mrb[6].mxu0  ;;  %v602_v11 = vpop.f32.mrb[6].mxu1 }
 0x10c   : > { %v656_v12 = vmax.f32 %v536_v6, 0.0  ;;  %v672_v13 = vmax.f32 %v600_v7, 0.0  ;;  %v539_v14 = vadd.f32 %v1254_v47, %v538_v10  ;;  %v603_v15 = vadd.f32 %v1254_v47, %v602_v11  ;;  %v540_v16 = vpop.f32.mrb[7].mxu0  ;;  %v604_v17 = vpop.f32.mrb[7].mxu1 }
 0x10e   : > { %v1009_v18 = vpack.c.bf16 %v656_v12, %v656_v12  ;;  %v1025_v19 = vpack.c.bf16 %v672_v13, %v672_v13  ;;  %v657_v20 = vmax.f32 %v539_v14, 0.0  ;;  %v673_v21 = vmax.f32 %v603_v15, 0.0 }
 0x110   : > { %817 = vst.msk [vmem:[%s1264_s18 + $0x8] sm:$0xf] %vm814_vm3, %v1009_v18  ;;  %833 = vst.msk [vmem:[%s1264_s18 + $0x48] sm:$0xf] %vm814_vm3, %v1025_v19  ;;  %v1010_v22 = vpack.c.bf16 %v657_v20, %v657_v20  ;;  %v1026_v23 = vpack.c.bf16 %v673_v21, %v673_v21 }
 0x111   : > { %v543_v24 = vpop.f32.mrb[8].mxu0  ;;  %v607_v25 = vpop.f32.mrb[8].mxu1 }
 0x112   : > { %818 = vst.msk [vmem:[%s1264_s18 + $0xc] sm:$0xf] %vm814_vm3, %v1010_v22  ;;  %834 = vst.msk [vmem:[%s1264_s18 + $0x4c] sm:$0xf] %vm814_vm3, %v1026_v23  ;;  %v544_v26 = vadd.f32 %v1254_v47, %v543_v24  ;;  %v608_v27 = vadd.f32 %v1254_v47, %v607_v25  ;;  %v545_v28 = vpop.f32.mrb[9].mxu0  ;;  %v609_v29 = vpop.f32.mrb[9].mxu1 }
 0x113   : > { %v546_v30 = vpop.f32.mrb[10].mxu0  ;;  %v610_v31 = vpop.f32.mrb[10].mxu1 }
 0x114   : > { %v658_v32 = vmax.f32 %v544_v26, 0.0  ;;  %v674_v33 = vmax.f32 %v608_v27, 0.0  ;;  %v547_v34 = vadd.f32 %v1254_v47, %v546_v30  ;;  %v611_v35 = vadd.f32 %v1254_v47, %v610_v31  ;;  %v548_v36 = vpop.f32.mrb[11].mxu0  ;;  %v612_v37 = vpop.f32.mrb[11].mxu1 }
 0x116   : > { %v1011_v38 = vpack.c.bf16 %v658_v32, %v658_v32  ;;  %v1027_v39 = vpack.c.bf16 %v674_v33, %v674_v33  ;;  %v659_v40 = vmax.f32 %v547_v34, 0.0  ;;  %v675_v41 = vmax.f32 %v611_v35, 0.0 }
 0x118   : > { %819 = vst.msk [vmem:[%s1264_s18 + $0x10] sm:$0xf] %vm814_vm3, %v1011_v38  ;;  %835 = vst.msk [vmem:[%s1264_s18 + $0x50] sm:$0xf] %vm814_vm3, %v1027_v39  ;;  %v1012_v42 = vpack.c.bf16 %v659_v40, %v659_v40  ;;  %v1028_v43 = vpack.c.bf16 %v675_v41, %v675_v41 }
 0x119   : > { %v551_v44 = vpop.f32.mrb[12].mxu0  ;;  %v615_v45 = vpop.f32.mrb[12].mxu1 }
 0x11a   : > { %820 = vst.msk [vmem:[%s1264_s18 + $0x14] sm:$0xf] %vm814_vm3, %v1012_v42  ;;  %836 = vst.msk [vmem:[%s1264_s18 + $0x54] sm:$0xf] %vm814_vm3, %v1028_v43  ;;  %v552_v46 = vadd.f32 %v1254_v47, %v551_v44  ;;  %v616_v48 = vadd.f32 %v1254_v47, %v615_v45  ;;  %v553_v49 = vpop.f32.mrb[13].mxu0  ;;  %v617_v50 = vpop.f32.mrb[13].mxu1 }
 0x11b   : > { %v554_v51 = vpop.f32.mrb[14].mxu0  ;;  %v618_v52 = vpop.f32.mrb[14].mxu1 }
 0x11c   : > { %v660_v53 = vmax.f32 %v552_v46, 0.0  ;;  %v676_v54 = vmax.f32 %v616_v48, 0.0  ;;  %v555_v55 = vadd.f32 %v1254_v47, %v554_v51  ;;  %v619_v56 = vadd.f32 %v1254_v47, %v618_v52  ;;  %v556_v57 = vpop.f32.mrb[15].mxu0  ;;  %v620_v58 = vpop.f32.mrb[15].mxu1 }
 0x11e   : > { %v1013_v59 = vpack.c.bf16 %v660_v53, %v660_v53  ;;  %v1029_v60 = vpack.c.bf16 %v676_v54, %v676_v54  ;;  %v661_v61 = vmax.f32 %v555_v55, 0.0  ;;  %v677_v62 = vmax.f32 %v619_v56, 0.0 }
 0x120   : > { %821 = vst.msk [vmem:[%s1264_s18 + $0x18] sm:$0xf] %vm814_vm3, %v1013_v59  ;;  %837 = vst.msk [vmem:[%s1264_s18 + $0x58] sm:$0xf] %vm814_vm3, %v1029_v60  ;;  %v1014_v63 = vpack.c.bf16 %v661_v61, %v661_v61  ;;  %v1030_v0 = vpack.c.bf16 %v677_v62, %v677_v62 }
 0x121   : > { %v559_v1 = vpop.f32.mrb[16].mxu0  ;;  %v623_v2 = vpop.f32.mrb[16].mxu1 }
 0x122   : > { %822 = vst.msk [vmem:[%s1264_s18 + $0x1c] sm:$0xf] %vm814_vm3, %v1014_v63  ;;  %838 = vst.msk [vmem:[%s1264_s18 + $0x5c] sm:$0xf] %vm814_vm3, %v1030_v0  ;;  %v560_v3 = vadd.f32 %v1254_v47, %v559_v1  ;;  %v624_v4 = vadd.f32 %v1254_v47, %v623_v2  ;;  %v561_v5 = vpop.f32.mrb[17].mxu0  ;;  %v625_v6 = vpop.f32.mrb[17].mxu1 }
 0x123   : > { %v562_v7 = vpop.f32.mrb[18].mxu0  ;;  %v626_v8 = vpop.f32.mrb[18].mxu1 }
 0x124   : > { %v662_v9 = vmax.f32 %v560_v3, 0.0  ;;  %v678_v10 = vmax.f32 %v624_v4, 0.0  ;;  %v563_v11 = vadd.f32 %v1254_v47, %v562_v7  ;;  %v627_v12 = vadd.f32 %v1254_v47, %v626_v8  ;;  %v564_v13 = vpop.f32.mrb[19].mxu0  ;;  %v628_v14 = vpop.f32.mrb[19].mxu1 }
 0x126   : > { %v1015_v15 = vpack.c.bf16 %v662_v9, %v662_v9  ;;  %v1031_v16 = vpack.c.bf16 %v678_v10, %v678_v10  ;;  %v663_v17 = vmax.f32 %v563_v11, 0.0  ;;  %v679_v18 = vmax.f32 %v627_v12, 0.0 }
 0x128   : > { %823 = vst.msk [vmem:[%s1264_s18 + $0x20] sm:$0xf] %vm814_vm3, %v1015_v15  ;;  %839 = vst.msk [vmem:[%s1264_s18 + $0x60] sm:$0xf] %vm814_vm3, %v1031_v16  ;;  %v1016_v19 = vpack.c.bf16 %v663_v17, %v663_v17  ;;  %v1032_v20 = vpack.c.bf16 %v679_v18, %v679_v18 }
 0x129   : > { %v567_v21 = vpop.f32.mrb[20].mxu0  ;;  %v631_v22 = vpop.f32.mrb[20].mxu1 }
 0x12a   : > { %824 = vst.msk [vmem:[%s1264_s18 + $0x24] sm:$0xf] %vm814_vm3, %v1016_v19  ;;  %840 = vst.msk [vmem:[%s1264_s18 + $0x64] sm:$0xf] %vm814_vm3, %v1032_v20  ;;  %v568_v23 = vadd.f32 %v1254_v47, %v567_v21  ;;  %v632_v24 = vadd.f32 %v1254_v47, %v631_v22  ;;  %v569_v25 = vpop.f32.mrb[21].mxu0  ;;  %v633_v26 = vpop.f32.mrb[21].mxu1 }
 0x12b   : > { %v570_v27 = vpop.f32.mrb[22].mxu0  ;;  %v634_v28 = vpop.f32.mrb[22].mxu1 }
 0x12c   : > { %v664_v29 = vmax.f32 %v568_v23, 0.0  ;;  %v680_v30 = vmax.f32 %v632_v24, 0.0  ;;  %v571_v31 = vadd.f32 %v1254_v47, %v570_v27  ;;  %v635_v32 = vadd.f32 %v1254_v47, %v634_v28  ;;  %v572_v33 = vpop.f32.mrb[23].mxu0  ;;  %v636_v34 = vpop.f32.mrb[23].mxu1 }
 0x12e   : > { %v1017_v35 = vpack.c.bf16 %v664_v29, %v664_v29  ;;  %v1033_v36 = vpack.c.bf16 %v680_v30, %v680_v30  ;;  %v665_v37 = vmax.f32 %v571_v31, 0.0  ;;  %v681_v38 = vmax.f32 %v635_v32, 0.0 }
 0x130   : > { %825 = vst.msk [vmem:[%s1264_s18 + $0x28] sm:$0xf] %vm814_vm3, %v1017_v35  ;;  %841 = vst.msk [vmem:[%s1264_s18 + $0x68] sm:$0xf] %vm814_vm3, %v1033_v36  ;;  %v1018_v39 = vpack.c.bf16 %v665_v37, %v665_v37  ;;  %v1034_v40 = vpack.c.bf16 %v681_v38, %v681_v38 }
 0x131   : > { %v575_v41 = vpop.f32.mrb[24].mxu0  ;;  %v639_v42 = vpop.f32.mrb[24].mxu1 }
 0x132   : > { %826 = vst.msk [vmem:[%s1264_s18 + $0x2c] sm:$0xf] %vm814_vm3, %v1018_v39  ;;  %842 = vst.msk [vmem:[%s1264_s18 + $0x6c] sm:$0xf] %vm814_vm3, %v1034_v40  ;;  %v576_v43 = vadd.f32 %v1254_v47, %v575_v41  ;;  %v640_v44 = vadd.f32 %v1254_v47, %v639_v42  ;;  %v577_v45 = vpop.f32.mrb[25].mxu0  ;;  %v641_v46 = vpop.f32.mrb[25].mxu1 }
 0x133   : > { %v578_v48 = vpop.f32.mrb[26].mxu0  ;;  %v642_v49 = vpop.f32.mrb[26].mxu1 }
 0x134   : > { %v666_v50 = vmax.f32 %v576_v43, 0.0  ;;  %v682_v51 = vmax.f32 %v640_v44, 0.0  ;;  %v579_v52 = vadd.f32 %v1254_v47, %v578_v48  ;;  %v643_v53 = vadd.f32 %v1254_v47, %v642_v49  ;;  %v580_v54 = vpop.f32.mrb[27].mxu0  ;;  %v644_v55 = vpop.f32.mrb[27].mxu1 }
 0x136   : > { %v1019_v56 = vpack.c.bf16 %v666_v50, %v666_v50  ;;  %v1035_v57 = vpack.c.bf16 %v682_v51, %v682_v51  ;;  %v667_v58 = vmax.f32 %v579_v52, 0.0  ;;  %v683_v59 = vmax.f32 %v643_v53, 0.0 }
 0x138   : > { %827 = vst.msk [vmem:[%s1264_s18 + $0x30] sm:$0xf] %vm814_vm3, %v1019_v56  ;;  %843 = vst.msk [vmem:[%s1264_s18 + $0x70] sm:$0xf] %vm814_vm3, %v1035_v57  ;;  %v1020_v60 = vpack.c.bf16 %v667_v58, %v667_v58  ;;  %v1036_v61 = vpack.c.bf16 %v683_v59, %v683_v59 }
 0x139   : > { %v583_v62 = vpop.f32.mrb[28].mxu0  ;;  %v647_v63 = vpop.f32.mrb[28].mxu1 }
 0x13a   : > { %828 = vst.msk [vmem:[%s1264_s18 + $0x34] sm:$0xf] %vm814_vm3, %v1020_v60  ;;  %844 = vst.msk [vmem:[%s1264_s18 + $0x74] sm:$0xf] %vm814_vm3, %v1036_v61  ;;  %v584_v0 = vadd.f32 %v1254_v47, %v583_v62  ;;  %v648_v1 = vadd.f32 %v1254_v47, %v647_v63  ;;  %v585_v2 = vpop.f32.mrb[29].mxu0  ;;  %v649_v3 = vpop.f32.mrb[29].mxu1 }
 0x13b   : > { %v586_v4 = vpop.f32.mrb[30].mxu0  ;;  %v650_v5 = vpop.f32.mrb[30].mxu1 }
 0x13c   : > { %v668_v6 = vmax.f32 %v584_v0, 0.0  ;;  %v684_v7 = vmax.f32 %v648_v1, 0.0  ;;  %v587_v8 = vadd.f32 %v1254_v47, %v586_v4  ;;  %v651_v9 = vadd.f32 %v1254_v47, %v650_v5  ;;  %v588_v10 = vpop.f32.mrb[31].mxu0  ;;  %v652_v11 = vpop.f32.mrb[31].mxu1 }
 0x13e   : > { %v1021_v12 = vpack.c.bf16 %v668_v6, %v668_v6  ;;  %v1037_v13 = vpack.c.bf16 %v684_v7, %v684_v7  ;;  %v669_v14 = vmax.f32 %v587_v8, 0.0  ;;  %v685_v15 = vmax.f32 %v651_v9, 0.0 }
 0x140   : > { %829 = vst.msk [vmem:[%s1264_s18 + $0x38] sm:$0xf] %vm814_vm3, %v1021_v12  ;;  %845 = vst.msk [vmem:[%s1264_s18 + $0x78] sm:$0xf] %vm814_vm3, %v1037_v13  ;;  %v1022_v16 = vpack.c.bf16 %v669_v14, %v669_v14  ;;  %v1038_v17 = vpack.c.bf16 %v685_v15, %v685_v15 }
 0x142   : > { %830 = vst.msk [vmem:[%s1264_s18 + $0x3c] sm:$0xf] %vm814_vm3, %v1022_v16  ;;  %846 = vst.msk [vmem:[%s1264_s18 + $0x7c] sm:$0xf] %vm814_vm3, %v1038_v17 }
 0x143 PF: > { %s13_s12 = sadd.s32 1, %s1133_s12  }
 0x144   : > { %p10_p4 = scmp.ge.s32.totalorder %s13_s12, 4  }
 0x146   :  { %12 = sbr.rel (!%p10_p4) target bundleno = 1 (0x1), region = 62 }

// kernel: as_mlp_forward.53
= control target key start
LH: loop header
LB: loop body
LE: loop exit
PB: predicated region body
PF: predicated region fallthrough
CT: control target
= control target key end

     0   :  { %s3174_s12 = smov 0   ;;  %s3806_s0 = inlined_call_operand.vmem [shape: bf16[512,864], index: 0, kind: input, shape index: {}]   ;;  %s3807_s1 = inlined_call_operand.vmem [shape: bf16[864,96], index: 1, kind: input, shape index: {}]   ;;  %s3808_s2 = inlined_call_operand.vmem [shape: f32[1,96], index: 2, kind: input, shape index: {}]   ;;  %s3809_s3 = inlined_call_operand.vmem [shape: bf16[512,96], index: 3, kind: output, shape index: {}]  }
   0x1 LB: > { %s2247_s13 = sadd.s32 4294967295, %s3152_s12   ;;  %p2251_p0 = scmp.ge.s32.totalorder %s3152_s12, 1  ;;  %s3152_s12 = sphi %s3174_s12, %s13_s12  }
   0x2   : > { %p139_p1 = scmp.lt.s32.totalorder %s3152_s12, 3 }
   0x4   : > { %p140_p2 = pnand %p2251_p0, %p139_p1 }
   0x5   : > { %v2932_v0 = vld [vmem:[%s3807_s1 + $0x40] sm:$0xff] (!%p140_p2)   ;;  %s2252_s16 = sshll.u32 (!%p140_p2), %s2247_s13, 5  ;;  %v2934_v2 = vld [vmem:[%s3807_s1 + $0x48] sm:$0xff] (!%p140_p2)   ;;  %v2936_v4 = vld [vmem:[%s3807_s1 + $0x50] sm:$0xff] (!%p140_p2)   ;;  %vm1305_vm0 = vcmask (!%p140_p2), 785408   ;;  %vm2158_vm1 = vcmask (!%p140_p2), 781312  }
   0x6   : > { %143 = sbr.rel (%p140_p2) target bundleno = 480 (0x1e0), region = 32  ;;  %v2933_v1 = vld [vmem:[%s3807_s1] sm:$0xff] (!%p140_p2)   ;;  %2505 = vmatprep.subr.bf16.mxu0 (!%p140_p2), %v2932_v0  ;;  %2907 = vmatprep.subr.bf16.mxu1 (!%p140_p2), %v2932_v0  ;;  %p165_p3 = scmp.lt.s32.totalorder (!%p140_p2), %s2252_s16, 63  ;;  %v2935_v3 = vld [vmem:[%s3807_s1 + $0x8] sm:$0xff] (!%p140_p2)   ;;  %v2937_v5 = vld [vmem:[%s3807_s1 + $0x10] sm:$0xff] (!%p140_p2)  }
   0x7   : > { %2506 = vmatpush3.bf16.msra.mxu0 (!%p140_p2), %v2933_v1  ;;  %2915 = vmatpush3.bf16.msra.mxu1 (!%p140_p2), %v2933_v1  ;;  %v2938_v6 = vld [vmem:[%s3807_s1 + $0x58] sm:$0xff] (!%p140_p2)   ;;  %v2940_v8 = vld [vmem:[%s3807_s1 + $0x60] sm:$0xff] (!%p140_p2)   ;;  %v2942_v10 = vld [vmem:[%s3807_s1 + $0x68] sm:$0xff] (!%p140_p2)  }
   0x8   : > { %2507 = vmatprep.subr.bf16.mxu0 (!%p140_p2), %v2934_v2  ;;  %2908 = vmatprep.subr.bf16.mxu1 (!%p140_p2), %v2934_v2  ;;  %v2939_v7 = vld [vmem:[%s3807_s1 + $0x18] sm:$0xff] (!%p140_p2)   ;;  %v2941_v9 = vld [vmem:[%s3807_s1 + $0x20] sm:$0xff] (!%p140_p2)   ;;  %v2943_v13 = vld [vmem:[%s3807_s1 + $0x28] sm:$0xff] (!%p140_p2)  }
   0x9   : > { %v2944_v14 = vld [vmem:[%s3807_s1 + $0x70] sm:$0xff] (!%p140_p2)   ;;  %v2946_v16 = vld [vmem:[%s3807_s1 + $0x78] sm:$0xff] (!%p140_p2)   ;;  %v2954_v18 = vld [vmem:[%s3807_s1 + $0xc0] sm:$0xff] (!%p140_p2)  }
   0xa   : > { %v2945_v15 = vld [vmem:[%s3807_s1 + $0x30] sm:$0xff] (!%p140_p2)   ;;  %v2947_v17 = vld [vmem:[%s3807_s1 + $0x38] sm:$0xff] (!%p140_p2)   ;;  %v2955_v21 = vld [vmem:[%s3807_s1 + $0x140] sm:$0xff] (!%p140_p2)  }
   0xb   : > { %2508 = vmatpush3.bf16.msra.mxu0 (!%p140_p2), %v2935_v3  ;;  %2916 = vmatpush3.bf16.msra.mxu1 (!%p140_p2), %v2935_v3  ;;  %v2956_v22 = vld [vmem:[%s3807_s1 + $0x80] sm:$0xff] (!%p140_p2)   ;;  %v2958_v24 = vld [vmem:[%s3807_s1 + $0xc8] sm:$0xff] (!%p140_p2)   ;;  %v2966_v32 = vld [vmem:[%s3807_s1 + $0xd0] sm:$0xff] (!%p140_p2)  }
   0xc   : > { %2509 = vmatprep.subr.bf16.mxu0 (!%p140_p2), %v2936_v4  ;;  %2909 = vmatprep.subr.bf16.mxu1 (!%p140_p2), %v2936_v4  ;;  %v2957_v23 = vld [vmem:[%s3807_s1 + $0x100] sm:$0xff] (!%p140_p2)   ;;  %v2969_v27 = vld [vmem:[%s3807_s1 + $0x148] sm:$0xff] (!%p140_p2)   ;;  %v2967_v33 = vld [vmem:[%s3807_s1 + $0x90] sm:$0xff] (!%p140_p2)  }
   0xd   : > { %s3811_s16 = smov (!%p165_p3, %s2252_s16), 63  ;;  %v2959_v28 = vld [vmem:[%s3807_s1 + $0x88] sm:$0xff]   ;;  %v2968_v34 = vld [vmem:[%s3807_s1 + $0xd8] sm:$0xff]   ;;  %v2978_v38 = vld [vmem:[%s3807_s1 + $0xe0] sm:$0xff]  }
   0xe   : > { %s2923_s29 = smul.u32 28, %s3811_s16  ;;  %v2971_v29 = vld [vmem:[%s3807_s1 + $0x108] sm:$0xff]   ;;  %v2970_v37 = vld [vmem:[%s3807_s1 + $0x98] sm:$0xff]   ;;  %v2989_v41 = vld [vmem:[%s3807_s1 + $0x150] sm:$0xff]   ;;  %s2255_s4 = sshll.u32 %s3811_s16, 2 }
   0xf   : > { %2510 = vmatpush3.bf16.msra.mxu0 %v2937_v5  ;;  %2917 = vmatpush3.bf16.msra.mxu1 %v2937_v5  ;;  %v2979_v42 = vld [vmem:[%s3807_s1 + $0xa0] sm:$0xff]   ;;  %v2980_v43 = vld [vmem:[%s3807_s1 + $0xe8] sm:$0xff]   ;;  %v2991_v44 = vld [vmem:[%s3807_s1 + $0x110] sm:$0xff]   ;;  %s3690_s7 = scalar_lea.vmem %s3809_s3, %s2255_s4 }
  0x10   : > { %2511 = vmatprep.subr.bf16.mxu0 %v2938_v6  ;;  %2910 = vmatprep.subr.bf16.mxu1 %v2938_v6  ;;  %s3215_s9 = scalar_lea.vmem %s3806_s0, %s2923_s29  ;;  %v2981_v47 = vld [vmem:[%s3807_s1 + $0xa8] sm:$0xff]   ;;  %v2988_v48 = vld [vmem:[%s3807_s1 + $0xf0] sm:$0xff]   ;;  %v3000_v51 = vld [vmem:[%s3807_s1 + $0x158] sm:$0xff]  }
  0x11   : > { %v2950_v11 = vld [vmem:[%s3215_s9 + $0x4] ss:$28 sps:$4 sm:$0xff]   ;;  %v2960_v25 = vld [vmem:[%s3215_s9 + $0x3c] ss:$28 sps:$4 sm:$0xff]   ;;  %v2972_v35 = vld [vmem:[%s3215_s9 + $0x74] ss:$28 sps:$4 sm:$0xff]  }
  0x12   : > { %v2953_v12 = vld [vmem:[%s3215_s9 + $0x2a4] ss:$28 sps:$4 sm:$0xff]   ;;  %1386 = vmatprep.mubr.bf16.mxu0 %v2950_v11  ;;  %v2962_v26 = vld [vmem:[%s3215_s9 + $0x2dc] ss:$28 sps:$4 sm:$0xff]   ;;  %v2974_v36 = vld [vmem:[%s3215_s9 + $0x314] ss:$28 sps:$4 sm:$0xff]  }
  0x13   : > { %2512 = vmatpush3.bf16.msra.mxu0 %v2939_v7  ;;  %2918 = vmatpush3.bf16.msra.mxu1 %v2939_v7  ;;  %v2948_v19 = vld [vmem:[%s3215_s9] ss:$28 sps:$4 sm:$0xff]   ;;  %v2964_v30 = vld [vmem:[%s3215_s9 + $0x38] ss:$28 sps:$4 sm:$0xff]   ;;  %v2976_v39 = vld [vmem:[%s3215_s9 + $0x70] ss:$28 sps:$4 sm:$0xff]  }
  0x14   : > { %2513 = vmatprep.subr.bf16.mxu0 %v2940_v8  ;;  %2911 = vmatprep.subr.bf16.mxu1 %v2940_v8  ;;  %v2951_v20 = vld [vmem:[%s3215_s9 + $0x2a0] ss:$28 sps:$4 sm:$0xff]   ;;  %v2965_v31 = vld [vmem:[%s3215_s9 + $0x2d8] ss:$28 sps:$4 sm:$0xff]   ;;  %v2977_v40 = vld [vmem:[%s3215_s9 + $0x310] ss:$28 sps:$4 sm:$0xff]  }
  0x15   : > { %1482 = vmatprep.mubr.bf16.mxu1 %v2953_v12  ;;  %v2982_v45 = vld [vmem:[%s3215_s9 + $0xac] ss:$28 sps:$4 sm:$0xff]   ;;  %v2990_v52 = vld [vmem:[%s3807_s1 + $0xb0] sm:$0xff]   ;;  %v3002_v53 = vld [vmem:[%s3807_s1 + $0x118] sm:$0xff]  }
  0x16   : > { %v2984_v46 = vld [vmem:[%s3215_s9 + $0x34c] ss:$28 sps:$4 sm:$0xff]   ;;  %v2994_v54 = vld [vmem:[%s3215_s9 + $0xe4] ss:$28 sps:$4 sm:$0xff]   ;;  %v2992_v55 = vld [vmem:[%s3807_s1 + $0xf8] sm:$0xff]  }
  0x17   : > { %2514 = vmatpush3.bf16.msra.mxu0 %v2941_v9  ;;  %2919 = vmatpush3.bf16.msra.mxu1 %v2941_v9  ;;  %v2986_v49 = vld [vmem:[%s3215_s9 + $0xa8] ss:$28 sps:$4 sm:$0xff]   ;;  %v2993_v57 = vld [vmem:[%s3807_s1 + $0xb8] sm:$0xff]   ;;  %v3009_v6 = vld [vmem:[%s3215_s9 + $0x154] ss:$28 sps:$4 sm:$0xff]  }
  0x18   : > { %2515 = vmatprep.subr.bf16.mxu0 %v2942_v10  ;;  %2912 = vmatprep.subr.bf16.mxu1 %v2942_v10  ;;  %v2987_v50 = vld [vmem:[%s3215_s9 + $0x348] ss:$28 sps:$4 sm:$0xff]   ;;  %v2999_v62 = vld [vmem:[%s3215_s9 + $0xe0] ss:$28 sps:$4 sm:$0xff]   ;;  %v3007_v4 = vld [vmem:[%s3215_s9 + $0x118] ss:$28 sps:$4 sm:$0xff]  }
  0x19   : > { %v2998_v56 = vld [vmem:[%s3215_s9 + $0xc] ss:$28 sps:$4 sm:$0xff]   ;;  %v3001_v58 = vld [vmem:[%s3807_s1 + $0x180] sm:$0xff]   ;;  %v3003_v63 = vld [vmem:[%s3215_s9 + $0x11c] ss:$28 sps:$4 sm:$0xff]  }
  0x1a   : > { %v2996_v59 = vld [vmem:[%s3215_s9 + $0x8] ss:$28 sps:$4 sm:$0xff]   ;;  %v3008_v5 = vld [vmem:[%s3215_s9 + $0x40] ss:$28 sps:$4 sm:$0xff]   ;;  %v3038_v8 = vld [vmem:[%s3807_s1 + $0x170] sm:$0xff]  }
  0x1b   : > { %2516 = vmatpush3.bf16.msra.mxu0 %v2943_v13  ;;  %2920 = vmatpush3.bf16.msra.mxu1 %v2943_v13  ;;  %v3015_v60 = vld [vmem:[%s3807_s1 + $0x160] sm:$0xff]   ;;  %v3023_v1 = vld [vmem:[%s3807_s1 + $0x188] sm:$0xff]   ;;  %v3011_v7 = vld [vmem:[%s3215_s9 + $0x7c] ss:$28 sps:$4 sm:$0xff]  }
  0x1c   : > { %2517 = vmatprep.subr.bf16.mxu0 %v2944_v14  ;;  %2913 = vmatprep.subr.bf16.mxu1 %v2944_v14  ;;  %v3016_v61 = vld [vmem:[%s3807_s1 + $0x120] sm:$0xff]   ;;  %v3024_v2 = vld [vmem:[%s3807_s1 + $0x168] sm:$0xff]   ;;  %v3039_v9 = vld [vmem:[%s3807_s1 + $0x130] sm:$0xff]  }
  0x1d   : > { %v3005_v0 = vld [vmem:[%s3215_s9 + $0x44] ss:$28 sps:$4 sm:$0xff]   ;;  %v3025_v3 = vld [vmem:[%s3807_s1 + $0x128] sm:$0xff]   ;;  %v3014_v11 = vld [vmem:[%s3215_s9 + $0x78] ss:$28 sps:$4 sm:$0xff]  }
  0x1e   : > { %v3013_v10 = vld [vmem:[%s3215_s9 + $0x150] ss:$28 sps:$4 sm:$0xff]  }
  0x1f   : > { %2518 = vmatpush3.bf16.msra.mxu0 %v2945_v15  ;;  %2921 = vmatpush3.bf16.msra.mxu1 %v2945_v15  ;;  %v3017_v12 = vld [vmem:[%s3215_s9 + $0x18c] ss:$28 sps:$4 sm:$0xff]   ;;  %v3044_v13 = vld [vmem:[%s3807_s1 + $0x190] sm:$0xff]   ;;  %v3047_v15 = vld [vmem:[%s3807_s1 + $0x178] sm:$0xff]  }
  0x20   : > { %2519 = vmatprep.subr.bf16.mxu0 %v2946_v16  ;;  %2914 = vmatprep.subr.bf16.mxu1 %v2946_v16  ;;  %v3019_v14 = vld [vmem:[%s3215_s9 + $0xb4] ss:$28 sps:$4 sm:$0xff]   ;;  %v3048_v16 = vld [vmem:[%s3807_s1 + $0x138] sm:$0xff]  }
  0x23   : > { %2520 = vmatpush3.bf16.msra.mxu0 %v2947_v17  ;;  %2922 = vmatpush3.bf16.msra.mxu1 %v2947_v17  ;;  %v3021_v17 = vld [vmem:[%s3215_s9 + $0x188] ss:$28 sps:$4 sm:$0xff]  }
  0x24   : > { %2617 = vmatprep.subr.bf16.mxu1 %v2954_v18  ;;  %2729 = vmatprep.subr.bf16.mxu0 %v2955_v21  ;;  %v3022_v18 = vld [vmem:[%s3215_s9 + $0xb0] ss:$28 sps:$4 sm:$0xff]  }
  0x25   : > { %v3028_v21 = vld [vmem:[%s3215_s9 + $0xec] ss:$28 sps:$4 sm:$0xff]  }
  0x26   : > { %1387 = vmatmul.mubr.bf16.vlgmr.msra.gmra.mrb[0].mxu0 %v2948_v19  ;;  %1483 = vmatmul.mubr.bf16.vlgmr.msra.gmra.mrb[0].mxu1 %v2951_v20  ;;  %v3026_v19 = vld [vmem:[%s3215_s9 + $0x1c4] ss:$28 sps:$4 sm:$0xff]   ;;  %v3061_v20 = vld [vmem:[%s3807_s1 + $0x198] sm:$0xff]  }
  0x27   : > { %2618 = vmatpush3.bf16.msra.mxu1 %v2956_v22  ;;  %2730 = vmatpush3.bf16.msra.mxu0 %v2957_v23  ;;  %v3030_v22 = vld [vmem:[%s3215_s9 + $0x1c0] ss:$28 sps:$4 sm:$0xff]   ;;  %v3031_v23 = vld [vmem:[%s3215_s9 + $0xe8] ss:$28 sps:$4 sm:$0xff]  }
  0x28   : > { %2619 = vmatprep.subr.bf16.mxu1 %v2958_v24  ;;  %1394 = vmatprep.mubr.bf16.mxu0 %v2960_v25  ;;  %v3032_v24 = vld [vmem:[%s3215_s9 + $0x1fc] ss:$28 sps:$4 sm:$0xff]   ;;  %v3034_v25 = vld [vmem:[%s3215_s9 + $0x124] ss:$28 sps:$4 sm:$0xff]  }
  0x29   : > { %1490 = vmatprep.mubr.bf16.mxu1 %v2962_v26  ;;  %2731 = vmatprep.subr.bf16.mxu0 %v2969_v27  ;;  %v3080_v26 = vld [vmem:[%s3807_s1 + $0x1a0] sm:$0xff]   ;;  %v3036_v27 = vld [vmem:[%s3215_s9 + $0x1f8] ss:$28 sps:$4 sm:$0xff]  }
  0x2b   : > { %2620 = vmatpush3.bf16.msra.mxu1 %v2959_v28  ;;  %2732 = vmatpush3.bf16.msra.mxu0 %v2971_v29  ;;  %v3037_v28 = vld [vmem:[%s3215_s9 + $0x120] ss:$28 sps:$4 sm:$0xff]   ;;  %v3040_v29 = vld [vmem:[%s3215_s9 + $0x234] ss:$28 sps:$4 sm:$0xff]  }
  0x2c   : > { %2621 = vmatprep.subr.bf16.mxu1 %v2966_v32  ;;  %2733 = vmatprep.subr.bf16.mxu0 %v2989_v41  ;;  %v3045_v32 = vld [vmem:[%s3215_s9 + $0x230] ss:$28 sps:$4 sm:$0xff]   ;;  %v3060_v41 = vld [vmem:[%s3215_s9 + $0x1c8] ss:$28 sps:$4 sm:$0xff]  }
  0x2e   : > { %1395 = vmatmul.mubr.bf16.gmra.mrb[4].mxu0 %v2964_v30  ;;  %1491 = vmatmul.mubr.bf16.gmra.mrb[4].mxu1 %v2965_v31  ;;  %v3042_v30 = vld [vmem:[%s3215_s9 + $0x15c] ss:$28 sps:$4 sm:$0xff]   ;;  %v3097_v31 = vld [vmem:[%s3807_s1 + $0x1a8] sm:$0xff]  }
  0x2f   : > { %2622 = vmatpush3.bf16.msra.mxu1 %v2967_v33  ;;  %1402 = vmatprep.mubr.bf16.mxu0 %v2972_v35  ;;  %v3046_v33 = vld [vmem:[%s3215_s9 + $0x158] ss:$28 sps:$4 sm:$0xff]  }
  0x30   : > { %2623 = vmatprep.subr.bf16.mxu1 %v2968_v34  ;;  %1498 = vmatprep.mubr.bf16.mxu1 %v2974_v36  ;;  %v3049_v34 = vld [vmem:[%s3215_s9 + $0x26c] ss:$28 sps:$4 sm:$0xff]   ;;  %v3051_v35 = vld [vmem:[%s3215_s9 + $0x194] ss:$28 sps:$4 sm:$0xff]  }
  0x31   : > { %2734 = vmatpush3.bf16.msra.mxu0 %v2991_v44  ;;  %v3053_v36 = vld [vmem:[%s3215_s9 + $0x268] ss:$28 sps:$4 sm:$0xff]   ;;  %v3066_v44 = vld [vmem:[%s3215_s9 + $0x200] ss:$28 sps:$4 sm:$0xff]  }
  0x32   : > { %2735 = vmatprep.subr.bf16.mxu0 %v3000_v51  ;;  %v3076_v51 = vld [vmem:[%s3215_s9 + $0xbc] ss:$28 sps:$4 sm:$0xff]  }
  0x33   : > { %2624 = vmatpush3.bf16.msra.mxu1 %v2970_v37  ;;  %v3054_v37 = vld [vmem:[%s3215_s9 + $0x190] ss:$28 sps:$4 sm:$0xff]  }
  0x34   : > { %2625 = vmatprep.subr.bf16.mxu1 %v2978_v38  ;;  %v3055_v38 = vld [vmem:[%s3215_s9 + $0x1cc] ss:$28 sps:$4 sm:$0xff]  }
  0x35   : > { %2736 = vmatpush3.bf16.msra.mxu0 %v3002_v53  ;;  %v3079_v53 = vld [vmem:[%s3215_s9 + $0xb8] ss:$28 sps:$4 sm:$0xff]  }
  0x36   : > { %1403 = vmatmul.mubr.bf16.gmra.mrb[8].mxu0 %v2976_v39  ;;  %1499 = vmatmul.mubr.bf16.gmra.mrb[8].mxu1 %v2977_v40  ;;  %v3059_v39 = vld [vmem:[%s3215_s9 + $0x14] ss:$28 sps:$4 sm:$0xff]  }
  0x37   : > { %2626 = vmatpush3.bf16.msra.mxu1 %v2979_v42  ;;  %1410 = vmatprep.mubr.bf16.mxu0 %v2982_v45  ;;  %v3057_v40 = vld [vmem:[%s3215_s9 + $0x10] ss:$28 sps:$4 sm:$0xff]   ;;  %v3062_v42 = vld [vmem:[%s3215_s9 + $0x204] ss:$28 sps:$4 sm:$0xff]  }
  0x38   : > { %2627 = vmatprep.subr.bf16.mxu1 %v2980_v43  ;;  %1506 = vmatprep.mubr.bf16.mxu1 %v2984_v46  ;;  %v3064_v43 = vld [vmem:[%s3215_s9 + $0x4c] ss:$28 sps:$4 sm:$0xff]   ;;  %v3068_v46 = vld [vmem:[%s3215_s9 + $0x23c] ss:$28 sps:$4 sm:$0xff]  }
  0x39   : > { %2737 = vmatprep.subr.bf16.mxu0 %v3015_v60  ;;  %v3067_v45 = vld [vmem:[%s3215_s9 + $0x48] ss:$28 sps:$4 sm:$0xff]   ;;  %v3091_v60 = vld [vmem:[%s3215_s9 + $0x2e0] ss:$28 sps:$4 sm:$0xff]  }
  0x3a   : > { %2738 = vmatpush3.bf16.msra.mxu0 %v3016_v61  ;;  %v3092_v61 = vld [vmem:[%s3215_s9 + $0x128] ss:$28 sps:$4 sm:$0xff]  }
  0x3b   : > { %2628 = vmatpush3.bf16.msra.mxu1 %v2981_v47  ;;  %2739 = vmatprep.subr.bf16.mxu0 %v3024_v2  ;;  %v3070_v47 = vld [vmem:[%s3215_s9 + $0x84] ss:$28 sps:$4 sm:$0xff]   ;;  %v3100_v2 = vld [vmem:[%s3215_s9 + $0x354] ss:$28 sps:$4 sm:$0xff]  }
  0x3c   : > { %2629 = vmatprep.subr.bf16.mxu1 %v2988_v48  ;;  %v3072_v48 = vld [vmem:[%s3215_s9 + $0x238] ss:$28 sps:$4 sm:$0xff]  }
  0x3e   : > { %1411 = vmatmul.mubr.bf16.gmra.mrb[12].mxu0 %v2986_v49  ;;  %1507 = vmatmul.mubr.bf16.gmra.mrb[12].mxu1 %v2987_v50  ;;  %v3073_v49 = vld [vmem:[%s3215_s9 + $0x80] ss:$28 sps:$4 sm:$0xff]   ;;  %v3074_v50 = vld [vmem:[%s3215_s9 + $0x274] ss:$28 sps:$4 sm:$0xff]  }
  0x3f   : > { %2630 = vmatpush3.bf16.msra.mxu1 %v2990_v52  ;;  %1418 = vmatprep.mubr.bf16.mxu0 %v2994_v54  ;;  %v3078_v52 = vld [vmem:[%s3215_s9 + $0x270] ss:$28 sps:$4 sm:$0xff]  }
  0x40   : > { %2631 = vmatprep.subr.bf16.mxu1 %v2992_v55  ;;  %1547 = vmatprep.mubr.bf16.mxu1 %v2998_v56  ;;  %v3081_v54 = vld [vmem:[%s3215_s9 + $0x2ac] ss:$28 sps:$4 sm:$0xff]   ;;  %v3083_v55 = vld [vmem:[%s3215_s9 + $0xf4] ss:$28 sps:$4 sm:$0xff]  }
  0x41   : > { %2740 = vmatpush3.bf16.msra.mxu0 %v3025_v3  ;;  %v3085_v56 = vld [vmem:[%s3215_s9 + $0x2a8] ss:$28 sps:$4 sm:$0xff]   ;;  %v3102_v3 = vld [vmem:[%s3215_s9 + $0x19c] ss:$28 sps:$4 sm:$0xff]  }
  0x42   : > { %2741 = vmatprep.subr.bf16.mxu0 %v3038_v8  ;;  %v3109_v8 = vld [vmem:[%s3215_s9 + $0x1d0] ss:$28 sps:$4 sm:$0xff]  }
  0x43   : > { %2632 = vmatpush3.bf16.msra.mxu1 %v2993_v57  ;;  %v3086_v57 = vld [vmem:[%s3215_s9 + $0xf0] ss:$28 sps:$4 sm:$0xff]  }
  0x44   : > { %2863 = vmatprep.subr.bf16.mxu1 %v3001_v58 }
  0x45   : > { %2742 = vmatpush3.bf16.msra.mxu0 %v3039_v9  ;;  %v3110_v9 = vld [vmem:[%s3215_s9 + $0x50] ss:$28 sps:$4 sm:$0xff]  }
  0x46   : > { %1419 = vmatmul.mubr.bf16.gmra.mrb[16].mxu0 %v2999_v62  ;;  %1548 = vmatmul.mubr.bf16.vlgmr.msra.gmra.mrb[16].mxu1 %v2996_v59  ;;  %v3089_v59 = vld [vmem:[%s3215_s9 + $0x12c] ss:$28 sps:$4 sm:$0xff]   ;;  %v3093_v62 = vld [vmem:[%s3215_s9 + $0x31c] ss:$28 sps:$4 sm:$0xff]  }
  0x47   : > { %2864 = vmatpush3.bf16.msra.mxu1 %v3001_v58  ;;  %1426 = vmatprep.mubr.bf16.mxu0 %v3003_v63  ;;  %v3087_v58 = vld [vmem:[%s3215_s9 + $0x2e4] ss:$28 sps:$4 sm:$0xff]  }
  0x48   : > { %1555 = vmatprep.mubr.bf16.mxu1 %v3005_v0  ;;  %2865 = vmatprep.subr.bf16.mxu1 %v3023_v1  ;;  %v3095_v63 = vld [vmem:[%s3215_s9 + $0x164] ss:$28 sps:$4 sm:$0xff]   ;;  %v3098_v0 = vld [vmem:[%s3215_s9 + $0x318] ss:$28 sps:$4 sm:$0xff]  }
  0x49   : > { %2743 = vmatprep.subr.bf16.mxu0 %v3047_v15  ;;  %v3118_v15 = vld [vmem:[%s3215_s9 + $0xf8] ss:$28 sps:$4 sm:$0xff]  }
  0x4a   : > { %2744 = vmatpush3.bf16.msra.mxu0 %v3048_v16  ;;  %v3119_v16 = vld [vmem:[%s3215_s9 + $0x240] ss:$28 sps:$4 sm:$0xff]  }
  0x4b   : > { %2866 = vmatpush3.bf16.msra.mxu1 %v3023_v1  ;;  %v3099_v1 = vld [vmem:[%s3215_s9 + $0x160] ss:$28 sps:$4 sm:$0xff]  }
  0x4c   : > { %2867 = vmatprep.subr.bf16.mxu1 %v3044_v13 }
  0x4e   : > { %1427 = vmatmul.mubr.bf16.gmra.mrb[20].mxu0 %v3007_v4  ;;  %1556 = vmatmul.mubr.bf16.gmra.mrb[20].mxu1 %v3008_v5  ;;  %v3104_v4 = vld [vmem:[%s3215_s9 + $0x350] ss:$28 sps:$4 sm:$0xff]   ;;  %v3105_v5 = vld [vmem:[%s3215_s9 + $0x198] ss:$28 sps:$4 sm:$0xff]  }
  0x4f   : > { %1434 = vmatprep.mubr.bf16.mxu0 %v3009_v6  ;;  %1563 = vmatprep.mubr.bf16.mxu1 %v3011_v7  ;;  %v3106_v6 = vld [vmem:[%s3215_s9 + $0x1d4] ss:$28 sps:$4 sm:$0xff]  }
  0x50   : > { %2868 = vmatpush3.bf16.msra.mxu1 %v3044_v13  ;;  %v3108_v7 = vld [vmem:[%s3215_s9 + $0x18] ss:$28 sps:$4 sm:$0xff]   ;;  %v3115_v13 = vld [vmem:[%s3215_s9 + $0xc0] ss:$28 sps:$4 sm:$0xff]  }
  0x51   : > { %2869 = vmatprep.subr.bf16.mxu1 %v3061_v20 }
  0x54   : > { %2870 = vmatpush3.bf16.msra.mxu1 %v3061_v20  ;;  %v3124_v20 = vld [vmem:[%s3215_s9 + $0x278] ss:$28 sps:$4 sm:$0xff]  }
  0x55   : > { %2871 = vmatprep.subr.bf16.mxu1 %v3080_v26 }
  0x56   : > { %1435 = vmatmul.mubr.bf16.gmra.mrb[24].mxu0 %v3013_v10  ;;  %1564 = vmatmul.mubr.bf16.gmra.mrb[24].mxu1 %v3014_v11  ;;  %v3111_v10 = vld [vmem:[%s3215_s9 + $0x20c] ss:$28 sps:$4 sm:$0xff]  }
  0x57   : > { %1442 = vmatprep.mubr.bf16.mxu0 %v3017_v12  ;;  %1571 = vmatprep.mubr.bf16.mxu1 %v3019_v14  ;;  %v3113_v11 = vld [vmem:[%s3215_s9 + $0x88] ss:$28 sps:$4 sm:$0xff]  }
  0x58   : > { %2872 = vmatpush3.bf16.msra.mxu1 %v3080_v26  ;;  %v3114_v12 = vld [vmem:[%s3215_s9 + $0x208] ss:$28 sps:$4 sm:$0xff]  }
  0x59   : > { %2873 = vmatprep.subr.bf16.mxu1 %v3097_v31  ;;  %v3116_v14 = vld [vmem:[%s3215_s9 + $0x244] ss:$28 sps:$4 sm:$0xff]   ;;  %v3131_v26 = vld [vmem:[%s3215_s9 + $0x2ec] ss:$28 sps:$4 sm:$0xff]  }
  0x5c   : > { %2874 = vmatpush3.bf16.msra.mxu1 %v3097_v31  ;;  %v3138_v31 = vld [vmem:[%s3215_s9 + $0x2b8] ss:$28 sps:$4 sm:$0xff]  }
  0x5e   : > { %1443 = vmatmul.mubr.bf16.gmra.mrb[28].mxu0 %v3021_v17  ;;  %1572 = vmatmul.mubr.bf16.gmra.mrb[28].mxu1 %v3022_v18  ;;  %v3120_v17 = vld [vmem:[%s3215_s9 + $0x130] ss:$28 sps:$4 sm:$0xff]   ;;  %v3121_v18 = vld [vmem:[%s3215_s9 + $0x27c] ss:$28 sps:$4 sm:$0xff]  }
  0x5f   : > { %1450 = vmatprep.mubr.bf16.mxu0 %v3026_v19  ;;  %1579 = vmatprep.mubr.bf16.mxu1 %v3028_v21  ;;  %v3123_v19 = vld [vmem:[%s3215_s9 + $0x168] ss:$28 sps:$4 sm:$0xff]   ;;  %v3125_v21 = vld [vmem:[%s3215_s9 + $0x1a0] ss:$28 sps:$4 sm:$0xff]  }
  0x66   : > { %1451 = vmatmul.mubr.bf16.gmra.mrb[32].mxu0 %v3030_v22  ;;  %1580 = vmatmul.mubr.bf16.gmra.mrb[32].mxu1 %v3031_v23  ;;  %v3126_v22 = vld [vmem:[%s3215_s9 + $0x2b4] ss:$28 sps:$4 sm:$0xff]  }
  0x67   : > { %1458 = vmatprep.mubr.bf16.mxu0 %v3032_v24  ;;  %1587 = vmatprep.mubr.bf16.mxu1 %v3034_v25  ;;  %v3128_v23 = vld [vmem:[%s3215_s9 + $0x1d8] ss:$28 sps:$4 sm:$0xff]   ;;  %v3129_v24 = vld [vmem:[%s3215_s9 + $0x2b0] ss:$28 sps:$4 sm:$0xff]  }
  0x68   : > { %v3130_v25 = vld [vmem:[%s3215_s9 + $0x210] ss:$28 sps:$4 sm:$0xff]  }
  0x6e   : > { %1459 = vmatmul.mubr.bf16.gmra.mrb[36].mxu0 %v3036_v27  ;;  %1588 = vmatmul.mubr.bf16.gmra.mrb[36].mxu1 %v3037_v28  ;;  %v3133_v27 = vld [vmem:[%s3215_s9 + $0x248] ss:$28 sps:$4 sm:$0xff]  }
  0x6f   : > { %1466 = vmatprep.mubr.bf16.mxu0 %v3040_v29  ;;  %1595 = vmatprep.mubr.bf16.mxu1 %v3042_v30  ;;  %v3134_v28 = vld [vmem:[%s3215_s9 + $0x2e8] ss:$28 sps:$4 sm:$0xff]   ;;  %v3135_v29 = vld [vmem:[%s3215_s9 + $0x280] ss:$28 sps:$4 sm:$0xff]  }
  0x70   : > { %v3136_v30 = vld [vmem:[%s3215_s9 + $0x324] ss:$28 sps:$4 sm:$0xff]  }
  0x76   : > { %1467 = vmatmul.mubr.bf16.gmra.mrb[40].mxu0 %v3045_v32  ;;  %1596 = vmatmul.mubr.bf16.gmra.mrb[40].mxu1 %v3046_v33  ;;  %v3139_v32 = vld [vmem:[%s3215_s9 + $0x320] ss:$28 sps:$4 sm:$0xff]   ;;  %v3140_v33 = vld [vmem:[%s3215_s9 + $0x2f0] ss:$28 sps:$4 sm:$0xff]  }
  0x77   : > { %1474 = vmatprep.mubr.bf16.mxu0 %v3049_v34  ;;  %1603 = vmatprep.mubr.bf16.mxu1 %v3051_v35  ;;  %v3141_v34 = vld [vmem:[%s3215_s9 + $0x35c] ss:$28 sps:$4 sm:$0xff]   ;;  %v3143_v35 = vld [vmem:[%s3215_s9 + $0x328] ss:$28 sps:$4 sm:$0xff]  }
  0x7e   : > { %1475 = vmatmul.mubr.bf16.gmra.mrb[44].mxu0 %v3053_v36  ;;  %1604 = vmatmul.mubr.bf16.gmra.mrb[44].mxu1 %v3054_v37 }
  0x7f   : > { %1611 = vmatprep.mubr.bf16.mxu1 %v3055_v38  ;;  %1708 = vmatprep.mubr.bf16.mxu0 %v3059_v39 }
  0x86   : > { %1612 = vmatmul.mubr.bf16.gmra.mrb[48].mxu1 %v3060_v41  ;;  %1709 = vmatmul.mubr.bf16.vlgmr.msra.gmra.mrb[48].mxu0 %v3057_v40  ;;  %v3144_v40 = vld [vmem:[%s3215_s9 + $0x358] ss:$28 sps:$4 sm:$0xff]   ;;  %v3145_v41 = vld [vmem:[%s3215_s9 + $0x360] ss:$28 sps:$4 sm:$0xff]  }
  0x87   : > { %1619 = vmatprep.mubr.bf16.mxu1 %v3062_v42  ;;  %1716 = vmatprep.mubr.bf16.mxu0 %v3064_v43 }
  0x8e   : > { %1620 = vmatmul.mubr.bf16.gmra.mrb[52].mxu1 %v3066_v44  ;;  %1717 = vmatmul.mubr.bf16.gmra.mrb[52].mxu0 %v3067_v45 }
  0x8f   : > { %1627 = vmatprep.mubr.bf16.mxu1 %v3068_v46  ;;  %1724 = vmatprep.mubr.bf16.mxu0 %v3070_v47 }
  0x96   : > { %1628 = vmatmul.mubr.bf16.gmra.mrb[56].mxu1 %v3072_v48  ;;  %1725 = vmatmul.mubr.bf16.gmra.mrb[56].mxu0 %v3073_v49 }
  0x97   : > { %1635 = vmatprep.mubr.bf16.mxu1 %v3074_v50  ;;  %1732 = vmatprep.mubr.bf16.mxu0 %v3076_v51 }
  0x9e   : > { %1636 = vmatmul.mubr.bf16.gmra.mrb[60].mxu1 %v3078_v52  ;;  %1733 = vmatmul.mubr.bf16.gmra.mrb[60].mxu0 %v3079_v53 }
  0x9f   : > { %1643 = vmatprep.mubr.bf16.mxu1 %v3081_v54  ;;  %1740 = vmatprep.mubr.bf16.mxu0 %v3083_v55 }
  0xa6   : > { %1644 = vmatmul.mubr.bf16.gmra.mrb[64].mxu1 %v3085_v56  ;;  %1741 = vmatmul.mubr.bf16.gmra.mrb[64].mxu0 %v3086_v57 }
  0xa7   : > { %1651 = vmatprep.mubr.bf16.mxu1 %v3087_v58  ;;  %1748 = vmatprep.mubr.bf16.mxu0 %v3089_v59 }
  0xae   : > { %1652 = vmatmul.mubr.bf16.gmra.mrb[68].mxu1 %v3091_v60  ;;  %1749 = vmatmul.mubr.bf16.gmra.mrb[68].mxu0 %v3092_v61 }
  0xaf   : > { %1659 = vmatprep.mubr.bf16.mxu1 %v3093_v62  ;;  %1756 = vmatprep.mubr.bf16.mxu0 %v3095_v63 }
  0xb6   : > { %1660 = vmatmul.mubr.bf16.gmra.mrb[72].mxu1 %v3098_v0  ;;  %1757 = vmatmul.mubr.bf16.gmra.mrb[72].mxu0 %v3099_v1 }
  0xb7   : > { %1667 = vmatprep.mubr.bf16.mxu1 %v3100_v2  ;;  %1764 = vmatprep.mubr.bf16.mxu0 %v3102_v3 }
  0xbe   : > { %1668 = vmatmul.mubr.bf16.gmra.mrb[76].mxu1 %v3104_v4  ;;  %1765 = vmatmul.mubr.bf16.gmra.mrb[76].mxu0 %v3105_v5 }
  0xbf   : > { %1772 = vmatprep.mubr.bf16.mxu0 %v3106_v6  ;;  %2875 = vmatprep.mubr.msk.bf16.mxu1 %vm1305_vm0, %v3108_v7 }
  0xc6   : > { %1773 = vmatmul.mubr.bf16.gmra.mrb[80].mxu0 %v3109_v8  ;;  %2876 = vmatmul.mubr.msk.bf16.vlgmr.msra.gmra.mrb[80].mxu1 %vm1305_vm0, %v3110_v9 }
  0xc7   : > { %1780 = vmatprep.mubr.bf16.mxu0 %v3111_v10  ;;  %2879 = vmatprep.mubr.msk.bf16.mxu1 %vm1305_vm0, %v3113_v11 }
  0xce   : > { %1781 = vmatmul.mubr.bf16.gmra.mrb[84].mxu0 %v3114_v12  ;;  %2880 = vmatmul.mubr.msk.bf16.gmra.mrb[84].mxu1 %vm1305_vm0, %v3115_v13 }
  0xcf   : > { %1788 = vmatprep.mubr.bf16.mxu0 %v3116_v14  ;;  %2883 = vmatprep.mubr.msk.bf16.mxu1 %vm1305_vm0, %v3118_v15 }
  0xd6   : > { %1789 = vmatmul.mubr.bf16.gmra.mrb[88].mxu0 %v3119_v16  ;;  %2884 = vmatmul.mubr.msk.bf16.gmra.mrb[88].mxu1 %vm1305_vm0, %v3120_v17 }
  0xd7   : > { %1796 = vmatprep.mubr.bf16.mxu0 %v3121_v18  ;;  %2887 = vmatprep.mubr.msk.bf16.mxu1 %vm1305_vm0, %v3123_v19 }
  0xde   : > { %1797 = vmatmul.mubr.bf16.gmra.mrb[92].mxu0 %v3124_v20  ;;  %2888 = vmatmul.mubr.msk.bf16.gmra.mrb[92].mxu1 %vm1305_vm0, %v3125_v21 }
  0xdf   : > { %1804 = vmatprep.mubr.bf16.mxu0 %v3126_v22  ;;  %2891 = vmatprep.mubr.msk.bf16.mxu1 %vm1305_vm0, %v3128_v23  ;;  %v3499_v22 = vld [vmem:[%s3808_s2] ss:$0 sm:$0xff] }
  0xe6   : > { %1805 = vmatmul.mubr.bf16.gmra.mrb[96].mxu0 %v3129_v24  ;;  %2892 = vmatmul.mubr.msk.bf16.gmra.mrb[96].mxu1 %vm1305_vm0, %v3130_v25 }
  0xe7   : > { %1812 = vmatprep.mubr.bf16.mxu0 %v3131_v26  ;;  %2895 = vmatprep.mubr.msk.bf16.mxu1 %vm1305_vm0, %v3133_v27 }
  0xee   : > { %1813 = vmatmul.mubr.bf16.gmra.mrb[100].mxu0 %v3134_v28  ;;  %2896 = vmatmul.mubr.msk.bf16.gmra.mrb[100].mxu1 %vm1305_vm0, %v3135_v29 }
  0xef   : > { %1820 = vmatprep.mubr.bf16.mxu0 %v3136_v30  ;;  %2899 = vmatprep.mubr.msk.bf16.mxu1 %vm1305_vm0, %v3138_v31 }
  0xf6   : > { %1821 = vmatmul.mubr.bf16.gmra.mrb[104].mxu0 %v3139_v32  ;;  %2900 = vmatmul.mubr.msk.bf16.gmra.mrb[104].mxu1 %vm1305_vm0, %v3140_v33 }
  0xf7   : > { %1828 = vmatprep.mubr.bf16.mxu0 %v3141_v34  ;;  %2903 = vmatprep.mubr.msk.bf16.mxu1 %vm1305_vm0, %v3143_v35 }
  0xf9   : > { %v2521_v36 = vpop.f32.mrb[0].mxu0  ;;  %v2593_v37 = vpop.f32.mrb[0].mxu1 }
  0xfa   : > { %v2522_v38 = vpop.f32.mrb[1].mxu0  ;;  %v2594_v39 = vpop.f32.mrb[1].mxu1 }
  0xfb   : > { %v2523_v42 = vadd.f32 %v2522_v38, %v2521_v36  ;;  %v2524_v43 = vpop.f32.mrb[2].mxu0  ;;  %v3479_v44 = vadd.f32 %v2594_v39, %v2593_v37  ;;  %v2596_v45 = vpop.f32.mrb[2].mxu1 }
  0xfc   : > { %v2525_v46 = vpop.f32.mrb[3].mxu0  ;;  %v2597_v47 = vpop.f32.mrb[3].mxu1 }
  0xfd   : > { %v2526_v48 = vadd.f32 %v2525_v46, %v2524_v43  ;;  %v3481_v49 = vadd.f32 %v2597_v47, %v2596_v45  ;;  %v1389_v27 = vadd.f32 %v2523_v42, %v3499_v22 }
  0xfe   : > { %1829 = vmatmul.mubr.bf16.gmra.mrb[108].mxu0 %v3144_v40  ;;  %2904 = vmatmul.mubr.msk.bf16.gmra.mrb[108].mxu1 %vm1305_vm0, %v3145_v41 }
  0xff   : > { %v1392_v34 = vadd.f32 %v2526_v48, %v3499_v22 }
 0x101   : > { %v2527_v50 = vpop.f32.mrb[4].mxu0  ;;  %v2599_v51 = vpop.f32.mrb[4].mxu1 }
 0x102   : > { %v2528_v52 = vpop.f32.mrb[5].mxu0  ;;  %v2600_v53 = vpop.f32.mrb[5].mxu1 }
 0x103   : > { %v2529_v54 = vadd.f32 %v2528_v52, %v2527_v50  ;;  %v2530_v55 = vpop.f32.mrb[6].mxu0  ;;  %v3484_v56 = vadd.f32 %v2600_v53, %v2599_v51  ;;  %v2602_v57 = vpop.f32.mrb[6].mxu1 }
 0x104   : > { %v2531_v58 = vpop.f32.mrb[7].mxu0  ;;  %v2603_v59 = vpop.f32.mrb[7].mxu1 }
 0x105   : > { %v2532_v60 = vadd.f32 %v2531_v58, %v2530_v55  ;;  %v3486_v61 = vadd.f32 %v2603_v59, %v2602_v57  ;;  %v1397_v42 = vadd.f32 %v2529_v54, %v3499_v22 }
 0x107   : > { %v1400_v48 = vadd.f32 %v2532_v60, %v3499_v22 }
 0x109   : > { %v2533_v62 = vpop.f32.mrb[8].mxu0  ;;  %v2605_v63 = vpop.f32.mrb[8].mxu1 }
 0x10a   : > { %v2534_v0 = vpop.f32.mrb[9].mxu0  ;;  %v2606_v1 = vpop.f32.mrb[9].mxu1 }
 0x10b   : > { %v2535_v2 = vadd.f32 %v2534_v0, %v2533_v62  ;;  %v2536_v3 = vpop.f32.mrb[10].mxu0  ;;  %v3488_v4 = vadd.f32 %v2606_v1, %v2605_v63  ;;  %v2608_v5 = vpop.f32.mrb[10].mxu1 }
 0x10c   : > { %v2537_v6 = vpop.f32.mrb[11].mxu0  ;;  %v2609_v7 = vpop.f32.mrb[11].mxu1 }
 0x10d   : > { %v2538_v8 = vadd.f32 %v2537_v6, %v2536_v3  ;;  %v3490_v9 = vadd.f32 %v2609_v7, %v2608_v5  ;;  %v1405_v54 = vadd.f32 %v2535_v2, %v3499_v22 }
 0x10f   : > { %v1408_v60 = vadd.f32 %v2538_v8, %v3499_v22 }
 0x111   : > { %v2539_v10 = vpop.f32.mrb[12].mxu0  ;;  %v2611_v11 = vpop.f32.mrb[12].mxu1 }
 0x112   : > { %v2540_v12 = vpop.f32.mrb[13].mxu0  ;;  %v2612_v13 = vpop.f32.mrb[13].mxu1 }
 0x113   : > { %v2541_v14 = vadd.f32 %v2540_v12, %v2539_v10  ;;  %v2542_v15 = vpop.f32.mrb[14].mxu0  ;;  %v3492_v16 = vadd.f32 %v2612_v13, %v2611_v11  ;;  %v2614_v17 = vpop.f32.mrb[14].mxu1 }
 0x114   : > { %v2543_v18 = vpop.f32.mrb[15].mxu0  ;;  %v2615_v19 = vpop.f32.mrb[15].mxu1 }
 0x115   : > { %v2544_v20 = vadd.f32 %v2543_v18, %v2542_v15  ;;  %v3494_v21 = vadd.f32 %v2615_v19, %v2614_v17  ;;  %v1413_v2 = vadd.f32 %v2541_v14, %v3499_v22 }
 0x117   : > { %v1416_v8 = vadd.f32 %v2544_v20, %v3499_v22 }
 0x119   : > { %v2545_v23 = vpop.f32.mrb[16].mxu0  ;;  %v2633_v24 = vpop.f32.mrb[16].mxu1 }
 0x11a   : > { %v2546_v25 = vpop.f32.mrb[17].mxu0  ;;  %v2634_v26 = vpop.f32.mrb[17].mxu1 }
 0x11b   : > { %v3502_v28 = vadd.f32 %v2546_v25, %v2545_v23  ;;  %v2635_v29 = vadd.f32 %v2634_v26, %v2633_v24  ;;  %v2548_v30 = vpop.f32.mrb[18].mxu0  ;;  %v2636_v31 = vpop.f32.mrb[18].mxu1 }
 0x11c   : > { %v2549_v32 = vpop.f32.mrb[19].mxu0  ;;  %v2637_v33 = vpop.f32.mrb[19].mxu1 }
 0x11d   : > { %v3505_v35 = vadd.f32 %v2635_v29, %v1389_v27  ;;  %v2550_v36 = vadd.f32 %v2549_v32, %v2548_v30  ;;  %v2638_v37 = vadd.f32 %v2637_v33, %v2636_v31  ;;  %v1421_v14 = vadd.f32 %v3502_v28, %v3499_v22 }
 0x11f   : > { %v3507_v38 = vadd.f32 %v2638_v37, %v1392_v34 }
 0x121   : > { %v2551_v39 = vpop.f32.mrb[20].mxu0  ;;  %v2639_v40 = vpop.f32.mrb[20].mxu1 }
 0x122   : > { %v2552_v41 = vpop.f32.mrb[21].mxu0  ;;  %v2640_v43 = vpop.f32.mrb[21].mxu1 }
 0x123   : > { %v3510_v45 = vadd.f32 %v2552_v41, %v2551_v39  ;;  %v2641_v46 = vadd.f32 %v2640_v43, %v2639_v40  ;;  %v2554_v47 = vpop.f32.mrb[22].mxu0  ;;  %v2642_v50 = vpop.f32.mrb[22].mxu1 }
 0x124   : > { %v2555_v51 = vpop.f32.mrb[23].mxu0  ;;  %v2643_v52 = vpop.f32.mrb[23].mxu1 }
 0x125   : > { %v3513_v53 = vadd.f32 %v2641_v46, %v1397_v42  ;;  %v2556_v55 = vadd.f32 %v2555_v51, %v2554_v47  ;;  %v2644_v57 = vadd.f32 %v2643_v52, %v2642_v50  ;;  %v1424_v51 = vadd.f32 %v2550_v36, %v3499_v22 }
 0x126   : > { %v1429_v28 = vadd.f32 %v3510_v45, %v3499_v22 }
 0x127   : > { %v3515_v58 = vadd.f32 %v2644_v57, %v1400_v48 }
 0x129   : > { %v2557_v59 = vpop.f32.mrb[24].mxu0  ;;  %v2645_v62 = vpop.f32.mrb[24].mxu1 }
 0x12a   : > { %v2558_v63 = vpop.f32.mrb[25].mxu0  ;;  %v2646_v0 = vpop.f32.mrb[25].mxu1 }
 0x12b   : > { %v3518_v1 = vadd.f32 %v2558_v63, %v2557_v59  ;;  %v2647_v3 = vadd.f32 %v2646_v0, %v2645_v62  ;;  %v2560_v5 = vpop.f32.mrb[26].mxu0  ;;  %v2648_v6 = vpop.f32.mrb[26].mxu1 }
 0x12c   : > { %v2561_v7 = vpop.f32.mrb[27].mxu0  ;;  %v2649_v10 = vpop.f32.mrb[27].mxu1 }
 0x12d   : > { %v3521_v11 = vadd.f32 %v2647_v3, %v1405_v54  ;;  %v2562_v12 = vadd.f32 %v2561_v7, %v2560_v5  ;;  %v2650_v13 = vadd.f32 %v2649_v10, %v2648_v6  ;;  %v1437_v45 = vadd.f32 %v3518_v1, %v3499_v22 }
 0x12f   : > { %v3523_v15 = vadd.f32 %v2650_v13, %v1408_v60  ;;  %v1432_v60 = vadd.f32 %v2556_v55, %v3499_v22 }
 0x131   : > { %v2563_v17 = vpop.f32.mrb[28].mxu0  ;;  %v2651_v18 = vpop.f32.mrb[28].mxu1 }
 0x132   : > { %v2564_v19 = vpop.f32.mrb[29].mxu0  ;;  %v2652_v23 = vpop.f32.mrb[29].mxu1 }
 0x133   : > { %v3526_v24 = vadd.f32 %v2564_v19, %v2563_v17  ;;  %v2653_v25 = vadd.f32 %v2652_v23, %v2651_v18  ;;  %v2566_v26 = vpop.f32.mrb[30].mxu0  ;;  %v2654_v27 = vpop.f32.mrb[30].mxu1 }
 0x134   : > { %v2567_v29 = vpop.f32.mrb[31].mxu0  ;;  %v2655_v30 = vpop.f32.mrb[31].mxu1 }
 0x135   : > { %v3529_v31 = vadd.f32 %v2653_v25, %v1413_v2  ;;  %v2568_v32 = vadd.f32 %v2567_v29, %v2566_v26  ;;  %v2656_v33 = vadd.f32 %v2655_v30, %v2654_v27 }
 0x137   : > { %v3531_v34 = vadd.f32 %v2656_v33, %v1416_v8 }
 0x139   : > { %v2569_v37 = vpop.f32.mrb[32].mxu0  ;;  %v2657_v39 = vpop.f32.mrb[32].mxu1 }
 0x13a   : > { %v2570_v40 = vpop.f32.mrb[33].mxu0  ;;  %v2658_v41 = vpop.f32.mrb[33].mxu1 }
 0x13b   : > { %v3535_v43 = vadd.f32 %v2570_v40, %v2569_v37  ;;  %v2659_v42 = vadd.f32 %v2658_v41, %v2657_v39  ;;  %v2572_v46 = vpop.f32.mrb[34].mxu0  ;;  %v2660_v47 = vpop.f32.mrb[34].mxu1  ;;  %v1440_v37 = vadd.f32 %v2562_v12, %v3499_v22 }
 0x13c   : > { %v2573_v50 = vpop.f32.mrb[35].mxu0  ;;  %v2661_v20 = vpop.f32.mrb[35].mxu1 }
 0x13d   : > { %v3538_v52 = vadd.f32 %v2659_v42, %v1421_v14  ;;  %v2574_v48 = vadd.f32 %v2573_v50, %v2572_v46  ;;  %v2662_v57 = vadd.f32 %v2661_v20, %v2660_v47  ;;  %v1445_v50 = vadd.f32 %v3526_v24, %v3499_v22 }
 0x13f   : > { %v3540_v59 = vadd.f32 %v2662_v57, %v1424_v51 }
 0x141   : > { %v2575_v62 = vpop.f32.mrb[36].mxu0  ;;  %v2663_v63 = vpop.f32.mrb[36].mxu1 }
 0x142   : > { %v2576_v0 = vpop.f32.mrb[37].mxu0  ;;  %v2664_v54 = vpop.f32.mrb[37].mxu1 }
 0x143   : > { %v3544_v3 = vadd.f32 %v2576_v0, %v2575_v62  ;;  %v2665_v5 = vadd.f32 %v2664_v54, %v2663_v63  ;;  %v2578_v6 = vpop.f32.mrb[38].mxu0  ;;  %v2666_v7 = vpop.f32.mrb[38].mxu1  ;;  %v1448_v0 = vadd.f32 %v2568_v32, %v3499_v22  ;;  %v1456_v32 = vadd.f32 %v2574_v48, %v3499_v22 }
 0x144   : > { %v2579_v10 = vpop.f32.mrb[39].mxu0  ;;  %v2667_v36 = vpop.f32.mrb[39].mxu1 }
 0x145   : > { %v3547_v13 = vadd.f32 %v2665_v5, %v1429_v28  ;;  %v2580_v17 = vadd.f32 %v2579_v10, %v2578_v6  ;;  %v2668_v18 = vadd.f32 %v2667_v36, %v2666_v7  ;;  %v1461_v48 = vadd.f32 %v3544_v3, %v3499_v22 }
 0x147   : > { %v3549_v19 = vadd.f32 %v2668_v18, %v1432_v60  ;;  %v1453_v60 = vadd.f32 %v3535_v43, %v3499_v22 }
 0x149   : > { %v2581_v23 = vpop.f32.mrb[40].mxu0  ;;  %v2669_v2 = vpop.f32.mrb[40].mxu1 }
 0x14a   : > { %v2582_v25 = vpop.f32.mrb[41].mxu0  ;;  %v2670_v26 = vpop.f32.mrb[41].mxu1 }
 0x14b   : > { %v3553_v27 = vadd.f32 %v2582_v25, %v2581_v23  ;;  %v2671_v29 = vadd.f32 %v2670_v26, %v2669_v2  ;;  %v2584_v30 = vpop.f32.mrb[42].mxu0  ;;  %v2672_v8 = vpop.f32.mrb[42].mxu1 }
 0x14c   : > { %v2585_v33 = vpop.f32.mrb[43].mxu0  ;;  %v2673_v55 = vpop.f32.mrb[43].mxu1 }
 0x14d   : > { %v3556_v39 = vadd.f32 %v2671_v29, %v1437_v45  ;;  %v3558_v40 = vadd.f32 %v2585_v33, %v2584_v30  ;;  %v2674_v41 = vadd.f32 %v2673_v55, %v2672_v8 }
 0x14f   : > { %v3560_v14 = vadd.f32 %v2674_v41, %v1440_v37 }
 0x151   : > { %v2587_v42 = vpop.f32.mrb[44].mxu0  ;;  %v2675_v46 = vpop.f32.mrb[44].mxu1 }
 0x152   : > { %v2588_v47 = vpop.f32.mrb[45].mxu0  ;;  %v2676_v1 = vpop.f32.mrb[45].mxu1 }
 0x153   : > { %v3564_v20 = vadd.f32 %v2588_v47, %v2587_v42  ;;  %v2677_v51 = vadd.f32 %v2676_v1, %v2675_v46  ;;  %v2590_v57 = vpop.f32.mrb[46].mxu0  ;;  %v2678_v62 = vpop.f32.mrb[46].mxu1 }
 0x154   : > { %v2591_v12 = vpop.f32.mrb[47].mxu0  ;;  %v2679_v63 = vpop.f32.mrb[47].mxu1 }
 0x155   : > { %v3567_v54 = vadd.f32 %v2677_v51, %v1445_v50  ;;  %v3569_v28 = vadd.f32 %v2591_v12, %v2590_v57  ;;  %v2680_v5 = vadd.f32 %v2679_v63, %v2678_v62  ;;  %v1464_v57 = vadd.f32 %v2580_v17, %v3499_v22 }
 0x156   : > { %v1469_v17 = vadd.f32 %v3553_v27, %v3499_v22 }
 0x157   : > { %v3571_v6 = vadd.f32 %v2680_v5, %v1448_v0 }
 0x159   : > { %v2681_v7 = vpop.f32.mrb[48].mxu1  ;;  %v2745_v10 = vpop.f32.mrb[48].mxu0 }
 0x15a   : > { %v2682_v36 = vpop.f32.mrb[49].mxu1  ;;  %v2746_v24 = vpop.f32.mrb[49].mxu0 }
 0x15b   : > { %v2683_v18 = vadd.f32 %v2682_v36, %v2681_v7  ;;  %v2747_v23 = vadd.f32 %v2746_v24, %v2745_v10  ;;  %v2684_v2 = vpop.f32.mrb[50].mxu1  ;;  %v2748_v25 = vpop.f32.mrb[50].mxu0 }
 0x15c   : > { %v2685_v26 = vpop.f32.mrb[51].mxu1  ;;  %v2749_v45 = vpop.f32.mrb[51].mxu0 }
 0x15d   : > { %v3576_v29 = vadd.f32 %v2683_v18, %v1453_v60  ;;  %v2686_v30 = vadd.f32 %v2685_v26, %v2684_v2  ;;  %v2750_v8 = vadd.f32 %v2749_v45, %v2748_v25  ;;  %v3579_v33 = vadd.f32 %v2747_v23, %v3505_v35 }
 0x15f   : > { %v3581_v55 = vadd.f32 %v2686_v30, %v1456_v32  ;;  %v3584_v37 = vadd.f32 %v2750_v8, %v3507_v38 }
 0x161   : > { %v2687_v43 = vpop.f32.mrb[52].mxu1  ;;  %v2751_v41 = vpop.f32.mrb[52].mxu0 }
 0x162   : > { %v2688_v42 = vpop.f32.mrb[53].mxu1  ;;  %v2752_v46 = vpop.f32.mrb[53].mxu0 }
 0x163   : > { %v2689_v47 = vadd.f32 %v2688_v42, %v2687_v43  ;;  %v2753_v1 = vadd.f32 %v2752_v46, %v2751_v41  ;;  %v2690_v50 = vpop.f32.mrb[54].mxu1  ;;  %v2754_v51 = vpop.f32.mrb[54].mxu0 }
 0x164   : > { %v2691_v35 = vpop.f32.mrb[55].mxu1  ;;  %v2755_v62 = vpop.f32.mrb[55].mxu0 }
 0x165   : > { %v3589_v12 = vadd.f32 %v2689_v47, %v1461_v48  ;;  %v2692_v63 = vadd.f32 %v2691_v35, %v2690_v50  ;;  %v2756_v38 = vadd.f32 %v2755_v62, %v2754_v51  ;;  %v3592_v0 = vadd.f32 %v2753_v1, %v3513_v53 }
 0x166   : > { %v1472_v53 = vadd.f32 %v3558_v40, %v3499_v22  ;;  %v1477_v40 = vadd.f32 %v3564_v20, %v3499_v22 }
 0x167   : > { %v3594_v5 = vadd.f32 %v2692_v63, %v1464_v57  ;;  %v3597_v7 = vadd.f32 %v2756_v38, %v3515_v58 }
 0x169   : > { %v2693_v3 = vpop.f32.mrb[56].mxu1  ;;  %v2757_v10 = vpop.f32.mrb[56].mxu0 }
 0x16a   : > { %v2694_v36 = vpop.f32.mrb[57].mxu1  ;;  %v2758_v24 = vpop.f32.mrb[57].mxu0 }
 0x16b   : > { %v2695_v60 = vadd.f32 %v2694_v36, %v2693_v3  ;;  %v2759_v18 = vadd.f32 %v2758_v24, %v2757_v10  ;;  %v2696_v23 = vpop.f32.mrb[58].mxu1  ;;  %v2760_v2 = vpop.f32.mrb[58].mxu0 }
 0x16c   : > { %v2697_v25 = vpop.f32.mrb[59].mxu1  ;;  %v2761_v32 = vpop.f32.mrb[59].mxu0 }
 0x16d   : > { %v3603_v26 = vadd.f32 %v2695_v60, %v1469_v17  ;;  %v2698_v58 = vadd.f32 %v2697_v25, %v2696_v23  ;;  %v2762_v45 = vadd.f32 %v2761_v32, %v2760_v2  ;;  %v3606_v30 = vadd.f32 %v2759_v18, %v3521_v11 }
 0x16e   : > { %v1480_v11 = vadd.f32 %v3569_v28, %v3499_v22  ;;  %v1485_v28 = vadd.f32 %v3479_v44, %v3499_v22 }
 0x16f   : > { %v3608_v8 = vadd.f32 %v2698_v58, %v1472_v53  ;;  %v3611_v27 = vadd.f32 %v2762_v45, %v3523_v15 }
 0x171   : > { %v2699_v43 = vpop.f32.mrb[60].mxu1  ;;  %v2763_v41 = vpop.f32.mrb[60].mxu0 }
 0x172   : > { %v2700_v42 = vpop.f32.mrb[61].mxu1  ;;  %v2764_v46 = vpop.f32.mrb[61].mxu0 }
 0x173   : > { %v2701_v48 = vadd.f32 %v2700_v42, %v2699_v43  ;;  %v2765_v47 = vadd.f32 %v2764_v46, %v2763_v41  ;;  %v2702_v1 = vpop.f32.mrb[62].mxu1  ;;  %v2766_v50 = vpop.f32.mrb[62].mxu0 }
 0x174   : > { %v2703_v51 = vpop.f32.mrb[63].mxu1  ;;  %v2767_v57 = vpop.f32.mrb[63].mxu0 }
 0x175   : > { %v3617_v35 = vadd.f32 %v2701_v48, %v1477_v40  ;;  %v2704_v15 = vadd.f32 %v2703_v51, %v2702_v1  ;;  %v2768_v62 = vadd.f32 %v2767_v57, %v2766_v50  ;;  %v3620_v63 = vadd.f32 %v2765_v47, %v3529_v31 }
 0x176   : > { %v1488_v31 = vadd.f32 %v3481_v49, %v3499_v22  ;;  %v1493_v49 = vadd.f32 %v3484_v56, %v3499_v22 }
 0x177   : > { %v3622_v38 = vadd.f32 %v2704_v15, %v1480_v11  ;;  %v3625_v20 = vadd.f32 %v2768_v62, %v3531_v34 }
 0x179   : > { %v2705_v3 = vpop.f32.mrb[64].mxu1  ;;  %v2769_v10 = vpop.f32.mrb[64].mxu0 }
 0x17a   : > { %v2706_v36 = vpop.f32.mrb[65].mxu1  ;;  %v2770_v24 = vpop.f32.mrb[65].mxu0 }
 0x17b   : > { %v2707_v17 = vadd.f32 %v2706_v36, %v2705_v3  ;;  %v2771_v60 = vadd.f32 %v2770_v24, %v2769_v10  ;;  %v2708_v18 = vpop.f32.mrb[66].mxu1  ;;  %v2772_v23 = vpop.f32.mrb[66].mxu0 }
 0x17c   : > { %v2709_v2 = vpop.f32.mrb[67].mxu1  ;;  %v2773_v53 = vpop.f32.mrb[67].mxu0 }
 0x17d   : > { %v3631_v25 = vadd.f32 %v2707_v17, %v1485_v28  ;;  %v2710_v34 = vadd.f32 %v2709_v2, %v2708_v18  ;;  %v2774_v32 = vadd.f32 %v2773_v53, %v2772_v23  ;;  %v3634_v58 = vadd.f32 %v2771_v60, %v3538_v52 }
 0x17e   : > { %v1496_v52 = vadd.f32 %v3486_v61, %v3499_v22  ;;  %v1501_v61 = vadd.f32 %v3488_v4, %v3499_v22 }
 0x17f   : > { %v3636_v45 = vadd.f32 %v2710_v34, %v1488_v31  ;;  %v3639_v44 = vadd.f32 %v2774_v32, %v3540_v59 }
 0x181   : > { %v2711_v43 = vpop.f32.mrb[68].mxu1  ;;  %v2775_v41 = vpop.f32.mrb[68].mxu0 }
 0x182   : > { %v2712_v42 = vpop.f32.mrb[69].mxu1  ;;  %v2776_v46 = vpop.f32.mrb[69].mxu0 }
 0x183   : > { %v2713_v40 = vadd.f32 %v2712_v42, %v2711_v43  ;;  %v2777_v48 = vadd.f32 %v2776_v46, %v2775_v41  ;;  %v2714_v47 = vpop.f32.mrb[70].mxu1  ;;  %v2778_v1 = vpop.f32.mrb[70].mxu0 }
 0x184   : > { %v2715_v50 = vpop.f32.mrb[71].mxu1  ;;  %v2779_v11 = vpop.f32.mrb[71].mxu0 }
 0x185   : > { %v3645_v51 = vadd.f32 %v2713_v40, %v1493_v49  ;;  %v2716_v59 = vadd.f32 %v2715_v50, %v2714_v47  ;;  %v2780_v57 = vadd.f32 %v2779_v11, %v2778_v1  ;;  %v3648_v15 = vadd.f32 %v2777_v48, %v3547_v13 }
 0x186   : > { %v1504_v13 = vadd.f32 %v3490_v9, %v3499_v22  ;;  %v1509_v9 = vadd.f32 %v3492_v16, %v3499_v22 }
 0x187   : > { %v3650_v62 = vadd.f32 %v2716_v59, %v1496_v52  ;;  %v3653_v56 = vadd.f32 %v2780_v57, %v3549_v19 }
 0x189   : > { %v2717_v3 = vpop.f32.mrb[72].mxu1  ;;  %v2781_v10 = vpop.f32.mrb[72].mxu0 }
 0x18a   : > { %v2718_v36 = vpop.f32.mrb[73].mxu1  ;;  %v2782_v24 = vpop.f32.mrb[73].mxu0 }
 0x18b   : > { %v2719_v28 = vadd.f32 %v2718_v36, %v2717_v3  ;;  %v2783_v17 = vadd.f32 %v2782_v24, %v2781_v10  ;;  %v2720_v60 = vpop.f32.mrb[74].mxu1  ;;  %v2784_v18 = vpop.f32.mrb[74].mxu0 }
 0x18c   : > { %v2721_v23 = vpop.f32.mrb[75].mxu1  ;;  %v2785_v31 = vpop.f32.mrb[75].mxu0 }
 0x18d   : > { %v3659_v2 = vadd.f32 %v2719_v28, %v1501_v61  ;;  %v2722_v19 = vadd.f32 %v2721_v23, %v2720_v60  ;;  %v2786_v53 = vadd.f32 %v2785_v31, %v2784_v18  ;;  %v3662_v34 = vadd.f32 %v2783_v17, %v3556_v39 }
 0x18e   : > { %v1512_v39 = vadd.f32 %v3494_v21, %v3499_v22 }
 0x18f   : > { %v3664_v32 = vadd.f32 %v2722_v19, %v1504_v13  ;;  %v3667_v4 = vadd.f32 %v2786_v53, %v3560_v14 }
 0x191   : > { %v2723_v43 = vpop.f32.mrb[76].mxu1  ;;  %v2787_v41 = vpop.f32.mrb[76].mxu0 }
 0x192   : > { %v2724_v42 = vpop.f32.mrb[77].mxu1  ;;  %v2788_v46 = vpop.f32.mrb[77].mxu0 }
 0x193   : > { %v2725_v49 = vadd.f32 %v2724_v42, %v2723_v43  ;;  %v2789_v40 = vadd.f32 %v2788_v46, %v2787_v41  ;;  %v2726_v48 = vpop.f32.mrb[78].mxu1  ;;  %v2790_v47 = vpop.f32.mrb[78].mxu0 }
 0x194   : > { %v2727_v1 = vpop.f32.mrb[79].mxu1  ;;  %v2791_v52 = vpop.f32.mrb[79].mxu0 }
 0x195   : > { %v3673_v50 = vadd.f32 %v2725_v49, %v1509_v9  ;;  %v2728_v14 = vadd.f32 %v2727_v1, %v2726_v48  ;;  %v2792_v11 = vadd.f32 %v2791_v52, %v2790_v47  ;;  %v3676_v59 = vadd.f32 %v2789_v40, %v3567_v54 }
 0x197   : > { %v3678_v57 = vadd.f32 %v2728_v14, %v1512_v39  ;;  %v3681_v16 = vadd.f32 %v2792_v11, %v3571_v6 }
 0x199   : > { %v2793_v3 = vpop.f32.mrb[80].mxu0  ;;  %v2877_v10 = vpop.f32.mrb[80].mxu1 }
 0x19a   : > { %v1880_v36 = vadd.f32 %v2877_v10, %v3592_v0  ;;  %v2794_v21 = vpop.f32.mrb[81].mxu0  ;;  %v1871_v22 = vpop.f32.mrb[81].mxu1 }
 0x19b   : > { %v2795_v24 = vadd.f32 %v2794_v21, %v2793_v3  ;;  %v1872_v61 = vadd.f32 %v1871_v22, %v3579_v33  ;;  %v2796_v28 = vpop.f32.mrb[82].mxu0  ;;  %v2878_v17 = vpop.f32.mrb[82].mxu1 }
 0x19c   : > { %v2000_v60 = vmax.f32 %v1880_v36, 0.0  ;;  %v1883_v54 = vadd.f32 %v2878_v17, %v3597_v7  ;;  %v2797_v18 = vpop.f32.mrb[83].mxu0  ;;  %v1874_v13 = vpop.f32.mrb[83].mxu1 }
 0x19d   : > { %v1998_v6 = vmax.f32 %v1872_v61, 0.0  ;;  %v2798_v0 = vadd.f32 %v2797_v18, %v2796_v28  ;;  %v1875_v33 = vadd.f32 %v1874_v13, %v3584_v37  ;;  %v3694_v23 = vadd.f32 %v2795_v24, %v3576_v29 }
 0x19e   : > { %v2475_v31 = vpack.c.bf16 %v2000_v60, %v2000_v60  ;;  %v2001_v7 = vmax.f32 %v1883_v54, 0.0 }
 0x19f   : > { %v2473_v19 = vpack.c.bf16 %v1998_v6, %v1998_v6  ;;  %v1999_v53 = vmax.f32 %v1875_v33, 0.0  ;;  %v3697_v43 = vadd.f32 %v2798_v0, %v3581_v55 }
 0x1a0   : > { %2161 = vst.msk [vmem:[%s3690_s7 + $0x8] sm:$0xf] %vm2158_vm1, %v2475_v31  ;;  %v2476_v41 = vpack.c.bf16 %v2001_v7, %v2001_v7 }
 0x1a1   : > { %2159 = vst.msk [vmem:[%s3690_s7] sm:$0xf] %vm2158_vm1, %v2473_v19  ;;  %v2474_v42 = vpack.c.bf16 %v1999_v53, %v1999_v53  ;;  %v2799_v46 = vpop.f32.mrb[84].mxu0  ;;  %v2881_v9 = vpop.f32.mrb[84].mxu1 }
 0x1a2   : > { %2162 = vst.msk [vmem:[%s3690_s7 + $0xc] sm:$0xf] %vm2158_vm1, %v2476_v41  ;;  %v1896_v29 = vadd.f32 %v2881_v9, %v3620_v63  ;;  %v2800_v37 = vpop.f32.mrb[85].mxu0  ;;  %v1887_v49 = vpop.f32.mrb[85].mxu1 }
 0x1a3   : > { %2160 = vst.msk [vmem:[%s3690_s7 + $0x4] sm:$0xf] %vm2158_vm1, %v2474_v42  ;;  %v2801_v40 = vadd.f32 %v2800_v37, %v2799_v46  ;;  %v1888_v55 = vadd.f32 %v1887_v49, %v3606_v30  ;;  %v2802_v48 = vpop.f32.mrb[86].mxu0  ;;  %v2882_v47 = vpop.f32.mrb[86].mxu1 }
 0x1a4   : > { %v2004_v39 = vmax.f32 %v1896_v29, 0.0  ;;  %v1899_v1 = vadd.f32 %v2882_v47, %v3625_v20  ;;  %v2803_v52 = vpop.f32.mrb[87].mxu0  ;;  %v1890_v14 = vpop.f32.mrb[87].mxu1 }
 0x1a5   : > { %v2002_v11 = vmax.f32 %v1888_v55, 0.0  ;;  %v2804_v3 = vadd.f32 %v2803_v52, %v2802_v48  ;;  %v1891_v63 = vadd.f32 %v1890_v14, %v3611_v27  ;;  %v3712_v10 = vadd.f32 %v2801_v40, %v3589_v12 }
 0x1a6   : > { %v2479_v36 = vpack.c.bf16 %v2004_v39, %v2004_v39  ;;  %v2005_v30 = vmax.f32 %v1899_v1, 0.0 }
 0x1a7   : > { %v2477_v21 = vpack.c.bf16 %v2002_v11, %v2002_v11  ;;  %v2003_v22 = vmax.f32 %v1891_v63, 0.0  ;;  %v3715_v24 = vadd.f32 %v2804_v3, %v3594_v5 }
 0x1a8   : > { %2165 = vst.msk [vmem:[%s3690_s7 + $0x18] sm:$0xf] %vm2158_vm1, %v2479_v36  ;;  %v2480_v20 = vpack.c.bf16 %v2005_v30, %v2005_v30 }
 0x1a9   : > { %2163 = vst.msk [vmem:[%s3690_s7 + $0x10] sm:$0xf] %vm2158_vm1, %v2477_v21  ;;  %v2478_v61 = vpack.c.bf16 %v2003_v22, %v2003_v22  ;;  %v2805_v28 = vpop.f32.mrb[88].mxu0  ;;  %v2885_v17 = vpop.f32.mrb[88].mxu1 }
 0x1aa   : > { %2166 = vst.msk [vmem:[%s3690_s7 + $0x1c] sm:$0xf] %vm2158_vm1, %v2480_v20  ;;  %v1912_v12 = vadd.f32 %v2885_v17, %v3648_v15  ;;  %v2806_v27 = vpop.f32.mrb[89].mxu0  ;;  %v1903_v60 = vpop.f32.mrb[89].mxu1 }
 0x1ab   : > { %2164 = vst.msk [vmem:[%s3690_s7 + $0x14] sm:$0xf] %vm2158_vm1, %v2478_v61  ;;  %v2807_v54 = vadd.f32 %v2806_v27, %v2805_v28  ;;  %v1904_v5 = vadd.f32 %v1903_v60, %v3634_v58  ;;  %v2808_v18 = vpop.f32.mrb[90].mxu0  ;;  %v2886_v13 = vpop.f32.mrb[90].mxu1 }
 0x1ac   : > { %v2008_v6 = vmax.f32 %v1912_v12, 0.0  ;;  %v1915_v0 = vadd.f32 %v2886_v13, %v3653_v56  ;;  %v2809_v33 = vpop.f32.mrb[91].mxu0  ;;  %v1906_v31 = vpop.f32.mrb[91].mxu1 }
 0x1ad   : > { %v2006_v7 = vmax.f32 %v1904_v5, 0.0  ;;  %v2810_v19 = vadd.f32 %v2809_v33, %v2808_v18  ;;  %v1907_v15 = vadd.f32 %v1906_v31, %v3639_v44  ;;  %v3730_v53 = vadd.f32 %v2807_v54, %v3603_v26 }
 0x1ae   : > { %v2483_v41 = vpack.c.bf16 %v2008_v6, %v2008_v6  ;;  %v2009_v58 = vmax.f32 %v1915_v0, 0.0 }
 0x1af   : > { %v2481_v42 = vpack.c.bf16 %v2006_v7, %v2006_v7  ;;  %v2007_v46 = vmax.f32 %v1907_v15, 0.0  ;;  %v3733_v9 = vadd.f32 %v2810_v19, %v3608_v8 }
 0x1b0   : > { %2169 = vst.msk [vmem:[%s3690_s7 + $0x28] sm:$0xf] %vm2158_vm1, %v2483_v41  ;;  %v2484_v56 = vpack.c.bf16 %v2009_v58, %v2009_v58 }
 0x1b1   : > { %2167 = vst.msk [vmem:[%s3690_s7 + $0x20] sm:$0xf] %vm2158_vm1, %v2481_v42  ;;  %v2482_v29 = vpack.c.bf16 %v2007_v46, %v2007_v46  ;;  %v2811_v37 = vpop.f32.mrb[92].mxu0  ;;  %v2889_v49 = vpop.f32.mrb[92].mxu1 }
 0x1b2   : > { %2170 = vst.msk [vmem:[%s3690_s7 + $0x2c] sm:$0xf] %vm2158_vm1, %v2484_v56  ;;  %v1928_v26 = vadd.f32 %v2889_v49, %v3676_v59  ;;  %v2812_v44 = vpop.f32.mrb[93].mxu0  ;;  %v1919_v40 = vpop.f32.mrb[93].mxu1 }
 0x1b3   : > { %2168 = vst.msk [vmem:[%s3690_s7 + $0x24] sm:$0xf] %vm2158_vm1, %v2482_v29  ;;  %v2813_v55 = vadd.f32 %v2812_v44, %v2811_v37  ;;  %v1920_v8 = vadd.f32 %v1919_v40, %v3662_v34  ;;  %v2814_v48 = vpop.f32.mrb[94].mxu0  ;;  %v2890_v47 = vpop.f32.mrb[94].mxu1 }
 0x1b4   : > { %v2012_v39 = vmax.f32 %v1928_v26, 0.0  ;;  %v1931_v1 = vadd.f32 %v2890_v47, %v3681_v16  ;;  %v2815_v52 = vpop.f32.mrb[95].mxu0  ;;  %v1922_v14 = vpop.f32.mrb[95].mxu1 }
 0x1b5   : > { %v2010_v11 = vmax.f32 %v1920_v8, 0.0  ;;  %v2816_v3 = vadd.f32 %v2815_v52, %v2814_v48  ;;  %v1923_v59 = vadd.f32 %v1922_v14, %v3667_v4  ;;  %v1799_v63 = vadd.f32 %v2813_v55, %v3617_v35 }
 0x1b6   : > { %v2487_v36 = vpack.c.bf16 %v2012_v39, %v2012_v39  ;;  %v2013_v30 = vmax.f32 %v1931_v1, 0.0 }
 0x1b7   : > { %v2485_v34 = vpack.c.bf16 %v2010_v11, %v2010_v11  ;;  %v2011_v21 = vmax.f32 %v1923_v59, 0.0  ;;  %v1802_v22 = vadd.f32 %v2816_v3, %v3622_v38 }
 0x1b8   : > { %2173 = vst.msk [vmem:[%s3690_s7 + $0x38] sm:$0xf] %vm2158_vm1, %v2487_v36  ;;  %v2488_v20 = vpack.c.bf16 %v2013_v30, %v2013_v30 }
 0x1b9   : > { %2171 = vst.msk [vmem:[%s3690_s7 + $0x30] sm:$0xf] %vm2158_vm1, %v2485_v34  ;;  %v2486_v16 = vpack.c.bf16 %v2011_v21, %v2011_v21  ;;  %v2817_v61 = vpop.f32.mrb[96].mxu0  ;;  %v2893_v28 = vpop.f32.mrb[96].mxu1 }
 0x1ba   : > { %2174 = vst.msk [vmem:[%s3690_s7 + $0x3c] sm:$0xf] %vm2158_vm1, %v2488_v20  ;;  %v1944_v4 = vadd.f32 %v2893_v28, %v3712_v10  ;;  %v2818_v35 = vpop.f32.mrb[97].mxu0  ;;  %v1935_v17 = vpop.f32.mrb[97].mxu1 }
 0x1bb   : > { %2172 = vst.msk [vmem:[%s3690_s7 + $0x34] sm:$0xf] %vm2158_vm1, %v2486_v16  ;;  %v2819_v12 = vadd.f32 %v2818_v35, %v2817_v61  ;;  %v1936_v27 = vadd.f32 %v1935_v17, %v3694_v23  ;;  %v2820_v38 = vpop.f32.mrb[98].mxu0  ;;  %v2894_v60 = vpop.f32.mrb[98].mxu1 }
 0x1bc   : > { %v2016_v54 = vmax.f32 %v1944_v4, 0.0  ;;  %v1947_v5 = vadd.f32 %v2894_v60, %v3715_v24  ;;  %v2821_v18 = vpop.f32.mrb[99].mxu0  ;;  %v1938_v13 = vpop.f32.mrb[99].mxu1 }
 0x1bd   : > { %v2014_v6 = vmax.f32 %v1936_v27, 0.0  ;;  %v2822_v0 = vadd.f32 %v2821_v18, %v2820_v38  ;;  %v1939_v10 = vadd.f32 %v1938_v13, %v3697_v43  ;;  %v1807_v33 = vadd.f32 %v2819_v12, %v3631_v25 }
 0x1be   : > { %v2491_v31 = vpack.c.bf16 %v2016_v54, %v2016_v54  ;;  %v2017_v7 = vmax.f32 %v1947_v5, 0.0 }
 0x1bf   : > { %v2489_v23 = vpack.c.bf16 %v2014_v6, %v2014_v6  ;;  %v2015_v19 = vmax.f32 %v1939_v10, 0.0  ;;  %v1810_v15 = vadd.f32 %v2822_v0, %v3636_v45 }
 0x1c0   : > { %2177 = vst.msk [vmem:[%s3690_s7 + $0x48] sm:$0xf] %vm2158_vm1, %v2491_v31  ;;  %v2492_v41 = vpack.c.bf16 %v2017_v7, %v2017_v7 }
 0x1c1   : > { %2175 = vst.msk [vmem:[%s3690_s7 + $0x40] sm:$0xf] %vm2158_vm1, %v2489_v23  ;;  %v2490_v24 = vpack.c.bf16 %v2015_v19, %v2015_v19  ;;  %v2823_v58 = vpop.f32.mrb[100].mxu0  ;;  %v2897_v42 = vpop.f32.mrb[100].mxu1 }
 0x1c2   : > { %2178 = vst.msk [vmem:[%s3690_s7 + $0x4c] sm:$0xf] %vm2158_vm1, %v2492_v41  ;;  %v1960_v43 = vadd.f32 %v2897_v42, %v1799_v63  ;;  %v2824_v46 = vpop.f32.mrb[101].mxu0  ;;  %v1951_v25 = vpop.f32.mrb[101].mxu1 }
 0x1c3   : > { %2176 = vst.msk [vmem:[%s3690_s7 + $0x44] sm:$0xf] %vm2158_vm1, %v2490_v24  ;;  %v2825_v56 = vadd.f32 %v2824_v46, %v2823_v58  ;;  %v1952_v29 = vadd.f32 %v1951_v25, %v3730_v53  ;;  %v2826_v45 = vpop.f32.mrb[102].mxu0  ;;  %v2898_v37 = vpop.f32.mrb[102].mxu1 }
 0x1c4   : > { %v2020_v49 = vmax.f32 %v1960_v43, 0.0  ;;  %v1963_v26 = vadd.f32 %v2898_v37, %v1802_v22  ;;  %v2827_v44 = vpop.f32.mrb[103].mxu0  ;;  %v1954_v40 = vpop.f32.mrb[103].mxu1 }
 0x1c5   : > { %v2018_v55 = vmax.f32 %v1952_v29, 0.0  ;;  %v2828_v8 = vadd.f32 %v2827_v44, %v2826_v45  ;;  %v1955_v48 = vadd.f32 %v1954_v40, %v3733_v9  ;;  %v1815_v47 = vadd.f32 %v2825_v56, %v3645_v51 }
 0x1c6   : > { %v2495_v39 = vpack.c.bf16 %v2020_v49, %v2020_v49  ;;  %v2021_v1 = vmax.f32 %v1963_v26, 0.0 }
 0x1c7   : > { %v2493_v52 = vpack.c.bf16 %v2018_v55, %v2018_v55  ;;  %v2019_v53 = vmax.f32 %v1955_v48, 0.0  ;;  %v1818_v14 = vadd.f32 %v2828_v8, %v3650_v62 }
 0x1c8   : > { %2181 = vst.msk [vmem:[%s3690_s7 + $0x58] sm:$0xf] %vm2158_vm1, %v2495_v39  ;;  %v2496_v11 = vpack.c.bf16 %v2021_v1, %v2021_v1 }
 0x1c9   : > { %2179 = vst.msk [vmem:[%s3690_s7 + $0x50] sm:$0xf] %vm2158_vm1, %v2493_v52  ;;  %v2494_v3 = vpack.c.bf16 %v2019_v53, %v2019_v53  ;;  %v2829_v59 = vpop.f32.mrb[104].mxu0  ;;  %v2901_v63 = vpop.f32.mrb[104].mxu1 }
 0x1ca   : > { %2182 = vst.msk [vmem:[%s3690_s7 + $0x5c] sm:$0xf] %vm2158_vm1, %v2496_v11  ;;  %v1976_v9 = vadd.f32 %v2901_v63, %v1815_v47  ;;  %v2830_v36 = vpop.f32.mrb[105].mxu0  ;;  %v1967_v51 = vpop.f32.mrb[105].mxu1 }
 0x1cb   : > { %2180 = vst.msk [vmem:[%s3690_s7 + $0x54] sm:$0xf] %vm2158_vm1, %v2494_v3  ;;  %v2831_v30 = vadd.f32 %v2830_v36, %v2829_v59  ;;  %v1968_v34 = vadd.f32 %v1967_v51, %v1807_v33  ;;  %v2832_v21 = vpop.f32.mrb[106].mxu0  ;;  %v2902_v62 = vpop.f32.mrb[106].mxu1 }
 0x1cc   : > { %v2024_v22 = vmax.f32 %v1976_v9, 0.0  ;;  %v1979_v20 = vadd.f32 %v2902_v62, %v1818_v14  ;;  %v2833_v16 = vpop.f32.mrb[107].mxu0  ;;  %v1970_v61 = vpop.f32.mrb[107].mxu1 }
 0x1cd   : > { %v2022_v28 = vmax.f32 %v1968_v34, 0.0  ;;  %v2834_v4 = vadd.f32 %v2833_v16, %v2832_v21  ;;  %v1971_v35 = vadd.f32 %v1970_v61, %v1810_v15  ;;  %v1823_v17 = vadd.f32 %v2831_v30, %v3659_v2 }
 0x1ce   : > { %v2499_v12 = vpack.c.bf16 %v2024_v22, %v2024_v22  ;;  %v2025_v27 = vmax.f32 %v1979_v20, 0.0 }
 0x1cf   : > { %v2497_v38 = vpack.c.bf16 %v2022_v28, %v2022_v28  ;;  %v2023_v60 = vmax.f32 %v1971_v35, 0.0  ;;  %v1826_v54 = vadd.f32 %v2834_v4, %v3664_v32 }
 0x1d0   : > { %2185 = vst.msk [vmem:[%s3690_s7 + $0x68] sm:$0xf] %vm2158_vm1, %v2499_v12  ;;  %v2500_v5 = vpack.c.bf16 %v2025_v27, %v2025_v27 }
 0x1d1   : > { %2183 = vst.msk [vmem:[%s3690_s7 + $0x60] sm:$0xf] %vm2158_vm1, %v2497_v38  ;;  %v2498_v18 = vpack.c.bf16 %v2023_v60, %v2023_v60  ;;  %v2835_v13 = vpop.f32.mrb[108].mxu0  ;;  %v2905_v6 = vpop.f32.mrb[108].mxu1 }
 0x1d2   : > { %2186 = vst.msk [vmem:[%s3690_s7 + $0x6c] sm:$0xf] %vm2158_vm1, %v2500_v5  ;;  %v2836_v0 = vpop.f32.mrb[109].mxu0  ;;  %v1983_v10 = vpop.f32.mrb[109].mxu1 }
 0x1d3   : > { %2184 = vst.msk [vmem:[%s3690_s7 + $0x64] sm:$0xf] %vm2158_vm1, %v2498_v18  ;;  %v2837_v2 = vadd.f32 %v2836_v0, %v2835_v13  ;;  %v1984_v33 = vadd.f32 %v1983_v10, %v1823_v17  ;;  %v2838_v31 = vpop.f32.mrb[110].mxu0  ;;  %v2906_v7 = vpop.f32.mrb[110].mxu1 }
 0x1d4   : > { %v2839_v32 = vpop.f32.mrb[111].mxu0  ;;  %v1986_v23 = vpop.f32.mrb[111].mxu1 }
 0x1d5   : > { %v1831_v19 = vadd.f32 %v2837_v2, %v3673_v50  ;;  %v2026_v15 = vmax.f32 %v1984_v33, 0.0  ;;  %v2840_v41 = vadd.f32 %v2839_v32, %v2838_v31  ;;  %v1987_v24 = vadd.f32 %v1986_v23, %v1826_v54 }
 0x1d7   : > { %v1992_v58 = vadd.f32 %v2905_v6, %v1831_v19  ;;  %v2501_v42 = vpack.c.bf16 %v2026_v15, %v2026_v15  ;;  %v1834_v43 = vadd.f32 %v2840_v41, %v3678_v57  ;;  %v2027_v46 = vmax.f32 %v1987_v24, 0.0 }
 0x1d9   : > { %v2028_v25 = vmax.f32 %v1992_v58, 0.0  ;;  %2187 = vst.msk [vmem:[%s3690_s7 + $0x70] sm:$0xf] %vm2158_vm1, %v2501_v42  ;;  %v1995_v56 = vadd.f32 %v2906_v7, %v1834_v43  ;;  %v2502_v29 = vpack.c.bf16 %v2027_v46, %v2027_v46 }
 0x1db   : > { %v2503_v45 = vpack.c.bf16 %v2028_v25, %v2028_v25  ;;  %v2029_v37 = vmax.f32 %v1995_v56, 0.0  ;;  %2188 = vst.msk [vmem:[%s3690_s7 + $0x74] sm:$0xf] %vm2158_vm1, %v2502_v29 }
 0x1dd   : > { %2189 = vst.msk [vmem:[%s3690_s7 + $0x78] sm:$0xf] %vm2158_vm1, %v2503_v45  ;;  %v2504_v50 = vpack.c.bf16 %v2029_v37, %v2029_v37 }
 0x1df   : > { %2190 = vst.msk [vmem:[%s3690_s7 + $0x7c] sm:$0xf] %vm2158_vm1, %v2504_v50 }
 0x1e0 PF: > { %s13_s12 = sadd.s32 1, %s3152_s12  }
 0x1e1   : > { %p10_p4 = scmp.ge.s32.totalorder %s13_s12, 4  }
 0x1e3   :  { %12 = sbr.rel (!%p10_p4) target bundleno = 1 (0x1), region = 62 }

// kernel: as_mlp_forward.55
= control target key start
LH: loop header
LB: loop body
LE: loop exit
PB: predicated region body
PF: predicated region fallthrough
CT: control target
= control target key end

     0   :  { %s901_s12 = smov 0   ;;  %s1029_s0 = inlined_call_operand.vmem [shape: bf16[128,384], index: 0, kind: input, shape index: {}]   ;;  %s1030_s1 = inlined_call_operand.vmem [shape: bf16[384,16], index: 1, kind: input, shape index: {}]   ;;  %s1031_s2 = inlined_call_operand.vmem [shape: f32[1,16], index: 2, kind: input, shape index: {}]   ;;  %s1032_s3 = inlined_call_operand.vmem [shape: bf16[128,16], index: 3, kind: output, shape index: {}]  }
   0x1 LB: > { %s684_s13 = sadd.s32 4294967295, %s879_s12   ;;  %p688_p0 = scmp.ge.s32.totalorder %s879_s12, 1  ;;  %s879_s12 = sphi %s901_s12, %s13_s12  }
   0x2   : > { %p139_p1 = scmp.lt.s32.totalorder %s879_s12, 3 }
   0x4   : > { %p140_p2 = pnand %p688_p0, %p139_p1 }
   0x5   : > { %v833_v0 = vld [vmem:[%s1030_s1 + $0x40] sm:$0xff] (!%p140_p2)   ;;  %v835_v2 = vld [vmem:[%s1030_s1 + $0x48] sm:$0xff] (!%p140_p2)   ;;  %v838_v5 = vld [vmem:[%s1030_s1 + $0x50] sm:$0xff] (!%p140_p2)   ;;  %s689_s28 = sshll.u32 (!%p140_p2), %s684_s13, 3  ;;  %vm619_vm0 = vcmask (!%p140_p2), 125952  }
   0x6   : > { %143 = sbr.rel (%p140_p2) target bundleno = 286 (0x11e), region = 32  ;;  %v834_v1 = vld [vmem:[%s1030_s1] sm:$0xff] (!%p140_p2)   ;;  %748 = vmatprep.subr.bf16.mxu0 (!%p140_p2), %v833_v0  ;;  %v837_v4 = vld [vmem:[%s1030_s1 + $0x8] sm:$0xff] (!%p140_p2)   ;;  %v840_v7 = vld [vmem:[%s1030_s1 + $0x10] sm:$0xff] (!%p140_p2)   ;;  %p165_p3 = scmp.lt.s32.totalorder (!%p140_p2), %s689_s28, 15 }
   0x7   : > { %749 = vmatpush3.bf16.msra.mxu0 (!%p140_p2), %v834_v1  ;;  %v836_v3 = vld [vmem:[%s1030_s1 + $0x80] sm:$0xff] (!%p140_p2)   ;;  %v839_v6 = vld [vmem:[%s1030_s1 + $0x88] sm:$0xff] (!%p140_p2)   ;;  %v841_v8 = vld [vmem:[%s1030_s1 + $0x58] sm:$0xff] (!%p140_p2)  }
   0x8   : > { %750 = vmatprep.subr.bf16.mxu0 (!%p140_p2), %v835_v2  ;;  %800 = vmatprep.subr.bf16.mxu1 (!%p140_p2), %v836_v3  ;;  %v842_v9 = vld [vmem:[%s1030_s1 + $0x90] sm:$0xff] (!%p140_p2)   ;;  %v843_v10 = vld [vmem:[%s1030_s1 + $0x18] sm:$0xff] (!%p140_p2)   ;;  %v844_v11 = vld [vmem:[%s1030_s1 + $0x60] sm:$0xff] (!%p140_p2)  }
   0x9   : > { %801 = vmatpush3.bf16.msra.mxu1 (!%p140_p2), %v836_v3  ;;  %v845_v12 = vld [vmem:[%s1030_s1 + $0x98] sm:$0xff] (!%p140_p2)   ;;  %v846_v13 = vld [vmem:[%s1030_s1 + $0x20] sm:$0xff] (!%p140_p2)   ;;  %v847_v15 = vld [vmem:[%s1030_s1 + $0x68] sm:$0xff] (!%p140_p2)  }
   0xa   : > { %802 = vmatprep.subr.bf16.mxu1 (!%p140_p2), %v839_v6  ;;  %v848_v14 = vld [vmem:[%s1030_s1 + $0xa0] sm:$0xff] (!%p140_p2)   ;;  %v849_v16 = vld [vmem:[%s1030_s1 + $0x28] sm:$0xff] (!%p140_p2)   ;;  %v850_v18 = vld [vmem:[%s1030_s1 + $0x70] sm:$0xff] (!%p140_p2)  }
   0xb   : > { %751 = vmatpush3.bf16.msra.mxu0 (!%p140_p2), %v837_v4  ;;  %v851_v17 = vld [vmem:[%s1030_s1 + $0xa8] sm:$0xff] (!%p140_p2)   ;;  %v852_v19 = vld [vmem:[%s1030_s1 + $0x30] sm:$0xff] (!%p140_p2)   ;;  %v853_v20 = vld [vmem:[%s1030_s1 + $0x78] sm:$0xff] (!%p140_p2)  }
   0xc   : > { %752 = vmatprep.subr.bf16.mxu0 (!%p140_p2), %v838_v5  ;;  %v854_v21 = vld [vmem:[%s1030_s1 + $0xb0] sm:$0xff] (!%p140_p2)   ;;  %v855_v23 = vld [vmem:[%s1030_s1 + $0x38] sm:$0xff] (!%p140_p2)   ;;  %v693_v38 = vld [vmem:[%s1031_s2] ss:$0 sm:$0xff] (!%p140_p2) }
   0xd   : > { %803 = vmatpush3.bf16.msra.mxu1 %v839_v6  ;;  %s1034_s28 = smov (!%p165_p3, %s689_s28), 15  ;;  %v859_v25 = vld [vmem:[%s1030_s1 + $0xb8] sm:$0xff]  }
   0xe   : > { %804 = vmatprep.subr.bf16.mxu1 %v842_v9  ;;  %s824_s21 = smul.u32 12, %s1034_s28  ;;  %s692_s18 = sshll.u32 %s1034_s28, 2 }
   0xf   : > { %753 = vmatpush3.bf16.msra.mxu0 %v840_v7 }
  0x10   : > { %754 = vmatprep.subr.bf16.mxu0 %v841_v8  ;;  %s975_s6 = scalar_lea.vmem %s1029_s0, %s824_s21  ;;  %s1008_s21 = scalar_lea.vmem %s1032_s3, %s692_s18 }
  0x11   : > { %805 = vmatpush3.bf16.msra.mxu1 %v842_v9  ;;  %v858_v22 = vld [vmem:[%s975_s6 + $0x4] ss:$12 sps:$4 sm:$0xff]   ;;  %v860_v24 = vld [vmem:[%s975_s6 + $0x8] ss:$12 sps:$4 sm:$0xff]   ;;  %v856_v26 = vld [vmem:[%s975_s6] ss:$12 sps:$4 sm:$0xff]  }
  0x12   : > { %806 = vmatprep.subr.bf16.mxu1 %v845_v12  ;;  %489 = vmatprep.mubr.bf16.mxu0 %v858_v22  ;;  %v862_v27 = vld [vmem:[%s975_s6 + $0x1c] ss:$12 sps:$4 sm:$0xff]   ;;  %v861_v28 = vld [vmem:[%s975_s6 + $0x20] ss:$12 sps:$4 sm:$0xff]   ;;  %v868_v29 = vld [vmem:[%s975_s6 + $0x38] ss:$12 sps:$4 sm:$0xff]  }
  0x13   : > { %755 = vmatpush3.bf16.msra.mxu0 %v843_v10  ;;  %816 = vmatprep.mubr.bf16.mxu1 %v860_v24  ;;  %v864_v30 = vld [vmem:[%s975_s6 + $0x18] ss:$12 sps:$4 sm:$0xff]   ;;  %v865_v31 = vld [vmem:[%s975_s6 + $0x34] ss:$12 sps:$4 sm:$0xff]   ;;  %v869_v32 = vld [vmem:[%s975_s6 + $0x50] ss:$12 sps:$4 sm:$0xff]  }
  0x14   : > { %756 = vmatprep.subr.bf16.mxu0 %v844_v11  ;;  %v867_v33 = vld [vmem:[%s975_s6 + $0x30] ss:$12 sps:$4 sm:$0xff]   ;;  %v870_v34 = vld [vmem:[%s975_s6 + $0x4c] ss:$12 sps:$4 sm:$0xff]   ;;  %v872_v35 = vld [vmem:[%s975_s6 + $0x48] ss:$12 sps:$4 sm:$0xff]  }
  0x15   : > { %807 = vmatpush3.bf16.msra.mxu1 %v845_v12 }
  0x16   : > { %808 = vmatprep.subr.bf16.mxu1 %v848_v14 }
  0x17   : > { %757 = vmatpush3.bf16.msra.mxu0 %v846_v13 }
  0x18   : > { %758 = vmatprep.subr.bf16.mxu0 %v847_v15 }
  0x19   : > { %809 = vmatpush3.bf16.msra.mxu1 %v848_v14 }
  0x1a   : > { %810 = vmatprep.subr.bf16.mxu1 %v851_v17 }
  0x1b   : > { %759 = vmatpush3.bf16.msra.mxu0 %v849_v16 }
  0x1c   : > { %760 = vmatprep.subr.bf16.mxu0 %v850_v18 }
  0x1d   : > { %811 = vmatpush3.bf16.msra.mxu1 %v851_v17 }
  0x1e   : > { %812 = vmatprep.subr.bf16.mxu1 %v854_v21 }
  0x1f   : > { %761 = vmatpush3.bf16.msra.mxu0 %v852_v19 }
  0x20   : > { %762 = vmatprep.subr.bf16.mxu0 %v853_v20 }
  0x21   : > { %813 = vmatpush3.bf16.msra.mxu1 %v854_v21 }
  0x22   : > { %814 = vmatprep.subr.bf16.mxu1 %v859_v25 }
  0x23   : > { %763 = vmatpush3.bf16.msra.mxu0 %v855_v23 }
  0x25   : > { %815 = vmatpush3.bf16.msra.mxu1 %v859_v25 }
  0x26   : > { %490 = vmatmul.mubr.bf16.vlgmr.msra.gmra.mrb[0].mxu0 %v856_v26 }
  0x27   : > { %497 = vmatprep.mubr.bf16.mxu0 %v862_v27 }
  0x28   : > { %817 = vmatmul.mubr.bf16.vlgmr.msra.gmra.mrb[0].mxu1 %v861_v28 }
  0x29   : > { %820 = vmatprep.mubr.bf16.mxu1 %v868_v29 }
  0x2e   : > { %498 = vmatmul.mubr.bf16.gmra.mrb[4].mxu0 %v864_v30 }
  0x2f   : > { %505 = vmatprep.mubr.bf16.mxu0 %v865_v31 }
  0x30   : > { %821 = vmatmul.mubr.bf16.gmra.mrb[4].mxu1 %v869_v32 }
  0x36   : > { %506 = vmatmul.mubr.bf16.gmra.mrb[8].mxu0 %v867_v33 }
  0x37   : > { %513 = vmatprep.mubr.bf16.mxu0 %v870_v34 }
  0x3e   : > { %514 = vmatmul.mubr.bf16.gmra.mrb[12].mxu0 %v872_v35 }
  0xf9   : > { %v764_v36 = vpop.f32.mrb[0].mxu0 }
  0xfa   : > { %v765_v37 = vpop.f32.mrb[1].mxu0 }
  0xfb   : > { %v766_v39 = vadd.f32 %v765_v37, %v764_v36  ;;  %v767_v40 = vpop.f32.mrb[2].mxu0  ;;  %v818_v42 = vpop.f32.mrb[0].mxu1 }
  0xfc   : > { %v768_v41 = vpop.f32.mrb[3].mxu0  ;;  %v556_v45 = vpop.f32.mrb[1].mxu1 }
  0xfd   : > { %v769_v43 = vadd.f32 %v768_v41, %v767_v40  ;;  %v492_v44 = vadd.f32 %v766_v39, %v693_v38  ;;  %v819_v46 = vpop.f32.mrb[2].mxu1 }
  0xfe   : > { %v559_v49 = vpop.f32.mrb[3].mxu1 }
  0xff   : > { %v557_v47 = vadd.f32 %v556_v45, %v492_v44  ;;  %v495_v48 = vadd.f32 %v769_v43, %v693_v38 }
 0x101   : > { %v740_v50 = vpack.c.bf16 %v557_v47, %v557_v47  ;;  %v560_v51 = vadd.f32 %v559_v49, %v495_v48  ;;  %v770_v52 = vpop.f32.mrb[4].mxu0 }
 0x102   : > { %v771_v53 = vpop.f32.mrb[5].mxu0 }
 0x103   : > { %620 = vst.msk [vmem:[%s1008_s21] sm:$0xf] %vm619_vm0, %v740_v50  ;;  %v741_v54 = vpack.c.bf16 %v560_v51, %v560_v51  ;;  %v772_v55 = vadd.f32 %v771_v53, %v770_v52  ;;  %v773_v56 = vpop.f32.mrb[6].mxu0  ;;  %v822_v58 = vpop.f32.mrb[4].mxu1 }
 0x104   : > { %v774_v57 = vpop.f32.mrb[7].mxu0  ;;  %v572_v61 = vpop.f32.mrb[5].mxu1 }
 0x105   : > { %621 = vst.msk [vmem:[%s1008_s21 + $0x4] sm:$0xf] %vm619_vm0, %v741_v54  ;;  %v500_v59 = vadd.f32 %v772_v55, %v693_v38  ;;  %v775_v60 = vadd.f32 %v774_v57, %v773_v56  ;;  %v823_v62 = vpop.f32.mrb[6].mxu1 }
 0x106   : > { %v575_v1 = vpop.f32.mrb[7].mxu1 }
 0x107   : > { %v565_v63 = vadd.f32 %v818_v42, %v500_v59  ;;  %v503_v0 = vadd.f32 %v775_v60, %v693_v38 }
 0x109   : > { %v742_v2 = vpack.c.bf16 %v565_v63, %v565_v63  ;;  %v568_v3 = vadd.f32 %v819_v46, %v503_v0  ;;  %v776_v4 = vpop.f32.mrb[8].mxu0 }
 0x10a   : > { %v777_v5 = vpop.f32.mrb[9].mxu0 }
 0x10b   : > { %622 = vst.msk [vmem:[%s1008_s21 + $0x8] sm:$0xf] %vm619_vm0, %v742_v2  ;;  %v743_v6 = vpack.c.bf16 %v568_v3, %v568_v3  ;;  %v778_v7 = vadd.f32 %v777_v5, %v776_v4  ;;  %v779_v8 = vpop.f32.mrb[10].mxu0 }
 0x10c   : > { %v780_v9 = vpop.f32.mrb[11].mxu0 }
 0x10d   : > { %623 = vst.msk [vmem:[%s1008_s21 + $0xc] sm:$0xf] %vm619_vm0, %v743_v6  ;;  %v781_v10 = vadd.f32 %v780_v9, %v779_v8  ;;  %v508_v11 = vadd.f32 %v778_v7, %v693_v38 }
 0x10f   : > { %v573_v12 = vadd.f32 %v572_v61, %v508_v11  ;;  %v511_v13 = vadd.f32 %v781_v10, %v693_v38 }
 0x111   : > { %v744_v14 = vpack.c.bf16 %v573_v12, %v573_v12  ;;  %v576_v15 = vadd.f32 %v575_v1, %v511_v13  ;;  %v782_v16 = vpop.f32.mrb[12].mxu0 }
 0x112   : > { %v783_v17 = vpop.f32.mrb[13].mxu0 }
 0x113   : > { %624 = vst.msk [vmem:[%s1008_s21 + $0x10] sm:$0xf] %vm619_vm0, %v744_v14  ;;  %v745_v18 = vpack.c.bf16 %v576_v15, %v576_v15  ;;  %v784_v19 = vadd.f32 %v783_v17, %v782_v16  ;;  %v785_v20 = vpop.f32.mrb[14].mxu0 }
 0x114   : > { %v786_v21 = vpop.f32.mrb[15].mxu0 }
 0x115   : > { %625 = vst.msk [vmem:[%s1008_s21 + $0x14] sm:$0xf] %vm619_vm0, %v745_v18  ;;  %v516_v22 = vadd.f32 %v784_v19, %v693_v38  ;;  %v787_v23 = vadd.f32 %v786_v21, %v785_v20 }
 0x117   : > { %v581_v24 = vadd.f32 %v822_v58, %v516_v22  ;;  %v519_v25 = vadd.f32 %v787_v23, %v693_v38 }
 0x119   : > { %v746_v26 = vpack.c.bf16 %v581_v24, %v581_v24  ;;  %v584_v27 = vadd.f32 %v823_v62, %v519_v25 }
 0x11b   : > { %626 = vst.msk [vmem:[%s1008_s21 + $0x18] sm:$0xf] %vm619_vm0, %v746_v26  ;;  %v747_v28 = vpack.c.bf16 %v584_v27, %v584_v27 }
 0x11d   : > { %627 = vst.msk [vmem:[%s1008_s21 + $0x1c] sm:$0xf] %vm619_vm0, %v747_v28 }
 0x11e PF: > { %s13_s12 = sadd.s32 1, %s879_s12  }
 0x11f   : > { %p10_p4 = scmp.ge.s32.totalorder %s13_s12, 4  }
 0x121   :  { %12 = sbr.rel (!%p10_p4) target bundleno = 1 (0x1), region = 62 }

// kernel: as_mlp_forward.57
= control target key start
LH: loop header
LB: loop body
LE: loop exit
PB: predicated region body
PF: predicated region fallthrough
CT: control target
= control target key end

     0   :  { %9 = vsyncpa [#allocation3], 0  ;;  %s589_s15 = smov 0   ;;  %s591_s16 = smov 0   ;;  %s683_s0 = inlined_call_operand.vmem [shape: f32[2,2], index: 0, kind: input, shape index: {}]   ;;  %s684_s1 = inlined_call_operand.vmem [shape: bf16[2,64,16], index: 1, kind: input, shape index: {}]   ;;  %s685_s2 = inlined_call_operand.vmem [shape: f32[1,16], index: 2, kind: input, shape index: {}]   ;;  %s686_s3 = inlined_call_operand.vmem [shape: f32[1,16], index: 3, kind: input, shape index: {}]   ;;  %s687_s4 = inlined_call_operand.vmem [shape: bf16[2,64,16], index: 4, kind: output, shape index: {}]  }
   0x1   :  { %s593_s17 = smov 0   ;;  %s595_s18 = smov 0  }
   0x2   :  { %s597_s19 = smov 0  }
   0x3 LB: > { %s418_s20 = sadd.s32 4294967295, %s561_s19   ;;  %s24_s21 = sadd.s32 1, %s553_s17  ;;  %s561_s19 = sphi %s597_s19, %s15_s19   ;;  %s557_s18 = sphi %s595_s18, %s693_s18   ;;  %s553_s17 = sphi %s593_s17, %s692_s17   ;;  %s549_s16 = sphi %s591_s16, %s691_s16   ;;  %s545_s15 = sphi %s589_s15, %s690_s15  }
   0x4   : > { %p25_p0 = scmp.ge.s32.totalorder %s24_s21, 2  ;;  %s27_s22 = sadd.s32 1, %s557_s18 }
   0x5   : > { %p420_p1 = scmp.ge.s32.totalorder %s561_s19, 1  ;;  %p151_p2 = scmp.lt.s32.totalorder %s561_s19, 5 }
   0x6   : > { %s695_s21 = smov (%p25_p0, %s24_s21), 0  ;;  %s697_s22 = smov (!%p25_p0, %s27_s22), %s557_s18 }
   0x7   : > { %p622_p3 = pnand %p420_p1, %p151_p2  ;;  %p29_p4 = scmp.ge.s32.totalorder %s697_s22, 2 }
   0x8   : > { %p626_p5 = scmp.eq.s32.totalorder %s418_s20, 0  ;;  %s164_s27 = sshll.u32 %s683_s0, 4  ;;  %s165_s27 = int_to_ptr.vmem [resolvable:$true] %s164_s27 }
   0x9   : > { %p457_p6 = pneg %p622_p3  ;;  %s699_s22 = smov (%p29_p4, %s697_s22), 0 }
   0xa   : > { %s504_s28 = scalar_lea.vmem %s165_s27, 32  ;;  %p512_p12 = scmp.lt.s32.totalorder %s165_s27, %s165_s27 }
   0xb   : > { %p458_p7 = pnand %p626_p5, %p457_p6  ;;  %p505_p8 = scmp.ne.s32.totalorder %s165_s27, %s504_s28 }
   0xc   : > { %p513_p13 = scmp.lt.s32.totalorder %s504_s28, %s504_s28 }
   0xd   : > { %p506_p9 = pneg %p458_p7 }
   0xe   : > { %p514_p0 = por %p513_p13, %p512_p12 }
   0xf   : > { %p507_p10 = pnand %p506_p9, %p505_p8 }
  0x11   : > { %p508_p11 = pneg %p507_p10 }
  0x13   : > { %p515_p1 = pnand %p514_p0, %p508_p11 }
  0x15   : > { %518 = shalt.err (!%p515_p1)
}
  0x16   : > { %s563_s29 = smov [#allocation2]   ;;  %196 = sbr.rel (%p622_p3) target bundleno = 54 (0x36), region = 36 }
  0x17   : > { %460 = dma.vmem_to_smem (!%p458_p7), %s165_s27, 32, %s563_s29, [#allocation3]  }
  0x1d   : > { %540 = dma.done.wait (%p626_p5), [#allocation3], 32  }
  0x1e   : > { %542 = vsyncadd (%p626_p5), [#allocation3], 4294967264 }
  0x1f   : > { %202 = sfence }
  0x20   : > { %s425_s30 = sshll.u32 %s545_s15, 2  ;;  %p232_p2 = scmp.lt.s32.totalorder %s549_s16, 1  ;;  %v432_v12 = vld [vmem:[%s685_s2] ss:$0 sm:$0xff]  ;;  %vm311_vm0 = vcmask 125952  }
  0x21   : > { %p234_p4 = scmp.lt.s32.totalorder %s425_s30, 7  ;;  %s431_s5 = sshll.u32 %s549_s16, 7  ;;  %v433_v17 = vld [vmem:[%s686_s3] ss:$0 sm:$0xff] }
  0x22   : > { %s701_s16 = smov (!%p232_p2, %s549_s16), 1  ;;  %s252_s7 = sld [smem:[#allocation2 + %s431_s5]] }
  0x23   : > { %s703_s30 = smov (!%p234_p4, %s425_s30), 7  ;;  %s426_s6 = sshll.u32 %s701_s16, 3 }
  0x24   : > { %s649_s8 = sadd.s32 %s426_s6, %s703_s30  ;;  %s253_s9 = sadd.s32 1, %s431_s5 }
  0x25   : > { %s427_s10 = sshll.u32 %s649_s8, 2  ;;  %s254_s11 = sld [smem:[#allocation2 + %s253_s9]] }
  0x26   : > { %s239_s14 = scalar_lea.vmem %s684_s1, %s427_s10  ;;  %s249_s26 = scalar_lea.vmem %s687_s4, %s427_s10 }
  0x27   : > { %v445_v0 = vld [vmem:[%s239_s14] sm:$0xff]   ;;  %v452_v1 = vld [vmem:[%s239_s14 + $0x8] sm:$0xff]  }
  0x28   : > { %v446_v2 = vunpack.c.l.bf16 %v445_v0  ;;  %v447_v3 = vunpack.c.h.bf16 %v445_v0  ;;  %v450_v4 = vunpack.c.l.bf16 %v452_v1  ;;  %v451_v5 = vunpack.c.h.bf16 %v452_v1 }
  0x29   : > { %v263_v6 = vstv %s252_s7 }
  0x2a   : > { %v264_v7 = vsub.f32 %v446_v2, %v263_v6  ;;  %v265_v8 = vsub.f32 %v447_v3, %v263_v6  ;;  %v266_v9 = vsub.f32 %v450_v4, %v263_v6  ;;  %v267_v10 = vsub.f32 %v451_v5, %v263_v6 }
  0x2b   : > { %v268_v11 = vstv %s254_s11 }
  0x2c   : > { %v269_v13 = vmul.f32 %v268_v11, %v264_v7  ;;  %v270_v14 = vmul.f32 %v268_v11, %v265_v8  ;;  %v271_v15 = vmul.f32 %v268_v11, %v266_v9  ;;  %v272_v16 = vmul.f32 %v268_v11, %v267_v10 }
  0x2e   : > { %v280_v18 = vmul.f32 %v432_v12, %v269_v13  ;;  %v281_v19 = vmul.f32 %v432_v12, %v270_v14  ;;  %v282_v20 = vmul.f32 %v432_v12, %v271_v15  ;;  %v283_v21 = vmul.f32 %v432_v12, %v272_v16 }
  0x30   : > { %v291_v22 = vadd.f32 %v433_v17, %v280_v18  ;;  %v292_v23 = vadd.f32 %v433_v17, %v281_v19  ;;  %v293_v24 = vadd.f32 %v433_v17, %v282_v20  ;;  %v294_v25 = vadd.f32 %v433_v17, %v283_v21 }
  0x32   : > { %v440_v26 = vpack.c.bf16 %v291_v22, %v291_v22  ;;  %v441_v27 = vpack.c.bf16 %v292_v23, %v292_v23  ;;  %v442_v28 = vpack.c.bf16 %v293_v24, %v293_v24  ;;  %v443_v29 = vpack.c.bf16 %v294_v25, %v294_v25 }
  0x34   : > { %312 = vst.msk [vmem:[%s249_s26] sm:$0xf] %vm311_vm0, %v440_v26  ;;  %313 = vst.msk [vmem:[%s249_s26 + $0x4] sm:$0xf] %vm311_vm0, %v441_v27 }
  0x35   : > { %314 = vst.msk [vmem:[%s249_s26 + $0x8] sm:$0xf] %vm311_vm0, %v442_v28  ;;  %315 = vst.msk [vmem:[%s249_s26 + $0xc] sm:$0xf] %vm311_vm0, %v443_v29 }
  0x36 PF: > { %s15_s19 = sadd.s32 1, %s561_s19   ;;  %s690_s15 = smov %s553_s17 }
  0x37   : > { %p12_p3 = scmp.ge.s32.totalorder %s15_s19, 6   ;;  %s691_s16 = smov %s557_s18 }
  0x38   : > { %s692_s17 = smov %s695_s21  ;;  %s693_s18 = smov %s699_s22 }
  0x39   :  { %14 = sbr.rel (!%p12_p3) target bundleno = 3 (0x3), region = 71 }
  0x40   :  { %346 = vsyncpa [#allocation3], 1 }
  0x41   :  { %348 = vsyncpa [#allocation3 + $0x1], 1 }

// kernel: as_mlp_forward.56
= control target key start
LH: loop header
LB: loop body
LE: loop exit
PB: predicated region body
PF: predicated region fallthrough
CT: control target
= control target key end

     0   :  { %6 = vsyncpa [#allocation3], 0  ;;  %s364_s6 = smov 0   ;;  %s415_s0 = inlined_call_operand.vmem [shape: bf16[2,64,16], index: 0, kind: input, shape index: {}]   ;;  %s416_s1 = inlined_call_operand.vmem [shape: f32[2,2], index: 1, kind: output, shape index: {}]  }
   0x1 LB: > { %s370_s7 = sadd.s32 4294967295, %s351_s6   ;;  %p277_p0 = scmp.ge.s32.totalorder %s351_s6, 1  ;;  %s351_s6 = sphi %s364_s6, %s12_s6  }
   0x2   : > { %p83_p1 = scmp.lt.s32.totalorder %s351_s6, 3 }
   0x4   : > { %p84_p2 = pnand %p277_p0, %p83_p1 }
   0x5   : > { %p98_p3 = scmp.lt.s32.totalorder (!%p84_p2), %s370_s7, 1  ;;  %vm119_vm0 = vcmask (!%p84_p2), 130048   ;;  %s280_s13 = sshll.u32 (!%p84_p2), %s370_s7, 7 }
   0x6   : > { %87 = sbr.rel (%p84_p2) target bundleno = 442 (0x1ba), region = 24  ;;  %s396_s15 = scalar_lea.smem (!%p84_p2), [#allocation2], %s280_s13 }
   0x7   : > { %s229_s18 = sshll.u32 (!%p84_p2), %s416_s1, 4  ;;  %s256_s19 = scalar_lea.smem (!%p84_p2), %s396_s15, 1 [#allocation2]  ;;  %s230_s18 = int_to_ptr.vmem [resolvable:$true] %s229_s18 }
   0x8   : > { %p314_p4 = scmp.eq.s32.totalorder (!%p84_p2), %s370_s7, 1  ;;  %s327_s21 = scalar_lea.vmem (!%p84_p2), %s230_s18, 32 }
   0x9   : > { %p328_p5 = scmp.ne.s32.totalorder (!%p84_p2), %s230_s18, %s327_s21  ;;  %p334_p8 = scmp.lt.s32.totalorder (!%p84_p2), %s230_s18, %s230_s18 }
   0xa   : > { %p335_p9 = scmp.lt.s32.totalorder (!%p84_p2), %s327_s21, %s327_s21 }
   0xb   : > { %p329_p6 = pnand (!%p84_p2), %p328_p5, %p314_p4 }
   0xc   : > { %p336_p10 = por (!%p84_p2), %p335_p9, %p334_p8 }
   0xd   : > { %s99_s8 = scalar_select %p98_p3, %s370_s7, 1 }
   0xe   : > { %p330_p7 = pneg %p329_p6 }
   0xf   : > { %s286_s9 = sshll.u32 %s99_s8, 5 }
  0x10   : > { %s102_s12 = scalar_lea.vmem %s415_s0, %s286_s9  ;;  %p337_p11 = pnand %p336_p10, %p330_p7 }
  0x11   : > { %v288_v0 = vld [vmem:[%s102_s12] sm:$0xff]   ;;  %v303_v1 = vld [vmem:[%s102_s12 + $0x8] sm:$0xff]   ;;  %v304_v6 = vld [vmem:[%s102_s12 + $0x10] sm:$0xff]  }
  0x12   : > { %v289_v2 = vunpack.c.l.bf16 %v288_v0  ;;  %v293_v3 = vunpack.c.l.bf16 %v303_v1  ;;  %v290_v4 = vunpack.c.h.bf16 %v288_v0  ;;  %v294_v5 = vunpack.c.h.bf16 %v303_v1  ;;  %v305_v13 = vld [vmem:[%s102_s12 + $0x18] sm:$0xff]  }
  0x13   : > { %v297_v11 = vunpack.c.l.bf16 %v304_v6  ;;  %v298_v12 = vunpack.c.h.bf16 %v304_v6  ;;  %v301_v16 = vunpack.c.l.bf16 %v305_v13  ;;  %v302_v17 = vunpack.c.h.bf16 %v305_v13 }
  0x14   : > { %v120_v7 = vsel %vm119_vm0, %v289_v2, 0.0  ;;  %v126_v8 = vsel %vm119_vm0, %v293_v3, 0.0  ;;  %v123_v9 = vsel %vm119_vm0, %v290_v4, 0.0  ;;  %v129_v10 = vsel %vm119_vm0, %v294_v5, 0.0 }
  0x15   : > { %121 = vadd.xlane.f32.xlu0 %v120_v7  ;;  %127 = vadd.xlane.f32.xlu1 %v126_v8  ;;  %v132_v14 = vsel %vm119_vm0, %v297_v11, 0.0  ;;  %v135_v15 = vsel %vm119_vm0, %v298_v12, 0.0  ;;  %v138_v18 = vsel %vm119_vm0, %v301_v16, 0.0  ;;  %v141_v19 = vsel %vm119_vm0, %v302_v17, 0.0 }
  0x19   : > { %124 = vadd.xlane.f32.xlu0 %v123_v9  ;;  %130 = vadd.xlane.f32.xlu1 %v129_v10 }
  0x1d   : > { %133 = vadd.xlane.f32.xlu0 %v132_v14  ;;  %136 = vadd.xlane.f32.xlu1 %v135_v15 }
  0x21   : > { %139 = vadd.xlane.f32.xlu0 %v138_v18  ;;  %142 = vadd.xlane.f32.xlu1 %v141_v19 }
  0xa2   : > { %v122_v20 = vpop.xlane.xlu0 %121  ;;  %v128_v21 = vpop.xlane.xlu1 %127 }
  0xa6   : > { %v125_v22 = vpop.xlane.xlu0 %124  ;;  %v131_v23 = vpop.xlane.xlu1 %130 }
  0xa7   : > { %v144_v24 = vadd.f32 %v125_v22, %v122_v20 }
  0xa9   : > { %v145_v25 = vadd.f32 %v144_v24, %v128_v21 }
  0xaa   : > { %v134_v26 = vpop.xlane.xlu0 %133  ;;  %v137_v27 = vpop.xlane.xlu1 %136 }
  0xab   : > { %v146_v28 = vadd.f32 %v145_v25, %v131_v23 }
  0xad   : > { %v147_v29 = vadd.f32 %v146_v28, %v134_v26 }
  0xae   : > { %v140_v30 = vpop.xlane.xlu0 %139  ;;  %v143_v32 = vpop.xlane.xlu1 %142 }
  0xaf   : > { %v148_v31 = vadd.f32 %v147_v29, %v137_v27 }
  0xb1   : > { %v149_v33 = vadd.f32 %v148_v31, %v140_v30 }
  0xb3   : > { %v150_v34 = vadd.f32 %v149_v33, %v143_v32 }
  0xb5   : > { %v151_v35 = vrot.slane %v150_v34, 4 }
  0xb7   : > { %v152_v36 = vadd.f32 %v151_v35, %v150_v34 }
  0xb9   : > { %v153_v37 = vrot.slane %v152_v36, 2 }
  0xbb   : > { %v154_v38 = vadd.f32 %v153_v37, %v152_v36 }
  0xbd   : > { %v155_v39 = vrot.slane %v154_v38, 1 }
  0xbf   : > { %v156_v40 = vadd.f32 %v155_v39, %v154_v38 }
  0xc1   : > { %v157_v41 = vmul.f32 0.0009765625, %v156_v40 }
  0xc3   : > { %306 = vpush %v157_v41  ;;  %v159_v42 = vsub.f32 %v290_v4, %v157_v41  ;;  %v158_v43 = vsub.f32 %v289_v2, %v157_v41  ;;  %v161_v44 = vsub.f32 %v294_v5, %v157_v41  ;;  %v160_v45 = vsub.f32 %v293_v3, %v157_v41 }
  0xc4   : > { %v163_v48 = vsub.f32 %v298_v12, %v157_v41  ;;  %v162_v49 = vsub.f32 %v297_v11, %v157_v41  ;;  %v165_v54 = vsub.f32 %v302_v17, %v157_v41  ;;  %v164_v55 = vsub.f32 %v301_v16, %v157_v41 }
  0xc5   : > { %v167_v46 = vmul.f32 %v159_v42, %v159_v42  ;;  %v166_v47 = vmul.f32 %v158_v43, %v158_v43  ;;  %v169_v52 = vmul.f32 %v161_v44, %v161_v44  ;;  %v168_v53 = vmul.f32 %v160_v45, %v160_v45 }
  0xc6   : > { %v171_v58 = vmul.f32 %v163_v48, %v163_v48  ;;  %v170_v59 = vmul.f32 %v162_v49, %v162_v49  ;;  %v173_v62 = vmul.f32 %v165_v54, %v165_v54  ;;  %v172_v63 = vmul.f32 %v164_v55, %v164_v55 }
  0xc7   : > { %v177_v50 = vsel %vm119_vm0, %v167_v46, 0.0  ;;  %v174_v51 = vsel %vm119_vm0, %v166_v47, 0.0  ;;  %v183_v56 = vsel %vm119_vm0, %v169_v52, 0.0  ;;  %v180_v57 = vsel %vm119_vm0, %v168_v53, 0.0 }
  0xc8   : > { %178 = vadd.xlane.f32.xlu1 %v177_v50  ;;  %175 = vadd.xlane.f32.xlu0 %v174_v51  ;;  %v189_v60 = vsel %vm119_vm0, %v171_v58, 0.0  ;;  %v186_v61 = vsel %vm119_vm0, %v170_v59, 0.0  ;;  %v195_v0 = vsel %vm119_vm0, %v173_v62, 0.0  ;;  %v192_v1 = vsel %vm119_vm0, %v172_v63, 0.0 }
  0xcc   : > { %184 = vadd.xlane.f32.xlu1 %v183_v56  ;;  %181 = vadd.xlane.f32.xlu0 %v180_v57 }
  0xd0   : > { %190 = vadd.xlane.f32.xlu1 %v189_v60  ;;  %187 = vadd.xlane.f32.xlu0 %v186_v61 }
  0xd4   : > { %196 = vadd.xlane.f32.xlu1 %v195_v0  ;;  %193 = vadd.xlane.f32.xlu0 %v192_v1 }
  0xf4   : > { %s307_s14 = spop %306 }
  0xf5   : > { %217 = sst [smem:[%s396_s15]] %s307_s14 }
 0x155   : > { %v179_v2 = vpop.xlane.xlu1 %178  ;;  %v176_v3 = vpop.xlane.xlu0 %175 }
 0x156   : > { %v198_v4 = vadd.f32 %v179_v2, %v176_v3 }
 0x159   : > { %v185_v5 = vpop.xlane.xlu1 %184  ;;  %v182_v6 = vpop.xlane.xlu0 %181 }
 0x15a   : > { %v199_v7 = vadd.f32 %v198_v4, %v182_v6 }
 0x15c   : > { %v200_v8 = vadd.f32 %v199_v7, %v185_v5 }
 0x15d   : > { %v191_v9 = vpop.xlane.xlu1 %190  ;;  %v188_v10 = vpop.xlane.xlu0 %187 }
 0x15e   : > { %v201_v11 = vadd.f32 %v200_v8, %v188_v10 }
 0x160   : > { %v202_v12 = vadd.f32 %v201_v11, %v191_v9 }
 0x161   : > { %v194_v13 = vpop.xlane.xlu0 %193  ;;  %v197_v15 = vpop.xlane.xlu1 %196 }
 0x162   : > { %v203_v14 = vadd.f32 %v202_v12, %v194_v13 }
 0x164   : > { %v204_v16 = vadd.f32 %v203_v14, %v197_v15 }
 0x166   : > { %v205_v17 = vrot.slane %v204_v16, 4 }
 0x168   : > { %v206_v18 = vadd.f32 %v205_v17, %v204_v16 }
 0x16a   : > { %v207_v19 = vrot.slane %v206_v18, 2 }
 0x16c   : > { %v208_v20 = vadd.f32 %v207_v19, %v206_v18 }
 0x16e   : > { %v209_v21 = vrot.slane %v208_v20, 1 }
 0x170   : > { %v210_v22 = vadd.f32 %v209_v21, %v208_v20 }
 0x172   : > { %v211_v23 = vmul.f32 0.0009765625, %v210_v22 }
 0x174   : > { %v212_v24 = vadd.f32 1e-05, %v211_v23 }
 0x176   : > { %325 = vrsqrt.f32 %v212_v24 }
 0x180   : > { %v326_v25 = vpop.eup %325 }
 0x181   : > { %308 = vpush %v326_v25 }
 0x1b2   : > { %s309_s20 = spop %308 }
 0x1b3   : > { %221 = sst [smem:[%s256_s19]] %s309_s20 }
 0x1b4   : > { %340 = shalt.err (!%p337_p11)
}
 0x1b5   : > { %s353_s22 = smov [#allocation2]  }
 0x1b6   : > { %311 = dma.smem_to_vmem (%p314_p4), %s353_s22, 32, %s230_s18, [#allocation3]  }
 0x1b7   : > { %346 = dma.done.wait (%p314_p4), [#allocation3], 32  }
 0x1b8   : > { %348 = vsyncadd (%p314_p4), [#allocation3], 4294967264 }
 0x1b9   : > { %237 = sfence }
 0x1ba PF: > { %s12_s6 = sadd.s32 1, %s351_s6  }
 0x1bb   : > { %p9_p12 = scmp.ge.s32.totalorder %s12_s6, 4  }
 0x1bd   :  { %11 = sbr.rel (!%p9_p12) target bundleno = 1 (0x1), region = 53 }
 0x1c4   :  { %243 = vsyncpa [#allocation3], 1 }
 0x1c5   :  { %245 = vsyncpa [#allocation3 + $0x1], 1 }

// kernel: as_mlp_forward.60
= control target key start
LH: loop header
LB: loop body
LE: loop exit
PB: predicated region body
PF: predicated region fallthrough
CT: control target
= control target key end

     0   :  { %s485_s12 = smov 0   ;;  %s516_s0 = inlined_call_operand.vmem [shape: bf16[128,4], index: 0, kind: input, shape index: {}]   ;;  %s517_s1 = inlined_call_operand.vmem [shape: bf16[4,4], index: 1, kind: input, shape index: {}]   ;;  %s518_s2 = inlined_call_operand.vmem [shape: f32[1,4], index: 2, kind: input, shape index: {}]   ;;  %s519_s3 = inlined_call_operand.vmem [shape: bf16[128,4], index: 3, kind: output, shape index: {}]  }
   0x1 LB: > { %s390_s13 = sadd.s32 4294967295, %s463_s12   ;;  %p394_p0 = scmp.ge.s32.totalorder %s463_s12, 1  ;;  %s463_s12 = sphi %s485_s12, %s13_s12  }
   0x2   : > { %p138_p1 = scmp.lt.s32.totalorder %s463_s12, 3 }
   0x4   : > { %p139_p2 = pnand %p394_p0, %p138_p1 }
   0x5   : > { %v183_v0 = vld [vmem:[%s517_s1] sm:$0x3] (!%p139_p2)  ;;  %vm224_vm0 = vcmask (!%p139_p2), 1041408   ;;  %s395_s16 = sshll.u32 (!%p139_p2), %s390_s13, 3  ;;  %vm211_vm1 = vcmask (!%p139_p2), 31744   ;;  %vm325_vm2 = vcmask (!%p139_p2), 27648  }
   0x6   : > { %142 = sbr.rel (%p139_p2) target bundleno = 238 (0xee), region = 32  ;;  %443 = vmatprep.subr.msk.bf16.mxu0 (!%p139_p2), %vm224_vm0, %v183_v0  ;;  %444 = vmatprep.subr.msk.bf16.mxu1 (!%p139_p2), %vm224_vm0, %v183_v0  ;;  %v226_v1 = vsel (!%p139_p2), %vm224_vm0, %v183_v0, 0  ;;  %p163_p3 = scmp.lt.s32.totalorder (!%p139_p2), %s395_s16, 15  ;;  %v399_v6 = vld [vmem:[%s518_s2] ss:$0 sm:$0xff] (!%p139_p2) }
   0x7   : > { %432 = vmatpush3.bf16.msra.mxu0 (!%p139_p2), %v226_v1  ;;  %442 = vmatpush3.bf16.msra.mxu1 (!%p139_p2), %v226_v1 }
   0xd   : > { %s521_s16 = smov (!%p163_p3, %s395_s16), 15 }
   0xe   : > { %s396_s17 = sshll.u32 %s521_s16, 2 }
   0xf   : > { %s166_s20 = scalar_lea.vmem %s516_s0, %s396_s17  ;;  %s172_s25 = scalar_lea.vmem %s519_s3, %s396_s17 }
  0x10   : > { %v453_v2 = vld [vmem:[%s166_s20] sm:$0xff]   ;;  %v454_v3 = vld [vmem:[%s166_s20 + $0x10] sm:$0xff]   ;;  %v455_v4 = vld [vmem:[%s166_s20 + $0x8] sm:$0xff]  }
  0x11   : > { %433 = vmatprep.mubr.msk.bf16.mxu0 %vm211_vm1, %v453_v2  ;;  %437 = vmatprep.mubr.msk.bf16.mxu1 %vm211_vm1, %v454_v3  ;;  %v456_v5 = vld [vmem:[%s166_s20 + $0x18] sm:$0xff]  }
  0x12   : > { %434 = vmatmul.mubr.msk.bf16.vlgmr.msra.gmra.mrb[0].mxu0 %vm211_vm1, %v455_v4  ;;  %438 = vmatmul.mubr.msk.bf16.vlgmr.msra.gmra.mrb[0].mxu1 %vm211_vm1, %v456_v5 }
  0xe5   : > { %v435_v7 = vpop.f32.mrb[0].mxu0  ;;  %v439_v9 = vpop.f32.mrb[0].mxu1 }
  0xe6   : > { %v271_v8 = vadd.f32 %v435_v7, %v399_v6  ;;  %v262_v10 = vpop.f32.mrb[1].mxu0  ;;  %v287_v11 = vadd.f32 %v439_v9, %v399_v6  ;;  %v278_v13 = vpop.f32.mrb[1].mxu1 }
  0xe7   : > { %v263_v12 = vadd.f32 %v399_v6, %v262_v10  ;;  %v436_v14 = vpop.f32.mrb[2].mxu0  ;;  %v279_v16 = vadd.f32 %v399_v6, %v278_v13  ;;  %v440_v18 = vpop.f32.mrb[2].mxu1 }
  0xe8   : > { %v420_v15 = vpack.c.bf16 %v271_v8, %v271_v8  ;;  %v274_v17 = vadd.f32 %v436_v14, %v399_v6  ;;  %v265_v19 = vpop.f32.mrb[3].mxu0  ;;  %v424_v20 = vpack.c.bf16 %v287_v11, %v287_v11  ;;  %v290_v22 = vadd.f32 %v440_v18, %v399_v6  ;;  %v281_v24 = vpop.f32.mrb[3].mxu1 }
  0xe9   : > { %v418_v21 = vpack.c.bf16 %v263_v12, %v263_v12  ;;  %v266_v23 = vadd.f32 %v399_v6, %v265_v19  ;;  %v422_v25 = vpack.c.bf16 %v279_v16, %v279_v16  ;;  %v282_v27 = vadd.f32 %v399_v6, %v281_v24 }
  0xea   : > { %328 = vst.msk [vmem:[%s172_s25 + $0x8] sm:$0xf] %vm325_vm2, %v420_v15  ;;  %v421_v26 = vpack.c.bf16 %v274_v17, %v274_v17  ;;  %332 = vst.msk [vmem:[%s172_s25 + $0x18] sm:$0xf] %vm325_vm2, %v424_v20  ;;  %v425_v28 = vpack.c.bf16 %v290_v22, %v290_v22 }
  0xeb   : > { %326 = vst.msk [vmem:[%s172_s25] sm:$0xf] %vm325_vm2, %v418_v21  ;;  %v419_v29 = vpack.c.bf16 %v266_v23, %v266_v23  ;;  %330 = vst.msk [vmem:[%s172_s25 + $0x10] sm:$0xf] %vm325_vm2, %v422_v25  ;;  %v423_v30 = vpack.c.bf16 %v282_v27, %v282_v27 }
  0xec   : > { %329 = vst.msk [vmem:[%s172_s25 + $0xc] sm:$0xf] %vm325_vm2, %v421_v26  ;;  %333 = vst.msk [vmem:[%s172_s25 + $0x1c] sm:$0xf] %vm325_vm2, %v425_v28 }
  0xed   : > { %327 = vst.msk [vmem:[%s172_s25 + $0x4] sm:$0xf] %vm325_vm2, %v419_v29  ;;  %331 = vst.msk [vmem:[%s172_s25 + $0x14] sm:$0xf] %vm325_vm2, %v423_v30 }
  0xee PF: > { %s13_s12 = sadd.s32 1, %s463_s12  }
  0xef   : > { %p10_p4 = scmp.ge.s32.totalorder %s13_s12, 4  }
  0xf1   :  { %12 = sbr.rel (!%p10_p4) target bundleno = 1 (0x1), region = 62 }

// kernel: as_mlp_forward.61
= control target key start
LH: loop header
LB: loop body
LE: loop exit
PB: predicated region body
PF: predicated region fallthrough
CT: control target
= control target key end

     0   :  { %s485_s12 = smov 0   ;;  %s516_s0 = inlined_call_operand.vmem [shape: bf16[128,6], index: 0, kind: input, shape index: {}]   ;;  %s517_s1 = inlined_call_operand.vmem [shape: bf16[6,6], index: 1, kind: input, shape index: {}]   ;;  %s518_s2 = inlined_call_operand.vmem [shape: f32[1,6], index: 2, kind: input, shape index: {}]   ;;  %s519_s3 = inlined_call_operand.vmem [shape: bf16[128,6], index: 3, kind: output, shape index: {}]  }
   0x1 LB: > { %s390_s13 = sadd.s32 4294967295, %s463_s12   ;;  %p394_p0 = scmp.ge.s32.totalorder %s463_s12, 1  ;;  %s463_s12 = sphi %s485_s12, %s13_s12  }
   0x2   : > { %p138_p1 = scmp.lt.s32.totalorder %s463_s12, 3 }
   0x4   : > { %p139_p2 = pnand %p394_p0, %p138_p1 }
   0x5   : > { %v183_v0 = vld [vmem:[%s517_s1] sm:$0x7] (!%p139_p2)  ;;  %vm224_vm0 = vcmask (!%p139_p2), 1042432   ;;  %s395_s16 = sshll.u32 (!%p139_p2), %s390_s13, 3  ;;  %vm211_vm1 = vcmask (!%p139_p2), 48128   ;;  %vm325_vm2 = vcmask (!%p139_p2), 44032  }
   0x6   : > { %142 = sbr.rel (%p139_p2) target bundleno = 238 (0xee), region = 32  ;;  %443 = vmatprep.subr.msk.bf16.mxu0 (!%p139_p2), %vm224_vm0, %v183_v0  ;;  %444 = vmatprep.subr.msk.bf16.mxu1 (!%p139_p2), %vm224_vm0, %v183_v0  ;;  %v226_v1 = vsel (!%p139_p2), %vm224_vm0, %v183_v0, 0  ;;  %p163_p3 = scmp.lt.s32.totalorder (!%p139_p2), %s395_s16, 15  ;;  %v399_v6 = vld [vmem:[%s518_s2] ss:$0 sm:$0xff] (!%p139_p2) }
   0x7   : > { %432 = vmatpush3.bf16.msra.mxu0 (!%p139_p2), %v226_v1  ;;  %442 = vmatpush3.bf16.msra.mxu1 (!%p139_p2), %v226_v1 }
   0xd   : > { %s521_s16 = smov (!%p163_p3, %s395_s16), 15 }
   0xe   : > { %s396_s17 = sshll.u32 %s521_s16, 2 }
   0xf   : > { %s166_s20 = scalar_lea.vmem %s516_s0, %s396_s17  ;;  %s172_s25 = scalar_lea.vmem %s519_s3, %s396_s17 }
  0x10   : > { %v453_v2 = vld [vmem:[%s166_s20] sm:$0xff]   ;;  %v454_v3 = vld [vmem:[%s166_s20 + $0x10] sm:$0xff]   ;;  %v455_v4 = vld [vmem:[%s166_s20 + $0x8] sm:$0xff]  }
  0x11   : > { %433 = vmatprep.mubr.msk.bf16.mxu0 %vm211_vm1, %v453_v2  ;;  %437 = vmatprep.mubr.msk.bf16.mxu1 %vm211_vm1, %v454_v3  ;;  %v456_v5 = vld [vmem:[%s166_s20 + $0x18] sm:$0xff]  }
  0x12   : > { %434 = vmatmul.mubr.msk.bf16.vlgmr.msra.gmra.mrb[0].mxu0 %vm211_vm1, %v455_v4  ;;  %438 = vmatmul.mubr.msk.bf16.vlgmr.msra.gmra.mrb[0].mxu1 %vm211_vm1, %v456_v5 }
  0xe5   : > { %v435_v7 = vpop.f32.mrb[0].mxu0  ;;  %v439_v9 = vpop.f32.mrb[0].mxu1 }
  0xe6   : > { %v271_v8 = vadd.f32 %v435_v7, %v399_v6  ;;  %v262_v10 = vpop.f32.mrb[1].mxu0  ;;  %v287_v11 = vadd.f32 %v439_v9, %v399_v6  ;;  %v278_v13 = vpop.f32.mrb[1].mxu1 }
  0xe7   : > { %v263_v12 = vadd.f32 %v399_v6, %v262_v10  ;;  %v436_v14 = vpop.f32.mrb[2].mxu0  ;;  %v279_v16 = vadd.f32 %v399_v6, %v278_v13  ;;  %v440_v18 = vpop.f32.mrb[2].mxu1 }
  0xe8   : > { %v420_v15 = vpack.c.bf16 %v271_v8, %v271_v8  ;;  %v274_v17 = vadd.f32 %v436_v14, %v399_v6  ;;  %v265_v19 = vpop.f32.mrb[3].mxu0  ;;  %v424_v20 = vpack.c.bf16 %v287_v11, %v287_v11  ;;  %v290_v22 = vadd.f32 %v440_v18, %v399_v6  ;;  %v281_v24 = vpop.f32.mrb[3].mxu1 }
  0xe9   : > { %v418_v21 = vpack.c.bf16 %v263_v12, %v263_v12  ;;  %v266_v23 = vadd.f32 %v399_v6, %v265_v19  ;;  %v422_v25 = vpack.c.bf16 %v279_v16, %v279_v16  ;;  %v282_v27 = vadd.f32 %v399_v6, %v281_v24 }
  0xea   : > { %328 = vst.msk [vmem:[%s172_s25 + $0x8] sm:$0xf] %vm325_vm2, %v420_v15  ;;  %v421_v26 = vpack.c.bf16 %v274_v17, %v274_v17  ;;  %332 = vst.msk [vmem:[%s172_s25 + $0x18] sm:$0xf] %vm325_vm2, %v424_v20  ;;  %v425_v28 = vpack.c.bf16 %v290_v22, %v290_v22 }
  0xeb   : > { %326 = vst.msk [vmem:[%s172_s25] sm:$0xf] %vm325_vm2, %v418_v21  ;;  %v419_v29 = vpack.c.bf16 %v266_v23, %v266_v23  ;;  %330 = vst.msk [vmem:[%s172_s25 + $0x10] sm:$0xf] %vm325_vm2, %v422_v25  ;;  %v423_v30 = vpack.c.bf16 %v282_v27, %v282_v27 }
  0xec   : > { %329 = vst.msk [vmem:[%s172_s25 + $0xc] sm:$0xf] %vm325_vm2, %v421_v26  ;;  %333 = vst.msk [vmem:[%s172_s25 + $0x1c] sm:$0xf] %vm325_vm2, %v425_v28 }
  0xed   : > { %327 = vst.msk [vmem:[%s172_s25 + $0x4] sm:$0xf] %vm325_vm2, %v419_v29  ;;  %331 = vst.msk [vmem:[%s172_s25 + $0x14] sm:$0xf] %vm325_vm2, %v423_v30 }
  0xee PF: > { %s13_s12 = sadd.s32 1, %s463_s12  }
  0xef   : > { %p10_p4 = scmp.ge.s32.totalorder %s13_s12, 4  }
  0xf1   :  { %12 = sbr.rel (!%p10_p4) target bundleno = 1 (0x1), region = 62 }

// kernel: as_mlp_forward.62
= control target key start
LH: loop header
LB: loop body
LE: loop exit
PB: predicated region body
PF: predicated region fallthrough
CT: control target
= control target key end

     0   :  { %s488_s12 = smov 0   ;;  %s519_s0 = inlined_call_operand.vmem [shape: bf16[128,7], index: 0, kind: input, shape index: {}]   ;;  %s520_s1 = inlined_call_operand.vmem [shape: bf16[7,7], index: 1, kind: input, shape index: {}]   ;;  %s521_s2 = inlined_call_operand.vmem [shape: f32[1,7], index: 2, kind: input, shape index: {}]   ;;  %s522_s3 = inlined_call_operand.vmem [shape: bf16[128,7], index: 3, kind: output, shape index: {}]  }
   0x1 LB: > { %s393_s13 = sadd.s32 4294967295, %s465_s12   ;;  %p397_p0 = scmp.ge.s32.totalorder %s465_s12, 1  ;;  %s465_s12 = sphi %s488_s12, %s13_s12  }
   0x2   : > { %p138_p1 = scmp.lt.s32.totalorder %s465_s12, 3 }
   0x4   : > { %p139_p2 = pnand %p397_p0, %p138_p1 }
   0x5   : > { %v183_v0 = vld [vmem:[%s520_s1] sm:$0xf] (!%p139_p2)  ;;  %vm224_vm0 = vcmask (!%p139_p2), 1042432   ;;  %vm225_vm1 = vcmask (!%p139_p2), 1043456   ;;  %s398_s16 = sshll.u32 (!%p139_p2), %s393_s13, 3  ;;  %v467_v1 = vmov (!%p139_p2), 65535  }
   0x6   : > { %142 = sbr.rel (%p139_p2) target bundleno = 238 (0xee), region = 32  ;;  %v226_v2 = vsel (!%p139_p2), %vm224_vm0, 4294967295, %v467_v1  ;;  %p163_p3 = scmp.lt.s32.totalorder (!%p139_p2), %s398_s16, 15  ;;  %vm211_vm2 = vcmask (!%p139_p2), 56320   ;;  %v402_v9 = vld [vmem:[%s521_s2] ss:$0 sm:$0xff] (!%p139_p2) }
   0x7   : > { %v227_v3 = vsel (!%p139_p2), %vm225_vm1, %v226_v2, 0  ;;  %vm328_vm3 = vcmask (!%p139_p2), 52224  }
   0x8   : > { %v229_v4 = vand.u32 (!%p139_p2), %v227_v3, %v183_v0 }
   0xa   : > { %434 = vmatprep.subr.bf16.mxu0 (!%p139_p2), %v229_v4  ;;  %444 = vmatprep.subr.bf16.mxu1 (!%p139_p2), %v229_v4 }
   0xb   : > { %435 = vmatpush3.bf16.msra.mxu0 (!%p139_p2), %v229_v4  ;;  %445 = vmatpush3.bf16.msra.mxu1 (!%p139_p2), %v229_v4 }
   0xd   : > { %s524_s16 = smov (!%p163_p3, %s398_s16), 15 }
   0xe   : > { %s399_s17 = sshll.u32 %s524_s16, 2 }
   0xf   : > { %s166_s20 = scalar_lea.vmem %s519_s0, %s399_s17  ;;  %s172_s25 = scalar_lea.vmem %s522_s3, %s399_s17 }
  0x10   : > { %v455_v5 = vld [vmem:[%s166_s20] sm:$0xff]   ;;  %v456_v6 = vld [vmem:[%s166_s20 + $0x10] sm:$0xff]   ;;  %v457_v7 = vld [vmem:[%s166_s20 + $0x8] sm:$0xff]  }
  0x11   : > { %436 = vmatprep.mubr.msk.bf16.mxu0 %vm211_vm2, %v455_v5  ;;  %440 = vmatprep.mubr.msk.bf16.mxu1 %vm211_vm2, %v456_v6  ;;  %v458_v8 = vld [vmem:[%s166_s20 + $0x18] sm:$0xff]  }
  0x12   : > { %437 = vmatmul.mubr.msk.bf16.vlgmr.msra.gmra.mrb[0].mxu0 %vm211_vm2, %v457_v7  ;;  %441 = vmatmul.mubr.msk.bf16.vlgmr.msra.gmra.mrb[0].mxu1 %vm211_vm2, %v458_v8 }
  0xe5   : > { %v438_v10 = vpop.f32.mrb[0].mxu0  ;;  %v442_v12 = vpop.f32.mrb[0].mxu1 }
  0xe6   : > { %v274_v11 = vadd.f32 %v438_v10, %v402_v9  ;;  %v265_v13 = vpop.f32.mrb[1].mxu0  ;;  %v290_v14 = vadd.f32 %v442_v12, %v402_v9  ;;  %v281_v16 = vpop.f32.mrb[1].mxu1 }
  0xe7   : > { %v266_v15 = vadd.f32 %v402_v9, %v265_v13  ;;  %v439_v17 = vpop.f32.mrb[2].mxu0  ;;  %v282_v19 = vadd.f32 %v402_v9, %v281_v16  ;;  %v443_v21 = vpop.f32.mrb[2].mxu1 }
  0xe8   : > { %v423_v18 = vpack.c.bf16 %v274_v11, %v274_v11  ;;  %v277_v20 = vadd.f32 %v439_v17, %v402_v9  ;;  %v268_v22 = vpop.f32.mrb[3].mxu0  ;;  %v427_v23 = vpack.c.bf16 %v290_v14, %v290_v14  ;;  %v293_v25 = vadd.f32 %v443_v21, %v402_v9  ;;  %v284_v27 = vpop.f32.mrb[3].mxu1 }
  0xe9   : > { %v421_v24 = vpack.c.bf16 %v266_v15, %v266_v15  ;;  %v269_v26 = vadd.f32 %v402_v9, %v268_v22  ;;  %v425_v28 = vpack.c.bf16 %v282_v19, %v282_v19  ;;  %v285_v30 = vadd.f32 %v402_v9, %v284_v27 }
  0xea   : > { %331 = vst.msk [vmem:[%s172_s25 + $0x8] sm:$0xf] %vm328_vm3, %v423_v18  ;;  %v424_v29 = vpack.c.bf16 %v277_v20, %v277_v20  ;;  %335 = vst.msk [vmem:[%s172_s25 + $0x18] sm:$0xf] %vm328_vm3, %v427_v23  ;;  %v428_v31 = vpack.c.bf16 %v293_v25, %v293_v25 }
  0xeb   : > { %329 = vst.msk [vmem:[%s172_s25] sm:$0xf] %vm328_vm3, %v421_v24  ;;  %v422_v32 = vpack.c.bf16 %v269_v26, %v269_v26  ;;  %333 = vst.msk [vmem:[%s172_s25 + $0x10] sm:$0xf] %vm328_vm3, %v425_v28  ;;  %v426_v33 = vpack.c.bf16 %v285_v30, %v285_v30 }
  0xec   : > { %332 = vst.msk [vmem:[%s172_s25 + $0xc] sm:$0xf] %vm328_vm3, %v424_v29  ;;  %336 = vst.msk [vmem:[%s172_s25 + $0x1c] sm:$0xf] %vm328_vm3, %v428_v31 }
  0xed   : > { %330 = vst.msk [vmem:[%s172_s25 + $0x4] sm:$0xf] %vm328_vm3, %v422_v32  ;;  %334 = vst.msk [vmem:[%s172_s25 + $0x14] sm:$0xf] %vm328_vm3, %v426_v33 }
  0xee PF: > { %s13_s12 = sadd.s32 1, %s465_s12  }
  0xef   : > { %p10_p4 = scmp.ge.s32.totalorder %s13_s12, 4  }
  0xf1   :  { %12 = sbr.rel (!%p10_p4) target bundleno = 1 (0x1), region = 62 }

// kernel: as_mlp_forward.64
= control target key start
LH: loop header
LB: loop body
LE: loop exit
PB: predicated region body
PF: predicated region fallthrough
CT: control target
= control target key end

     0   :  { %10 = vsyncpa [#allocation3], 0  ;;  %s763_s18 = smov 0   ;;  %s765_s19 = smov 0   ;;  %s858_s0 = inlined_call_operand.vmem [shape: f32[2,2], index: 0, kind: input, shape index: {}]   ;;  %s859_s1 = inlined_call_operand.vmem [shape: bf16[2,64,16], index: 1, kind: input, shape index: {}]   ;;  %s860_s2 = inlined_call_operand.vmem [shape: bf16[16,16], index: 2, kind: input, shape index: {}]   ;;  %s861_s3 = inlined_call_operand.vmem [shape: f32[1,16], index: 3, kind: input, shape index: {}]   ;;  %s862_s4 = inlined_call_operand.vmem [shape: bf16[2,64,16], index: 4, kind: input, shape index: {}]   ;;  %s863_s5 = inlined_call_operand.vmem [shape: bf16[2,64,16], index: 5, kind: output, shape index: {}]  }
   0x1   :  { %s767_s20 = smov 0   ;;  %s769_s21 = smov 0  }
   0x2   :  { %s771_s22 = smov 0  }
   0x3 LB: > { %s563_s23 = sadd.s32 4294967295, %s730_s22   ;;  %s25_s24 = sadd.s32 1, %s722_s20  ;;  %s730_s22 = sphi %s771_s22, %s16_s22   ;;  %s726_s21 = sphi %s769_s21, %s869_s21   ;;  %s722_s20 = sphi %s767_s20, %s868_s20   ;;  %s718_s19 = sphi %s765_s19, %s867_s19   ;;  %s714_s18 = sphi %s763_s18, %s866_s18  }
   0x4   : > { %p26_p0 = scmp.ge.s32.totalorder %s25_s24, 2  ;;  %s28_s25 = sadd.s32 1, %s726_s21 }
   0x5   : > { %p565_p1 = scmp.ge.s32.totalorder %s730_s22, 1  ;;  %p180_p2 = scmp.lt.s32.totalorder %s730_s22, 5 }
   0x6   : > { %s871_s24 = smov (%p26_p0, %s25_s24), 0  ;;  %s873_s25 = smov (!%p26_p0, %s28_s25), %s726_s21 }
   0x7   : > { %p796_p3 = pnand %p565_p1, %p180_p2  ;;  %p30_p4 = scmp.ge.s32.totalorder %s873_s25, 2 }
   0x8   : > { %p800_p5 = scmp.eq.s32.totalorder %s563_s23, 0  ;;  %s193_s30 = sshll.u32 %s858_s0, 4  ;;  %s194_s30 = int_to_ptr.vmem [resolvable:$true] %s193_s30 }
   0x9   : > { %p625_p6 = pneg %p796_p3  ;;  %s875_s25 = smov (%p30_p4, %s873_s25), 0 }
   0xa   : > { %s673_s6 = scalar_lea.vmem %s194_s30, 32  ;;  %p681_p12 = scmp.lt.s32.totalorder %s194_s30, %s194_s30 }
   0xb   : > { %p626_p7 = pnand %p800_p5, %p625_p6  ;;  %p674_p8 = scmp.ne.s32.totalorder %s194_s30, %s673_s6 }
   0xc   : > { %p682_p13 = scmp.lt.s32.totalorder %s673_s6, %s673_s6 }
   0xd   : > { %p675_p9 = pneg %p626_p7 }
   0xe   : > { %p683_p0 = por %p682_p13, %p681_p12 }
   0xf   : > { %p676_p10 = pnand %p675_p9, %p674_p8 }
  0x11   : > { %p677_p11 = pneg %p676_p10 }
  0x13   : > { %p684_p1 = pnand %p683_p0, %p677_p11 }
  0x15   : > { %687 = shalt.err (!%p684_p1)
}
  0x16   : > { %s732_s7 = smov [#allocation2]   ;;  %238 = sbr.rel (%p796_p3) target bundleno = 271 (0x10f), region = 40 }
  0x17   : > { %628 = dma.vmem_to_smem (!%p626_p7), %s194_s30, 32, %s732_s7, [#allocation3]  }
  0x1d   : > { %709 = dma.done.wait (%p800_p5), [#allocation3], 32  }
  0x1e   : > { %711 = vsyncadd (%p800_p5), [#allocation3], 4294967264 }
  0x1f   : > { %244 = sfence }
  0x20   : > { %v672_v0 = vld [vmem:[%s860_s2] sm:$0xff]   ;;  %s570_s10 = sshll.u32 %s714_s18, 2  ;;  %p285_p2 = scmp.lt.s32.totalorder %s718_s19, 1  ;;  %vm354_vm0 = vcmask 130048   ;;  %vm438_vm1 = vcmask 125952  }
  0x21   : > { %p287_p4 = scmp.lt.s32.totalorder %s570_s10, 7  ;;  %615 = vmatprep.subr.bf16.mxu0 %v672_v0  ;;  %s579_s11 = sshll.u32 %s718_s19, 7  ;;  %v580_v21 = vld [vmem:[%s861_s3] ss:$0 sm:$0xff] }
  0x22   : > { %616 = vmatpush3.bf16.msra.mxu0 %v672_v0  ;;  %s877_s19 = smov (!%p285_p2, %s718_s19), 1  ;;  %s316_s13 = sld [smem:[#allocation2 + %s579_s11]] }
  0x23   : > { %s879_s10 = smov (!%p287_p4, %s570_s10), 7  ;;  %s571_s12 = sshll.u32 %s877_s19, 3 }
  0x24   : > { %s290_s14 = sadd.s32 %s571_s12, %s879_s10  ;;  %s317_s15 = sadd.s32 1, %s579_s11 }
  0x25   : > { %s826_s16 = sshll.u32 %s290_s14, 2  ;;  %s318_s17 = sld [smem:[#allocation2 + %s317_s15]] }
  0x26   : > { %s292_s27 = scalar_lea.vmem %s859_s1, %s826_s16  ;;  %s302_s28 = scalar_lea.vmem %s862_s4, %s826_s16 }
  0x27   : > { %v595_v1 = vld [vmem:[%s292_s27] sm:$0xff]   ;;  %v610_v2 = vld [vmem:[%s292_s27 + $0x8] sm:$0xff]   ;;  %s312_s8 = scalar_lea.vmem %s863_s5, %s826_s16 }
  0x28   : > { %v596_v3 = vunpack.c.l.bf16 %v595_v1  ;;  %v597_v4 = vunpack.c.h.bf16 %v595_v1  ;;  %v600_v5 = vunpack.c.l.bf16 %v610_v2  ;;  %v601_v6 = vunpack.c.h.bf16 %v610_v2  ;;  %v611_v19 = vld [vmem:[%s302_s28 + $0x8] sm:$0xff]   ;;  %v603_v20 = vld [vmem:[%s302_s28] sm:$0xff]  }
  0x29   : > { %v327_v7 = vstv %s316_s13  ;;  %v608_v22 = vunpack.c.l.bf16 %v611_v19  ;;  %v604_v24 = vunpack.c.l.bf16 %v603_v20  ;;  %v609_v27 = vunpack.c.h.bf16 %v611_v19 }
  0x2a   : > { %v328_v8 = vsub.f32 %v596_v3, %v327_v7  ;;  %v329_v9 = vsub.f32 %v597_v4, %v327_v7  ;;  %v330_v10 = vsub.f32 %v600_v5, %v327_v7  ;;  %v331_v11 = vsub.f32 %v601_v6, %v327_v7 }
  0x2b   : > { %v332_v12 = vstv %s318_s17  ;;  %v605_v30 = vunpack.c.h.bf16 %v603_v20 }
  0x2c   : > { %v333_v13 = vmul.f32 %v332_v12, %v328_v8  ;;  %v334_v14 = vmul.f32 %v332_v12, %v329_v9  ;;  %v335_v15 = vmul.f32 %v332_v12, %v330_v10  ;;  %v336_v16 = vmul.f32 %v332_v12, %v331_v11 }
  0x2e   : > { %v337_v17 = vpack.c.bf16 %v334_v14, %v333_v13  ;;  %v338_v18 = vpack.c.bf16 %v336_v16, %v335_v15 }
  0x30   : > { %617 = vmatprep.mubr.msk.bf16.mxu0 %vm354_vm0, %v337_v17 }
  0x31   : > { %618 = vmatmul.mubr.msk.bf16.vlgmr.msra.gmra.mrb[0].mxu0 %vm354_vm0, %v338_v18 }
 0x104   : > { %v619_v23 = vpop.f32.mrb[0].mxu0 }
 0x105   : > { %v404_v25 = vadd.f32 %v619_v23, %v580_v21  ;;  %v395_v26 = vpop.f32.mrb[1].mxu0 }
 0x106   : > { %v396_v28 = vadd.f32 %v580_v21, %v395_v26  ;;  %v620_v29 = vpop.f32.mrb[2].mxu0 }
 0x107   : > { %v420_v31 = vadd.f32 %v608_v22, %v404_v25  ;;  %v407_v32 = vadd.f32 %v620_v29, %v580_v21  ;;  %v398_v33 = vpop.f32.mrb[3].mxu0 }
 0x108   : > { %v418_v34 = vadd.f32 %v604_v24, %v396_v28  ;;  %v399_v35 = vadd.f32 %v580_v21, %v398_v33 }
 0x109   : > { %v592_v36 = vpack.c.bf16 %v420_v31, %v420_v31  ;;  %v421_v37 = vadd.f32 %v609_v27, %v407_v32 }
 0x10a   : > { %v590_v38 = vpack.c.bf16 %v418_v34, %v418_v34  ;;  %v419_v39 = vadd.f32 %v605_v30, %v399_v35 }
 0x10b   : > { %441 = vst.msk [vmem:[%s312_s8 + $0x8] sm:$0xf] %vm438_vm1, %v592_v36  ;;  %v593_v40 = vpack.c.bf16 %v421_v37, %v421_v37 }
 0x10c   : > { %439 = vst.msk [vmem:[%s312_s8] sm:$0xf] %vm438_vm1, %v590_v38  ;;  %v591_v41 = vpack.c.bf16 %v419_v39, %v419_v39 }
 0x10d   : > { %442 = vst.msk [vmem:[%s312_s8 + $0xc] sm:$0xf] %vm438_vm1, %v593_v40 }
 0x10e   : > { %440 = vst.msk [vmem:[%s312_s8 + $0x4] sm:$0xf] %vm438_vm1, %v591_v41 }
 0x10f PF: > { %s16_s22 = sadd.s32 1, %s730_s22   ;;  %s866_s18 = smov %s722_s20 }
 0x110   : > { %p13_p3 = scmp.ge.s32.totalorder %s16_s22, 6   ;;  %s867_s19 = smov %s726_s21 }
 0x111   : > { %s868_s20 = smov %s871_s24  ;;  %s869_s21 = smov %s875_s25 }
 0x112   :  { %15 = sbr.rel (!%p13_p3) target bundleno = 3 (0x3), region = 78 }
 0x119   :  { %473 = vsyncpa [#allocation3], 1 }
 0x11a   :  { %475 = vsyncpa [#allocation3 + $0x1], 1 }

// kernel: as_mlp_forward.67
= control target key start
LH: loop header
LB: loop body
LE: loop exit
PB: predicated region body
PF: predicated region fallthrough
CT: control target
= control target key end

     0   :  { %s644_s15 = smov 0   ;;  %s696_s0 = inlined_call_operand.vmem [shape: bf16[128,64], index: 0, kind: input, shape index: {}]   ;;  %s697_s1 = inlined_call_operand.vmem [shape: bf16[64,16], index: 1, kind: input, shape index: {}]   ;;  %s698_s2 = inlined_call_operand.vmem [shape: f32[1,16], index: 2, kind: input, shape index: {}]   ;;  %s699_s3 = inlined_call_operand.vmem [shape: bf16[128,16], index: 3, kind: input, shape index: {}]   ;;  %s700_s4 = inlined_call_operand.vmem [shape: bf16[128,16], index: 4, kind: output, shape index: {}]  }
   0x1 LB: > { %s502_s16 = sadd.s32 4294967295, %s617_s15   ;;  %p506_p0 = scmp.ge.s32.totalorder %s617_s15, 1  ;;  %s617_s15 = sphi %s644_s15, %s14_s15  }
   0x2   : > { %p174_p1 = scmp.lt.s32.totalorder %s617_s15, 3 }
   0x4   : > { %p175_p2 = pnand %p506_p0, %p174_p1 }
   0x5   : > { %v603_v0 = vld [vmem:[%s697_s1] sm:$0xff] (!%p175_p2)   ;;  %s507_s19 = sshll.u32 (!%p175_p2), %s502_s16, 3  ;;  %v604_v1 = vld [vmem:[%s697_s1 + $0x8] sm:$0xff] (!%p175_p2)   ;;  %v605_v2 = vld [vmem:[%s697_s1 + $0x10] sm:$0xff] (!%p175_p2)   ;;  %vm291_vm0 = vcmask (!%p175_p2), 523264   ;;  %vm425_vm1 = vcmask (!%p175_p2), 125952  }
   0x6   : > { %178 = sbr.rel (%p175_p2) target bundleno = 244 (0xf4), region = 36  ;;  %p206_p3 = scmp.lt.s32.totalorder (!%p175_p2), %s507_s19, 15  ;;  %571 = vmatprep.subr.bf16.mxu0 (!%p175_p2), %v603_v0  ;;  %587 = vmatprep.subr.bf16.mxu1 (!%p175_p2), %v603_v0  ;;  %v606_v3 = vld [vmem:[%s697_s1 + $0x18] sm:$0xff] (!%p175_p2)   ;;  %v513_v12 = vld [vmem:[%s698_s2] ss:$0 sm:$0xff] (!%p175_p2) }
   0x7   : > { %572 = vmatpush3.bf16.msra.mxu0 (!%p175_p2), %v603_v0  ;;  %591 = vmatpush3.bf16.msra.mxu1 (!%p175_p2), %v603_v0 }
   0x8   : > { %573 = vmatprep.subr.bf16.mxu0 (!%p175_p2), %v604_v1  ;;  %588 = vmatprep.subr.bf16.mxu1 (!%p175_p2), %v604_v1 }
   0xb   : > { %574 = vmatpush3.bf16.msra.mxu0 (!%p175_p2), %v604_v1  ;;  %592 = vmatpush3.bf16.msra.mxu1 (!%p175_p2), %v604_v1 }
   0xc   : > { %575 = vmatprep.subr.bf16.mxu0 (!%p175_p2), %v605_v2  ;;  %589 = vmatprep.subr.bf16.mxu1 (!%p175_p2), %v605_v2 }
   0xd   : > { %s702_s19 = smov (!%p206_p3, %s507_s19), 15 }
   0xe   : > { %s661_s24 = sshll.u32 %s702_s19, 2 }
   0xf   : > { %s209_s29 = scalar_lea.vmem %s696_s0, %s661_s24  ;;  %576 = vmatpush3.bf16.msra.mxu0 %v605_v2  ;;  %593 = vmatpush3.bf16.msra.mxu1 %v605_v2  ;;  %s215_s6 = scalar_lea.vmem %s699_s3, %s661_s24 }
  0x10   : > { %v607_v4 = vld [vmem:[%s209_s29] sm:$0xff]   ;;  %v608_v5 = vld [vmem:[%s209_s29 + $0x10] sm:$0xff]   ;;  %577 = vmatprep.subr.bf16.mxu0 %v606_v3  ;;  %590 = vmatprep.subr.bf16.mxu1 %v606_v3  ;;  %v609_v6 = vld [vmem:[%s209_s29 + $0x8] sm:$0xff]   ;;  %s221_s11 = scalar_lea.vmem %s700_s4, %s661_s24 }
  0x11   : > { %579 = vmatprep.mubr.msk.bf16.mxu0 %vm291_vm0, %v607_v4  ;;  %583 = vmatprep.mubr.msk.bf16.mxu1 %vm291_vm0, %v608_v5  ;;  %v610_v7 = vld [vmem:[%s209_s29 + $0x18] sm:$0xff]   ;;  %v560_v8 = vld [vmem:[%s215_s6 + $0x8] sm:$0xff]   ;;  %v545_v10 = vld [vmem:[%s215_s6] sm:$0xff]  }
  0x12   : > { %v562_v9 = vld [vmem:[%s215_s6 + $0x18] sm:$0xff]   ;;  %v561_v11 = vld [vmem:[%s215_s6 + $0x10] sm:$0xff]   ;;  %v550_v13 = vunpack.c.l.bf16 %v560_v8  ;;  %v546_v17 = vunpack.c.l.bf16 %v545_v10  ;;  %v551_v19 = vunpack.c.h.bf16 %v560_v8  ;;  %v547_v25 = vunpack.c.h.bf16 %v545_v10 }
  0x13   : > { %578 = vmatpush3.bf16.msra.mxu0 %v606_v3  ;;  %594 = vmatpush3.bf16.msra.mxu1 %v606_v3  ;;  %v558_v14 = vunpack.c.l.bf16 %v562_v9  ;;  %v554_v18 = vunpack.c.l.bf16 %v561_v11  ;;  %v559_v24 = vunpack.c.h.bf16 %v562_v9  ;;  %v555_v30 = vunpack.c.h.bf16 %v561_v11 }
  0x16   : > { %580 = vmatmul.mubr.msk.bf16.vlgmr.msra.gmra.mrb[0].mxu0 %vm291_vm0, %v609_v6  ;;  %584 = vmatmul.mubr.msk.bf16.vlgmr.msra.gmra.mrb[0].mxu1 %vm291_vm0, %v610_v7 }
  0xe9   : > { %v581_v15 = vpop.f32.mrb[0].mxu0  ;;  %v585_v16 = vpop.f32.mrb[0].mxu1 }
  0xea   : > { %v347_v20 = vadd.f32 %v581_v15, %v513_v12  ;;  %v363_v21 = vadd.f32 %v585_v16, %v513_v12  ;;  %v338_v22 = vpop.f32.mrb[1].mxu0  ;;  %v354_v23 = vpop.f32.mrb[1].mxu1 }
  0xeb   : > { %v339_v26 = vadd.f32 %v513_v12, %v338_v22  ;;  %v355_v27 = vadd.f32 %v513_v12, %v354_v23  ;;  %v582_v28 = vpop.f32.mrb[2].mxu0  ;;  %v586_v29 = vpop.f32.mrb[2].mxu1 }
  0xec   : > { %v387_v31 = vadd.f32 %v550_v13, %v347_v20  ;;  %v391_v32 = vadd.f32 %v558_v14, %v363_v21  ;;  %v350_v33 = vadd.f32 %v582_v28, %v513_v12  ;;  %v366_v34 = vadd.f32 %v586_v29, %v513_v12  ;;  %v341_v35 = vpop.f32.mrb[3].mxu0  ;;  %v357_v36 = vpop.f32.mrb[3].mxu1 }
  0xed   : > { %v385_v37 = vadd.f32 %v546_v17, %v339_v26  ;;  %v389_v38 = vadd.f32 %v554_v18, %v355_v27  ;;  %v342_v39 = vadd.f32 %v513_v12, %v341_v35  ;;  %v358_v40 = vadd.f32 %v513_v12, %v357_v36 }
  0xee   : > { %v538_v41 = vpack.c.bf16 %v387_v31, %v387_v31  ;;  %v542_v42 = vpack.c.bf16 %v391_v32, %v391_v32  ;;  %v388_v43 = vadd.f32 %v551_v19, %v350_v33  ;;  %v392_v44 = vadd.f32 %v559_v24, %v366_v34 }
  0xef   : > { %v536_v45 = vpack.c.bf16 %v385_v37, %v385_v37  ;;  %v540_v46 = vpack.c.bf16 %v389_v38, %v389_v38  ;;  %v386_v47 = vadd.f32 %v547_v25, %v342_v39  ;;  %v390_v48 = vadd.f32 %v555_v30, %v358_v40 }
  0xf0   : > { %428 = vst.msk [vmem:[%s221_s11 + $0x8] sm:$0xf] %vm425_vm1, %v538_v41  ;;  %432 = vst.msk [vmem:[%s221_s11 + $0x18] sm:$0xf] %vm425_vm1, %v542_v42  ;;  %v539_v49 = vpack.c.bf16 %v388_v43, %v388_v43  ;;  %v543_v50 = vpack.c.bf16 %v392_v44, %v392_v44 }
  0xf1   : > { %426 = vst.msk [vmem:[%s221_s11] sm:$0xf] %vm425_vm1, %v536_v45  ;;  %430 = vst.msk [vmem:[%s221_s11 + $0x10] sm:$0xf] %vm425_vm1, %v540_v46  ;;  %v537_v51 = vpack.c.bf16 %v386_v47, %v386_v47  ;;  %v541_v52 = vpack.c.bf16 %v390_v48, %v390_v48 }
  0xf2   : > { %429 = vst.msk [vmem:[%s221_s11 + $0xc] sm:$0xf] %vm425_vm1, %v539_v49  ;;  %433 = vst.msk [vmem:[%s221_s11 + $0x1c] sm:$0xf] %vm425_vm1, %v543_v50 }
  0xf3   : > { %427 = vst.msk [vmem:[%s221_s11 + $0x4] sm:$0xf] %vm425_vm1, %v537_v51  ;;  %431 = vst.msk [vmem:[%s221_s11 + $0x14] sm:$0xf] %vm425_vm1, %v541_v52 }
  0xf4 PF: > { %s14_s15 = sadd.s32 1, %s617_s15  }
  0xf5   : > { %p11_p4 = scmp.ge.s32.totalorder %s14_s15, 4  }
  0xf7   :  { %13 = sbr.rel (!%p11_p4) target bundleno = 1 (0x1), region = 69 }

// kernel: as_mlp_forward.66
= control target key start
LH: loop header
LB: loop body
LE: loop exit
PB: predicated region body
PF: predicated region fallthrough
CT: control target
= control target key end

     0   :  { %9 = vsyncpa [#allocation3], 0  ;;  %s697_s15 = smov 0   ;;  %s699_s16 = smov 0   ;;  %s791_s0 = inlined_call_operand.vmem [shape: f32[2,2], index: 0, kind: input, shape index: {}]   ;;  %s792_s1 = inlined_call_operand.vmem [shape: bf16[2,64,16], index: 1, kind: input, shape index: {}]   ;;  %s793_s2 = inlined_call_operand.vmem [shape: bf16[16,64], index: 2, kind: input, shape index: {}]   ;;  %s794_s3 = inlined_call_operand.vmem [shape: f32[1,64], index: 3, kind: input, shape index: {}]   ;;  %s795_s4 = inlined_call_operand.vmem [shape: bf16[2,64,64], index: 4, kind: output, shape index: {}]  }
   0x1   :  { %s701_s17 = smov 0   ;;  %s703_s18 = smov 0  }
   0x2   :  { %s705_s19 = smov 0  }
   0x3 LB: > { %s506_s20 = sadd.s32 4294967295, %s669_s19   ;;  %s24_s21 = sadd.s32 1, %s661_s17  ;;  %s669_s19 = sphi %s705_s19, %s15_s19   ;;  %s665_s18 = sphi %s703_s18, %s801_s18   ;;  %s661_s17 = sphi %s701_s17, %s800_s17   ;;  %s657_s16 = sphi %s699_s16, %s799_s16   ;;  %s653_s15 = sphi %s697_s15, %s798_s15  }
   0x4   : > { %p25_p0 = scmp.ge.s32.totalorder %s24_s21, 2  ;;  %s27_s22 = sadd.s32 1, %s665_s18 }
   0x5   : > { %p508_p1 = scmp.ge.s32.totalorder %s669_s19, 1  ;;  %p151_p2 = scmp.lt.s32.totalorder %s669_s19, 5 }
   0x6   : > { %s803_s21 = smov (%p25_p0, %s24_s21), 0  ;;  %s805_s22 = smov (!%p25_p0, %s27_s22), %s665_s18 }
   0x7   : > { %p730_p3 = pnand %p508_p1, %p151_p2  ;;  %p29_p4 = scmp.ge.s32.totalorder %s805_s22, 2 }
   0x8   : > { %p734_p5 = scmp.eq.s32.totalorder %s506_s20, 0  ;;  %s164_s27 = sshll.u32 %s791_s0, 4  ;;  %s165_s27 = int_to_ptr.vmem [resolvable:$true] %s164_s27 }
   0x9   : > { %p556_p6 = pneg %p730_p3  ;;  %s807_s22 = smov (%p29_p4, %s805_s22), 0 }
   0xa   : > { %s612_s28 = scalar_lea.vmem %s165_s27, 32  ;;  %p620_p12 = scmp.lt.s32.totalorder %s165_s27, %s165_s27 }
   0xb   : > { %p557_p7 = pnand %p734_p5, %p556_p6  ;;  %p613_p8 = scmp.ne.s32.totalorder %s165_s27, %s612_s28 }
   0xc   : > { %p621_p13 = scmp.lt.s32.totalorder %s612_s28, %s612_s28 }
   0xd   : > { %p614_p9 = pneg %p557_p7 }
   0xe   : > { %p622_p0 = por %p621_p13, %p620_p12 }
   0xf   : > { %p615_p10 = pnand %p614_p9, %p613_p8 }
  0x11   : > { %p616_p11 = pneg %p615_p10 }
  0x13   : > { %p623_p1 = pnand %p622_p0, %p616_p11 }
  0x15   : > { %626 = shalt.err (!%p623_p1)
}
  0x16   : > { %s671_s29 = smov [#allocation2]   ;;  %196 = sbr.rel (%p730_p3) target bundleno = 294 (0x126), region = 36 }
  0x17   : > { %559 = dma.vmem_to_smem (!%p557_p7), %s165_s27, 32, %s671_s29, [#allocation3]  }
  0x1d   : > { %648 = dma.done.wait (%p734_p5), [#allocation3], 32  }
  0x1e   : > { %650 = vsyncadd (%p734_p5), [#allocation3], 4294967264 }
  0x1f   : > { %202 = sfence }
  0x20   : > { %v603_v0 = vld [vmem:[%s793_s2] sm:$0xff]   ;;  %s513_s6 = sshll.u32 %s653_s15, 2  ;;  %p232_p2 = scmp.lt.s32.totalorder %s657_s16, 1  ;;  %vm291_vm0 = vcmask 130048   ;;  %vm399_vm1 = vcmask 519168  }
  0x21   : > { %p234_p4 = scmp.lt.s32.totalorder %s513_s6, 7  ;;  %546 = vmatprep.subr.bf16.mxu0 %v603_v0  ;;  %s519_s7 = sshll.u32 %s657_s16, 7  ;;  %v520_v19 = vld [vmem:[%s794_s3] ss:$0 sm:$0xff] }
  0x22   : > { %547 = vmatpush3.bf16.msra.mxu0 %v603_v0  ;;  %s809_s16 = smov (!%p232_p2, %s657_s16), 1  ;;  %s253_s9 = sld [smem:[#allocation2 + %s519_s7]] }
  0x23   : > { %s811_s6 = smov (!%p234_p4, %s513_s6), 7  ;;  %s514_s8 = sshll.u32 %s809_s16, 3 }
  0x24   : > { %s760_s10 = sadd.s32 %s514_s8, %s811_s6  ;;  %s254_s11 = sadd.s32 1, %s519_s7 }
  0x25   : > { %s515_s12 = sshll.u32 %s760_s10, 2  ;;  %s255_s13 = sld [smem:[#allocation2 + %s254_s11]] }
  0x26   : > { %s239_s15 = scalar_lea.vmem %s792_s1, %s515_s12  ;;  %s249_s26 = scalar_lea.vmem %s795_s4, %s515_s12 }
  0x27   : > { %v535_v1 = vld [vmem:[%s239_s15] sm:$0xff]   ;;  %v542_v2 = vld [vmem:[%s239_s15 + $0x8] sm:$0xff]  }
  0x28   : > { %v536_v3 = vunpack.c.l.bf16 %v535_v1  ;;  %v537_v4 = vunpack.c.h.bf16 %v535_v1  ;;  %v540_v5 = vunpack.c.l.bf16 %v542_v2  ;;  %v541_v6 = vunpack.c.h.bf16 %v542_v2 }
  0x29   : > { %v264_v7 = vstv %s253_s9 }
  0x2a   : > { %v265_v8 = vsub.f32 %v536_v3, %v264_v7  ;;  %v266_v9 = vsub.f32 %v537_v4, %v264_v7  ;;  %v267_v10 = vsub.f32 %v540_v5, %v264_v7  ;;  %v268_v11 = vsub.f32 %v541_v6, %v264_v7 }
  0x2b   : > { %v269_v12 = vstv %s255_s13 }
  0x2c   : > { %v270_v13 = vmul.f32 %v269_v12, %v265_v8  ;;  %v271_v14 = vmul.f32 %v269_v12, %v266_v9  ;;  %v272_v15 = vmul.f32 %v269_v12, %v267_v10  ;;  %v273_v16 = vmul.f32 %v269_v12, %v268_v11 }
  0x2e   : > { %v274_v17 = vpack.c.bf16 %v271_v14, %v270_v13  ;;  %v275_v18 = vpack.c.bf16 %v273_v16, %v272_v15 }
  0x30   : > { %548 = vmatprep.mubr.msk.bf16.mxu0 %vm291_vm0, %v274_v17 }
  0x31   : > { %549 = vmatmul.mubr.msk.bf16.vlgmr.msra.gmra.mrb[0].mxu0 %vm291_vm0, %v275_v18 }
 0x104   : > { %v550_v20 = vpop.f32.mrb[0].mxu0 }
 0x105   : > { %v341_v21 = vadd.f32 %v550_v20, %v520_v19  ;;  %v332_v22 = vpop.f32.mrb[1].mxu0 }
 0x106   : > { %v333_v23 = vadd.f32 %v520_v19, %v332_v22  ;;  %v551_v24 = vpop.f32.mrb[2].mxu0 }
 0x107   : > { %v353_v25 = vmul.f32 0.044715, %v341_v21  ;;  %v344_v26 = vadd.f32 %v551_v24, %v520_v19  ;;  %v335_v27 = vpop.f32.mrb[3].mxu0  ;;  %v349_v50 = vmul.f32 0.5, %v341_v21 }
 0x108   : > { %v351_v28 = vmul.f32 0.044715, %v333_v23  ;;  %v336_v29 = vadd.f32 %v520_v19, %v335_v27  ;;  %v347_v53 = vmul.f32 0.5, %v333_v23 }
 0x109   : > { %v357_v30 = vmul.f32 %v353_v25, %v341_v21  ;;  %v354_v31 = vmul.f32 0.044715, %v344_v26  ;;  %v350_v57 = vmul.f32 0.5, %v344_v26 }
 0x10a   : > { %v355_v32 = vmul.f32 %v351_v28, %v333_v23  ;;  %v352_v33 = vmul.f32 0.044715, %v336_v29  ;;  %v348_v60 = vmul.f32 0.5, %v336_v29 }
 0x10b   : > { %v361_v34 = vmul.f32 %v357_v30, %v341_v21  ;;  %v358_v35 = vmul.f32 %v354_v31, %v344_v26 }
 0x10c   : > { %v359_v36 = vmul.f32 %v355_v32, %v333_v23  ;;  %v356_v37 = vmul.f32 %v352_v33, %v336_v29 }
 0x10d   : > { %v365_v38 = vadd.f32 %v361_v34, %v341_v21  ;;  %v362_v39 = vmul.f32 %v358_v35, %v344_v26 }
 0x10e   : > { %v363_v40 = vadd.f32 %v359_v36, %v333_v23  ;;  %v360_v41 = vmul.f32 %v356_v37, %v336_v29 }
 0x10f   : > { %v369_v42 = vmul.f32 0.7978846, %v365_v38  ;;  %v366_v43 = vadd.f32 %v362_v39, %v344_v26 }
 0x110   : > { %v367_v44 = vmul.f32 0.7978846, %v363_v40  ;;  %v364_v45 = vadd.f32 %v360_v41, %v336_v29 }
 0x111   : > { %604 = vtanh.f32 %v369_v42  ;;  %v370_v46 = vmul.f32 0.7978846, %v366_v43 }
 0x112   : > { %606 = vtanh.f32 %v367_v44  ;;  %v368_v47 = vmul.f32 0.7978846, %v364_v45 }
 0x113   : > { %608 = vtanh.f32 %v370_v46 }
 0x114   : > { %610 = vtanh.f32 %v368_v47 }
 0x11b   : > { %v605_v48 = vpop.eup %604 }
 0x11c   : > { %v607_v49 = vpop.eup %606  ;;  %v377_v51 = vadd.f32 1.0, %v605_v48 }
 0x11d   : > { %v609_v52 = vpop.eup %608  ;;  %v375_v54 = vadd.f32 1.0, %v607_v49 }
 0x11e   : > { %v611_v55 = vpop.eup %610  ;;  %v381_v56 = vmul.f32 %v377_v51, %v349_v50  ;;  %v378_v58 = vadd.f32 1.0, %v609_v52 }
 0x11f   : > { %v379_v59 = vmul.f32 %v375_v54, %v347_v53  ;;  %v376_v61 = vadd.f32 1.0, %v611_v55 }
 0x120   : > { %v532_v62 = vpack.c.bf16 %v381_v56, %v381_v56  ;;  %v382_v63 = vmul.f32 %v378_v58, %v350_v57 }
 0x121   : > { %v530_v0 = vpack.c.bf16 %v379_v59, %v379_v59  ;;  %v380_v1 = vmul.f32 %v376_v61, %v348_v60 }
 0x122   : > { %402 = vst.msk [vmem:[%s249_s26 + $0x8] sm:$0xf] %vm399_vm1, %v532_v62  ;;  %v533_v2 = vpack.c.bf16 %v382_v63, %v382_v63 }
 0x123   : > { %400 = vst.msk [vmem:[%s249_s26] sm:$0xf] %vm399_vm1, %v530_v0  ;;  %v531_v3 = vpack.c.bf16 %v380_v1, %v380_v1 }
 0x124   : > { %403 = vst.msk [vmem:[%s249_s26 + $0xc] sm:$0xf] %vm399_vm1, %v533_v2 }
 0x125   : > { %401 = vst.msk [vmem:[%s249_s26 + $0x4] sm:$0xf] %vm399_vm1, %v531_v3 }
 0x126 PF: > { %s15_s19 = sadd.s32 1, %s669_s19   ;;  %s798_s15 = smov %s661_s17 }
 0x127   : > { %p12_p3 = scmp.ge.s32.totalorder %s15_s19, 6   ;;  %s799_s16 = smov %s665_s18 }
 0x128   : > { %s800_s17 = smov %s803_s21  ;;  %s801_s18 = smov %s807_s22 }
 0x129   :  { %14 = sbr.rel (!%p12_p3) target bundleno = 3 (0x3), region = 71 }
 0x130   :  { %434 = vsyncpa [#allocation3], 1 }
 0x131   :  { %436 = vsyncpa [#allocation3 + $0x1], 1 }

// kernel: as_mlp_forward.68
= control target key start
LH: loop header
LB: loop body
LE: loop exit
PB: predicated region body
PF: predicated region fallthrough
CT: control target
= control target key end

     0   :  { %6 = vsyncpa [#allocation3], 0  ;;  %s277_s6 = smov 0   ;;  %s312_s0 = inlined_call_operand.vmem [shape: bf16[2,16,64], index: 0, kind: input, shape index: {}]   ;;  %s313_s1 = inlined_call_operand.vmem [shape: f32[2,2], index: 1, kind: output, shape index: {}]  }
   0x1 LB: > { %s283_s7 = sadd.s32 4294967295, %s264_s6   ;;  %p205_p0 = scmp.ge.s32.totalorder %s264_s6, 1  ;;  %s264_s6 = sphi %s277_s6, %s12_s6  }
   0x2   : > { %p83_p1 = scmp.lt.s32.totalorder %s264_s6, 3 }
   0x4   : > { %p84_p2 = pnand %p205_p0, %p83_p1 }
   0x5   : > { %p98_p3 = scmp.lt.s32.totalorder (!%p84_p2), %s283_s7, 1  ;;  %vm107_vm0 = vcmask (!%p84_p2), 523264   ;;  %s208_s13 = sshll.u32 (!%p84_p2), %s283_s7, 7 }
   0x6   : > { %87 = sbr.rel (%p84_p2) target bundleno = 420 (0x1a4), region = 24  ;;  %s144_s15 = scalar_lea.smem (!%p84_p2), [#allocation2], %s208_s13 }
   0x7   : > { %s157_s18 = sshll.u32 (!%p84_p2), %s313_s1, 4  ;;  %s184_s19 = scalar_lea.smem (!%p84_p2), %s144_s15, 1 [#allocation2]  ;;  %s158_s18 = int_to_ptr.vmem [resolvable:$true] %s157_s18 }
   0x8   : > { %p227_p4 = scmp.eq.s32.totalorder (!%p84_p2), %s283_s7, 1  ;;  %s240_s21 = scalar_lea.vmem (!%p84_p2), %s158_s18, 32 }
   0x9   : > { %p241_p5 = scmp.ne.s32.totalorder (!%p84_p2), %s158_s18, %s240_s21  ;;  %p247_p8 = scmp.lt.s32.totalorder (!%p84_p2), %s158_s18, %s158_s18 }
   0xa   : > { %p248_p9 = scmp.lt.s32.totalorder (!%p84_p2), %s240_s21, %s240_s21 }
   0xb   : > { %p242_p6 = pnand (!%p84_p2), %p241_p5, %p227_p4 }
   0xc   : > { %p249_p10 = por (!%p84_p2), %p248_p9, %p247_p8 }
   0xd   : > { %s99_s8 = scalar_select %p98_p3, %s283_s7, 1 }
   0xe   : > { %p243_p7 = pneg %p242_p6 }
   0xf   : > { %s214_s9 = sshll.u32 %s99_s8, 3 }
  0x10   : > { %s102_s12 = scalar_lea.vmem %s312_s0, %s214_s9  ;;  %p250_p11 = pnand %p249_p10, %p243_p7 }
  0x11   : > { %v216_v0 = vld [vmem:[%s102_s12] sm:$0xff]  }
  0x12   : > { %v217_v1 = vunpack.c.l.bf16 %v216_v0  ;;  %v218_v2 = vunpack.c.h.bf16 %v216_v0 }
  0x14   : > { %v108_v3 = vsel %vm107_vm0, %v217_v1, 0.0  ;;  %v111_v4 = vsel %vm107_vm0, %v218_v2, 0.0 }
  0x15   : > { %109 = vadd.xlane.f32.xlu0 %v108_v3 }
  0x19   : > { %112 = vadd.xlane.f32.xlu0 %v111_v4 }
  0xa2   : > { %v110_v5 = vpop.xlane.xlu0 %109 }
  0xa6   : > { %v113_v6 = vpop.xlane.xlu0 %112 }
  0xa7   : > { %v114_v7 = vadd.f32 %v113_v6, %v110_v5 }
  0xa9   : > { %v115_v8 = vrot.slane %v114_v7, 4 }
  0xab   : > { %v116_v9 = vadd.f32 %v115_v8, %v114_v7 }
  0xad   : > { %v117_v10 = vrot.slane %v116_v9, 2 }
  0xaf   : > { %v118_v11 = vadd.f32 %v117_v10, %v116_v9 }
  0xb1   : > { %v119_v12 = vrot.slane %v118_v11, 1 }
  0xb3   : > { %v120_v13 = vadd.f32 %v119_v12, %v118_v11 }
  0xb5   : > { %v121_v14 = vmul.f32 0.0009765625, %v120_v13 }
  0xb7   : > { %219 = vpush %v121_v14  ;;  %v122_v15 = vsub.f32 %v217_v1, %v121_v14  ;;  %v123_v16 = vsub.f32 %v218_v2, %v121_v14 }
  0xb9   : > { %v124_v17 = vmul.f32 %v122_v15, %v122_v15  ;;  %v125_v19 = vmul.f32 %v123_v16, %v123_v16 }
  0xbb   : > { %v126_v18 = vsel %vm107_vm0, %v124_v17, 0.0  ;;  %v129_v20 = vsel %vm107_vm0, %v125_v19, 0.0 }
  0xbc   : > { %127 = vadd.xlane.f32.xlu1 %v126_v18 }
  0xc0   : > { %130 = vadd.xlane.f32.xlu1 %v129_v20 }
  0xe8   : > { %s220_s14 = spop %219 }
  0xe9   : > { %145 = sst [smem:[%s144_s15]] %s220_s14 }
 0x149   : > { %v128_v21 = vpop.xlane.xlu1 %127 }
 0x14d   : > { %v131_v22 = vpop.xlane.xlu1 %130 }
 0x14e   : > { %v132_v23 = vadd.f32 %v131_v22, %v128_v21 }
 0x150   : > { %v133_v24 = vrot.slane %v132_v23, 4 }
 0x152   : > { %v134_v25 = vadd.f32 %v133_v24, %v132_v23 }
 0x154   : > { %v135_v26 = vrot.slane %v134_v25, 2 }
 0x156   : > { %v136_v27 = vadd.f32 %v135_v26, %v134_v25 }
 0x158   : > { %v137_v28 = vrot.slane %v136_v27, 1 }
 0x15a   : > { %v138_v29 = vadd.f32 %v137_v28, %v136_v27 }
 0x15c   : > { %v139_v30 = vmul.f32 0.0009765625, %v138_v29 }
 0x15e   : > { %v140_v31 = vadd.f32 1e-05, %v139_v30 }
 0x160   : > { %238 = vrsqrt.f32 %v140_v31 }
 0x16a   : > { %v239_v32 = vpop.eup %238 }
 0x16b   : > { %221 = vpush %v239_v32 }
 0x19c   : > { %s222_s20 = spop %221 }
 0x19d   : > { %149 = sst [smem:[%s184_s19]] %s222_s20 }
 0x19e   : > { %253 = shalt.err (!%p250_p11)
}
 0x19f   : > { %s266_s22 = smov [#allocation2]  }
 0x1a0   : > { %224 = dma.smem_to_vmem (%p227_p4), %s266_s22, 32, %s158_s18, [#allocation3]  }
 0x1a1   : > { %259 = dma.done.wait (%p227_p4), [#allocation3], 32  }
 0x1a2   : > { %261 = vsyncadd (%p227_p4), [#allocation3], 4294967264 }
 0x1a3   : > { %165 = sfence }
 0x1a4 PF: > { %s12_s6 = sadd.s32 1, %s264_s6  }
 0x1a5   : > { %p9_p12 = scmp.ge.s32.totalorder %s12_s6, 4  }
 0x1a7   :  { %11 = sbr.rel (!%p9_p12) target bundleno = 1 (0x1), region = 53 }
 0x1ae   :  { %171 = vsyncpa [#allocation3], 1 }
 0x1af   :  { %173 = vsyncpa [#allocation3 + $0x1], 1 }

// kernel: as_mlp_forward.70
= control target key start
LH: loop header
LB: loop body
LE: loop exit
PB: predicated region body
PF: predicated region fallthrough
CT: control target
= control target key end

     0   :  { %6 = vsyncpa [#allocation3], 0  ;;  %s277_s6 = smov 0   ;;  %s312_s0 = inlined_call_operand.vmem [shape: bf16[2,16,32], index: 0, kind: input, shape index: {}]   ;;  %s313_s1 = inlined_call_operand.vmem [shape: f32[2,2], index: 1, kind: output, shape index: {}]  }
   0x1 LB: > { %s283_s7 = sadd.s32 4294967295, %s264_s6   ;;  %p205_p0 = scmp.ge.s32.totalorder %s264_s6, 1  ;;  %s264_s6 = sphi %s277_s6, %s12_s6  }
   0x2   : > { %p83_p1 = scmp.lt.s32.totalorder %s264_s6, 3 }
   0x4   : > { %p84_p2 = pnand %p205_p0, %p83_p1 }
   0x5   : > { %p98_p3 = scmp.lt.s32.totalorder (!%p84_p2), %s283_s7, 1  ;;  %vm107_vm0 = vcmask (!%p84_p2), 261120   ;;  %s208_s13 = sshll.u32 (!%p84_p2), %s283_s7, 7 }
   0x6   : > { %87 = sbr.rel (%p84_p2) target bundleno = 420 (0x1a4), region = 24  ;;  %s144_s15 = scalar_lea.smem (!%p84_p2), [#allocation2], %s208_s13 }
   0x7   : > { %s157_s18 = sshll.u32 (!%p84_p2), %s313_s1, 4  ;;  %s184_s19 = scalar_lea.smem (!%p84_p2), %s144_s15, 1 [#allocation2]  ;;  %s158_s18 = int_to_ptr.vmem [resolvable:$true] %s157_s18 }
   0x8   : > { %p227_p4 = scmp.eq.s32.totalorder (!%p84_p2), %s283_s7, 1  ;;  %s240_s21 = scalar_lea.vmem (!%p84_p2), %s158_s18, 32 }
   0x9   : > { %p241_p5 = scmp.ne.s32.totalorder (!%p84_p2), %s158_s18, %s240_s21  ;;  %p247_p8 = scmp.lt.s32.totalorder (!%p84_p2), %s158_s18, %s158_s18 }
   0xa   : > { %p248_p9 = scmp.lt.s32.totalorder (!%p84_p2), %s240_s21, %s240_s21 }
   0xb   : > { %p242_p6 = pnand (!%p84_p2), %p241_p5, %p227_p4 }
   0xc   : > { %p249_p10 = por (!%p84_p2), %p248_p9, %p247_p8 }
   0xd   : > { %s99_s8 = scalar_select %p98_p3, %s283_s7, 1 }
   0xe   : > { %p243_p7 = pneg %p242_p6 }
   0xf   : > { %s214_s9 = sshll.u32 %s99_s8, 3 }
  0x10   : > { %s102_s12 = scalar_lea.vmem %s312_s0, %s214_s9  ;;  %p250_p11 = pnand %p249_p10, %p243_p7 }
  0x11   : > { %v216_v0 = vld [vmem:[%s102_s12] sm:$0xff]  }
  0x12   : > { %v217_v1 = vunpack.c.l.bf16 %v216_v0  ;;  %v218_v2 = vunpack.c.h.bf16 %v216_v0 }
  0x14   : > { %v108_v3 = vsel %vm107_vm0, %v217_v1, 0.0  ;;  %v111_v4 = vsel %vm107_vm0, %v218_v2, 0.0 }
  0x15   : > { %109 = vadd.xlane.f32.xlu0 %v108_v3 }
  0x19   : > { %112 = vadd.xlane.f32.xlu0 %v111_v4 }
  0xa2   : > { %v110_v5 = vpop.xlane.xlu0 %109 }
  0xa6   : > { %v113_v6 = vpop.xlane.xlu0 %112 }
  0xa7   : > { %v114_v7 = vadd.f32 %v113_v6, %v110_v5 }
  0xa9   : > { %v115_v8 = vrot.slane %v114_v7, 4 }
  0xab   : > { %v116_v9 = vadd.f32 %v115_v8, %v114_v7 }
  0xad   : > { %v117_v10 = vrot.slane %v116_v9, 2 }
  0xaf   : > { %v118_v11 = vadd.f32 %v117_v10, %v116_v9 }
  0xb1   : > { %v119_v12 = vrot.slane %v118_v11, 1 }
  0xb3   : > { %v120_v13 = vadd.f32 %v119_v12, %v118_v11 }
  0xb5   : > { %v121_v14 = vmul.f32 0.001953125, %v120_v13 }
  0xb7   : > { %219 = vpush %v121_v14  ;;  %v122_v15 = vsub.f32 %v217_v1, %v121_v14  ;;  %v123_v16 = vsub.f32 %v218_v2, %v121_v14 }
  0xb9   : > { %v124_v17 = vmul.f32 %v122_v15, %v122_v15  ;;  %v125_v19 = vmul.f32 %v123_v16, %v123_v16 }
  0xbb   : > { %v126_v18 = vsel %vm107_vm0, %v124_v17, 0.0  ;;  %v129_v20 = vsel %vm107_vm0, %v125_v19, 0.0 }
  0xbc   : > { %127 = vadd.xlane.f32.xlu1 %v126_v18 }
  0xc0   : > { %130 = vadd.xlane.f32.xlu1 %v129_v20 }
  0xe8   : > { %s220_s14 = spop %219 }
  0xe9   : > { %145 = sst [smem:[%s144_s15]] %s220_s14 }
 0x149   : > { %v128_v21 = vpop.xlane.xlu1 %127 }
 0x14d   : > { %v131_v22 = vpop.xlane.xlu1 %130 }
 0x14e   : > { %v132_v23 = vadd.f32 %v131_v22, %v128_v21 }
 0x150   : > { %v133_v24 = vrot.slane %v132_v23, 4 }
 0x152   : > { %v134_v25 = vadd.f32 %v133_v24, %v132_v23 }
 0x154   : > { %v135_v26 = vrot.slane %v134_v25, 2 }
 0x156   : > { %v136_v27 = vadd.f32 %v135_v26, %v134_v25 }
 0x158   : > { %v137_v28 = vrot.slane %v136_v27, 1 }
 0x15a   : > { %v138_v29 = vadd.f32 %v137_v28, %v136_v27 }
 0x15c   : > { %v139_v30 = vmul.f32 0.001953125, %v138_v29 }
 0x15e   : > { %v140_v31 = vadd.f32 1e-05, %v139_v30 }
 0x160   : > { %238 = vrsqrt.f32 %v140_v31 }
 0x16a   : > { %v239_v32 = vpop.eup %238 }
 0x16b   : > { %221 = vpush %v239_v32 }
 0x19c   : > { %s222_s20 = spop %221 }
 0x19d   : > { %149 = sst [smem:[%s184_s19]] %s222_s20 }
 0x19e   : > { %253 = shalt.err (!%p250_p11)
}
 0x19f   : > { %s266_s22 = smov [#allocation2]  }
 0x1a0   : > { %224 = dma.smem_to_vmem (%p227_p4), %s266_s22, 32, %s158_s18, [#allocation3]  }
 0x1a1   : > { %259 = dma.done.wait (%p227_p4), [#allocation3], 32  }
 0x1a2   : > { %261 = vsyncadd (%p227_p4), [#allocation3], 4294967264 }
 0x1a3   : > { %165 = sfence }
 0x1a4 PF: > { %s12_s6 = sadd.s32 1, %s264_s6  }
 0x1a5   : > { %p9_p12 = scmp.ge.s32.totalorder %s12_s6, 4  }
 0x1a7   :  { %11 = sbr.rel (!%p9_p12) target bundleno = 1 (0x1), region = 53 }
 0x1ae   :  { %171 = vsyncpa [#allocation3], 1 }
 0x1af   :  { %173 = vsyncpa [#allocation3 + $0x1], 1 }

// kernel: as_mlp_forward.69
= control target key start
LH: loop header
LB: loop body
LE: loop exit
PB: predicated region body
PF: predicated region fallthrough
CT: control target
= control target key end

     0   :  { %9 = vsyncpa [#allocation3], 0  ;;  %s620_s15 = smov 0   ;;  %s622_s16 = smov 0   ;;  %s698_s0 = inlined_call_operand.vmem [shape: f32[2,2], index: 0, kind: input, shape index: {}]   ;;  %s699_s1 = inlined_call_operand.vmem [shape: bf16[2,16,64], index: 1, kind: input, shape index: {}]   ;;  %s700_s2 = inlined_call_operand.vmem [shape: bf16[64,32], index: 2, kind: input, shape index: {}]   ;;  %s701_s3 = inlined_call_operand.vmem [shape: f32[1,32], index: 3, kind: input, shape index: {}]   ;;  %s702_s4 = inlined_call_operand.vmem [shape: bf16[2,16,32], index: 4, kind: output, shape index: {}]  }
   0x1   :  { %s624_s17 = smov 0  }
   0x2 LB: > { %s461_s18 = sadd.s32 4294967295, %s590_s17   ;;  %s27_s19 = sadd.s32 1, %s586_s16  ;;  %s590_s17 = sphi %s624_s17, %s15_s17   ;;  %s586_s16 = sphi %s622_s16, %s706_s16   ;;  %s582_s15 = sphi %s620_s15, %s705_s15  }
   0x3   : > { %p29_p0 = scmp.ge.s32.totalorder %s27_s19, 2  ;;  %p463_p1 = scmp.ge.s32.totalorder %s590_s17, 1 }
   0x4   : > { %p151_p2 = scmp.lt.s32.totalorder %s590_s17, 3  ;;  %p645_p4 = scmp.eq.s32.totalorder %s461_s18, 0 }
   0x5   : > { %s708_s19 = smov (%p29_p0, %s27_s19), 0  ;;  %s164_s24 = sshll.u32 %s698_s0, 4  ;;  %s165_s24 = int_to_ptr.vmem [resolvable:$true] %s164_s24 }
   0x6   : > { %p641_p3 = pnand %p463_p1, %p151_p2  ;;  %s549_s25 = scalar_lea.vmem %s165_s24, 32 }
   0x7   : > { %p550_p7 = scmp.ne.s32.totalorder %s165_s24, %s549_s25  ;;  %p557_p11 = scmp.lt.s32.totalorder %s165_s24, %s165_s24 }
   0x8   : > { %p512_p5 = pneg %p641_p3  ;;  %p558_p12 = scmp.lt.s32.totalorder %s549_s25, %s549_s25 }
   0xa   : > { %p513_p6 = pnand %p645_p4, %p512_p5  ;;  %p559_p13 = por %p558_p12, %p557_p11 }
   0xc   : > { %p551_p8 = pneg %p513_p6 }
   0xe   : > { %p552_p9 = pnand %p551_p8, %p550_p7 }
  0x10   : > { %p553_p10 = pneg %p552_p9 }
  0x12   : > { %p560_p0 = pnand %p559_p13, %p553_p10 }
  0x14   : > { %563 = shalt.err (!%p560_p0)
}
  0x15   : > { %s592_s26 = smov [#allocation2]   ;;  %196 = sbr.rel (%p641_p3) target bundleno = 267 (0x10b), region = 36 }
  0x16   : > { %515 = dma.vmem_to_smem (!%p513_p6), %s165_s24, 32, %s592_s26, [#allocation3]  }
  0x1c   : > { %577 = dma.done.wait (%p645_p4), [#allocation3], 32  }
  0x1d   : > { %579 = vsyncadd (%p645_p4), [#allocation3], 4294967264 }
  0x1e   : > { %202 = sfence }
  0x1f   : > { %v545_v0 = vld [vmem:[%s700_s2] sm:$0xff]   ;;  %v593_v1 = vmov 0.0   ;;  %v546_v2 = vld [vmem:[%s700_s2 + $0x8] sm:$0xff]   ;;  %vm594_vm0 = vmmov 0   ;;  %p232_p1 = scmp.lt.s32.totalorder %s582_s15, 1  ;;  %s472_s5 = sshll.u32 %s582_s15, 7 }
  0x20   : > { %496 = vmatprep.subr.bf16.mxu0 %v593_v1  ;;  %504 = vmatprep.mubr.msk.bf16.mxu0 %vm594_vm0, %v593_v1  ;;  %s253_s6 = sld [smem:[#allocation2 + %s472_s5]]  ;;  %s254_s7 = sadd.s32 1, %s472_s5  ;;  %v547_v3 = vld [vmem:[%s700_s2 + $0x10] sm:$0xff]   ;;  %v548_v7 = vld [vmem:[%s700_s2 + $0x18] sm:$0xff]   ;;  %vm306_vm1 = vcmask 523264   ;;  %vm359_vm2 = vcmask 257024  }
  0x21   : > { %497 = vmatpush3.bf16.msra.mxu0 %v545_v0  ;;  %s710_s15 = smov (!%p232_p1, %s582_s15), 1  ;;  %s255_s11 = sld [smem:[#allocation2 + %s254_s7]]  ;;  %v473_v15 = vld [vmem:[%s701_s3] ss:$0 sm:$0xff] }
  0x22   : > { %498 = vmatprep.subr.bf16.mxu0 %v593_v1  ;;  %s483_s10 = sshll.u32 %s710_s15, 3 }
  0x23   : > { %s239_s14 = scalar_lea.vmem %s699_s1, %s483_s10  ;;  %s249_s24 = scalar_lea.vmem %s702_s4, %s483_s10 }
  0x24   : > { %v488_v4 = vld [vmem:[%s239_s14] sm:$0xff]  }
  0x25   : > { %499 = vmatpush3.bf16.msra.mxu0 %v546_v2  ;;  %v489_v5 = vunpack.c.l.bf16 %v488_v4  ;;  %v490_v6 = vunpack.c.h.bf16 %v488_v4 }
  0x26   : > { %500 = vmatprep.subr.bf16.mxu0 %v593_v1  ;;  %v260_v8 = vstv %s253_s6 }
  0x27   : > { %v261_v9 = vsub.f32 %v489_v5, %v260_v8  ;;  %v262_v10 = vsub.f32 %v490_v6, %v260_v8  ;;  %v263_v11 = vstv %s255_s11 }
  0x29   : > { %501 = vmatpush3.bf16.msra.mxu0 %v547_v3  ;;  %v264_v12 = vmul.f32 %v263_v11, %v261_v9  ;;  %v265_v13 = vmul.f32 %v263_v11, %v262_v10 }
  0x2a   : > { %502 = vmatprep.subr.bf16.mxu0 %v593_v1 }
  0x2b   : > { %v266_v14 = vpack.c.bf16 %v265_v13, %v264_v12 }
  0x2d   : > { %503 = vmatpush3.bf16.msra.mxu0 %v548_v7 }
  0x30   : > { %505 = vmatmul.mubr.msk.bf16.vlgmr.msra.gmra.mrb[0].mxu0 %vm306_vm1, %v266_v14 }
 0x103   : > { %v344_v16 = vpop.f32.mrb[0].mxu0 }
 0x104   : > { %v345_v17 = vadd.f32 %v473_v15, %v344_v16  ;;  %v506_v18 = vpop.f32.mrb[1].mxu0 }
 0x105   : > { %v347_v19 = vpop.f32.mrb[2].mxu0 }
 0x106   : > { %v485_v20 = vpack.c.bf16 %v345_v17, %v345_v17  ;;  %v348_v21 = vadd.f32 %v473_v15, %v347_v19  ;;  %v507_v22 = vpop.f32.mrb[3].mxu0 }
 0x108   : > { %360 = vst.msk [vmem:[%s249_s24] sm:$0xf] %vm359_vm2, %v485_v20  ;;  %v486_v23 = vpack.c.bf16 %v348_v21, %v348_v21 }
 0x10a   : > { %361 = vst.msk [vmem:[%s249_s24 + $0x4] sm:$0xf] %vm359_vm2, %v486_v23 }
 0x10b PF: > { %s15_s17 = sadd.s32 1, %s590_s17   ;;  %s705_s15 = smov %s586_s16 }
 0x10c   : > { %p12_p2 = scmp.ge.s32.totalorder %s15_s17, 4   ;;  %s706_s16 = smov %s708_s19 }
 0x10e   :  { %14 = sbr.rel (!%p12_p2) target bundleno = 2 (0x2), region = 71 }
 0x115   :  { %392 = vsyncpa [#allocation3], 1 }
 0x116   :  { %394 = vsyncpa [#allocation3 + $0x1], 1 }

// kernel: as_mlp_forward.71
= control target key start
LH: loop header
LB: loop body
LE: loop exit
PB: predicated region body
PF: predicated region fallthrough
CT: control target
= control target key end

     0   :  { %9 = vsyncpa [#allocation3], 0  ;;  %s523_s15 = smov 0   ;;  %s525_s16 = smov 0   ;;  %s589_s0 = inlined_call_operand.vmem [shape: f32[2,2], index: 0, kind: input, shape index: {}]   ;;  %s590_s1 = inlined_call_operand.vmem [shape: bf16[2,16,32], index: 1, kind: input, shape index: {}]   ;;  %s591_s2 = inlined_call_operand.vmem [shape: f32[1,32], index: 2, kind: input, shape index: {}]   ;;  %s592_s3 = inlined_call_operand.vmem [shape: f32[1,32], index: 3, kind: input, shape index: {}]   ;;  %s593_s4 = inlined_call_operand.vmem [shape: bf16[2,16,32], index: 4, kind: output, shape index: {}]  }
   0x1   :  { %s527_s17 = smov 0  }
   0x2 LB: > { %s393_s18 = sadd.s32 4294967295, %s495_s17   ;;  %s27_s19 = sadd.s32 1, %s491_s16  ;;  %s495_s17 = sphi %s527_s17, %s15_s17   ;;  %s491_s16 = sphi %s525_s16, %s597_s16   ;;  %s487_s15 = sphi %s523_s15, %s596_s15  }
   0x3   : > { %p29_p0 = scmp.ge.s32.totalorder %s27_s19, 2  ;;  %p395_p1 = scmp.ge.s32.totalorder %s495_s17, 1 }
   0x4   : > { %p151_p2 = scmp.lt.s32.totalorder %s495_s17, 3  ;;  %p548_p4 = scmp.eq.s32.totalorder %s393_s18, 0 }
   0x5   : > { %s599_s19 = smov (%p29_p0, %s27_s19), 0  ;;  %s164_s24 = sshll.u32 %s589_s0, 4  ;;  %s165_s24 = int_to_ptr.vmem [resolvable:$true] %s164_s24 }
   0x6   : > { %p544_p3 = pnand %p395_p1, %p151_p2  ;;  %s454_s25 = scalar_lea.vmem %s165_s24, 32 }
   0x7   : > { %p455_p7 = scmp.ne.s32.totalorder %s165_s24, %s454_s25  ;;  %p462_p11 = scmp.lt.s32.totalorder %s165_s24, %s165_s24 }
   0x8   : > { %p423_p5 = pneg %p544_p3  ;;  %p463_p12 = scmp.lt.s32.totalorder %s454_s25, %s454_s25 }
   0xa   : > { %p424_p6 = pnand %p548_p4, %p423_p5  ;;  %p464_p13 = por %p463_p12, %p462_p11 }
   0xc   : > { %p456_p8 = pneg %p424_p6 }
   0xe   : > { %p457_p9 = pnand %p456_p8, %p455_p7 }
  0x10   : > { %p458_p10 = pneg %p457_p9 }
  0x12   : > { %p465_p0 = pnand %p464_p13, %p458_p10 }
  0x14   : > { %468 = shalt.err (!%p465_p0)
}
  0x15   : > { %s497_s26 = smov [#allocation2]   ;;  %196 = sbr.rel (%p544_p3) target bundleno = 50 (0x32), region = 36 }
  0x16   : > { %426 = dma.vmem_to_smem (!%p424_p6), %s165_s24, 32, %s497_s26, [#allocation3]  }
  0x1c   : > { %482 = dma.done.wait (%p548_p4), [#allocation3], 32  }
  0x1d   : > { %484 = vsyncadd (%p548_p4), [#allocation3], 4294967264 }
  0x1e   : > { %202 = sfence }
  0x1f   : > { %p232_p1 = scmp.lt.s32.totalorder %s487_s15, 1  ;;  %s404_s27 = sshll.u32 %s487_s15, 7  ;;  %v405_v7 = vld [vmem:[%s591_s2] ss:$0 sm:$0xff]  ;;  %vm291_vm0 = vcmask 257024  }
  0x20   : > { %s252_s28 = sld [smem:[#allocation2 + %s404_s27]]  ;;  %s253_s29 = sadd.s32 1, %s404_s27  ;;  %v406_v10 = vld [vmem:[%s592_s3] ss:$0 sm:$0xff] }
  0x21   : > { %s601_s15 = smov (!%p232_p1, %s487_s15), 1  ;;  %s254_s30 = sld [smem:[#allocation2 + %s253_s29]] }
  0x22   : > { %s411_s5 = sshll.u32 %s601_s15, 3 }
  0x23   : > { %s239_s8 = scalar_lea.vmem %s590_s1, %s411_s5  ;;  %s249_s15 = scalar_lea.vmem %s593_s4, %s411_s5 }
  0x24   : > { %v416_v0 = vld [vmem:[%s239_s8] sm:$0xff]  }
  0x25   : > { %v417_v1 = vunpack.c.l.bf16 %v416_v0  ;;  %v418_v2 = vunpack.c.h.bf16 %v416_v0 }
  0x26   : > { %v259_v3 = vstv %s252_s28 }
  0x27   : > { %v260_v4 = vsub.f32 %v417_v1, %v259_v3  ;;  %v261_v5 = vsub.f32 %v418_v2, %v259_v3  ;;  %v262_v6 = vstv %s254_s30 }
  0x29   : > { %v263_v8 = vmul.f32 %v262_v6, %v260_v4  ;;  %v264_v9 = vmul.f32 %v262_v6, %v261_v5 }
  0x2b   : > { %v272_v11 = vmul.f32 %v405_v7, %v263_v8  ;;  %v273_v12 = vmul.f32 %v405_v7, %v264_v9 }
  0x2d   : > { %v281_v13 = vadd.f32 %v406_v10, %v272_v11  ;;  %v282_v14 = vadd.f32 %v406_v10, %v273_v12 }
  0x2f   : > { %v413_v15 = vpack.c.bf16 %v281_v13, %v281_v13  ;;  %v414_v16 = vpack.c.bf16 %v282_v14, %v282_v14 }
  0x31   : > { %292 = vst.msk [vmem:[%s249_s15] sm:$0xf] %vm291_vm0, %v413_v15  ;;  %293 = vst.msk [vmem:[%s249_s15 + $0x4] sm:$0xf] %vm291_vm0, %v414_v16 }
  0x32 PF: > { %s15_s17 = sadd.s32 1, %s495_s17   ;;  %s596_s15 = smov %s491_s16 }
  0x33   : > { %p12_p2 = scmp.ge.s32.totalorder %s15_s17, 4   ;;  %s597_s16 = smov %s599_s19 }
  0x35   :  { %14 = sbr.rel (!%p12_p2) target bundleno = 2 (0x2), region = 71 }
  0x3c   :  { %324 = vsyncpa [#allocation3], 1 }
  0x3d   :  { %326 = vsyncpa [#allocation3 + $0x1], 1 }

// kernel: as_mlp_forward.72
= control target key start
LH: loop header
LB: loop body
LE: loop exit
PB: predicated region body
PF: predicated region fallthrough
CT: control target
= control target key end

     0   :  { %s373_s12 = smov 0   ;;  %s396_s0 = inlined_call_operand.vmem [shape: bf16[32,8], index: 0, kind: input, shape index: {}]   ;;  %s397_s1 = inlined_call_operand.vmem [shape: bf16[8,8], index: 1, kind: input, shape index: {}]   ;;  %s398_s2 = inlined_call_operand.vmem [shape: f32[1,8], index: 2, kind: input, shape index: {}]   ;;  %s399_s3 = inlined_call_operand.vmem [shape: bf16[32,8], index: 3, kind: output, shape index: {}]  }
   0x1 LB: > { %s306_s13 = sadd.s32 4294967295, %s349_s12   ;;  %p310_p0 = scmp.ge.s32.totalorder %s349_s12, 1  ;;  %s349_s12 = sphi %s373_s12, %s13_s12  }
   0x2   : > { %p138_p1 = scmp.lt.s32.totalorder %s349_s12, 3 }
   0x4   : > { %p139_p2 = pnand %p310_p0, %p138_p1 }
   0x5   : > { %v177_v0 = vld [vmem:[%s397_s1] sm:$0xf] (!%p139_p2)  ;;  %vm194_vm0 = vcmask (!%p139_p2), 1043456   ;;  %s311_s16 = sshll.u32 (!%p139_p2), %s306_s13, 1  ;;  %v351_v1 = vmov (!%p139_p2), 0.0   ;;  %vm352_vm1 = vmmov (!%p139_p2), 0  }
   0x6   : > { %142 = sbr.rel (%p139_p2) target bundleno = 236 (0xec), region = 32  ;;  %326 = vmatprep.subr.bf16.mxu0 (!%p139_p2), %v351_v1  ;;  %v196_v2 = vsel (!%p139_p2), %vm194_vm0, %v177_v0, 0  ;;  %328 = vmatprep.mubr.msk.bf16.mxu0 (!%p139_p2), %vm352_vm1, %v351_v1  ;;  %p163_p3 = scmp.lt.s32.totalorder (!%p139_p2), %s311_s16, 3  ;;  %vm190_vm2 = vcmask (!%p139_p2), 64512   ;;  %v315_v4 = vld [vmem:[%s398_s2] ss:$0 sm:$0xff] (!%p139_p2) }
   0x7   : > { %327 = vmatpush3.bf16.msra.mxu0 (!%p139_p2), %v196_v2  ;;  %vm247_vm3 = vcmask (!%p139_p2), 60416  }
   0xd   : > { %s401_s16 = smov (!%p163_p3, %s311_s16), 3 }
   0xe   : > { %s312_s17 = sshll.u32 %s401_s16, 2 }
   0xf   : > { %s166_s20 = scalar_lea.vmem %s396_s0, %s312_s17  ;;  %s172_s25 = scalar_lea.vmem %s399_s3, %s312_s17 }
  0x10   : > { %v342_v3 = vld [vmem:[%s166_s20] sm:$0xff]  }
  0x11   : > { %329 = vmatmul.mubr.msk.bf16.vlgmr.msra.gmra.mrb[0].mxu0 %vm190_vm2, %v342_v3 }
  0xe4   : > { %v232_v5 = vpop.f32.mrb[0].mxu0 }
  0xe5   : > { %v233_v6 = vadd.f32 %v315_v4, %v232_v5  ;;  %v330_v7 = vpop.f32.mrb[1].mxu0 }
  0xe6   : > { %v235_v8 = vpop.f32.mrb[2].mxu0 }
  0xe7   : > { %v322_v9 = vpack.c.bf16 %v233_v6, %v233_v6  ;;  %v236_v10 = vadd.f32 %v315_v4, %v235_v8  ;;  %v331_v11 = vpop.f32.mrb[3].mxu0 }
  0xe9   : > { %248 = vst.msk [vmem:[%s172_s25] sm:$0xf] %vm247_vm3, %v322_v9  ;;  %v323_v12 = vpack.c.bf16 %v236_v10, %v236_v10 }
  0xeb   : > { %249 = vst.msk [vmem:[%s172_s25 + $0x4] sm:$0xf] %vm247_vm3, %v323_v12 }
  0xec PF: > { %s13_s12 = sadd.s32 1, %s349_s12  }
  0xed   : > { %p10_p4 = scmp.ge.s32.totalorder %s13_s12, 4  }
  0xef   :  { %12 = sbr.rel (!%p10_p4) target bundleno = 1 (0x1), region = 62 }

// kernel: as_mlp_forward.73
= control target key start
LH: loop header
LB: loop body
LE: loop exit
PB: predicated region body
PF: predicated region fallthrough
CT: control target
= control target key end

     0   :  { %s381_s12 = smov 0   ;;  %s404_s0 = inlined_call_operand.vmem [shape: bf16[32,12], index: 0, kind: input, shape index: {}]   ;;  %s405_s1 = inlined_call_operand.vmem [shape: bf16[12,12], index: 1, kind: input, shape index: {}]   ;;  %s406_s2 = inlined_call_operand.vmem [shape: f32[1,12], index: 2, kind: input, shape index: {}]   ;;  %s407_s3 = inlined_call_operand.vmem [shape: bf16[32,12], index: 3, kind: output, shape index: {}]  }
   0x1 LB: > { %s312_s13 = sadd.s32 4294967295, %s357_s12   ;;  %p316_p0 = scmp.ge.s32.totalorder %s357_s12, 1  ;;  %s357_s12 = sphi %s381_s12, %s13_s12  }
   0x2   : > { %p138_p1 = scmp.lt.s32.totalorder %s357_s12, 3 }
   0x4   : > { %p139_p2 = pnand %p316_p0, %p138_p1 }
   0x5   : > { %vm200_vm0 = vcmask (!%p139_p2), 1045504   ;;  %v359_v0 = vmov (!%p139_p2), 0.0   ;;  %v349_v1 = vld [vmem:[%s405_s1] sm:$0x3f] (!%p139_p2)   ;;  %s317_s16 = sshll.u32 (!%p139_p2), %s312_s13, 1  ;;  %vm360_vm1 = vmmov (!%p139_p2), 0  }
   0x6   : > { %142 = sbr.rel (%p139_p2) target bundleno = 236 (0xec), region = 32  ;;  %333 = vmatprep.subr.bf16.mxu0 (!%p139_p2), %v359_v0  ;;  %335 = vmatprep.mubr.msk.bf16.mxu0 (!%p139_p2), %vm360_vm1, %v359_v0  ;;  %p163_p3 = scmp.lt.s32.totalorder (!%p139_p2), %s317_s16, 3  ;;  %v202_v2 = vsel (!%p139_p2), %vm200_vm0, %v349_v1, 0  ;;  %vm196_vm2 = vcmask (!%p139_p2), 97280   ;;  %v321_v4 = vld [vmem:[%s406_s2] ss:$0 sm:$0xff] (!%p139_p2) }
   0x7   : > { %334 = vmatpush3.bf16.msra.mxu0 (!%p139_p2), %v202_v2  ;;  %vm253_vm3 = vcmask (!%p139_p2), 93184  }
   0xd   : > { %s409_s16 = smov (!%p163_p3, %s317_s16), 3 }
   0xe   : > { %s318_s17 = sshll.u32 %s409_s16, 2 }
   0xf   : > { %s166_s20 = scalar_lea.vmem %s404_s0, %s318_s17  ;;  %s172_s25 = scalar_lea.vmem %s407_s3, %s318_s17 }
  0x10   : > { %v350_v3 = vld [vmem:[%s166_s20] sm:$0xff]  }
  0x11   : > { %336 = vmatmul.mubr.msk.bf16.vlgmr.msra.gmra.mrb[0].mxu0 %vm196_vm2, %v350_v3 }
  0xe4   : > { %v238_v5 = vpop.f32.mrb[0].mxu0 }
  0xe5   : > { %v239_v6 = vadd.f32 %v321_v4, %v238_v5  ;;  %v337_v7 = vpop.f32.mrb[1].mxu0 }
  0xe6   : > { %v241_v8 = vpop.f32.mrb[2].mxu0 }
  0xe7   : > { %v329_v9 = vpack.c.bf16 %v239_v6, %v239_v6  ;;  %v242_v10 = vadd.f32 %v321_v4, %v241_v8  ;;  %v338_v11 = vpop.f32.mrb[3].mxu0 }
  0xe9   : > { %254 = vst.msk [vmem:[%s172_s25] sm:$0xf] %vm253_vm3, %v329_v9  ;;  %v330_v12 = vpack.c.bf16 %v242_v10, %v242_v10 }
  0xeb   : > { %255 = vst.msk [vmem:[%s172_s25 + $0x4] sm:$0xf] %vm253_vm3, %v330_v12 }
  0xec PF: > { %s13_s12 = sadd.s32 1, %s357_s12  }
  0xed   : > { %p10_p4 = scmp.ge.s32.totalorder %s13_s12, 4  }
  0xef   :  { %12 = sbr.rel (!%p10_p4) target bundleno = 1 (0x1), region = 62 }

// kernel: as_mlp_forward.74
= control target key start
LH: loop header
LB: loop body
LE: loop exit
PB: predicated region body
PF: predicated region fallthrough
CT: control target
= control target key end

     0   :  { %s381_s12 = smov 0   ;;  %s404_s0 = inlined_call_operand.vmem [shape: bf16[32,14], index: 0, kind: input, shape index: {}]   ;;  %s405_s1 = inlined_call_operand.vmem [shape: bf16[14,14], index: 1, kind: input, shape index: {}]   ;;  %s406_s2 = inlined_call_operand.vmem [shape: f32[1,14], index: 2, kind: input, shape index: {}]   ;;  %s407_s3 = inlined_call_operand.vmem [shape: bf16[32,14], index: 3, kind: output, shape index: {}]  }
   0x1 LB: > { %s312_s13 = sadd.s32 4294967295, %s357_s12   ;;  %p316_p0 = scmp.ge.s32.totalorder %s357_s12, 1  ;;  %s357_s12 = sphi %s381_s12, %s13_s12  }
   0x2   : > { %p138_p1 = scmp.lt.s32.totalorder %s357_s12, 3 }
   0x4   : > { %p139_p2 = pnand %p316_p0, %p138_p1 }
   0x5   : > { %vm200_vm0 = vcmask (!%p139_p2), 1046528   ;;  %v359_v0 = vmov (!%p139_p2), 0.0   ;;  %v349_v1 = vld [vmem:[%s405_s1] sm:$0x7f] (!%p139_p2)   ;;  %s317_s16 = sshll.u32 (!%p139_p2), %s312_s13, 1  ;;  %vm360_vm1 = vmmov (!%p139_p2), 0  }
   0x6   : > { %142 = sbr.rel (%p139_p2) target bundleno = 236 (0xec), region = 32  ;;  %333 = vmatprep.subr.bf16.mxu0 (!%p139_p2), %v359_v0  ;;  %335 = vmatprep.mubr.msk.bf16.mxu0 (!%p139_p2), %vm360_vm1, %v359_v0  ;;  %p163_p3 = scmp.lt.s32.totalorder (!%p139_p2), %s317_s16, 3  ;;  %v202_v2 = vsel (!%p139_p2), %vm200_vm0, %v349_v1, 0  ;;  %vm196_vm2 = vcmask (!%p139_p2), 113664   ;;  %v321_v4 = vld [vmem:[%s406_s2] ss:$0 sm:$0xff] (!%p139_p2) }
   0x7   : > { %334 = vmatpush3.bf16.msra.mxu0 (!%p139_p2), %v202_v2  ;;  %vm253_vm3 = vcmask (!%p139_p2), 109568  }
   0xd   : > { %s409_s16 = smov (!%p163_p3, %s317_s16), 3 }
   0xe   : > { %s318_s17 = sshll.u32 %s409_s16, 2 }
   0xf   : > { %s166_s20 = scalar_lea.vmem %s404_s0, %s318_s17  ;;  %s172_s25 = scalar_lea.vmem %s407_s3, %s318_s17 }
  0x10   : > { %v350_v3 = vld [vmem:[%s166_s20] sm:$0xff]  }
  0x11   : > { %336 = vmatmul.mubr.msk.bf16.vlgmr.msra.gmra.mrb[0].mxu0 %vm196_vm2, %v350_v3 }
  0xe4   : > { %v238_v5 = vpop.f32.mrb[0].mxu0 }
  0xe5   : > { %v239_v6 = vadd.f32 %v321_v4, %v238_v5  ;;  %v337_v7 = vpop.f32.mrb[1].mxu0 }
  0xe6   : > { %v241_v8 = vpop.f32.mrb[2].mxu0 }
  0xe7   : > { %v329_v9 = vpack.c.bf16 %v239_v6, %v239_v6  ;;  %v242_v10 = vadd.f32 %v321_v4, %v241_v8  ;;  %v338_v11 = vpop.f32.mrb[3].mxu0 }
  0xe9   : > { %254 = vst.msk [vmem:[%s172_s25] sm:$0xf] %vm253_vm3, %v329_v9  ;;  %v330_v12 = vpack.c.bf16 %v242_v10, %v242_v10 }
  0xeb   : > { %255 = vst.msk [vmem:[%s172_s25 + $0x4] sm:$0xf] %vm253_vm3, %v330_v12 }
  0xec PF: > { %s13_s12 = sadd.s32 1, %s357_s12  }
  0xed   : > { %p10_p4 = scmp.ge.s32.totalorder %s13_s12, 4  }
  0xef   :  { %12 = sbr.rel (!%p10_p4) target bundleno = 1 (0x1), region = 62 }

// kernel: as_mlp_forward.76
= control target key start
LH: loop header
LB: loop body
LE: loop exit
PB: predicated region body
PF: predicated region fallthrough
CT: control target
= control target key end

     0   :  { %10 = vsyncpa [#allocation3], 0  ;;  %s693_s18 = smov 0   ;;  %s695_s19 = smov 0   ;;  %s765_s0 = inlined_call_operand.vmem [shape: f32[2,2], index: 0, kind: input, shape index: {}]   ;;  %s766_s1 = inlined_call_operand.vmem [shape: bf16[2,16,32], index: 1, kind: input, shape index: {}]   ;;  %s767_s2 = inlined_call_operand.vmem [shape: bf16[32,32], index: 2, kind: input, shape index: {}]   ;;  %s768_s3 = inlined_call_operand.vmem [shape: f32[1,32], index: 3, kind: input, shape index: {}]   ;;  %s769_s4 = inlined_call_operand.vmem [shape: bf16[2,16,32], index: 4, kind: input, shape index: {}]   ;;  %s770_s5 = inlined_call_operand.vmem [shape: bf16[2,16,32], index: 5, kind: output, shape index: {}]  }
   0x1   :  { %s697_s20 = smov 0  }
   0x2 LB: > { %s532_s21 = sadd.s32 4294967295, %s658_s20   ;;  %s28_s22 = sadd.s32 1, %s654_s19  ;;  %s658_s20 = sphi %s697_s20, %s16_s20   ;;  %s654_s19 = sphi %s695_s19, %s774_s19   ;;  %s650_s18 = sphi %s693_s18, %s773_s18  }
   0x3   : > { %p30_p0 = scmp.ge.s32.totalorder %s28_s22, 2  ;;  %p534_p1 = scmp.ge.s32.totalorder %s658_s20, 1 }
   0x4   : > { %p180_p2 = scmp.lt.s32.totalorder %s658_s20, 3  ;;  %p718_p4 = scmp.eq.s32.totalorder %s532_s21, 0 }
   0x5   : > { %s776_s22 = smov (%p30_p0, %s28_s22), 0  ;;  %s193_s27 = sshll.u32 %s765_s0, 4  ;;  %s194_s27 = int_to_ptr.vmem [resolvable:$true] %s193_s27 }
   0x6   : > { %p714_p3 = pnand %p534_p1, %p180_p2  ;;  %s617_s28 = scalar_lea.vmem %s194_s27, 32 }
   0x7   : > { %p618_p7 = scmp.ne.s32.totalorder %s194_s27, %s617_s28  ;;  %p625_p11 = scmp.lt.s32.totalorder %s194_s27, %s194_s27 }
   0x8   : > { %p582_p5 = pneg %p714_p3  ;;  %p626_p12 = scmp.lt.s32.totalorder %s617_s28, %s617_s28 }
   0xa   : > { %p583_p6 = pnand %p718_p4, %p582_p5  ;;  %p627_p13 = por %p626_p12, %p625_p11 }
   0xc   : > { %p619_p8 = pneg %p583_p6 }
   0xe   : > { %p620_p9 = pnand %p619_p8, %p618_p7 }
  0x10   : > { %p621_p10 = pneg %p620_p9 }
  0x12   : > { %p628_p0 = pnand %p627_p13, %p621_p10 }
  0x14   : > { %631 = shalt.err (!%p628_p0)
}
  0x15   : > { %s660_s29 = smov [#allocation2]   ;;  %238 = sbr.rel (%p714_p3) target bundleno = 266 (0x10a), region = 40 }
  0x16   : > { %585 = dma.vmem_to_smem (!%p583_p6), %s194_s27, 32, %s660_s29, [#allocation3]  }
  0x1c   : > { %645 = dma.done.wait (%p718_p4), [#allocation3], 32  }
  0x1d   : > { %647 = vsyncadd (%p718_p4), [#allocation3], 4294967264 }
  0x1e   : > { %244 = sfence }
  0x1f   : > { %v615_v0 = vld [vmem:[%s767_s2] sm:$0xff]   ;;  %v661_v1 = vmov 0.0   ;;  %v616_v2 = vld [vmem:[%s767_s2 + $0x8] sm:$0xff]   ;;  %vm662_vm0 = vmmov 0   ;;  %p285_p1 = scmp.lt.s32.totalorder %s650_s18, 1  ;;  %s545_s9 = sshll.u32 %s650_s18, 7 }
  0x20   : > { %570 = vmatprep.subr.bf16.mxu0 %v661_v1  ;;  %574 = vmatprep.mubr.msk.bf16.mxu0 %vm662_vm0, %v661_v1  ;;  %s316_s10 = sld [smem:[#allocation2 + %s545_s9]]  ;;  %s317_s11 = sadd.s32 1, %s545_s9  ;;  %vm353_vm1 = vcmask 261120   ;;  %v546_v14 = vld [vmem:[%s768_s3] ss:$0 sm:$0xff]  ;;  %vm412_vm2 = vcmask 257024  }
  0x21   : > { %571 = vmatpush3.bf16.msra.mxu0 %v615_v0  ;;  %s778_s18 = smov (!%p285_p1, %s650_s18), 1  ;;  %s318_s12 = sld [smem:[#allocation2 + %s317_s11]] }
  0x22   : > { %572 = vmatprep.subr.bf16.mxu0 %v661_v1  ;;  %s554_s13 = sshll.u32 %s778_s18, 3 }
  0x23   : > { %s292_s16 = scalar_lea.vmem %s766_s1, %s554_s13  ;;  %s302_s18 = scalar_lea.vmem %s769_s4, %s554_s13 }
  0x24   : > { %v560_v3 = vld [vmem:[%s292_s16] sm:$0xff]   ;;  %s312_s27 = scalar_lea.vmem %s770_s5, %s554_s13 }
  0x25   : > { %573 = vmatpush3.bf16.msra.mxu0 %v616_v2  ;;  %v561_v4 = vunpack.c.l.bf16 %v560_v3  ;;  %v562_v5 = vunpack.c.h.bf16 %v560_v3  ;;  %v564_v13 = vld [vmem:[%s302_s18] sm:$0xff]  }
  0x26   : > { %v323_v6 = vstv %s316_s10  ;;  %v565_v15 = vunpack.c.l.bf16 %v564_v13  ;;  %v566_v19 = vunpack.c.h.bf16 %v564_v13 }
  0x27   : > { %v324_v7 = vsub.f32 %v561_v4, %v323_v6  ;;  %v325_v8 = vsub.f32 %v562_v5, %v323_v6  ;;  %v326_v9 = vstv %s318_s12 }
  0x29   : > { %v327_v10 = vmul.f32 %v326_v9, %v324_v7  ;;  %v328_v11 = vmul.f32 %v326_v9, %v325_v8 }
  0x2b   : > { %v329_v12 = vpack.c.bf16 %v328_v11, %v327_v10 }
  0x2d   : > { %575 = vmatmul.mubr.msk.bf16.vlgmr.msra.gmra.mrb[0].mxu0 %vm353_vm1, %v329_v12 }
 0x100   : > { %v391_v16 = vpop.f32.mrb[0].mxu0 }
 0x101   : > { %v392_v17 = vadd.f32 %v546_v14, %v391_v16  ;;  %v576_v18 = vpop.f32.mrb[1].mxu0 }
 0x102   : > { %v394_v20 = vpop.f32.mrb[2].mxu0 }
 0x103   : > { %v402_v21 = vadd.f32 %v565_v15, %v392_v17  ;;  %v395_v22 = vadd.f32 %v546_v14, %v394_v20  ;;  %v577_v23 = vpop.f32.mrb[3].mxu0 }
 0x105   : > { %v557_v24 = vpack.c.bf16 %v402_v21, %v402_v21  ;;  %v403_v25 = vadd.f32 %v566_v19, %v395_v22 }
 0x107   : > { %413 = vst.msk [vmem:[%s312_s27] sm:$0xf] %vm412_vm2, %v557_v24  ;;  %v558_v26 = vpack.c.bf16 %v403_v25, %v403_v25 }
 0x109   : > { %414 = vst.msk [vmem:[%s312_s27 + $0x4] sm:$0xf] %vm412_vm2, %v558_v26 }
 0x10a PF: > { %s16_s20 = sadd.s32 1, %s658_s20   ;;  %s773_s18 = smov %s654_s19 }
 0x10b   : > { %p13_p2 = scmp.ge.s32.totalorder %s16_s20, 4   ;;  %s774_s19 = smov %s776_s22 }
 0x10d   :  { %15 = sbr.rel (!%p13_p2) target bundleno = 2 (0x2), region = 78 }
 0x114   :  { %445 = vsyncpa [#allocation3], 1 }
 0x115   :  { %447 = vsyncpa [#allocation3 + $0x1], 1 }

// kernel: as_mlp_forward.79
= control target key start
LH: loop header
LB: loop body
LE: loop exit
PB: predicated region body
PF: predicated region fallthrough
CT: control target
= control target key end

     0   :  { %s543_s15 = smov 0   ;;  %s595_s0 = inlined_call_operand.vmem [shape: bf16[32,128], index: 0, kind: input, shape index: {}]   ;;  %s596_s1 = inlined_call_operand.vmem [shape: bf16[128,32], index: 1, kind: input, shape index: {}]   ;;  %s597_s2 = inlined_call_operand.vmem [shape: f32[1,32], index: 2, kind: input, shape index: {}]   ;;  %s598_s3 = inlined_call_operand.vmem [shape: bf16[32,32], index: 3, kind: input, shape index: {}]   ;;  %s599_s4 = inlined_call_operand.vmem [shape: bf16[32,32], index: 4, kind: output, shape index: {}]  }
   0x1 LB: > { %s429_s16 = sadd.s32 4294967295, %s514_s15   ;;  %p433_p0 = scmp.ge.s32.totalorder %s514_s15, 1  ;;  %s514_s15 = sphi %s543_s15, %s14_s15  }
   0x2   : > { %p174_p1 = scmp.lt.s32.totalorder %s514_s15, 3 }
   0x4   : > { %p175_p2 = pnand %p433_p0, %p174_p1 }
   0x5   : > { %v499_v0 = vld [vmem:[%s596_s1] sm:$0xff] (!%p175_p2)   ;;  %v516_v1 = vmov (!%p175_p2), 0.0   ;;  %v500_v2 = vld [vmem:[%s596_s1 + $0x8] sm:$0xff] (!%p175_p2)   ;;  %vm517_vm0 = vmmov (!%p175_p2), 0   ;;  %s434_s21 = sshll.u32 (!%p175_p2), %s429_s16, 1  ;;  %v501_v3 = vld [vmem:[%s596_s1 + $0x10] sm:$0xff] (!%p175_p2)  }
   0x6   : > { %178 = sbr.rel (%p175_p2) target bundleno = 259 (0x103), region = 36  ;;  %469 = vmatprep.subr.bf16.mxu0 (!%p175_p2), %v516_v1  ;;  %485 = vmatprep.mubr.msk.bf16.mxu0 (!%p175_p2), %vm517_vm0, %v516_v1  ;;  %p206_p3 = scmp.lt.s32.totalorder (!%p175_p2), %s434_s21, 3  ;;  %v502_v4 = vld [vmem:[%s596_s1 + $0x18] sm:$0xff] (!%p175_p2)   ;;  %v503_v5 = vld [vmem:[%s596_s1 + $0x20] sm:$0xff] (!%p175_p2)   ;;  %v504_v6 = vld [vmem:[%s596_s1 + $0x28] sm:$0xff] (!%p175_p2)   ;;  %vm358_vm1 = vcmask (!%p175_p2), 257024  }
   0x7   : > { %470 = vmatpush3.bf16.msra.mxu0 (!%p175_p2), %v499_v0  ;;  %v505_v7 = vld [vmem:[%s596_s1 + $0x30] sm:$0xff] (!%p175_p2)   ;;  %v506_v8 = vld [vmem:[%s596_s1 + $0x38] sm:$0xff] (!%p175_p2)   ;;  %v440_v11 = vld [vmem:[%s597_s2] ss:$0 sm:$0xff] (!%p175_p2) }
   0x8   : > { %471 = vmatprep.subr.bf16.mxu0 (!%p175_p2), %v516_v1 }
   0xb   : > { %472 = vmatpush3.bf16.msra.mxu0 (!%p175_p2), %v500_v2 }
   0xc   : > { %473 = vmatprep.subr.bf16.mxu0 (!%p175_p2), %v516_v1 }
   0xd   : > { %s601_s21 = smov (!%p206_p3, %s434_s21), 3 }
   0xe   : > { %s560_s24 = sshll.u32 %s601_s21, 2 }
   0xf   : > { %s209_s27 = scalar_lea.vmem %s595_s0, %s560_s24  ;;  %474 = vmatpush3.bf16.msra.mxu0 %v501_v3  ;;  %s215_s14 = scalar_lea.vmem %s598_s3, %s560_s24 }
  0x10   : > { %475 = vmatprep.subr.bf16.mxu0 %v516_v1  ;;  %v507_v9 = vld [vmem:[%s209_s27] sm:$0xff]   ;;  %s221_s20 = scalar_lea.vmem %s599_s4, %s560_s24 }
  0x11   : > { %v457_v10 = vld [vmem:[%s215_s14] sm:$0xff]  }
  0x12   : > { %v458_v12 = vunpack.c.l.bf16 %v457_v10  ;;  %v459_v16 = vunpack.c.h.bf16 %v457_v10 }
  0x13   : > { %476 = vmatpush3.bf16.msra.mxu0 %v502_v4 }
  0x14   : > { %477 = vmatprep.subr.bf16.mxu0 %v516_v1 }
  0x17   : > { %478 = vmatpush3.bf16.msra.mxu0 %v503_v5 }
  0x18   : > { %479 = vmatprep.subr.bf16.mxu0 %v516_v1 }
  0x1b   : > { %480 = vmatpush3.bf16.msra.mxu0 %v504_v6 }
  0x1c   : > { %481 = vmatprep.subr.bf16.mxu0 %v516_v1 }
  0x1f   : > { %482 = vmatpush3.bf16.msra.mxu0 %v505_v7 }
  0x20   : > { %483 = vmatprep.subr.bf16.mxu0 %v516_v1 }
  0x23   : > { %484 = vmatpush3.bf16.msra.mxu0 %v506_v8 }
  0x26   : > { %486 = vmatmul.mubr.bf16.vlgmr.msra.gmra.mrb[0].mxu0 %v507_v9 }
  0xf9   : > { %v337_v13 = vpop.f32.mrb[0].mxu0 }
  0xfa   : > { %v338_v14 = vadd.f32 %v440_v11, %v337_v13  ;;  %v487_v15 = vpop.f32.mrb[1].mxu0 }
  0xfb   : > { %v340_v17 = vpop.f32.mrb[2].mxu0 }
  0xfc   : > { %v348_v18 = vadd.f32 %v458_v12, %v338_v14  ;;  %v341_v19 = vadd.f32 %v440_v11, %v340_v17  ;;  %v488_v20 = vpop.f32.mrb[3].mxu0 }
  0xfe   : > { %v454_v21 = vpack.c.bf16 %v348_v18, %v348_v18  ;;  %v349_v22 = vadd.f32 %v459_v16, %v341_v19 }
 0x100   : > { %359 = vst.msk [vmem:[%s221_s20] sm:$0xf] %vm358_vm1, %v454_v21  ;;  %v455_v23 = vpack.c.bf16 %v349_v22, %v349_v22 }
 0x102   : > { %360 = vst.msk [vmem:[%s221_s20 + $0x4] sm:$0xf] %vm358_vm1, %v455_v23 }
 0x103 PF: > { %s14_s15 = sadd.s32 1, %s514_s15  }
 0x104   : > { %p11_p4 = scmp.ge.s32.totalorder %s14_s15, 4  }
 0x106   :  { %13 = sbr.rel (!%p11_p4) target bundleno = 1 (0x1), region = 69 }

// kernel: as_mlp_forward.78
= control target key start
LH: loop header
LB: loop body
LE: loop exit
PB: predicated region body
PF: predicated region fallthrough
CT: control target
= control target key end

     0   :  { %9 = vsyncpa [#allocation3], 0  ;;  %s620_s15 = smov 0   ;;  %s622_s16 = smov 0   ;;  %s696_s0 = inlined_call_operand.vmem [shape: f32[2,2], index: 0, kind: input, shape index: {}]   ;;  %s697_s1 = inlined_call_operand.vmem [shape: bf16[2,16,32], index: 1, kind: input, shape index: {}]   ;;  %s698_s2 = inlined_call_operand.vmem [shape: bf16[32,128], index: 2, kind: input, shape index: {}]   ;;  %s699_s3 = inlined_call_operand.vmem [shape: f32[1,128], index: 3, kind: input, shape index: {}]   ;;  %s700_s4 = inlined_call_operand.vmem [shape: bf16[2,16,128], index: 4, kind: output, shape index: {}]  }
   0x1   :  { %s624_s17 = smov 0  }
   0x2 LB: > { %s462_s18 = sadd.s32 4294967295, %s590_s17   ;;  %s27_s19 = sadd.s32 1, %s586_s16  ;;  %s590_s17 = sphi %s624_s17, %s15_s17   ;;  %s586_s16 = sphi %s622_s16, %s704_s16   ;;  %s582_s15 = sphi %s620_s15, %s703_s15  }
   0x3   : > { %p29_p0 = scmp.ge.s32.totalorder %s27_s19, 2  ;;  %p464_p1 = scmp.ge.s32.totalorder %s590_s17, 1 }
   0x4   : > { %p151_p2 = scmp.lt.s32.totalorder %s590_s17, 3  ;;  %p645_p4 = scmp.eq.s32.totalorder %s462_s18, 0 }
   0x5   : > { %s706_s19 = smov (%p29_p0, %s27_s19), 0  ;;  %s164_s24 = sshll.u32 %s696_s0, 4  ;;  %s165_s24 = int_to_ptr.vmem [resolvable:$true] %s164_s24 }
   0x6   : > { %p641_p3 = pnand %p464_p1, %p151_p2  ;;  %s549_s25 = scalar_lea.vmem %s165_s24, 32 }
   0x7   : > { %p550_p7 = scmp.ne.s32.totalorder %s165_s24, %s549_s25  ;;  %p557_p11 = scmp.lt.s32.totalorder %s165_s24, %s165_s24 }
   0x8   : > { %p510_p5 = pneg %p641_p3  ;;  %p558_p12 = scmp.lt.s32.totalorder %s549_s25, %s549_s25 }
   0xa   : > { %p511_p6 = pnand %p645_p4, %p510_p5  ;;  %p559_p13 = por %p558_p12, %p557_p11 }
   0xc   : > { %p551_p8 = pneg %p511_p6 }
   0xe   : > { %p552_p9 = pnand %p551_p8, %p550_p7 }
  0x10   : > { %p553_p10 = pneg %p552_p9 }
  0x12   : > { %p560_p0 = pnand %p559_p13, %p553_p10 }
  0x14   : > { %563 = shalt.err (!%p560_p0)
}
  0x15   : > { %s592_s26 = smov [#allocation2]   ;;  %196 = sbr.rel (%p641_p3) target bundleno = 289 (0x121), region = 36 }
  0x16   : > { %513 = dma.vmem_to_smem (!%p511_p6), %s165_s24, 32, %s592_s26, [#allocation3]  }
  0x1c   : > { %577 = dma.done.wait (%p645_p4), [#allocation3], 32  }
  0x1d   : > { %579 = vsyncadd (%p645_p4), [#allocation3], 4294967264 }
  0x1e   : > { %202 = sfence }
  0x1f   : > { %v543_v0 = vld [vmem:[%s698_s2] sm:$0xff]   ;;  %v593_v1 = vmov 0.0   ;;  %v544_v2 = vld [vmem:[%s698_s2 + $0x8] sm:$0xff]   ;;  %vm594_vm0 = vmmov 0   ;;  %p232_p1 = scmp.lt.s32.totalorder %s582_s15, 1  ;;  %s473_s5 = sshll.u32 %s582_s15, 7 }
  0x20   : > { %498 = vmatprep.subr.bf16.mxu0 %v593_v1  ;;  %502 = vmatprep.mubr.msk.bf16.mxu0 %vm594_vm0, %v593_v1  ;;  %s253_s6 = sld [smem:[#allocation2 + %s473_s5]]  ;;  %s254_s7 = sadd.s32 1, %s473_s5  ;;  %vm290_vm1 = vcmask 261120   ;;  %v474_v13 = vld [vmem:[%s699_s3] ss:$0 sm:$0xff] }
  0x21   : > { %499 = vmatpush3.bf16.msra.mxu0 %v543_v0  ;;  %s708_s15 = smov (!%p232_p1, %s582_s15), 1  ;;  %s255_s8 = sld [smem:[#allocation2 + %s254_s7]] }
  0x22   : > { %500 = vmatprep.subr.bf16.mxu0 %v593_v1  ;;  %s482_s9 = sshll.u32 %s708_s15, 3 }
  0x23   : > { %s239_s12 = scalar_lea.vmem %s697_s1, %s482_s9  ;;  %s249_s21 = scalar_lea.vmem %s700_s4, %s482_s9 }
  0x24   : > { %v487_v3 = vld [vmem:[%s239_s12] sm:$0xff]  }
  0x25   : > { %501 = vmatpush3.bf16.msra.mxu0 %v544_v2  ;;  %v488_v4 = vunpack.c.l.bf16 %v487_v3  ;;  %v489_v5 = vunpack.c.h.bf16 %v487_v3 }
  0x26   : > { %v260_v6 = vstv %s253_s6 }
  0x27   : > { %v261_v7 = vsub.f32 %v488_v4, %v260_v6  ;;  %v262_v8 = vsub.f32 %v489_v5, %v260_v6  ;;  %v263_v9 = vstv %s255_s8 }
  0x29   : > { %v264_v10 = vmul.f32 %v263_v9, %v261_v7  ;;  %v265_v11 = vmul.f32 %v263_v9, %v262_v8 }
  0x2b   : > { %v266_v12 = vpack.c.bf16 %v265_v11, %v264_v10 }
  0x2d   : > { %503 = vmatmul.mubr.msk.bf16.vlgmr.msra.gmra.mrb[0].mxu0 %vm290_vm1, %v266_v12 }
 0x100   : > { %v328_v14 = vpop.f32.mrb[0].mxu0 }
 0x101   : > { %v329_v15 = vadd.f32 %v474_v13, %v328_v14  ;;  %v504_v16 = vpop.f32.mrb[1].mxu0 }
 0x102   : > { %v331_v17 = vpop.f32.mrb[2].mxu0 }
 0x103   : > { %v337_v18 = vmul.f32 0.044715, %v329_v15  ;;  %v332_v19 = vadd.f32 %v474_v13, %v331_v17  ;;  %v505_v20 = vpop.f32.mrb[3].mxu0  ;;  %v335_v33 = vmul.f32 0.5, %v329_v15 }
 0x105   : > { %v339_v21 = vmul.f32 %v337_v18, %v329_v15  ;;  %v338_v22 = vmul.f32 0.044715, %v332_v19  ;;  %v336_v34 = vmul.f32 0.5, %v332_v19 }
 0x107   : > { %v341_v23 = vmul.f32 %v339_v21, %v329_v15  ;;  %v340_v24 = vmul.f32 %v338_v22, %v332_v19 }
 0x109   : > { %v343_v25 = vadd.f32 %v341_v23, %v329_v15  ;;  %v342_v26 = vmul.f32 %v340_v24, %v332_v19 }
 0x10b   : > { %v345_v27 = vmul.f32 0.7978846, %v343_v25  ;;  %v344_v28 = vadd.f32 %v342_v26, %v332_v19 }
 0x10d   : > { %545 = vtanh.f32 %v345_v27  ;;  %v346_v29 = vmul.f32 0.7978846, %v344_v28 }
 0x10f   : > { %547 = vtanh.f32 %v346_v29 }
 0x117   : > { %v546_v30 = vpop.eup %545 }
 0x118   : > { %v349_v31 = vadd.f32 1.0, %v546_v30 }
 0x119   : > { %v548_v32 = vpop.eup %547 }
 0x11a   : > { %v350_v35 = vadd.f32 1.0, %v548_v32  ;;  %v351_v36 = vmul.f32 %v349_v31, %v335_v33 }
 0x11c   : > { %v352_v37 = vmul.f32 %v350_v35, %v336_v34 }
 0x11e   : > { %v493_v38 = vpack.c.bf16 %v352_v37, %v351_v36 }
 0x120   : > { %494 = vst [vmem:[%s249_s21] sm:$0xff] %v493_v38  }
 0x121 PF: > { %s15_s17 = sadd.s32 1, %s590_s17   ;;  %s703_s15 = smov %s586_s16 }
 0x122   : > { %p12_p2 = scmp.ge.s32.totalorder %s15_s17, 4   ;;  %s704_s16 = smov %s706_s19 }
 0x124   :  { %14 = sbr.rel (!%p12_p2) target bundleno = 2 (0x2), region = 71 }
 0x12b   :  { %393 = vsyncpa [#allocation3], 1 }
 0x12c   :  { %395 = vsyncpa [#allocation3 + $0x1], 1 }

// kernel: as_mlp_forward.80
= control target key start
LH: loop header
LB: loop body
LE: loop exit
PB: predicated region body
PF: predicated region fallthrough
CT: control target
= control target key end

     0   :  { %6 = vsyncpa [#allocation3], 0  ;;  %s258_s6 = smov 0   ;;  %s293_s0 = inlined_call_operand.vmem [shape: bf16[2,4,128], index: 0, kind: input, shape index: {}]   ;;  %s294_s1 = inlined_call_operand.vmem [shape: f32[2,2], index: 1, kind: output, shape index: {}]  }
   0x1 LB: > { %s264_s7 = sadd.s32 4294967295, %s245_s6   ;;  %p192_p0 = scmp.ge.s32.totalorder %s245_s6, 1  ;;  %s245_s6 = sphi %s258_s6, %s12_s6  }
   0x2   : > { %p82_p1 = scmp.lt.s32.totalorder %s245_s6, 3 }
   0x4   : > { %p83_p2 = pnand %p192_p0, %p82_p1 }
   0x5   : > { %p96_p3 = scmp.lt.s32.totalorder (!%p83_p2), %s264_s7, 1  ;;  %vm102_vm0 = vcmask (!%p83_p2), 1043456   ;;  %s194_s13 = sshll.u32 (!%p83_p2), %s264_s7, 7 }
   0x6   : > { %86 = sbr.rel (%p83_p2) target bundleno = 410 (0x19a), region = 24  ;;  %s131_s15 = scalar_lea.smem (!%p83_p2), [#allocation2], %s194_s13 }
   0x7   : > { %s144_s18 = sshll.u32 (!%p83_p2), %s294_s1, 4  ;;  %s171_s19 = scalar_lea.smem (!%p83_p2), %s131_s15, 1 [#allocation2]  ;;  %s145_s18 = int_to_ptr.vmem [resolvable:$true] %s144_s18 }
   0x8   : > { %p208_p4 = scmp.eq.s32.totalorder (!%p83_p2), %s264_s7, 1  ;;  %s221_s21 = scalar_lea.vmem (!%p83_p2), %s145_s18, 32 }
   0x9   : > { %p222_p5 = scmp.ne.s32.totalorder (!%p83_p2), %s145_s18, %s221_s21  ;;  %p228_p8 = scmp.lt.s32.totalorder (!%p83_p2), %s145_s18, %s145_s18 }
   0xa   : > { %p229_p9 = scmp.lt.s32.totalorder (!%p83_p2), %s221_s21, %s221_s21 }
   0xb   : > { %p223_p6 = pnand (!%p83_p2), %p222_p5, %p208_p4 }
   0xc   : > { %p230_p10 = por (!%p83_p2), %p229_p9, %p228_p8 }
   0xd   : > { %s97_s8 = scalar_select %p96_p3, %s264_s7, 1 }
   0xe   : > { %p224_p7 = pneg %p223_p6 }
   0xf   : > { %s193_s9 = sshll.u32 %s97_s8, 1 }
  0x10   : > { %s99_s12 = scalar_lea.vmem %s293_s0, %s193_s9  ;;  %p231_p11 = pnand %p230_p10, %p224_p7 }
  0x11   : > { %v100_v0 = vld [vmem:[%s99_s12] sm:$0x3] }
  0x12   : > { %v101_v1 = vunpack.c.l.bf16 %v100_v0 }
  0x14   : > { %v103_v2 = vsel %vm102_vm0, %v101_v1, 0.0 }
  0x15   : > { %104 = vadd.xlane.f32.xlu0 %v103_v2 }
  0xa2   : > { %v105_v3 = vpop.xlane.xlu0 %104 }
  0xa3   : > { %v106_v4 = vsel %vm102_vm0, %v105_v3, 0.0 }
  0xa4   : > { %v107_v5 = vrot.slane %v106_v4, 4 }
  0xa6   : > { %v108_v6 = vadd.f32 %v107_v5, %v106_v4 }
  0xa8   : > { %v109_v7 = vrot.slane %v108_v6, 2 }
  0xaa   : > { %v110_v8 = vadd.f32 %v109_v7, %v108_v6 }
  0xac   : > { %v111_v9 = vrot.slane %v110_v8, 1 }
  0xae   : > { %v112_v10 = vadd.f32 %v111_v9, %v110_v8 }
  0xb0   : > { %v113_v11 = vmul.f32 0.001953125, %v112_v10 }
  0xb2   : > { %200 = vpush %v113_v11  ;;  %v114_v12 = vsub.f32 %v101_v1, %v113_v11 }
  0xb4   : > { %v115_v13 = vmul.f32 %v114_v12, %v114_v12 }
  0xb6   : > { %v116_v14 = vsel %vm102_vm0, %v115_v13, 0.0 }
  0xb7   : > { %117 = vadd.xlane.f32.xlu0 %v116_v14 }
  0xe3   : > { %s201_s14 = spop %200 }
  0xe4   : > { %132 = sst [smem:[%s131_s15]] %s201_s14 }
 0x144   : > { %v118_v15 = vpop.xlane.xlu0 %117 }
 0x145   : > { %v119_v16 = vsel %vm102_vm0, %v118_v15, 0.0 }
 0x146   : > { %v120_v17 = vrot.slane %v119_v16, 4 }
 0x148   : > { %v121_v18 = vadd.f32 %v120_v17, %v119_v16 }
 0x14a   : > { %v122_v19 = vrot.slane %v121_v18, 2 }
 0x14c   : > { %v123_v20 = vadd.f32 %v122_v19, %v121_v18 }
 0x14e   : > { %v124_v21 = vrot.slane %v123_v20, 1 }
 0x150   : > { %v125_v22 = vadd.f32 %v124_v21, %v123_v20 }
 0x152   : > { %v126_v23 = vmul.f32 0.001953125, %v125_v22 }
 0x154   : > { %v127_v24 = vadd.f32 1e-05, %v126_v23 }
 0x156   : > { %219 = vrsqrt.f32 %v127_v24 }
 0x160   : > { %v220_v25 = vpop.eup %219 }
 0x161   : > { %202 = vpush %v220_v25 }
 0x192   : > { %s203_s20 = spop %202 }
 0x193   : > { %136 = sst [smem:[%s171_s19]] %s203_s20 }
 0x194   : > { %234 = shalt.err (!%p231_p11)
}
 0x195   : > { %s247_s22 = smov [#allocation2]  }
 0x196   : > { %205 = dma.smem_to_vmem (%p208_p4), %s247_s22, 32, %s145_s18, [#allocation3]  }
 0x197   : > { %240 = dma.done.wait (%p208_p4), [#allocation3], 32  }
 0x198   : > { %242 = vsyncadd (%p208_p4), [#allocation3], 4294967264 }
 0x199   : > { %152 = sfence }
 0x19a PF: > { %s12_s6 = sadd.s32 1, %s245_s6  }
 0x19b   : > { %p9_p12 = scmp.ge.s32.totalorder %s12_s6, 4  }
 0x19d   :  { %11 = sbr.rel (!%p9_p12) target bundleno = 1 (0x1), region = 53 }
 0x1a4   :  { %158 = vsyncpa [#allocation3], 1 }
 0x1a5   :  { %160 = vsyncpa [#allocation3 + $0x1], 1 }

// kernel: as_mlp_forward.82
= control target key start
LH: loop header
LB: loop body
LE: loop exit
PB: predicated region body
PF: predicated region fallthrough
CT: control target
= control target key end

     0   :  { %6 = vsyncpa [#allocation3], 0  ;;  %s259_s6 = smov 0   ;;  %s294_s0 = inlined_call_operand.vmem [shape: bf16[2,4,64], index: 0, kind: input, shape index: {}]   ;;  %s295_s1 = inlined_call_operand.vmem [shape: f32[2,2], index: 1, kind: output, shape index: {}]  }
   0x1 LB: > { %s265_s7 = sadd.s32 4294967295, %s246_s6   ;;  %p193_p0 = scmp.ge.s32.totalorder %s246_s6, 1  ;;  %s246_s6 = sphi %s259_s6, %s12_s6  }
   0x2   : > { %p82_p1 = scmp.lt.s32.totalorder %s246_s6, 3 }
   0x4   : > { %p83_p2 = pnand %p193_p0, %p82_p1 }
   0x5   : > { %p96_p3 = scmp.lt.s32.totalorder (!%p83_p2), %s265_s7, 1  ;;  %vm102_vm0 = vcmask (!%p83_p2), 519168   ;;  %vm106_vm1 = vcmask (!%p83_p2), 1043456   ;;  %s195_s13 = sshll.u32 (!%p83_p2), %s265_s7, 7 }
   0x6   : > { %86 = sbr.rel (%p83_p2) target bundleno = 410 (0x19a), region = 24  ;;  %s132_s15 = scalar_lea.smem (!%p83_p2), [#allocation2], %s195_s13 }
   0x7   : > { %s145_s18 = sshll.u32 (!%p83_p2), %s295_s1, 4  ;;  %s172_s19 = scalar_lea.smem (!%p83_p2), %s132_s15, 1 [#allocation2]  ;;  %s146_s18 = int_to_ptr.vmem [resolvable:$true] %s145_s18 }
   0x8   : > { %p209_p4 = scmp.eq.s32.totalorder (!%p83_p2), %s265_s7, 1  ;;  %s222_s21 = scalar_lea.vmem (!%p83_p2), %s146_s18, 32 }
   0x9   : > { %p223_p5 = scmp.ne.s32.totalorder (!%p83_p2), %s146_s18, %s222_s21  ;;  %p229_p8 = scmp.lt.s32.totalorder (!%p83_p2), %s146_s18, %s146_s18 }
   0xa   : > { %p230_p9 = scmp.lt.s32.totalorder (!%p83_p2), %s222_s21, %s222_s21 }
   0xb   : > { %p224_p6 = pnand (!%p83_p2), %p223_p5, %p209_p4 }
   0xc   : > { %p231_p10 = por (!%p83_p2), %p230_p9, %p229_p8 }
   0xd   : > { %s97_s8 = scalar_select %p96_p3, %s265_s7, 1 }
   0xe   : > { %p225_p7 = pneg %p224_p6 }
   0xf   : > { %s194_s9 = sshll.u32 %s97_s8, 1 }
  0x10   : > { %s99_s12 = scalar_lea.vmem %s294_s0, %s194_s9  ;;  %p232_p11 = pnand %p231_p10, %p225_p7 }
  0x11   : > { %v100_v0 = vld [vmem:[%s99_s12] sm:$0x3] }
  0x12   : > { %v101_v1 = vunpack.c.l.bf16 %v100_v0 }
  0x14   : > { %v103_v2 = vsel %vm102_vm0, %v101_v1, 0.0 }
  0x15   : > { %104 = vadd.xlane.f32.xlu0 %v103_v2 }
  0xa2   : > { %v105_v3 = vpop.xlane.xlu0 %104 }
  0xa3   : > { %v107_v4 = vsel %vm106_vm1, %v105_v3, 0.0 }
  0xa4   : > { %v108_v5 = vrot.slane %v107_v4, 4 }
  0xa6   : > { %v109_v6 = vadd.f32 %v108_v5, %v107_v4 }
  0xa8   : > { %v110_v7 = vrot.slane %v109_v6, 2 }
  0xaa   : > { %v111_v8 = vadd.f32 %v110_v7, %v109_v6 }
  0xac   : > { %v112_v9 = vrot.slane %v111_v8, 1 }
  0xae   : > { %v113_v10 = vadd.f32 %v112_v9, %v111_v8 }
  0xb0   : > { %v114_v11 = vmul.f32 0.00390625, %v113_v10 }
  0xb2   : > { %201 = vpush %v114_v11  ;;  %v115_v12 = vsub.f32 %v101_v1, %v114_v11 }
  0xb4   : > { %v116_v13 = vmul.f32 %v115_v12, %v115_v12 }
  0xb6   : > { %v117_v14 = vsel %vm102_vm0, %v116_v13, 0.0 }
  0xb7   : > { %118 = vadd.xlane.f32.xlu0 %v117_v14 }
  0xe3   : > { %s202_s14 = spop %201 }
  0xe4   : > { %133 = sst [smem:[%s132_s15]] %s202_s14 }
 0x144   : > { %v119_v15 = vpop.xlane.xlu0 %118 }
 0x145   : > { %v120_v16 = vsel %vm106_vm1, %v119_v15, 0.0 }
 0x146   : > { %v121_v17 = vrot.slane %v120_v16, 4 }
 0x148   : > { %v122_v18 = vadd.f32 %v121_v17, %v120_v16 }
 0x14a   : > { %v123_v19 = vrot.slane %v122_v18, 2 }
 0x14c   : > { %v124_v20 = vadd.f32 %v123_v19, %v122_v18 }
 0x14e   : > { %v125_v21 = vrot.slane %v124_v20, 1 }
 0x150   : > { %v126_v22 = vadd.f32 %v125_v21, %v124_v20 }
 0x152   : > { %v127_v23 = vmul.f32 0.00390625, %v126_v22 }
 0x154   : > { %v128_v24 = vadd.f32 1e-05, %v127_v23 }
 0x156   : > { %220 = vrsqrt.f32 %v128_v24 }
 0x160   : > { %v221_v25 = vpop.eup %220 }
 0x161   : > { %203 = vpush %v221_v25 }
 0x192   : > { %s204_s20 = spop %203 }
 0x193   : > { %137 = sst [smem:[%s172_s19]] %s204_s20 }
 0x194   : > { %235 = shalt.err (!%p232_p11)
}
 0x195   : > { %s248_s22 = smov [#allocation2]  }
 0x196   : > { %206 = dma.smem_to_vmem (%p209_p4), %s248_s22, 32, %s146_s18, [#allocation3]  }
 0x197   : > { %241 = dma.done.wait (%p209_p4), [#allocation3], 32  }
 0x198   : > { %243 = vsyncadd (%p209_p4), [#allocation3], 4294967264 }
 0x199   : > { %153 = sfence }
 0x19a PF: > { %s12_s6 = sadd.s32 1, %s246_s6  }
 0x19b   : > { %p9_p12 = scmp.ge.s32.totalorder %s12_s6, 4  }
 0x19d   :  { %11 = sbr.rel (!%p9_p12) target bundleno = 1 (0x1), region = 53 }
 0x1a4   :  { %159 = vsyncpa [#allocation3], 1 }
 0x1a5   :  { %161 = vsyncpa [#allocation3 + $0x1], 1 }

// kernel: as_mlp_forward.81
= control target key start
LH: loop header
LB: loop body
LE: loop exit
PB: predicated region body
PF: predicated region fallthrough
CT: control target
= control target key end

     0   :  { %9 = vsyncpa [#allocation3], 0  ;;  %s617_s15 = smov 0   ;;  %s619_s16 = smov 0   ;;  %s711_s0 = inlined_call_operand.vmem [shape: f32[2,2], index: 0, kind: input, shape index: {}]   ;;  %s712_s1 = inlined_call_operand.vmem [shape: bf16[2,4,128], index: 1, kind: input, shape index: {}]   ;;  %s713_s2 = inlined_call_operand.vmem [shape: bf16[128,64], index: 2, kind: input, shape index: {}]   ;;  %s714_s3 = inlined_call_operand.vmem [shape: f32[1,64], index: 3, kind: input, shape index: {}]   ;;  %s715_s4 = inlined_call_operand.vmem [shape: bf16[2,4,64], index: 4, kind: output, shape index: {}]  }
   0x1   :  { %s621_s17 = smov 0  }
   0x2 LB: > { %s451_s18 = sadd.s32 4294967295, %s587_s17   ;;  %s27_s19 = sadd.s32 1, %s583_s16  ;;  %s587_s17 = sphi %s621_s17, %s15_s17   ;;  %s583_s16 = sphi %s619_s16, %s719_s16   ;;  %s579_s15 = sphi %s617_s15, %s718_s15  }
   0x3   : > { %p29_p0 = scmp.ge.s32.totalorder %s27_s19, 2  ;;  %p453_p1 = scmp.ge.s32.totalorder %s587_s17, 1 }
   0x4   : > { %p151_p2 = scmp.lt.s32.totalorder %s587_s17, 3  ;;  %p642_p4 = scmp.eq.s32.totalorder %s451_s18, 0 }
   0x5   : > { %s721_s19 = smov (%p29_p0, %s27_s19), 0  ;;  %s164_s24 = sshll.u32 %s711_s0, 4  ;;  %s165_s24 = int_to_ptr.vmem [resolvable:$true] %s164_s24 }
   0x6   : > { %p638_p3 = pnand %p453_p1, %p151_p2  ;;  %s546_s25 = scalar_lea.vmem %s165_s24, 32 }
   0x7   : > { %p547_p7 = scmp.ne.s32.totalorder %s165_s24, %s546_s25  ;;  %p554_p11 = scmp.lt.s32.totalorder %s165_s24, %s165_s24 }
   0x8   : > { %p505_p5 = pneg %p638_p3  ;;  %p555_p12 = scmp.lt.s32.totalorder %s546_s25, %s546_s25 }
   0xa   : > { %p506_p6 = pnand %p642_p4, %p505_p5  ;;  %p556_p13 = por %p555_p12, %p554_p11 }
   0xc   : > { %p548_p8 = pneg %p506_p6 }
   0xe   : > { %p549_p9 = pnand %p548_p8, %p547_p7 }
  0x10   : > { %p550_p10 = pneg %p549_p9 }
  0x12   : > { %p557_p0 = pnand %p556_p13, %p550_p10 }
  0x14   : > { %560 = shalt.err (!%p557_p0)
}
  0x15   : > { %s589_s26 = smov [#allocation2]   ;;  %193 = sbr.rel (%p638_p3) target bundleno = 281 (0x119), region = 36 }
  0x16   : > { %508 = dma.vmem_to_smem (!%p506_p6), %s165_s24, 32, %s589_s26, [#allocation3]  }
  0x1c   : > { %574 = dma.done.wait (%p642_p4), [#allocation3], 32  }
  0x1d   : > { %576 = vsyncadd (%p642_p4), [#allocation3], 4294967264 }
  0x1e   : > { %199 = sfence }
  0x1f   : > { %v538_v0 = vld [vmem:[%s713_s2] sm:$0xff]   ;;  %v590_v1 = vmov 0.0   ;;  %v539_v2 = vld [vmem:[%s713_s2 + $0x8] sm:$0xff]   ;;  %vm591_vm0 = vmmov 0   ;;  %p224_p1 = scmp.lt.s32.totalorder %s579_s15, 1  ;;  %v540_v3 = vld [vmem:[%s713_s2 + $0x10] sm:$0xff]  }
  0x20   : > { %481 = vmatprep.subr.bf16.mxu0 %v590_v1  ;;  %497 = vmatprep.mubr.msk.bf16.mxu0 %vm591_vm0, %v590_v1  ;;  %s460_s8 = sshll.u32 %s579_s15, 7  ;;  %v541_v4 = vld [vmem:[%s713_s2 + $0x18] sm:$0xff]   ;;  %v542_v5 = vld [vmem:[%s713_s2 + $0x20] sm:$0xff]   ;;  %v543_v8 = vld [vmem:[%s713_s2 + $0x28] sm:$0xff]   ;;  %vm362_vm1 = vcmask 517120  }
  0x21   : > { %482 = vmatpush3.bf16.msra.mxu0 %v538_v0  ;;  %s667_s5 = scalar_select %p224_p1, %s579_s15, 1  ;;  %v544_v11 = vld [vmem:[%s713_s2 + $0x30] sm:$0xff]   ;;  %v545_v14 = vld [vmem:[%s713_s2 + $0x38] sm:$0xff]   ;;  %v461_v16 = vld [vmem:[%s714_s3] ss:$0 sm:$0xff] }
  0x22   : > { %483 = vmatprep.subr.bf16.mxu0 %v590_v1  ;;  %s240_s12 = sld [smem:[#allocation2 + %s460_s8]]  ;;  %s241_s20 = sadd.s32 1, %s460_s8 }
  0x23   : > { %s458_s9 = sshll.u32 %s667_s5, 1  ;;  %s242_s15 = sld [smem:[#allocation2 + %s241_s20]] }
  0x24   : > { %s230_s18 = scalar_lea.vmem %s712_s1, %s458_s9  ;;  %s237_s8 = scalar_lea.vmem %s715_s4, %s458_s9 }
  0x25   : > { %484 = vmatpush3.bf16.msra.mxu0 %v539_v2  ;;  %v243_v6 = vld [vmem:[%s230_s18] sm:$0x3] }
  0x26   : > { %485 = vmatprep.subr.bf16.mxu0 %v590_v1  ;;  %v244_v7 = vunpack.c.l.bf16 %v243_v6 }
  0x28   : > { %v245_v9 = vstv %s240_s12 }
  0x29   : > { %486 = vmatpush3.bf16.msra.mxu0 %v540_v3  ;;  %v246_v10 = vsub.f32 %v244_v7, %v245_v9  ;;  %v247_v12 = vstv %s242_s15 }
  0x2a   : > { %487 = vmatprep.subr.bf16.mxu0 %v590_v1 }
  0x2b   : > { %v248_v13 = vmul.f32 %v247_v12, %v246_v10 }
  0x2d   : > { %488 = vmatpush3.bf16.msra.mxu0 %v541_v4  ;;  %v249_v15 = vpack.c.bf16 %v248_v13, %v248_v13 }
  0x2e   : > { %489 = vmatprep.subr.bf16.mxu0 %v590_v1 }
  0x31   : > { %490 = vmatpush3.bf16.msra.mxu0 %v542_v5 }
  0x32   : > { %491 = vmatprep.subr.bf16.mxu0 %v590_v1 }
  0x35   : > { %492 = vmatpush3.bf16.msra.mxu0 %v543_v8 }
  0x36   : > { %493 = vmatprep.subr.bf16.mxu0 %v590_v1 }
  0x39   : > { %494 = vmatpush3.bf16.msra.mxu0 %v544_v11 }
  0x3a   : > { %495 = vmatprep.subr.bf16.mxu0 %v590_v1 }
  0x3d   : > { %496 = vmatpush3.bf16.msra.mxu0 %v545_v14 }
  0x40   : > { %498 = vmatmul.mubr.bf16.vlgmr.msra.gmra.mrb[0].mxu0 %v249_v15 }
 0x113   : > { %v355_v17 = vpop.f32.mrb[0].mxu0 }
 0x114   : > { %v356_v18 = vadd.f32 %v461_v16, %v355_v17  ;;  %v499_v19 = vpop.f32.mrb[1].mxu0 }
 0x115   : > { %v358_v20 = vpop.f32.mrb[2].mxu0 }
 0x116   : > { %v361_v21 = vpack.c.bf16 %v356_v18, %v356_v18  ;;  %v500_v22 = vpop.f32.mrb[3].mxu0 }
 0x118   : > { %363 = vst.msk [vmem:[%s237_s8] sm:$0x3] %vm362_vm1, %v361_v21 }
 0x119 PF: > { %s15_s17 = sadd.s32 1, %s587_s17   ;;  %s718_s15 = smov %s583_s16 }
 0x11a   : > { %p12_p2 = scmp.ge.s32.totalorder %s15_s17, 4   ;;  %s719_s16 = smov %s721_s19 }
 0x11c   :  { %14 = sbr.rel (!%p12_p2) target bundleno = 2 (0x2), region = 71 }
 0x123   :  { %389 = vsyncpa [#allocation3], 1 }
 0x124   :  { %391 = vsyncpa [#allocation3 + $0x1], 1 }

// kernel: as_mlp_forward.83
= control target key start
LH: loop header
LB: loop body
LE: loop exit
PB: predicated region body
PF: predicated region fallthrough
CT: control target
= control target key end

     0   :  { %9 = vsyncpa [#allocation3], 0  ;;  %s472_s15 = smov 0   ;;  %s474_s16 = smov 0   ;;  %s538_s0 = inlined_call_operand.vmem [shape: f32[2,2], index: 0, kind: input, shape index: {}]   ;;  %s539_s1 = inlined_call_operand.vmem [shape: bf16[2,4,64], index: 1, kind: input, shape index: {}]   ;;  %s540_s2 = inlined_call_operand.vmem [shape: f32[1,64], index: 2, kind: input, shape index: {}]   ;;  %s541_s3 = inlined_call_operand.vmem [shape: f32[1,64], index: 3, kind: input, shape index: {}]   ;;  %s542_s4 = inlined_call_operand.vmem [shape: bf16[2,4,64], index: 4, kind: output, shape index: {}]  }
   0x1   :  { %s476_s17 = smov 0  }
   0x2 LB: > { %s354_s18 = sadd.s32 4294967295, %s444_s17   ;;  %s27_s19 = sadd.s32 1, %s440_s16  ;;  %s444_s17 = sphi %s476_s17, %s15_s17   ;;  %s440_s16 = sphi %s474_s16, %s546_s16   ;;  %s436_s15 = sphi %s472_s15, %s545_s15  }
   0x3   : > { %p29_p0 = scmp.ge.s32.totalorder %s27_s19, 2  ;;  %p356_p1 = scmp.ge.s32.totalorder %s444_s17, 1 }
   0x4   : > { %p151_p2 = scmp.lt.s32.totalorder %s444_s17, 3  ;;  %p497_p4 = scmp.eq.s32.totalorder %s354_s18, 0 }
   0x5   : > { %s548_s19 = smov (%p29_p0, %s27_s19), 0  ;;  %s164_s24 = sshll.u32 %s538_s0, 4  ;;  %s165_s24 = int_to_ptr.vmem [resolvable:$true] %s164_s24 }
   0x6   : > { %p493_p3 = pnand %p356_p1, %p151_p2  ;;  %s403_s25 = scalar_lea.vmem %s165_s24, 32 }
   0x7   : > { %p404_p7 = scmp.ne.s32.totalorder %s165_s24, %s403_s25  ;;  %p411_p11 = scmp.lt.s32.totalorder %s165_s24, %s165_s24 }
   0x8   : > { %p372_p5 = pneg %p493_p3  ;;  %p412_p12 = scmp.lt.s32.totalorder %s403_s25, %s403_s25 }
   0xa   : > { %p373_p6 = pnand %p497_p4, %p372_p5  ;;  %p413_p13 = por %p412_p12, %p411_p11 }
   0xc   : > { %p405_p8 = pneg %p373_p6 }
   0xe   : > { %p406_p9 = pnand %p405_p8, %p404_p7 }
  0x10   : > { %p407_p10 = pneg %p406_p9 }
  0x12   : > { %p414_p0 = pnand %p413_p13, %p407_p10 }
  0x14   : > { %417 = shalt.err (!%p414_p0)
}
  0x15   : > { %s446_s26 = smov [#allocation2]   ;;  %193 = sbr.rel (%p493_p3) target bundleno = 50 (0x32), region = 36 }
  0x16   : > { %375 = dma.vmem_to_smem (!%p373_p6), %s165_s24, 32, %s446_s26, [#allocation3]  }
  0x1c   : > { %431 = dma.done.wait (%p497_p4), [#allocation3], 32  }
  0x1d   : > { %433 = vsyncadd (%p497_p4), [#allocation3], 4294967264 }
  0x1e   : > { %199 = sfence }
  0x1f   : > { %p224_p1 = scmp.lt.s32.totalorder %s436_s15, 1  ;;  %s363_s27 = sshll.u32 %s436_s15, 7  ;;  %v364_v5 = vld [vmem:[%s540_s2] ss:$0 sm:$0xff]  ;;  %vm265_vm0 = vcmask 517120  }
  0x20   : > { %s239_s28 = sld [smem:[#allocation2 + %s363_s27]]  ;;  %s240_s29 = sadd.s32 1, %s363_s27  ;;  %v365_v7 = vld [vmem:[%s541_s3] ss:$0 sm:$0xff] }
  0x21   : > { %s550_s15 = smov (!%p224_p1, %s436_s15), 1  ;;  %s241_s30 = sld [smem:[#allocation2 + %s240_s29]] }
  0x22   : > { %s361_s5 = sshll.u32 %s550_s15, 1 }
  0x23   : > { %s230_s8 = scalar_lea.vmem %s539_s1, %s361_s5  ;;  %s237_s15 = scalar_lea.vmem %s542_s4, %s361_s5 }
  0x24   : > { %v242_v0 = vld [vmem:[%s230_s8] sm:$0x3] }
  0x25   : > { %v243_v1 = vunpack.c.l.bf16 %v242_v0 }
  0x26   : > { %v244_v2 = vstv %s239_s28 }
  0x27   : > { %v245_v3 = vsub.f32 %v243_v1, %v244_v2  ;;  %v246_v4 = vstv %s241_s30 }
  0x29   : > { %v247_v6 = vmul.f32 %v246_v4, %v245_v3 }
  0x2b   : > { %v255_v8 = vmul.f32 %v364_v5, %v247_v6 }
  0x2d   : > { %v263_v9 = vadd.f32 %v365_v7, %v255_v8 }
  0x2f   : > { %v264_v10 = vpack.c.bf16 %v263_v9, %v263_v9 }
  0x31   : > { %266 = vst.msk [vmem:[%s237_s15] sm:$0x3] %vm265_vm0, %v264_v10 }
  0x32 PF: > { %s15_s17 = sadd.s32 1, %s444_s17   ;;  %s545_s15 = smov %s440_s16 }
  0x33   : > { %p12_p2 = scmp.ge.s32.totalorder %s15_s17, 4   ;;  %s546_s16 = smov %s548_s19 }
  0x35   :  { %14 = sbr.rel (!%p12_p2) target bundleno = 2 (0x2), region = 71 }
  0x3c   :  { %292 = vsyncpa [#allocation3], 1 }
  0x3d   :  { %294 = vsyncpa [#allocation3 + $0x1], 1 }

// kernel: as_mlp_forward.84
= control target key start
LH: loop header
LB: loop body
LE: loop exit
PB: predicated region body
PF: predicated region fallthrough
CT: control target
= control target key end

     0   :  { %v96_v0 = vmov 0.0   ;;  %vm97_vm0 = vmmov 0   ;;  %vm31_vm1 = vcmask 130048   ;;  %vm76_vm2 = vcmask 125952   ;;  %s130_s1 = inlined_call_operand.vmem [shape: bf16[16,16], index: 1, kind: input, shape index: {}]   ;;  %s131_s0 = inlined_call_operand.vmem [shape: bf16[8,16], index: 0, kind: input, shape index: {}]   ;;  %s132_s2 = inlined_call_operand.vmem [shape: f32[1,16], index: 2, kind: input, shape index: {}]   ;;  %s133_s3 = inlined_call_operand.vmem [shape: bf16[8,16], index: 3, kind: output, shape index: {}]  }
   0x1   :  { %87 = vmatprep.subr.bf16.mxu0 %v96_v0  ;;  %v95_v1 = vld [vmem:[%s130_s1] sm:$0xff]   ;;  %89 = vmatprep.mubr.msk.bf16.mxu0 %vm97_vm0, %v96_v0 }
   0x2   :  { %88 = vmatpush3.bf16.msra.mxu0 %v95_v1  ;;  %v15_v2 = vld [vmem:[%s131_s0] sm:$0xf] }
   0x3   :  { %v82_v3 = vld [vmem:[%s132_s2] ss:$0 sm:$0xff] }
   0x5   :  { %90 = vmatmul.mubr.msk.bf16.vlgmr.msra.gmra.mrb[0].mxu0 %vm31_vm1, %v15_v2 }
  0xd8   :  { %v69_v4 = vpop.f32.mrb[0].mxu0 }
  0xd9   :  { %v70_v5 = vadd.f32 %v82_v3, %v69_v4  ;;  %v91_v6 = vpop.f32.mrb[1].mxu0 }
  0xda   :  { %v72_v7 = vpop.f32.mrb[2].mxu0 }
  0xdb   :  { %v75_v8 = vpack.c.bf16 %v70_v5, %v70_v5  ;;  %v92_v9 = vpop.f32.mrb[3].mxu0 }
  0xdd   :  { %77 = vst.msk [vmem:[%s133_s3] sm:$0xf] %vm76_vm2, %v75_v8 }

// kernel: as_mlp_forward.85
= control target key start
LH: loop header
LB: loop body
LE: loop exit
PB: predicated region body
PF: predicated region fallthrough
CT: control target
= control target key end

     0   :  { %v109_v0 = vmov 0.0   ;;  %vm39_vm0 = vcmask 1043456   ;;  %vm110_vm1 = vmmov 0   ;;  %vm35_vm2 = vcmask 195584   ;;  %s146_s1 = inlined_call_operand.vmem [shape: bf16[24,24], index: 1, kind: input, shape index: {}]   ;;  %s147_s0 = inlined_call_operand.vmem [shape: bf16[8,24], index: 0, kind: input, shape index: {}]   ;;  %s148_s2 = inlined_call_operand.vmem [shape: f32[1,24], index: 2, kind: input, shape index: {}]   ;;  %s149_s3 = inlined_call_operand.vmem [shape: bf16[8,24], index: 3, kind: output, shape index: {}]  }
   0x1   :  { %97 = vmatprep.subr.bf16.mxu0 %v109_v0  ;;  %v107_v1 = vld [vmem:[%s146_s1] sm:$0xff]   ;;  %101 = vmatprep.mubr.msk.bf16.mxu0 %vm110_vm1, %v109_v0  ;;  %v108_v2 = vld [vmem:[%s146_s1 + $0x8] ss:$0 sps:$4 sm:$0xff]   ;;  %vm84_vm3 = vcmask 191488  }
   0x2   :  { %98 = vmatpush3.bf16.msra.mxu0 %v107_v1  ;;  %v41_v3 = vsel %vm39_vm0, %v108_v2, 0  ;;  %v15_v4 = vld [vmem:[%s147_s0] sm:$0xf] }
   0x3   :  { %99 = vmatprep.subr.bf16.mxu0 %v109_v0  ;;  %v90_v5 = vld [vmem:[%s148_s2] ss:$0 sm:$0xff] }
   0x6   :  { %100 = vmatpush3.bf16.msra.mxu0 %v41_v3 }
   0x9   :  { %102 = vmatmul.mubr.msk.bf16.vlgmr.msra.gmra.mrb[0].mxu0 %vm35_vm2, %v15_v4 }
  0xdc   :  { %v77_v6 = vpop.f32.mrb[0].mxu0 }
  0xdd   :  { %v78_v7 = vadd.f32 %v90_v5, %v77_v6  ;;  %v103_v8 = vpop.f32.mrb[1].mxu0 }
  0xde   :  { %v80_v9 = vpop.f32.mrb[2].mxu0 }
  0xdf   :  { %v83_v10 = vpack.c.bf16 %v78_v7, %v78_v7  ;;  %v104_v11 = vpop.f32.mrb[3].mxu0 }
  0xe1   :  { %85 = vst.msk [vmem:[%s149_s3] sm:$0xf] %vm84_vm3, %v83_v10 }

// kernel: as_mlp_forward.86
= control target key start
LH: loop header
LB: loop body
LE: loop exit
PB: predicated region body
PF: predicated region fallthrough
CT: control target
= control target key end

     0   :  { %v112_v0 = vmov 0.0   ;;  %vm42_vm0 = vcmask 1045504   ;;  %vm113_vm1 = vmmov 0   ;;  %vm38_vm2 = vcmask 228352   ;;  %s149_s1 = inlined_call_operand.vmem [shape: bf16[28,28], index: 1, kind: input, shape index: {}]   ;;  %s150_s0 = inlined_call_operand.vmem [shape: bf16[8,28], index: 0, kind: input, shape index: {}]   ;;  %s151_s2 = inlined_call_operand.vmem [shape: f32[1,28], index: 2, kind: input, shape index: {}]   ;;  %s152_s3 = inlined_call_operand.vmem [shape: bf16[8,28], index: 3, kind: output, shape index: {}]  }
   0x1   :  { %100 = vmatprep.subr.bf16.mxu0 %v112_v0  ;;  %v110_v1 = vld [vmem:[%s149_s1] sm:$0xff]   ;;  %104 = vmatprep.mubr.msk.bf16.mxu0 %vm113_vm1, %v112_v0  ;;  %v111_v2 = vld [vmem:[%s149_s1 + $0x8] sm:$0x3f]   ;;  %vm87_vm3 = vcmask 224256  }
   0x2   :  { %101 = vmatpush3.bf16.msra.mxu0 %v110_v1  ;;  %v44_v3 = vsel %vm42_vm0, %v111_v2, 0  ;;  %v15_v4 = vld [vmem:[%s150_s0] sm:$0xf] }
   0x3   :  { %102 = vmatprep.subr.bf16.mxu0 %v112_v0  ;;  %v93_v5 = vld [vmem:[%s151_s2] ss:$0 sm:$0xff] }
   0x6   :  { %103 = vmatpush3.bf16.msra.mxu0 %v44_v3 }
   0x9   :  { %105 = vmatmul.mubr.msk.bf16.vlgmr.msra.gmra.mrb[0].mxu0 %vm38_vm2, %v15_v4 }
  0xdc   :  { %v80_v6 = vpop.f32.mrb[0].mxu0 }
  0xdd   :  { %v81_v7 = vadd.f32 %v93_v5, %v80_v6  ;;  %v106_v8 = vpop.f32.mrb[1].mxu0 }
  0xde   :  { %v83_v9 = vpop.f32.mrb[2].mxu0 }
  0xdf   :  { %v86_v10 = vpack.c.bf16 %v81_v7, %v81_v7  ;;  %v107_v11 = vpop.f32.mrb[3].mxu0 }
  0xe1   :  { %88 = vst.msk [vmem:[%s152_s3] sm:$0xf] %vm87_vm3, %v86_v10 }

// kernel: as_mlp_forward.88
= control target key start
LH: loop header
LB: loop body
LE: loop exit
PB: predicated region body
PF: predicated region fallthrough
CT: control target
= control target key end

     0   :  { %10 = vsyncpa [#allocation3], 0  ;;  %s649_s18 = smov 0   ;;  %s651_s19 = smov 0   ;;  %s732_s0 = inlined_call_operand.vmem [shape: f32[2,2], index: 0, kind: input, shape index: {}]   ;;  %s733_s1 = inlined_call_operand.vmem [shape: bf16[2,4,64], index: 1, kind: input, shape index: {}]   ;;  %s734_s2 = inlined_call_operand.vmem [shape: bf16[64,64], index: 2, kind: input, shape index: {}]   ;;  %s735_s3 = inlined_call_operand.vmem [shape: f32[1,64], index: 3, kind: input, shape index: {}]   ;;  %s736_s4 = inlined_call_operand.vmem [shape: bf16[2,4,64], index: 4, kind: input, shape index: {}]   ;;  %s737_s5 = inlined_call_operand.vmem [shape: bf16[2,4,64], index: 5, kind: output, shape index: {}]  }
   0x1   :  { %s653_s20 = smov 0  }
   0x2 LB: > { %s496_s21 = sadd.s32 4294967295, %s614_s20   ;;  %s28_s22 = sadd.s32 1, %s610_s19  ;;  %s614_s20 = sphi %s653_s20, %s16_s20   ;;  %s610_s19 = sphi %s651_s19, %s741_s19   ;;  %s606_s18 = sphi %s649_s18, %s740_s18  }
   0x3   : > { %p30_p0 = scmp.ge.s32.totalorder %s28_s22, 2  ;;  %p498_p1 = scmp.ge.s32.totalorder %s614_s20, 1 }
   0x4   : > { %p180_p2 = scmp.lt.s32.totalorder %s614_s20, 3  ;;  %p674_p4 = scmp.eq.s32.totalorder %s496_s21, 0 }
   0x5   : > { %s743_s22 = smov (%p30_p0, %s28_s22), 0  ;;  %s193_s27 = sshll.u32 %s732_s0, 4  ;;  %s194_s27 = int_to_ptr.vmem [resolvable:$true] %s193_s27 }
   0x6   : > { %p670_p3 = pnand %p498_p1, %p180_p2  ;;  %s573_s28 = scalar_lea.vmem %s194_s27, 32 }
   0x7   : > { %p574_p7 = scmp.ne.s32.totalorder %s194_s27, %s573_s28  ;;  %p581_p11 = scmp.lt.s32.totalorder %s194_s27, %s194_s27 }
   0x8   : > { %p536_p5 = pneg %p670_p3  ;;  %p582_p12 = scmp.lt.s32.totalorder %s573_s28, %s573_s28 }
   0xa   : > { %p537_p6 = pnand %p674_p4, %p536_p5  ;;  %p583_p13 = por %p582_p12, %p581_p11 }
   0xc   : > { %p575_p8 = pneg %p537_p6 }
   0xe   : > { %p576_p9 = pnand %p575_p8, %p574_p7 }
  0x10   : > { %p577_p10 = pneg %p576_p9 }
  0x12   : > { %p584_p0 = pnand %p583_p13, %p577_p10 }
  0x14   : > { %587 = shalt.err (!%p584_p0)
}
  0x15   : > { %s616_s29 = smov [#allocation2]   ;;  %232 = sbr.rel (%p670_p3) target bundleno = 267 (0x10b), region = 40 }
  0x16   : > { %539 = dma.vmem_to_smem (!%p537_p6), %s194_s27, 32, %s616_s29, [#allocation3]  }
  0x1c   : > { %601 = dma.done.wait (%p674_p4), [#allocation3], 32  }
  0x1d   : > { %603 = vsyncadd (%p674_p4), [#allocation3], 4294967264 }
  0x1e   : > { %238 = sfence }
  0x1f   : > { %v569_v0 = vld [vmem:[%s734_s2] sm:$0xff]   ;;  %v617_v1 = vmov 0.0   ;;  %v570_v2 = vld [vmem:[%s734_s2 + $0x8] sm:$0xff]   ;;  %vm618_vm0 = vmmov 0   ;;  %p272_p1 = scmp.lt.s32.totalorder %s606_s18, 1  ;;  %s506_s9 = sshll.u32 %s606_s18, 7 }
  0x20   : > { %520 = vmatprep.subr.bf16.mxu0 %v617_v1  ;;  %528 = vmatprep.mubr.msk.bf16.mxu0 %vm618_vm0, %v617_v1  ;;  %s295_s10 = sld [smem:[#allocation2 + %s506_s9]]  ;;  %s296_s11 = sadd.s32 1, %s506_s9  ;;  %v571_v3 = vld [vmem:[%s734_s2 + $0x10] sm:$0xff]   ;;  %v572_v6 = vld [vmem:[%s734_s2 + $0x18] sm:$0xff]   ;;  %vm344_vm1 = vcmask 523264   ;;  %vm392_vm2 = vcmask 517120  }
  0x21   : > { %521 = vmatpush3.bf16.msra.mxu0 %v569_v0  ;;  %s745_s18 = smov (!%p272_p1, %s606_s18), 1  ;;  %s297_s15 = sld [smem:[#allocation2 + %s296_s11]]  ;;  %v507_v13 = vld [vmem:[%s735_s3] ss:$0 sm:$0xff] }
  0x22   : > { %522 = vmatprep.subr.bf16.mxu0 %v617_v1  ;;  %s703_s14 = sshll.u32 %s745_s18, 1 }
  0x23   : > { %s278_s21 = scalar_lea.vmem %s733_s1, %s703_s14  ;;  %s285_s26 = scalar_lea.vmem %s736_s4, %s703_s14 }
  0x24   : > { %v298_v4 = vld [vmem:[%s278_s21] sm:$0x3]  ;;  %s292_s6 = scalar_lea.vmem %s737_s5, %s703_s14 }
  0x25   : > { %523 = vmatpush3.bf16.msra.mxu0 %v570_v2  ;;  %v299_v5 = vunpack.c.l.bf16 %v298_v4  ;;  %v388_v12 = vld [vmem:[%s285_s26] sm:$0x3] }
  0x26   : > { %524 = vmatprep.subr.bf16.mxu0 %v617_v1  ;;  %v300_v7 = vstv %s295_s10  ;;  %v389_v14 = vunpack.c.l.bf16 %v388_v12 }
  0x27   : > { %v301_v8 = vsub.f32 %v299_v5, %v300_v7  ;;  %v302_v9 = vstv %s297_s15 }
  0x29   : > { %525 = vmatpush3.bf16.msra.mxu0 %v571_v3  ;;  %v303_v10 = vmul.f32 %v302_v9, %v301_v8 }
  0x2a   : > { %526 = vmatprep.subr.bf16.mxu0 %v617_v1 }
  0x2b   : > { %v304_v11 = vpack.c.bf16 %v303_v10, %v303_v10 }
  0x2d   : > { %527 = vmatpush3.bf16.msra.mxu0 %v572_v6 }
  0x30   : > { %529 = vmatmul.mubr.msk.bf16.vlgmr.msra.gmra.mrb[0].mxu0 %vm344_vm1, %v304_v11 }
 0x103   : > { %v382_v15 = vpop.f32.mrb[0].mxu0 }
 0x104   : > { %v383_v16 = vadd.f32 %v507_v13, %v382_v15  ;;  %v530_v17 = vpop.f32.mrb[1].mxu0 }
 0x105   : > { %v385_v18 = vpop.f32.mrb[2].mxu0 }
 0x106   : > { %v390_v19 = vadd.f32 %v389_v14, %v383_v16  ;;  %v531_v20 = vpop.f32.mrb[3].mxu0 }
 0x108   : > { %v391_v21 = vpack.c.bf16 %v390_v19, %v390_v19 }
 0x10a   : > { %393 = vst.msk [vmem:[%s292_s6] sm:$0x3] %vm392_vm2, %v391_v21 }
 0x10b PF: > { %s16_s20 = sadd.s32 1, %s614_s20   ;;  %s740_s18 = smov %s610_s19 }
 0x10c   : > { %p13_p2 = scmp.ge.s32.totalorder %s16_s20, 4   ;;  %s741_s19 = smov %s743_s22 }
 0x10e   :  { %15 = sbr.rel (!%p13_p2) target bundleno = 2 (0x2), region = 78 }
 0x115   :  { %419 = vsyncpa [#allocation3], 1 }
 0x116   :  { %421 = vsyncpa [#allocation3 + $0x1], 1 }

// kernel: as_mlp_forward.90
= control target key start
LH: loop header
LB: loop body
LE: loop exit
PB: predicated region body
PF: predicated region fallthrough
CT: control target
= control target key end

     0   :  { %9 = vsyncpa [#allocation3], 0  ;;  %s637_s15 = smov 0   ;;  %s639_s16 = smov 0   ;;  %s728_s0 = inlined_call_operand.vmem [shape: f32[2,2], index: 0, kind: input, shape index: {}]   ;;  %s729_s1 = inlined_call_operand.vmem [shape: bf16[2,4,64], index: 1, kind: input, shape index: {}]   ;;  %s730_s2 = inlined_call_operand.vmem [shape: bf16[64,256], index: 2, kind: input, shape index: {}]   ;;  %s731_s3 = inlined_call_operand.vmem [shape: f32[1,256], index: 3, kind: input, shape index: {}]   ;;  %s732_s4 = inlined_call_operand.vmem [shape: bf16[2,4,256], index: 4, kind: output, shape index: {}]  }
   0x1   :  { %s641_s17 = smov 0  }
   0x2 LB: > { %s490_s18 = sadd.s32 4294967295, %s608_s17   ;;  %s27_s19 = sadd.s32 1, %s604_s16  ;;  %s608_s17 = sphi %s641_s17, %s15_s17   ;;  %s604_s16 = sphi %s639_s16, %s736_s16   ;;  %s600_s15 = sphi %s637_s15, %s735_s15  }
   0x3   : > { %p29_p0 = scmp.ge.s32.totalorder %s27_s19, 2  ;;  %p492_p1 = scmp.ge.s32.totalorder %s608_s17, 1 }
   0x4   : > { %p151_p2 = scmp.lt.s32.totalorder %s608_s17, 3  ;;  %p662_p4 = scmp.eq.s32.totalorder %s490_s18, 0 }
   0x5   : > { %s738_s19 = smov (%p29_p0, %s27_s19), 0  ;;  %s164_s24 = sshll.u32 %s728_s0, 4  ;;  %s165_s24 = int_to_ptr.vmem [resolvable:$true] %s164_s24 }
   0x6   : > { %p658_p3 = pnand %p492_p1, %p151_p2  ;;  %s567_s25 = scalar_lea.vmem %s165_s24, 32 }
   0x7   : > { %p568_p7 = scmp.ne.s32.totalorder %s165_s24, %s567_s25  ;;  %p575_p11 = scmp.lt.s32.totalorder %s165_s24, %s165_s24 }
   0x8   : > { %p519_p5 = pneg %p658_p3  ;;  %p576_p12 = scmp.lt.s32.totalorder %s567_s25, %s567_s25 }
   0xa   : > { %p520_p6 = pnand %p662_p4, %p519_p5  ;;  %p577_p13 = por %p576_p12, %p575_p11 }
   0xc   : > { %p569_p8 = pneg %p520_p6 }
   0xe   : > { %p570_p9 = pnand %p569_p8, %p568_p7 }
  0x10   : > { %p571_p10 = pneg %p570_p9 }
  0x12   : > { %p578_p0 = pnand %p577_p13, %p571_p10 }
  0x14   : > { %581 = shalt.err (!%p578_p0)
}
  0x15   : > { %s610_s26 = smov [#allocation2]   ;;  %193 = sbr.rel (%p658_p3) target bundleno = 291 (0x123), region = 36 }
  0x16   : > { %522 = dma.vmem_to_smem (!%p520_p6), %s165_s24, 32, %s610_s26, [#allocation3]  }
  0x1c   : > { %595 = dma.done.wait (%p662_p4), [#allocation3], 32  }
  0x1d   : > { %597 = vsyncadd (%p662_p4), [#allocation3], 4294967264 }
  0x1e   : > { %199 = sfence }
  0x1f   : > { %v551_v0 = vld [vmem:[%s730_s2 + $0x4] ss:$8 sps:$4 sm:$0xff]   ;;  %p226_p1 = scmp.lt.s32.totalorder %s600_s15, 1  ;;  %v553_v1 = vld [vmem:[%s730_s2] ss:$8 sps:$4 sm:$0xff]   ;;  %v611_v2 = vmov 0   ;;  %v264_v16 = vlaneseq }
  0x20   : > { %350 = vmatprep.mubr.bf16.mxu0 %v611_v2  ;;  %s500_s5 = sshll.u32 %s600_s15, 7  ;;  %318 = vmatprep.subr.bf16.mxu0 %v551_v0  ;;  %v554_v3 = vld [vmem:[%s730_s2 + $0x14] ss:$8 sps:$4 sm:$0xff]   ;;  %v556_v4 = vld [vmem:[%s730_s2 + $0x10] ss:$8 sps:$4 sm:$0xff]   ;;  %vm314_vm0 = vcmask 523264  }
  0x21   : > { %s740_s15 = smov (!%p226_p1, %s600_s15), 1  ;;  %319 = vmatpush1.bf16.msra.mxu0 %v553_v1  ;;  %s244_s10 = sld [smem:[#allocation2 + %s500_s5]]  ;;  %v557_v5 = vld [vmem:[%s730_s2 + $0x24] ss:$8 sps:$4 sm:$0xff]   ;;  %v559_v7 = vld [vmem:[%s730_s2 + $0x20] ss:$8 sps:$4 sm:$0xff]  }
  0x22   : > { %320 = vmatprep.subr.bf16.mxu0 %v554_v3  ;;  %s497_s13 = sshll.u32 %s740_s15, 1  ;;  %s245_s21 = sadd.s32 1, %s500_s5  ;;  %v560_v9 = vld [vmem:[%s730_s2 + $0x34] ss:$8 sps:$4 sm:$0xff]   ;;  %v562_v12 = vld [vmem:[%s730_s2 + $0x30] ss:$8 sps:$4 sm:$0xff]  }
  0x23   : > { %s232_s20 = scalar_lea.vmem %s729_s1, %s497_s13  ;;  %s246_s24 = sld [smem:[#allocation2 + %s245_s21]]  ;;  %v265_v17 = vshrl.u32 %v264_v16, 7  ;;  %v262_v19 = vld [vmem:[%s731_s3] sm:$0x3] }
  0x24   : > { %v247_v6 = vld [vmem:[%s232_s20] sm:$0x3]  ;;  %s514_s5 = sshll.u32 %s740_s15, 2 }
  0x25   : > { %321 = vmatpush1.bf16.msra.mxu0 %v556_v4  ;;  %v248_v8 = vunpack.c.l.bf16 %v247_v6  ;;  %v266_v18 = vsub.s32 0, %v265_v17  ;;  %v270_v20 = vsub.s32 1, %v265_v17  ;;  %s241_s8 = scalar_lea.vmem %s732_s4, %s514_s5 }
  0x26   : > { %322 = vmatprep.subr.bf16.mxu0 %v557_v5 }
  0x27   : > { %v249_v10 = vstv %s244_s10  ;;  %v267_v21 = vrot.slane %v262_v19, %v266_v18  ;;  %v271_v22 = vrot.slane %v262_v19, %v270_v20 }
  0x28   : > { %v250_v11 = vsub.f32 %v248_v8, %v249_v10 }
  0x29   : > { %323 = vmatpush1.bf16.msra.mxu0 %v559_v7  ;;  %v251_v13 = vstv %s246_s24 }
  0x2a   : > { %324 = vmatprep.subr.bf16.mxu0 %v560_v9  ;;  %v252_v14 = vmul.f32 %v251_v13, %v250_v11 }
  0x2c   : > { %v253_v15 = vpack.c.bf16 %v252_v14, %v252_v14 }
  0x2d   : > { %325 = vmatpush1.bf16.msra.mxu0 %v562_v12 }
  0x30   : > { %509 = vmatmul.mubr.msk.bf16.vlgmr.msra.gmra.mrb[0].mxu0 %vm314_vm0, %v253_v15 }
 0x103   : > { %v352_v23 = vpop.f32.mrb[0].mxu0 }
 0x104   : > { %v353_v24 = vadd.f32 %v352_v23, %v267_v21  ;;  %v354_v25 = vpop.f32.mrb[1].mxu0 }
 0x105   : > { %v355_v26 = vadd.f32 %v354_v25, %v271_v22  ;;  %v356_v27 = vpop.f32.mrb[2].mxu0 }
 0x106   : > { %v361_v28 = vmul.f32 0.044715, %v353_v24  ;;  %v357_v29 = vpop.f32.mrb[3].mxu0  ;;  %v359_v41 = vmul.f32 0.5, %v353_v24 }
 0x107   : > { %v362_v30 = vmul.f32 0.044715, %v355_v26  ;;  %v360_v43 = vmul.f32 0.5, %v355_v26 }
 0x108   : > { %v363_v31 = vmul.f32 %v361_v28, %v353_v24 }
 0x109   : > { %v364_v32 = vmul.f32 %v362_v30, %v355_v26 }
 0x10a   : > { %v365_v33 = vmul.f32 %v363_v31, %v353_v24 }
 0x10b   : > { %v366_v34 = vmul.f32 %v364_v32, %v355_v26 }
 0x10c   : > { %v367_v35 = vadd.f32 %v365_v33, %v353_v24 }
 0x10d   : > { %v368_v36 = vadd.f32 %v366_v34, %v355_v26 }
 0x10e   : > { %v369_v37 = vmul.f32 0.7978846, %v367_v35 }
 0x10f   : > { %v370_v38 = vmul.f32 0.7978846, %v368_v36 }
 0x110   : > { %563 = vtanh.f32 %v369_v37 }
 0x111   : > { %565 = vtanh.f32 %v370_v38 }
 0x11a   : > { %v564_v39 = vpop.eup %563 }
 0x11b   : > { %v566_v40 = vpop.eup %565  ;;  %v373_v42 = vadd.f32 1.0, %v564_v39 }
 0x11c   : > { %v374_v44 = vadd.f32 1.0, %v566_v40 }
 0x11d   : > { %v375_v45 = vmul.f32 %v373_v42, %v359_v41 }
 0x11e   : > { %v376_v46 = vmul.f32 %v374_v44, %v360_v43 }
 0x120   : > { %v510_v47 = vpack.c.bf16 %v376_v46, %v375_v45 }
 0x122   : > { %511 = vst.sshfl [vmem:[%s241_s8] sm:$0x33 pattern:$0x76325410] %v510_v47 }
 0x123 PF: > { %s15_s17 = sadd.s32 1, %s608_s17   ;;  %s735_s15 = smov %s604_s16 }
 0x124   : > { %p12_p2 = scmp.ge.s32.totalorder %s15_s17, 4   ;;  %s736_s16 = smov %s738_s19 }
 0x126   :  { %14 = sbr.rel (!%p12_p2) target bundleno = 2 (0x2), region = 71 }
 0x12d   :  { %420 = vsyncpa [#allocation3], 1 }
 0x12e   :  { %422 = vsyncpa [#allocation3 + $0x1], 1 }

// kernel: as_mlp_forward.91
= control target key start
LH: loop header
LB: loop body
LE: loop exit
PB: predicated region body
PF: predicated region fallthrough
CT: control target
= control target key end

     0   :  { %vm205_vm0 = vcmask 519168   ;;  %s355_s1 = inlined_call_operand.vmem [shape: bf16[256,64], index: 1, kind: input, shape index: {}]   ;;  %s356_s0 = inlined_call_operand.vmem [shape: bf16[8,256], index: 0, kind: input, shape index: {}]   ;;  %s357_s3 = inlined_call_operand.vmem [shape: bf16[8,64], index: 3, kind: input, shape index: {}]   ;;  %s358_s2 = inlined_call_operand.vmem [shape: f32[1,64], index: 2, kind: input, shape index: {}]   ;;  %s359_s4 = inlined_call_operand.vmem [shape: bf16[8,64], index: 4, kind: output, shape index: {}]  }
   0x1   :  { %v252_v0 = vld [vmem:[%s355_s1 + $0x40] sm:$0xff]   ;;  %v254_v2 = vld [vmem:[%s355_s1 + $0x48] sm:$0xff]   ;;  %v256_v4 = vld [vmem:[%s355_s1 + $0x50] sm:$0xff]  }
   0x2   :  { %v253_v1 = vld [vmem:[%s355_s1] sm:$0xff]   ;;  %230 = vmatprep.subr.bf16.mxu0 %v252_v0  ;;  %v255_v3 = vld [vmem:[%s355_s1 + $0x8] sm:$0xff]   ;;  %v257_v5 = vld [vmem:[%s355_s1 + $0x10] sm:$0xff]  }
   0x3   :  { %231 = vmatpush3.bf16.msra.mxu0 %v253_v1  ;;  %v258_v6 = vld [vmem:[%s355_s1 + $0x58] sm:$0xff]   ;;  %v260_v8 = vld [vmem:[%s355_s1 + $0x60] sm:$0xff]   ;;  %v262_v10 = vld [vmem:[%s355_s1 + $0x68] sm:$0xff]  }
   0x4   :  { %232 = vmatprep.subr.bf16.mxu0 %v254_v2  ;;  %v259_v7 = vld [vmem:[%s355_s1 + $0x18] sm:$0xff]   ;;  %v261_v9 = vld [vmem:[%s355_s1 + $0x20] sm:$0xff]   ;;  %v263_v13 = vld [vmem:[%s355_s1 + $0x28] sm:$0xff]  }
   0x5   :  { %v18_v11 = vld [vmem:[%s356_s0] sm:$0xff]  ;;  %v264_v14 = vld [vmem:[%s355_s1 + $0x70] sm:$0xff]   ;;  %v266_v16 = vld [vmem:[%s355_s1 + $0x78] sm:$0xff]  }
   0x6   :  { %v213_v12 = vcombine.high %v18_v11, %v18_v11  ;;  %v265_v15 = vld [vmem:[%s355_s1 + $0x30] sm:$0xff]   ;;  %v267_v17 = vld [vmem:[%s355_s1 + $0x38] sm:$0xff]   ;;  %v212_v18 = vcombine.low %v18_v11, %v18_v11  ;;  %v201_v19 = vld [vmem:[%s357_s3] sm:$0xf] }
   0x7   :  { %233 = vmatpush3.bf16.msra.mxu0 %v255_v3  ;;  %v211_v21 = vld [vmem:[%s358_s2] ss:$0 sm:$0xff]  ;;  %v202_v24 = vunpack.c.l.bf16 %v201_v19 }
   0x8   :  { %234 = vmatprep.subr.bf16.mxu0 %v256_v4  ;;  %193 = vmatprep.mubr.bf16.mxu0 %v213_v12 }
   0xb   :  { %235 = vmatpush3.bf16.msra.mxu0 %v257_v5 }
   0xc   :  { %236 = vmatprep.subr.bf16.mxu0 %v258_v6 }
   0xf   :  { %237 = vmatpush3.bf16.msra.mxu0 %v259_v7 }
  0x10   :  { %238 = vmatprep.subr.bf16.mxu0 %v260_v8 }
  0x13   :  { %239 = vmatpush3.bf16.msra.mxu0 %v261_v9 }
  0x14   :  { %240 = vmatprep.subr.bf16.mxu0 %v262_v10 }
  0x17   :  { %241 = vmatpush3.bf16.msra.mxu0 %v263_v13 }
  0x18   :  { %242 = vmatprep.subr.bf16.mxu0 %v264_v14 }
  0x1b   :  { %243 = vmatpush3.bf16.msra.mxu0 %v265_v15 }
  0x1c   :  { %244 = vmatprep.subr.bf16.mxu0 %v266_v16 }
  0x1f   :  { %245 = vmatpush3.bf16.msra.mxu0 %v267_v17 }
  0x22   :  { %194 = vmatmul.mubr.bf16.vlgmr.msra.gmra.mrb[0].mxu0 %v212_v18 }
  0xf5   :  { %v246_v20 = vpop.f32.mrb[0].mxu0 }
  0xf6   :  { %v247_v22 = vpop.f32.mrb[1].mxu0 }
  0xf7   :  { %v248_v23 = vadd.f32 %v247_v22, %v246_v20  ;;  %v249_v25 = vpop.f32.mrb[2].mxu0 }
  0xf8   :  { %v250_v26 = vpop.f32.mrb[3].mxu0 }
  0xf9   :  { %v196_v27 = vadd.f32 %v248_v23, %v211_v21 }
  0xfb   :  { %v203_v28 = vadd.f32 %v202_v24, %v196_v27 }
  0xfd   :  { %v204_v29 = vpack.c.bf16 %v203_v28, %v203_v28 }
  0xff   :  { %206 = vst.msk [vmem:[%s359_s4] sm:$0xf] %vm205_vm0, %v204_v29 }

// kernel: as_mlp_forward.92
= control target key start
LH: loop header
LB: loop body
LE: loop exit
PB: predicated region body
PF: predicated region fallthrough
CT: control target
= control target key end

     0   :  { %6 = vsyncpa [#allocation3], 0  ;;  %s283_s6 = smov 0   ;;  %s318_s0 = inlined_call_operand.vmem [shape: bf16[2,1,256], index: 0, kind: input, shape index: {}]   ;;  %s319_s1 = inlined_call_operand.vmem [shape: f32[2,2], index: 1, kind: output, shape index: {}]  }
   0x1 LB: > { %s289_s7 = sadd.s32 4294967295, %s269_s6   ;;  %p215_p0 = scmp.ge.s32.totalorder %s269_s6, 1  ;;  %s269_s6 = sphi %s283_s6, %s12_s6  }
   0x2   : > { %p82_p1 = scmp.lt.s32.totalorder %s269_s6, 3 }
   0x4   : > { %p83_p2 = pnand %p215_p0, %p82_p1 }
   0x5   : > { %p96_p3 = scmp.lt.s32.totalorder (!%p83_p2), %s289_s7, 1  ;;  %v103_v0 = vlaneseq (!%p83_p2)  ;;  %vm113_vm0 = vcmask (!%p83_p2), 1040384   ;;  %v271_v11 = vmov (!%p83_p2), 269488144   ;;  %s217_s13 = sshll.u32 (!%p83_p2), %s289_s7, 7 }
   0x6   : > { %86 = sbr.rel (%p83_p2) target bundleno = 394 (0x18a), region = 24  ;;  %v123_v12 = vunpack.c.l.s4 (!%p83_p2), %v271_v11  ;;  %s154_s15 = scalar_lea.smem (!%p83_p2), [#allocation2], %s217_s13 }
   0x7   : > { %v104_v1 = vshrl.u32 (!%p83_p2), %v103_v0, 7  ;;  %s167_s18 = sshll.u32 (!%p83_p2), %s319_s1, 4  ;;  %s194_s19 = scalar_lea.smem (!%p83_p2), %s154_s15, 1 [#allocation2]  ;;  %s168_s18 = int_to_ptr.vmem [resolvable:$true] %s167_s18 }
   0x8   : > { %v124_v13 = vunpack.c.0.s8 (!%p83_p2), %v123_v12  ;;  %p231_p4 = scmp.eq.s32.totalorder (!%p83_p2), %s289_s7, 1  ;;  %s245_s21 = scalar_lea.vmem (!%p83_p2), %s168_s18, 32 }
   0x9   : > { %v105_v2 = vsub.s32 (!%p83_p2), 0, %v104_v1  ;;  %v109_v3 = vsub.s32 (!%p83_p2), 2, %v104_v1  ;;  %p246_p5 = scmp.ne.s32.totalorder (!%p83_p2), %s168_s18, %s245_s21  ;;  %p252_p8 = scmp.lt.s32.totalorder (!%p83_p2), %s168_s18, %s168_s18 }
   0xa   : > { %v127_v14 = vsub.s32 (!%p83_p2), %v124_v13, %v104_v1  ;;  %p253_p9 = scmp.lt.s32.totalorder (!%p83_p2), %s245_s21, %s245_s21 }
   0xb   : > { %p247_p6 = pnand (!%p83_p2), %p246_p5, %p231_p4 }
   0xc   : > { %p254_p10 = por (!%p83_p2), %p253_p9, %p252_p8 }
   0xd   : > { %s97_s8 = scalar_select %p96_p3, %s289_s7, 1 }
   0xe   : > { %p248_p7 = pneg %p247_p6 }
   0xf   : > { %s216_s9 = sshll.u32 %s97_s8, 1 }
  0x10   : > { %s99_s12 = scalar_lea.vmem %s318_s0, %s216_s9  ;;  %p255_p11 = pnand %p254_p10, %p248_p7 }
  0x11   : > { %v100_v4 = vld [vmem:[%s99_s12] sm:$0x3] }
  0x12   : > { %v101_v5 = vunpack.c.l.bf16 %v100_v4 }
  0x14   : > { %v106_v6 = vrot.slane %v101_v5, %v105_v2  ;;  %v110_v7 = vrot.slane %v101_v5, %v109_v3 }
  0x16   : > { %v114_v8 = vsel %vm113_vm0, %v106_v6, 0.0  ;;  %v115_v9 = vsel %vm113_vm0, %v110_v7, 0.0 }
  0x17   : > { %v116_v10 = vadd.f32 %v115_v9, %v114_v8 }
  0x19   : > { %117 = vadd.xlane.f32.xlu0 %v116_v10 }
  0xa6   : > { %v118_v15 = vpop.xlane.xlu0 %117 }
  0xa7   : > { %v120_v16 = vmul.f32 0.00390625, %v118_v15 }
  0xa9   : > { %v128_v17 = vrot.slane %v120_v16, %v127_v14  ;;  %223 = vpush %v120_v16 }
  0xab   : > { %v130_v18 = vsub.f32 %v101_v5, %v128_v17 }
  0xad   : > { %v131_v19 = vmul.f32 %v130_v18, %v130_v18 }
  0xaf   : > { %v136_v20 = vrot.slane %v131_v19, %v105_v2  ;;  %v140_v21 = vrot.slane %v131_v19, %v109_v3 }
  0xb1   : > { %v143_v22 = vsel %vm113_vm0, %v136_v20, 0.0  ;;  %v144_v23 = vsel %vm113_vm0, %v140_v21, 0.0 }
  0xb2   : > { %v145_v24 = vadd.f32 %v144_v23, %v143_v22 }
  0xb4   : > { %146 = vadd.xlane.f32.xlu0 %v145_v24 }
  0xda   : > { %s224_s14 = spop %223 }
  0xdb   : > { %155 = sst [smem:[%s154_s15]] %s224_s14 }
 0x141   : > { %v147_v25 = vpop.xlane.xlu0 %146 }
 0x142   : > { %v149_v26 = vmul.f32 0.00390625, %v147_v25 }
 0x144   : > { %v150_v27 = vadd.f32 1e-05, %v149_v26 }
 0x146   : > { %243 = vrsqrt.f32 %v150_v27 }
 0x150   : > { %v244_v28 = vpop.eup %243 }
 0x151   : > { %225 = vpush %v244_v28 }
 0x182   : > { %s226_s20 = spop %225 }
 0x183   : > { %159 = sst [smem:[%s194_s19]] %s226_s20 }
 0x184   : > { %258 = shalt.err (!%p255_p11)
}
 0x185   : > { %s272_s22 = smov [#allocation2]  }
 0x186   : > { %228 = dma.smem_to_vmem (%p231_p4), %s272_s22, 32, %s168_s18, [#allocation3]  }
 0x187   : > { %264 = dma.done.wait (%p231_p4), [#allocation3], 32  }
 0x188   : > { %266 = vsyncadd (%p231_p4), [#allocation3], 4294967264 }
 0x189   : > { %175 = sfence }
 0x18a PF: > { %s12_s6 = sadd.s32 1, %s269_s6  }
 0x18b   : > { %p9_p12 = scmp.ge.s32.totalorder %s12_s6, 4  }
 0x18d   :  { %11 = sbr.rel (!%p9_p12) target bundleno = 1 (0x1), region = 53 }
 0x194   :  { %181 = vsyncpa [#allocation3], 1 }
 0x195   :  { %183 = vsyncpa [#allocation3 + $0x1], 1 }

// kernel: as_mlp_forward.94
= control target key start
LH: loop header
LB: loop body
LE: loop exit
PB: predicated region body
PF: predicated region fallthrough
CT: control target
= control target key end

     0   :  { %6 = vsyncpa [#allocation3], 0  ;;  %s239_s6 = smov 0   ;;  %s270_s0 = inlined_call_operand.vmem [shape: bf16[2,1,128], index: 0, kind: input, shape index: {}]   ;;  %s271_s1 = inlined_call_operand.vmem [shape: f32[2,2], index: 1, kind: output, shape index: {}]  }
   0x1 LB: > { %s245_s7 = sadd.s32 4294967295, %s226_s6   ;;  %p174_p0 = scmp.ge.s32.totalorder %s226_s6, 1  ;;  %s226_s6 = sphi %s239_s6, %s12_s6  }
   0x2   : > { %p81_p1 = scmp.lt.s32.totalorder %s226_s6, 3 }
   0x4   : > { %p82_p2 = pnand %p174_p0, %p81_p1 }
   0x5   : > { %p94_p3 = scmp.lt.s32.totalorder (!%p82_p2), %s245_s7, 1  ;;  %vm99_vm0 = vcmask (!%p82_p2), 1040384   ;;  %s175_s12 = sshll.u32 (!%p82_p2), %s245_s7, 7 }
   0x6   : > { %85 = sbr.rel (%p82_p2) target bundleno = 383 (0x17f), region = 24  ;;  %s116_s14 = scalar_lea.smem (!%p82_p2), [#allocation2], %s175_s12 }
   0x7   : > { %s129_s17 = sshll.u32 (!%p82_p2), %s271_s1, 4  ;;  %s153_s18 = scalar_lea.smem (!%p82_p2), %s116_s14, 1 [#allocation2]  ;;  %s130_s17 = int_to_ptr.vmem [resolvable:$true] %s129_s17 }
   0x8   : > { %p189_p4 = scmp.eq.s32.totalorder (!%p82_p2), %s245_s7, 1  ;;  %s202_s20 = scalar_lea.vmem (!%p82_p2), %s130_s17, 32 }
   0x9   : > { %p203_p5 = scmp.ne.s32.totalorder (!%p82_p2), %s130_s17, %s202_s20  ;;  %p209_p8 = scmp.lt.s32.totalorder (!%p82_p2), %s130_s17, %s130_s17 }
   0xa   : > { %p210_p9 = scmp.lt.s32.totalorder (!%p82_p2), %s202_s20, %s202_s20 }
   0xb   : > { %p204_p6 = pnand (!%p82_p2), %p203_p5, %p189_p4 }
   0xc   : > { %p211_p10 = por (!%p82_p2), %p210_p9, %p209_p8 }
   0xd   : > { %s95_s8 = scalar_select %p94_p3, %s245_s7, 1 }
   0xe   : > { %p205_p7 = pneg %p204_p6 }
   0xf   : > { %s96_s11 = scalar_lea.vmem %s270_s0, %s95_s8 }
  0x10   : > { %v97_v0 = vld [vmem:[%s96_s11] sm:$0x1]  ;;  %p212_p11 = pnand %p211_p10, %p205_p7 }
  0x11   : > { %v98_v1 = vunpack.c.l.bf16 %v97_v0 }
  0x13   : > { %v100_v2 = vsel %vm99_vm0, %v98_v1, 0.0 }
  0x14   : > { %101 = vadd.xlane.f32.xlu0 %v100_v2 }
  0xa1   : > { %v102_v3 = vpop.xlane.xlu0 %101 }
  0xa2   : > { %v104_v4 = vmul.f32 0.0078125, %v102_v3 }
  0xa4   : > { %v105_v5 = vsub.f32 %v98_v1, %v104_v4  ;;  %181 = vpush %v104_v4 }
  0xa6   : > { %v106_v6 = vmul.f32 %v105_v5, %v105_v5 }
  0xa8   : > { %v107_v7 = vsel %vm99_vm0, %v106_v6, 0.0 }
  0xa9   : > { %108 = vadd.xlane.f32.xlu0 %v107_v7 }
  0xd5   : > { %s182_s13 = spop %181 }
  0xd6   : > { %117 = sst [smem:[%s116_s14]] %s182_s13 }
 0x136   : > { %v109_v8 = vpop.xlane.xlu0 %108 }
 0x137   : > { %v111_v9 = vmul.f32 0.0078125, %v109_v8 }
 0x139   : > { %v112_v10 = vadd.f32 1e-05, %v111_v9 }
 0x13b   : > { %200 = vrsqrt.f32 %v112_v10 }
 0x145   : > { %v201_v11 = vpop.eup %200 }
 0x146   : > { %183 = vpush %v201_v11 }
 0x177   : > { %s184_s19 = spop %183 }
 0x178   : > { %121 = sst [smem:[%s153_s18]] %s184_s19 }
 0x179   : > { %215 = shalt.err (!%p212_p11)
}
 0x17a   : > { %s228_s21 = smov [#allocation2]  }
 0x17b   : > { %186 = dma.smem_to_vmem (%p189_p4), %s228_s21, 32, %s130_s17, [#allocation3]  }
 0x17c   : > { %221 = dma.done.wait (%p189_p4), [#allocation3], 32  }
 0x17d   : > { %223 = vsyncadd (%p189_p4), [#allocation3], 4294967264 }
 0x17e   : > { %137 = sfence }
 0x17f PF: > { %s12_s6 = sadd.s32 1, %s226_s6  }
 0x180   : > { %p9_p12 = scmp.ge.s32.totalorder %s12_s6, 4  }
 0x182   :  { %11 = sbr.rel (!%p9_p12) target bundleno = 1 (0x1), region = 53 }
 0x189   :  { %143 = vsyncpa [#allocation3], 1 }
 0x18a   :  { %145 = vsyncpa [#allocation3 + $0x1], 1 }

// kernel: as_mlp_forward.95
= control target key start
LH: loop header
LB: loop body
LE: loop exit
PB: predicated region body
PF: predicated region fallthrough
CT: control target
= control target key end

     0   :  { %9 = vsyncpa [#allocation3], 0  ;;  %s446_s15 = smov 0   ;;  %s448_s16 = smov 0   ;;  %s512_s0 = inlined_call_operand.vmem [shape: f32[2,2], index: 0, kind: input, shape index: {}]   ;;  %s513_s1 = inlined_call_operand.vmem [shape: bf16[2,1,128], index: 1, kind: input, shape index: {}]   ;;  %s514_s2 = inlined_call_operand.vmem [shape: f32[1,128], index: 2, kind: input, shape index: {}]   ;;  %s515_s3 = inlined_call_operand.vmem [shape: f32[1,128], index: 3, kind: input, shape index: {}]   ;;  %s516_s4 = inlined_call_operand.vmem [shape: bf16[2,1,128], index: 4, kind: output, shape index: {}]  }
   0x1   :  { %s450_s17 = smov 0  }
   0x2 LB: > { %s332_s18 = sadd.s32 4294967295, %s418_s17   ;;  %s27_s19 = sadd.s32 1, %s414_s16  ;;  %s418_s17 = sphi %s450_s17, %s15_s17   ;;  %s414_s16 = sphi %s448_s16, %s520_s16   ;;  %s410_s15 = sphi %s446_s15, %s519_s15  }
   0x3   : > { %p29_p0 = scmp.ge.s32.totalorder %s27_s19, 2  ;;  %p334_p1 = scmp.ge.s32.totalorder %s418_s17, 1 }
   0x4   : > { %p151_p2 = scmp.lt.s32.totalorder %s418_s17, 3  ;;  %p471_p4 = scmp.eq.s32.totalorder %s332_s18, 0 }
   0x5   : > { %s522_s19 = smov (%p29_p0, %s27_s19), 0  ;;  %s164_s24 = sshll.u32 %s512_s0, 4  ;;  %s165_s24 = int_to_ptr.vmem [resolvable:$true] %s164_s24 }
   0x6   : > { %p467_p3 = pnand %p334_p1, %p151_p2  ;;  %s377_s25 = scalar_lea.vmem %s165_s24, 32 }
   0x7   : > { %p378_p7 = scmp.ne.s32.totalorder %s165_s24, %s377_s25  ;;  %p385_p11 = scmp.lt.s32.totalorder %s165_s24, %s165_s24 }
   0x8   : > { %p346_p5 = pneg %p467_p3  ;;  %p386_p12 = scmp.lt.s32.totalorder %s377_s25, %s377_s25 }
   0xa   : > { %p347_p6 = pnand %p471_p4, %p346_p5  ;;  %p387_p13 = por %p386_p12, %p385_p11 }
   0xc   : > { %p379_p8 = pneg %p347_p6 }
   0xe   : > { %p380_p9 = pnand %p379_p8, %p378_p7 }
  0x10   : > { %p381_p10 = pneg %p380_p9 }
  0x12   : > { %p388_p0 = pnand %p387_p13, %p381_p10 }
  0x14   : > { %391 = shalt.err (!%p388_p0)
}
  0x15   : > { %s420_s26 = smov [#allocation2]   ;;  %192 = sbr.rel (%p467_p3) target bundleno = 51 (0x33), region = 36 }
  0x16   : > { %349 = dma.vmem_to_smem (!%p347_p6), %s165_s24, 32, %s420_s26, [#allocation3]  }
  0x1c   : > { %405 = dma.done.wait (%p471_p4), [#allocation3], 32  }
  0x1d   : > { %407 = vsyncadd (%p471_p4), [#allocation3], 4294967264 }
  0x1e   : > { %198 = sfence }
  0x1f   : > { %p221_p1 = scmp.lt.s32.totalorder %s410_s15, 1  ;;  %s339_s27 = sshll.u32 %s410_s15, 7  ;;  %v243_v5 = vld [vmem:[%s514_s2] sm:$0x1]  ;;  %vm248_vm0 = vcmask 1040384  }
  0x20   : > { %s234_s28 = sld [smem:[#allocation2 + %s339_s27]]  ;;  %s235_s29 = sadd.s32 1, %s339_s27  ;;  %v245_v7 = vld [vmem:[%s515_s3] sm:$0x1]  ;;  %vm249_vm1 = vsmask.f32 256 }
  0x21   : > { %s524_s15 = smov (!%p221_p1, %s410_s15), 1  ;;  %s236_s30 = sld [smem:[#allocation2 + %s235_s29]]  ;;  %vm250_vm2 = vmand %vm248_vm0, %vm249_vm1 }
  0x22   : > { %s226_s7 = scalar_lea.vmem %s513_s1, %s524_s15  ;;  %s232_s14 = scalar_lea.vmem %s516_s4, %s524_s15 }
  0x23   : > { %v237_v0 = vld [vmem:[%s226_s7] sm:$0x1] }
  0x24   : > { %v238_v1 = vunpack.c.l.bf16 %v237_v0  ;;  %v251_v10 = vld [vmem:[%s232_s14] sm:$0x1] }
  0x26   : > { %v239_v2 = vstv %s234_s28 }
  0x27   : > { %v240_v3 = vsub.f32 %v238_v1, %v239_v2  ;;  %v241_v4 = vstv %s236_s30 }
  0x29   : > { %v242_v6 = vmul.f32 %v241_v4, %v240_v3 }
  0x2b   : > { %v244_v8 = vmul.f32 %v243_v5, %v242_v6 }
  0x2d   : > { %v246_v9 = vadd.f32 %v245_v7, %v244_v8 }
  0x2f   : > { %v247_v11 = vpack.c.bf16 %v246_v9, %v246_v9 }
  0x31   : > { %v252_v12 = vsel %vm250_vm2, %v247_v11, %v251_v10 }
  0x32   : > { %253 = vst [vmem:[%s232_s14] sm:$0x1] %v252_v12 }
  0x33 PF: > { %s15_s17 = sadd.s32 1, %s418_s17   ;;  %s519_s15 = smov %s414_s16 }
  0x34   : > { %p12_p2 = scmp.ge.s32.totalorder %s15_s17, 4   ;;  %s520_s16 = smov %s522_s19 }
  0x36   :  { %14 = sbr.rel (!%p12_p2) target bundleno = 2 (0x2), region = 71 }
  0x3d   :  { %277 = vsyncpa [#allocation3], 1 }
  0x3e   :  { %279 = vsyncpa [#allocation3 + $0x1], 1 }

// kernel: as_mlp_forward.96
= control target key start
LH: loop header
LB: loop body
LE: loop exit
PB: predicated region body
PF: predicated region fallthrough
CT: control target
= control target key end

     0   :  { %v109_v0 = vmov 0.0   ;;  %vm110_vm0 = vmmov 0   ;;  %vm39_vm1 = vcmask 261120   ;;  %vm84_vm2 = vcmask 253952   ;;  %s146_s1 = inlined_call_operand.vmem [shape: bf16[32,32], index: 1, kind: input, shape index: {}]   ;;  %s147_s0 = inlined_call_operand.vmem [shape: bf16[2,32], index: 0, kind: input, shape index: {}]   ;;  %s148_s2 = inlined_call_operand.vmem [shape: f32[1,32], index: 2, kind: input, shape index: {}]   ;;  %s149_s3 = inlined_call_operand.vmem [shape: bf16[2,32], index: 3, kind: output, shape index: {}]  }
   0x1   :  { %97 = vmatprep.subr.bf16.mxu0 %v109_v0  ;;  %v107_v1 = vld [vmem:[%s146_s1] sm:$0xff]   ;;  %101 = vmatprep.mubr.msk.bf16.mxu0 %vm110_vm0, %v109_v0  ;;  %v108_v2 = vld [vmem:[%s146_s1 + $0x8] sm:$0xff]  }
   0x2   :  { %98 = vmatpush3.bf16.msra.mxu0 %v107_v1  ;;  %v15_v3 = vld [vmem:[%s147_s0] sm:$0x1] }
   0x3   :  { %99 = vmatprep.subr.bf16.mxu0 %v109_v0  ;;  %v90_v4 = vld [vmem:[%s148_s2] ss:$0 sm:$0xff] }
   0x6   :  { %100 = vmatpush3.bf16.msra.mxu0 %v108_v2 }
   0x9   :  { %102 = vmatmul.mubr.msk.bf16.vlgmr.msra.gmra.mrb[0].mxu0 %vm39_vm1, %v15_v3 }
  0xdc   :  { %v77_v5 = vpop.f32.mrb[0].mxu0 }
  0xdd   :  { %v78_v6 = vadd.f32 %v90_v4, %v77_v5  ;;  %v103_v7 = vpop.f32.mrb[1].mxu0 }
  0xde   :  { %v80_v8 = vpop.f32.mrb[2].mxu0 }
  0xdf   :  { %v83_v9 = vpack.c.bf16 %v78_v6, %v78_v6  ;;  %v104_v10 = vpop.f32.mrb[3].mxu0 }
  0xe1   :  { %85 = vst.msk [vmem:[%s149_s3] sm:$0x1] %vm84_vm2, %v83_v9 }

// kernel: as_mlp_forward.93
= control target key start
LH: loop header
LB: loop body
LE: loop exit
PB: predicated region body
PF: predicated region fallthrough
CT: control target
= control target key end

     0   :  { %9 = vsyncpa [#allocation3], 0  ;;  %s692_s15 = smov 0   ;;  %s694_s16 = smov 0   ;;  %s807_s0 = inlined_call_operand.vmem [shape: f32[2,2], index: 0, kind: input, shape index: {}]   ;;  %s808_s1 = inlined_call_operand.vmem [shape: bf16[2,1,256], index: 1, kind: input, shape index: {}]   ;;  %s809_s2 = inlined_call_operand.vmem [shape: bf16[256,128], index: 2, kind: input, shape index: {}]   ;;  %s810_s3 = inlined_call_operand.vmem [shape: f32[1,128], index: 3, kind: input, shape index: {}]   ;;  %s811_s4 = inlined_call_operand.vmem [shape: bf16[2,1,128], index: 4, kind: output, shape index: {}]  }
   0x1   :  { %s696_s17 = smov 0  }
   0x2 LB: > { %s523_s18 = sadd.s32 4294967295, %s664_s17   ;;  %s27_s19 = sadd.s32 1, %s660_s16  ;;  %s664_s17 = sphi %s696_s17, %s15_s17   ;;  %s660_s16 = sphi %s694_s16, %s815_s16   ;;  %s656_s15 = sphi %s692_s15, %s814_s15  }
   0x3   : > { %p29_p0 = scmp.ge.s32.totalorder %s27_s19, 2  ;;  %p525_p1 = scmp.ge.s32.totalorder %s664_s17, 1 }
   0x4   : > { %p151_p2 = scmp.lt.s32.totalorder %s664_s17, 3  ;;  %p717_p4 = scmp.eq.s32.totalorder %s523_s18, 0 }
   0x5   : > { %s817_s19 = smov (%p29_p0, %s27_s19), 0  ;;  %s164_s24 = sshll.u32 %s807_s0, 4  ;;  %s165_s24 = int_to_ptr.vmem [resolvable:$true] %s164_s24 }
   0x6   : > { %p713_p3 = pnand %p525_p1, %p151_p2  ;;  %s623_s25 = scalar_lea.vmem %s165_s24, 32 }
   0x7   : > { %p624_p7 = scmp.ne.s32.totalorder %s165_s24, %s623_s25  ;;  %p631_p11 = scmp.lt.s32.totalorder %s165_s24, %s165_s24 }
   0x8   : > { %p576_p5 = pneg %p713_p3  ;;  %p632_p12 = scmp.lt.s32.totalorder %s623_s25, %s623_s25 }
   0xa   : > { %p577_p6 = pnand %p717_p4, %p576_p5  ;;  %p633_p13 = por %p632_p12, %p631_p11 }
   0xc   : > { %p625_p8 = pneg %p577_p6 }
   0xe   : > { %p626_p9 = pnand %p625_p8, %p624_p7 }
  0x10   : > { %p627_p10 = pneg %p626_p9 }
  0x12   : > { %p634_p0 = pnand %p633_p13, %p627_p10 }
  0x14   : > { %637 = shalt.err (!%p634_p0)
}
  0x15   : > { %s666_s26 = smov [#allocation2]   ;;  %194 = sbr.rel (%p713_p3) target bundleno = 285 (0x11d), region = 36 }
  0x16   : > { %579 = dma.vmem_to_smem (!%p577_p6), %s165_s24, 32, %s666_s26, [#allocation3]  }
  0x1c   : > { %651 = dma.done.wait (%p717_p4), [#allocation3], 32  }
  0x1d   : > { %653 = vsyncadd (%p717_p4), [#allocation3], 4294967264 }
  0x1e   : > { %200 = sfence }
  0x1f   : > { %v607_v0 = vld [vmem:[%s809_s2 + $0x40] sm:$0xff]   ;;  %v609_v2 = vld [vmem:[%s809_s2 + $0x48] sm:$0xff]   ;;  %p225_p1 = scmp.lt.s32.totalorder %s656_s15, 1  ;;  %v611_v4 = vld [vmem:[%s809_s2 + $0x50] sm:$0xff]   ;;  %s531_s11 = sshll.u32 %s656_s15, 7  ;;  %v251_v8 = vlaneseq  ;;  %vm433_vm0 = vcmask 1040384  }
  0x20   : > { %v608_v1 = vld [vmem:[%s809_s2] sm:$0xff]   ;;  %550 = vmatprep.subr.bf16.mxu0 %v607_v0  ;;  %v610_v3 = vld [vmem:[%s809_s2 + $0x8] sm:$0xff]   ;;  %v612_v5 = vld [vmem:[%s809_s2 + $0x10] sm:$0xff]   ;;  %s242_s14 = sadd.s32 1, %s531_s11  ;;  %s241_s21 = sld [smem:[#allocation2 + %s531_s11]] }
  0x21   : > { %551 = vmatpush3.bf16.msra.mxu0 %v608_v1  ;;  %s819_s15 = smov (!%p225_p1, %s656_s15), 1  ;;  %v613_v6 = vld [vmem:[%s809_s2 + $0x58] sm:$0xff]   ;;  %s243_s23 = sld [smem:[#allocation2 + %s242_s14]]  ;;  %v615_v9 = vld [vmem:[%s809_s2 + $0x60] sm:$0xff]   ;;  %v252_v11 = vshrl.u32 %v251_v8, 7  ;;  %v617_v12 = vld [vmem:[%s809_s2 + $0x68] sm:$0xff]  }
  0x22   : > { %552 = vmatprep.subr.bf16.mxu0 %v609_v2  ;;  %s530_s22 = sshll.u32 %s819_s15, 1  ;;  %v614_v7 = vld [vmem:[%s809_s2 + $0x18] sm:$0xff]   ;;  %v616_v10 = vld [vmem:[%s809_s2 + $0x20] sm:$0xff]   ;;  %v618_v17 = vld [vmem:[%s809_s2 + $0x28] sm:$0xff]   ;;  %s238_s27 = scalar_lea.vmem %s811_s4, %s819_s15  ;;  %vm434_vm1 = vsmask.f32 256 }
  0x23   : > { %s232_s30 = scalar_lea.vmem %s808_s1, %s530_s22  ;;  %v257_v19 = vsub.s32 2, %v252_v11  ;;  %v619_v20 = vld [vmem:[%s809_s2 + $0x70] sm:$0xff]   ;;  %v253_v22 = vsub.s32 0, %v252_v11  ;;  %v621_v25 = vld [vmem:[%s809_s2 + $0x78] sm:$0xff]   ;;  %v295_v31 = vld [vmem:[%s810_s3] sm:$0x1] }
  0x24   : > { %v244_v13 = vld [vmem:[%s232_s30] sm:$0x3]  ;;  %v620_v23 = vld [vmem:[%s809_s2 + $0x30] sm:$0xff]   ;;  %v622_v28 = vld [vmem:[%s809_s2 + $0x38] sm:$0xff]  }
  0x25   : > { %553 = vmatpush3.bf16.msra.mxu0 %v610_v3  ;;  %v245_v15 = vunpack.c.l.bf16 %v244_v13  ;;  %vm435_vm2 = vmand %vm433_vm0, %vm434_vm1  ;;  %v436_v37 = vld [vmem:[%s238_s27] sm:$0x1] }
  0x26   : > { %554 = vmatprep.subr.bf16.mxu0 %v611_v4  ;;  %v246_v14 = vstv %s241_s21 }
  0x27   : > { %v248_v16 = vstv %s243_s23  ;;  %v247_v18 = vsub.f32 %v245_v15, %v246_v14 }
  0x29   : > { %555 = vmatpush3.bf16.msra.mxu0 %v612_v5  ;;  %v249_v21 = vmul.f32 %v248_v16, %v247_v18 }
  0x2a   : > { %556 = vmatprep.subr.bf16.mxu0 %v613_v6 }
  0x2b   : > { %v258_v24 = vrot.slane %v249_v21, %v257_v19  ;;  %v254_v27 = vrot.slane %v249_v21, %v253_v22 }
  0x2d   : > { %557 = vmatpush3.bf16.msra.mxu0 %v614_v7  ;;  %v262_v26 = vpack.c.bf16 %v258_v24, %v258_v24  ;;  %v261_v29 = vpack.c.bf16 %v254_v27, %v254_v27 }
  0x2e   : > { %558 = vmatprep.subr.bf16.mxu0 %v615_v9 }
  0x2f   : > { %424 = vmatprep.mubr.bf16.mxu0 %v262_v26 }
  0x31   : > { %559 = vmatpush3.bf16.msra.mxu0 %v616_v10 }
  0x32   : > { %560 = vmatprep.subr.bf16.mxu0 %v617_v12 }
  0x35   : > { %561 = vmatpush3.bf16.msra.mxu0 %v618_v17 }
  0x36   : > { %562 = vmatprep.subr.bf16.mxu0 %v619_v20 }
  0x39   : > { %563 = vmatpush3.bf16.msra.mxu0 %v620_v23 }
  0x3a   : > { %564 = vmatprep.subr.bf16.mxu0 %v621_v25 }
  0x3d   : > { %565 = vmatpush3.bf16.msra.mxu0 %v622_v28 }
  0x40   : > { %425 = vmatmul.mubr.bf16.vlgmr.msra.gmra.mrb[0].mxu0 %v261_v29 }
 0x113   : > { %v566_v30 = vpop.f32.mrb[0].mxu0 }
 0x114   : > { %v567_v32 = vpop.f32.mrb[1].mxu0 }
 0x115   : > { %v568_v33 = vadd.f32 %v567_v32, %v566_v30  ;;  %v569_v34 = vpop.f32.mrb[2].mxu0 }
 0x116   : > { %v570_v35 = vpop.f32.mrb[3].mxu0 }
 0x117   : > { %v427_v36 = vadd.f32 %v568_v33, %v295_v31 }
 0x119   : > { %v432_v38 = vpack.c.bf16 %v427_v36, %v427_v36 }
 0x11b   : > { %v437_v39 = vsel %vm435_vm2, %v432_v38, %v436_v37 }
 0x11c   : > { %438 = vst [vmem:[%s238_s27] sm:$0x1] %v437_v39 }
 0x11d PF: > { %s15_s17 = sadd.s32 1, %s664_s17   ;;  %s814_s15 = smov %s660_s16 }
 0x11e   : > { %p12_p2 = scmp.ge.s32.totalorder %s15_s17, 4   ;;  %s815_s16 = smov %s817_s19 }
 0x120   :  { %14 = sbr.rel (!%p12_p2) target bundleno = 2 (0x2), region = 71 }
 0x127   :  { %462 = vsyncpa [#allocation3], 1 }
 0x128   :  { %464 = vsyncpa [#allocation3 + $0x1], 1 }

// kernel: as_mlp_forward.97
= control target key start
LH: loop header
LB: loop body
LE: loop exit
PB: predicated region body
PF: predicated region fallthrough
CT: control target
= control target key end

     0   :  { %v122_v0 = vmov 0.0   ;;  %vm123_vm0 = vmmov 0   ;;  %vm47_vm1 = vcmask 392192   ;;  %vm92_vm2 = vcmask 385024   ;;  %s162_s1 = inlined_call_operand.vmem [shape: bf16[48,48], index: 1, kind: input, shape index: {}]   ;;  %s163_s0 = inlined_call_operand.vmem [shape: bf16[2,48], index: 0, kind: input, shape index: {}]   ;;  %s164_s2 = inlined_call_operand.vmem [shape: f32[1,48], index: 2, kind: input, shape index: {}]   ;;  %s165_s3 = inlined_call_operand.vmem [shape: bf16[2,48], index: 3, kind: output, shape index: {}]  }
   0x1   :  { %107 = vmatprep.subr.bf16.mxu0 %v122_v0  ;;  %v119_v1 = vld [vmem:[%s162_s1] sm:$0xff]   ;;  %113 = vmatprep.mubr.msk.bf16.mxu0 %vm123_vm0, %v122_v0  ;;  %v120_v2 = vld [vmem:[%s162_s1 + $0x8] sm:$0xff]   ;;  %v121_v3 = vld [vmem:[%s162_s1 + $0x10] sm:$0xff]  }
   0x2   :  { %108 = vmatpush3.bf16.msra.mxu0 %v119_v1  ;;  %v15_v4 = vld [vmem:[%s163_s0] sm:$0x1] }
   0x3   :  { %109 = vmatprep.subr.bf16.mxu0 %v122_v0  ;;  %v98_v5 = vld [vmem:[%s164_s2] ss:$0 sm:$0xff] }
   0x6   :  { %110 = vmatpush3.bf16.msra.mxu0 %v120_v2 }
   0x7   :  { %111 = vmatprep.subr.bf16.mxu0 %v122_v0 }
   0xa   :  { %112 = vmatpush3.bf16.msra.mxu0 %v121_v3 }
   0xd   :  { %114 = vmatmul.mubr.msk.bf16.vlgmr.msra.gmra.mrb[0].mxu0 %vm47_vm1, %v15_v4 }
  0xe0   :  { %v85_v6 = vpop.f32.mrb[0].mxu0 }
  0xe1   :  { %v86_v7 = vadd.f32 %v98_v5, %v85_v6  ;;  %v115_v8 = vpop.f32.mrb[1].mxu0 }
  0xe2   :  { %v88_v9 = vpop.f32.mrb[2].mxu0 }
  0xe3   :  { %v91_v10 = vpack.c.bf16 %v86_v7, %v86_v7  ;;  %v116_v11 = vpop.f32.mrb[3].mxu0 }
  0xe5   :  { %93 = vst.msk [vmem:[%s165_s3] sm:$0x1] %vm92_vm2, %v91_v10 }

// kernel: as_mlp_forward.98
= control target key start
LH: loop header
LB: loop body
LE: loop exit
PB: predicated region body
PF: predicated region fallthrough
CT: control target
= control target key end

     0   :  { %v135_v0 = vmov 0.0   ;;  %vm136_vm0 = vmmov 0   ;;  %vm55_vm1 = vcmask 1043456   ;;  %vm51_vm2 = vcmask 457728   ;;  %s178_s1 = inlined_call_operand.vmem [shape: bf16[56,56], index: 1, kind: input, shape index: {}]   ;;  %s179_s0 = inlined_call_operand.vmem [shape: bf16[2,56], index: 0, kind: input, shape index: {}]   ;;  %s180_s2 = inlined_call_operand.vmem [shape: f32[1,56], index: 2, kind: input, shape index: {}]   ;;  %s181_s3 = inlined_call_operand.vmem [shape: bf16[2,56], index: 3, kind: output, shape index: {}]  }
   0x1   :  { %117 = vmatprep.subr.bf16.mxu0 %v135_v0  ;;  %v131_v1 = vld [vmem:[%s178_s1] sm:$0xff]   ;;  %125 = vmatprep.mubr.msk.bf16.mxu0 %vm136_vm0, %v135_v0  ;;  %v132_v2 = vld [vmem:[%s178_s1 + $0x8] sm:$0xff]   ;;  %v133_v3 = vld [vmem:[%s178_s1 + $0x10] sm:$0xff]   ;;  %vm100_vm3 = vcmask 450560  }
   0x2   :  { %118 = vmatpush3.bf16.msra.mxu0 %v131_v1  ;;  %v134_v4 = vld [vmem:[%s178_s1 + $0x18] ss:$0 sps:$4 sm:$0xff]   ;;  %v15_v6 = vld [vmem:[%s179_s0] sm:$0x1] }
   0x3   :  { %119 = vmatprep.subr.bf16.mxu0 %v135_v0  ;;  %v57_v5 = vsel %vm55_vm1, %v134_v4, 0  ;;  %v106_v7 = vld [vmem:[%s180_s2] ss:$0 sm:$0xff] }
   0x6   :  { %120 = vmatpush3.bf16.msra.mxu0 %v132_v2 }
   0x7   :  { %121 = vmatprep.subr.bf16.mxu0 %v135_v0 }
   0xa   :  { %122 = vmatpush3.bf16.msra.mxu0 %v133_v3 }
   0xb   :  { %123 = vmatprep.subr.bf16.mxu0 %v135_v0 }
   0xe   :  { %124 = vmatpush3.bf16.msra.mxu0 %v57_v5 }
  0x11   :  { %126 = vmatmul.mubr.msk.bf16.vlgmr.msra.gmra.mrb[0].mxu0 %vm51_vm2, %v15_v6 }
  0xe4   :  { %v93_v8 = vpop.f32.mrb[0].mxu0 }
  0xe5   :  { %v94_v9 = vadd.f32 %v106_v7, %v93_v8  ;;  %v127_v10 = vpop.f32.mrb[1].mxu0 }
  0xe6   :  { %v96_v11 = vpop.f32.mrb[2].mxu0 }
  0xe7   :  { %v99_v12 = vpack.c.bf16 %v94_v9, %v94_v9  ;;  %v128_v13 = vpop.f32.mrb[3].mxu0 }
  0xe9   :  { %101 = vst.msk [vmem:[%s181_s3] sm:$0x1] %vm100_vm3, %v99_v12 }

// kernel: as_mlp_forward.100
= control target key start
LH: loop header
LB: loop body
LE: loop exit
PB: predicated region body
PF: predicated region fallthrough
CT: control target
= control target key end

     0   :  { %10 = vsyncpa [#allocation3], 0  ;;  %s670_s18 = smov 0   ;;  %s672_s19 = smov 0   ;;  %s765_s0 = inlined_call_operand.vmem [shape: f32[2,2], index: 0, kind: input, shape index: {}]   ;;  %s766_s1 = inlined_call_operand.vmem [shape: bf16[2,1,128], index: 1, kind: input, shape index: {}]   ;;  %s767_s2 = inlined_call_operand.vmem [shape: bf16[128,128], index: 2, kind: input, shape index: {}]   ;;  %s768_s3 = inlined_call_operand.vmem [shape: f32[1,128], index: 3, kind: input, shape index: {}]   ;;  %s769_s4 = inlined_call_operand.vmem [shape: bf16[2,1,128], index: 4, kind: input, shape index: {}]   ;;  %s770_s5 = inlined_call_operand.vmem [shape: bf16[2,1,128], index: 5, kind: output, shape index: {}]  }
   0x1   :  { %s674_s20 = smov 0  }
   0x2 LB: > { %s502_s21 = sadd.s32 4294967295, %s635_s20   ;;  %s28_s22 = sadd.s32 1, %s631_s19  ;;  %s635_s20 = sphi %s674_s20, %s16_s20   ;;  %s631_s19 = sphi %s672_s19, %s774_s19   ;;  %s627_s18 = sphi %s670_s18, %s773_s18  }
   0x3   : > { %p30_p0 = scmp.ge.s32.totalorder %s28_s22, 2  ;;  %p504_p1 = scmp.ge.s32.totalorder %s635_s20, 1 }
   0x4   : > { %p180_p2 = scmp.lt.s32.totalorder %s635_s20, 3  ;;  %p695_p4 = scmp.eq.s32.totalorder %s502_s21, 0 }
   0x5   : > { %s776_s22 = smov (%p30_p0, %s28_s22), 0  ;;  %s193_s27 = sshll.u32 %s765_s0, 4  ;;  %s194_s27 = int_to_ptr.vmem [resolvable:$true] %s193_s27 }
   0x6   : > { %p691_p3 = pnand %p504_p1, %p180_p2  ;;  %s594_s28 = scalar_lea.vmem %s194_s27, 32 }
   0x7   : > { %p595_p7 = scmp.ne.s32.totalorder %s194_s27, %s594_s28  ;;  %p602_p11 = scmp.lt.s32.totalorder %s194_s27, %s194_s27 }
   0x8   : > { %p553_p5 = pneg %p691_p3  ;;  %p603_p12 = scmp.lt.s32.totalorder %s594_s28, %s594_s28 }
   0xa   : > { %p554_p6 = pnand %p695_p4, %p553_p5  ;;  %p604_p13 = por %p603_p12, %p602_p11 }
   0xc   : > { %p596_p8 = pneg %p554_p6 }
   0xe   : > { %p597_p9 = pnand %p596_p8, %p595_p7 }
  0x10   : > { %p598_p10 = pneg %p597_p9 }
  0x12   : > { %p605_p0 = pnand %p604_p13, %p598_p10 }
  0x14   : > { %608 = shalt.err (!%p605_p0)
}
  0x15   : > { %s637_s29 = smov [#allocation2]   ;;  %230 = sbr.rel (%p691_p3) target bundleno = 284 (0x11c), region = 40 }
  0x16   : > { %556 = dma.vmem_to_smem (!%p554_p6), %s194_s27, 32, %s637_s29, [#allocation3]  }
  0x1c   : > { %622 = dma.done.wait (%p695_p4), [#allocation3], 32  }
  0x1d   : > { %624 = vsyncadd (%p695_p4), [#allocation3], 4294967264 }
  0x1e   : > { %236 = sfence }
  0x1f   : > { %v586_v0 = vld [vmem:[%s767_s2] sm:$0xff]   ;;  %v638_v1 = vmov 0.0   ;;  %v587_v2 = vld [vmem:[%s767_s2 + $0x8] sm:$0xff]   ;;  %vm639_vm0 = vmmov 0   ;;  %p267_p1 = scmp.lt.s32.totalorder %s627_s18, 1  ;;  %v588_v3 = vld [vmem:[%s767_s2 + $0x10] sm:$0xff]  }
  0x20   : > { %529 = vmatprep.subr.bf16.mxu0 %v638_v1  ;;  %545 = vmatprep.mubr.msk.bf16.mxu0 %vm639_vm0, %v638_v1  ;;  %s509_s11 = sshll.u32 %s627_s18, 7  ;;  %v589_v4 = vld [vmem:[%s767_s2 + $0x18] sm:$0xff]   ;;  %v590_v5 = vld [vmem:[%s767_s2 + $0x20] sm:$0xff]   ;;  %v591_v8 = vld [vmem:[%s767_s2 + $0x28] sm:$0xff]   ;;  %vm406_vm1 = vcmask 1040384  }
  0x21   : > { %530 = vmatpush3.bf16.msra.mxu0 %v586_v0  ;;  %s778_s18 = smov (!%p267_p1, %s627_s18), 1  ;;  %s287_s14 = sld [smem:[#allocation2 + %s509_s11]]  ;;  %v592_v11 = vld [vmem:[%s767_s2 + $0x30] sm:$0xff]   ;;  %v593_v14 = vld [vmem:[%s767_s2 + $0x38] sm:$0xff]   ;;  %v313_v17 = vld [vmem:[%s768_s3] sm:$0x1] }
  0x22   : > { %531 = vmatprep.subr.bf16.mxu0 %v638_v1  ;;  %s272_s17 = scalar_lea.vmem %s766_s1, %s778_s18  ;;  %s288_s21 = sadd.s32 1, %s509_s11  ;;  %vm407_vm2 = vsmask.f32 256 }
  0x23   : > { %s289_s25 = sld [smem:[#allocation2 + %s288_s21]]  ;;  %v290_v6 = vld [vmem:[%s272_s17] sm:$0x1]  ;;  %s278_s9 = scalar_lea.vmem %s769_s4, %s778_s18  ;;  %vm408_vm3 = vmand %vm406_vm1, %vm407_vm2 }
  0x24   : > { %v291_v7 = vunpack.c.l.bf16 %v290_v6  ;;  %v402_v16 = vld [vmem:[%s278_s9] sm:$0x1] }
  0x25   : > { %532 = vmatpush3.bf16.msra.mxu0 %v587_v2  ;;  %v403_v18 = vunpack.c.l.bf16 %v402_v16 }
  0x26   : > { %533 = vmatprep.subr.bf16.mxu0 %v638_v1 }
  0x27   : > { %v292_v9 = vstv %s287_s14  ;;  %s284_s14 = scalar_lea.vmem %s770_s5, %s778_s18 }
  0x28   : > { %v293_v10 = vsub.f32 %v291_v7, %v292_v9  ;;  %v409_v25 = vld [vmem:[%s284_s14] sm:$0x1] }
  0x29   : > { %534 = vmatpush3.bf16.msra.mxu0 %v588_v3  ;;  %v294_v12 = vstv %s289_s25 }
  0x2a   : > { %535 = vmatprep.subr.bf16.mxu0 %v638_v1  ;;  %v295_v13 = vmul.f32 %v294_v12, %v293_v10 }
  0x2c   : > { %v296_v15 = vpack.c.bf16 %v295_v13, %v295_v13 }
  0x2d   : > { %536 = vmatpush3.bf16.msra.mxu0 %v589_v4 }
  0x2e   : > { %537 = vmatprep.subr.bf16.mxu0 %v638_v1 }
  0x31   : > { %538 = vmatpush3.bf16.msra.mxu0 %v590_v5 }
  0x32   : > { %539 = vmatprep.subr.bf16.mxu0 %v638_v1 }
  0x35   : > { %540 = vmatpush3.bf16.msra.mxu0 %v591_v8 }
  0x36   : > { %541 = vmatprep.subr.bf16.mxu0 %v638_v1 }
  0x39   : > { %542 = vmatpush3.bf16.msra.mxu0 %v592_v11 }
  0x3a   : > { %543 = vmatprep.subr.bf16.mxu0 %v638_v1 }
  0x3d   : > { %544 = vmatpush3.bf16.msra.mxu0 %v593_v14 }
  0x40   : > { %546 = vmatmul.mubr.bf16.vlgmr.msra.gmra.mrb[0].mxu0 %v296_v15 }
 0x113   : > { %v396_v19 = vpop.f32.mrb[0].mxu0 }
 0x114   : > { %v397_v20 = vadd.f32 %v396_v19, %v313_v17  ;;  %v547_v21 = vpop.f32.mrb[1].mxu0 }
 0x115   : > { %v399_v22 = vpop.f32.mrb[2].mxu0 }
 0x116   : > { %v404_v23 = vadd.f32 %v403_v18, %v397_v20  ;;  %v548_v24 = vpop.f32.mrb[3].mxu0 }
 0x118   : > { %v405_v26 = vpack.c.bf16 %v404_v23, %v404_v23 }
 0x11a   : > { %v410_v27 = vsel %vm408_vm3, %v405_v26, %v409_v25 }
 0x11b   : > { %411 = vst [vmem:[%s284_s14] sm:$0x1] %v410_v27 }
 0x11c PF: > { %s16_s20 = sadd.s32 1, %s635_s20   ;;  %s773_s18 = smov %s631_s19 }
 0x11d   : > { %p13_p2 = scmp.ge.s32.totalorder %s16_s20, 4   ;;  %s774_s19 = smov %s776_s22 }
 0x11f   :  { %15 = sbr.rel (!%p13_p2) target bundleno = 2 (0x2), region = 78 }
 0x126   :  { %435 = vsyncpa [#allocation3], 1 }
 0x127   :  { %437 = vsyncpa [#allocation3 + $0x1], 1 }

// kernel: as_mlp_forward.102
= control target key start
LH: loop header
LB: loop body
LE: loop exit
PB: predicated region body
PF: predicated region fallthrough
CT: control target
= control target key end

     0   :  { %9 = vsyncpa [#allocation3], 0  ;;  %s931_s15 = smov 0   ;;  %s933_s16 = smov 0   ;;  %s1113_s0 = inlined_call_operand.vmem [shape: f32[2,2], index: 0, kind: input, shape index: {}]   ;;  %s1114_s1 = inlined_call_operand.vmem [shape: bf16[2,1,128], index: 1, kind: input, shape index: {}]   ;;  %s1115_s2 = inlined_call_operand.vmem [shape: bf16[128,512], index: 2, kind: input, shape index: {}]   ;;  %s1116_s3 = inlined_call_operand.vmem [shape: f32[1,512], index: 3, kind: input, shape index: {}]   ;;  %s1117_s4 = inlined_call_operand.vmem [shape: bf16[2,1,512], index: 4, kind: output, shape index: {}]  }
   0x1   :  { %s935_s17 = smov 0  }
   0x2 LB: > { %s722_s18 = sadd.s32 4294967295, %s901_s17   ;;  %s27_s19 = sadd.s32 1, %s897_s16  ;;  %s901_s17 = sphi %s935_s17, %s15_s17   ;;  %s897_s16 = sphi %s933_s16, %s1125_s16   ;;  %s893_s15 = sphi %s931_s15, %s1124_s15  }
   0x3   : > { %p29_p0 = scmp.ge.s32.totalorder %s27_s19, 2  ;;  %p724_p1 = scmp.ge.s32.totalorder %s901_s17, 1 }
   0x4   : > { %p151_p2 = scmp.lt.s32.totalorder %s901_s17, 3  ;;  %p956_p4 = scmp.eq.s32.totalorder %s722_s18, 0 }
   0x5   : > { %s1127_s19 = smov (%p29_p0, %s27_s19), 0  ;;  %s164_s24 = sshll.u32 %s1113_s0, 4  ;;  %s165_s24 = int_to_ptr.vmem [resolvable:$true] %s164_s24 }
   0x6   : > { %p952_p3 = pnand %p724_p1, %p151_p2  ;;  %s860_s25 = scalar_lea.vmem %s165_s24, 32 }
   0x7   : > { %p861_p7 = scmp.ne.s32.totalorder %s165_s24, %s860_s25  ;;  %p868_p11 = scmp.lt.s32.totalorder %s165_s24, %s165_s24 }
   0x8   : > { %p771_p5 = pneg %p952_p3  ;;  %p869_p12 = scmp.lt.s32.totalorder %s860_s25, %s860_s25 }
   0xa   : > { %p772_p6 = pnand %p956_p4, %p771_p5  ;;  %p870_p13 = por %p869_p12, %p868_p11 }
   0xc   : > { %p862_p8 = pneg %p772_p6 }
   0xe   : > { %p863_p9 = pnand %p862_p8, %p861_p7 }
  0x10   : > { %p864_p10 = pneg %p863_p9 }
  0x12   : > { %p871_p0 = pnand %p870_p13, %p864_p10 }
  0x14   : > { %874 = shalt.err (!%p871_p0)
}
  0x15   : > { %s903_s26 = smov [#allocation2]   ;;  %192 = sbr.rel (%p952_p3) target bundleno = 317 (0x13d), region = 36 }
  0x16   : > { %774 = dma.vmem_to_smem (!%p772_p6), %s165_s24, 32, %s903_s26, [#allocation3]  }
  0x1c   : > { %888 = dma.done.wait (%p956_p4), [#allocation3], 32  }
  0x1d   : > { %890 = vsyncadd (%p956_p4), [#allocation3], 4294967264 }
  0x1e   : > { %198 = sfence }
  0x1f   : > { %v804_v0 = vld [vmem:[%s1115_s2 + $0x4] ss:$16 sps:$4 sm:$0xff]   ;;  %v806_v1 = vld [vmem:[%s1115_s2 + $0xc] ss:$16 sps:$4 sm:$0xff]   ;;  %v904_v2 = vmov 0   ;;  %p223_p1 = scmp.lt.s32.totalorder %s893_s15, 1  ;;  %v443_v40 = vlaneseq }
  0x20   : > { %495 = vmatprep.mubr.bf16.mxu0 %v904_v2  ;;  %536 = vmatprep.mubr.bf16.mxu1 %v904_v2  ;;  %v808_v3 = vld [vmem:[%s1115_s2] ss:$16 sps:$4 sm:$0xff]   ;;  %v809_v4 = vld [vmem:[%s1115_s2 + $0x8] ss:$16 sps:$4 sm:$0xff]   ;;  %v810_v5 = vld [vmem:[%s1115_s2 + $0x24] ss:$16 sps:$4 sm:$0xff]  }
  0x21   : > { %463 = vmatprep.subr.bf16.mxu0 %v804_v0  ;;  %504 = vmatprep.subr.bf16.mxu1 %v806_v1  ;;  %v812_v6 = vld [vmem:[%s1115_s2 + $0x2c] ss:$16 sps:$4 sm:$0xff]   ;;  %v814_v7 = vld [vmem:[%s1115_s2 + $0x20] ss:$16 sps:$4 sm:$0xff]   ;;  %v815_v8 = vld [vmem:[%s1115_s2 + $0x28] ss:$16 sps:$4 sm:$0xff]  }
  0x22   : > { %464 = vmatpush1.bf16.msra.mxu0 %v808_v3  ;;  %505 = vmatpush1.bf16.msra.mxu1 %v809_v4  ;;  %v816_v9 = vld [vmem:[%s1115_s2 + $0x44] ss:$16 sps:$4 sm:$0xff]   ;;  %v818_v10 = vld [vmem:[%s1115_s2 + $0x4c] ss:$16 sps:$4 sm:$0xff]   ;;  %v820_v11 = vld [vmem:[%s1115_s2 + $0x40] ss:$16 sps:$4 sm:$0xff]  }
  0x23   : > { %465 = vmatprep.subr.bf16.mxu0 %v810_v5  ;;  %506 = vmatprep.subr.bf16.mxu1 %v812_v6  ;;  %v821_v12 = vld [vmem:[%s1115_s2 + $0x48] ss:$16 sps:$4 sm:$0xff]   ;;  %v822_v13 = vld [vmem:[%s1115_s2 + $0x64] ss:$16 sps:$4 sm:$0xff]   ;;  %v824_v14 = vld [vmem:[%s1115_s2 + $0x6c] ss:$16 sps:$4 sm:$0xff]  }
  0x24   : > { %s730_s7 = sshll.u32 %s893_s15, 7  ;;  %v826_v15 = vld [vmem:[%s1115_s2 + $0x60] ss:$16 sps:$4 sm:$0xff]   ;;  %v827_v16 = vld [vmem:[%s1115_s2 + $0x68] ss:$16 sps:$4 sm:$0xff]   ;;  %s1129_s15 = smov (!%p223_p1, %s893_s15), 1 }
  0x25   : > { %v828_v17 = vld [vmem:[%s1115_s2 + $0x84] ss:$16 sps:$4 sm:$0xff]   ;;  %v830_v18 = vld [vmem:[%s1115_s2 + $0x8c] ss:$16 sps:$4 sm:$0xff]   ;;  %s239_s20 = sld [smem:[#allocation2 + %s730_s7]]  ;;  %s240_s21 = sadd.s32 1, %s730_s7 }
  0x26   : > { %466 = vmatpush1.bf16.msra.mxu0 %v814_v7  ;;  %507 = vmatpush1.bf16.msra.mxu1 %v815_v8  ;;  %v832_v19 = vld [vmem:[%s1115_s2 + $0x80] ss:$16 sps:$4 sm:$0xff]   ;;  %v833_v20 = vld [vmem:[%s1115_s2 + $0x88] ss:$16 sps:$4 sm:$0xff]   ;;  %v834_v21 = vld [vmem:[%s1115_s2 + $0xa4] ss:$16 sps:$4 sm:$0xff]   ;;  %s228_s7 = scalar_lea.vmem %s1114_s1, %s1129_s15 }
  0x27   : > { %467 = vmatprep.subr.bf16.mxu0 %v816_v9  ;;  %508 = vmatprep.subr.bf16.mxu1 %v818_v10  ;;  %s241_s28 = sld [smem:[#allocation2 + %s240_s21]]  ;;  %v836_v22 = vld [vmem:[%s1115_s2 + $0xac] ss:$16 sps:$4 sm:$0xff]   ;;  %v838_v23 = vld [vmem:[%s1115_s2 + $0xa0] ss:$16 sps:$4 sm:$0xff]   ;;  %v1078_v41 = vshrl.u32 %v443_v40, 7 }
  0x28   : > { %v839_v24 = vld [vmem:[%s1115_s2 + $0xa8] ss:$16 sps:$4 sm:$0xff]   ;;  %v840_v25 = vld [vmem:[%s1115_s2 + $0xc4] ss:$16 sps:$4 sm:$0xff]   ;;  %v842_v26 = vld [vmem:[%s1115_s2 + $0xcc] ss:$16 sps:$4 sm:$0xff]  }
  0x29   : > { %v242_v27 = vld [vmem:[%s228_s7] sm:$0x1]  ;;  %v845_v31 = vld [vmem:[%s1115_s2 + $0xc8] ss:$16 sps:$4 sm:$0xff]   ;;  %v846_v34 = vld [vmem:[%s1115_s2 + $0xe4] ss:$16 sps:$4 sm:$0xff]  }
  0x2a   : > { %468 = vmatpush1.bf16.msra.mxu0 %v820_v11  ;;  %509 = vmatpush1.bf16.msra.mxu1 %v821_v12  ;;  %v243_v29 = vunpack.c.l.bf16 %v242_v27  ;;  %v844_v30 = vld [vmem:[%s1115_s2 + $0xc0] ss:$16 sps:$4 sm:$0xff]   ;;  %v848_v35 = vld [vmem:[%s1115_s2 + $0xec] ss:$16 sps:$4 sm:$0xff]   ;;  %v851_v38 = vld [vmem:[%s1115_s2 + $0xe8] ss:$16 sps:$4 sm:$0xff]  }
  0x2b   : > { %469 = vmatprep.subr.bf16.mxu0 %v822_v13  ;;  %510 = vmatprep.subr.bf16.mxu1 %v824_v14  ;;  %v244_v28 = vstv %s239_s20  ;;  %v850_v37 = vld [vmem:[%s1115_s2 + $0xe0] ss:$16 sps:$4 sm:$0xff]   ;;  %v445_v42 = vsub.s32 0, %v1078_v41  ;;  %v453_v43 = vsub.s32 2, %v1078_v41  ;;  %v449_v45 = vsub.s32 1, %v1078_v41  ;;  %s729_s8 = sshll.u32 %s1129_s15, 2 }
  0x2c   : > { %v245_v32 = vsub.f32 %v243_v29, %v244_v28  ;;  %v281_v44 = vld [vmem:[%s1116_s3] sm:$0xf]  ;;  %v457_v46 = vsub.s32 3, %v1078_v41  ;;  %vm614_vm0 = vcmask 1040384   ;;  %vm615_vm1 = vsmask.f32 256  ;;  %s236_s11 = scalar_lea.vmem %s1117_s4, %s729_s8 }
  0x2d   : > { %v246_v33 = vstv %s241_s28  ;;  %v446_v47 = vrot.slane %v281_v44, %v445_v42  ;;  %v454_v48 = vrot.slane %v281_v44, %v453_v43  ;;  %v450_v49 = vrot.slane %v281_v44, %v449_v45  ;;  %vm1087_vm4 = vmand %vm614_vm0, %vm615_vm1 }
  0x2e   : > { %470 = vmatpush1.bf16.msra.mxu0 %v826_v15  ;;  %511 = vmatpush1.bf16.msra.mxu1 %v827_v16  ;;  %v247_v36 = vmul.f32 %v246_v33, %v245_v32  ;;  %v458_v50 = vrot.slane %v281_v44, %v457_v46  ;;  %vm617_vm2 = vcmask 1041409   ;;  %vm618_vm3 = vsmask.f32 1280  ;;  %v629_v46 = vld [vmem:[%s236_s11] sm:$0xf] }
  0x2f   : > { %471 = vmatprep.subr.bf16.mxu0 %v828_v17  ;;  %512 = vmatprep.subr.bf16.mxu1 %v830_v18  ;;  %vm1091_vm5 = vmand %vm617_vm2, %vm618_vm3  ;;  %vm621_vm6 = vcmask 1042434   ;;  %vm622_vm7 = vsmask.f32 2304  ;;  %vm625_vm10 = vcmask 1043459   ;;  %vm626_vm11 = vsmask.f32 3328 }
  0x30   : > { %v248_v39 = vpack.c.bf16 %v247_v36, %v247_v36  ;;  %vm620_vm8 = vmor %vm1091_vm5, %vm1087_vm4 }
  0x31   : > { %vm623_vm9 = vmand %vm621_vm6, %vm622_vm7 }
  0x32   : > { %472 = vmatpush1.bf16.msra.mxu0 %v832_v19  ;;  %513 = vmatpush1.bf16.msra.mxu1 %v833_v20  ;;  %v905_v19 = vmov 1966171168   ;;  %vm624_vm12 = vmor %vm623_vm9, %vm620_vm8 }
  0x33   : > { %473 = vmatprep.subr.bf16.mxu0 %v834_v21  ;;  %514 = vmatprep.subr.bf16.mxu1 %v836_v22  ;;  %v592_v20 = vunpack.c.l.s4 %v905_v19  ;;  %vm627_vm13 = vmand %vm625_vm10, %vm626_vm11 }
  0x34   : > { %vm628_vm14 = vmor %vm627_vm13, %vm624_vm12 }
  0x36   : > { %474 = vmatpush1.bf16.msra.mxu0 %v838_v23  ;;  %515 = vmatpush1.bf16.msra.mxu1 %v839_v24 }
  0x37   : > { %475 = vmatprep.subr.bf16.mxu0 %v840_v25  ;;  %516 = vmatprep.subr.bf16.mxu1 %v842_v26  ;;  %v593_v25 = vunpack.c.0.s8 %v592_v20 }
  0x3a   : > { %476 = vmatpush1.bf16.msra.mxu0 %v844_v30  ;;  %517 = vmatpush1.bf16.msra.mxu1 %v845_v31 }
  0x3b   : > { %477 = vmatprep.subr.bf16.mxu0 %v846_v34  ;;  %518 = vmatprep.subr.bf16.mxu1 %v848_v35 }
  0x3e   : > { %478 = vmatpush1.bf16.msra.mxu0 %v850_v37  ;;  %519 = vmatpush1.bf16.msra.mxu1 %v851_v38 }
  0x41   : > { %496 = vmatmul.mubr.bf16.vlgmr.msra.gmra.mrb[0].mxu0 %v248_v39  ;;  %537 = vmatmul.mubr.bf16.vlgmr.msra.gmra.mrb[0].mxu1 %v248_v39  ;;  %v596_v39 = vsub.s32 %v593_v25, %v1078_v41 }
 0x114   : > { %v497_v51 = vpop.f32.mrb[0].mxu0  ;;  %v538_v52 = vpop.f32.mrb[0].mxu1 }
 0x115   : > { %v498_v53 = vadd.f32 %v497_v51, %v446_v47  ;;  %v539_v54 = vadd.f32 %v538_v52, %v454_v48  ;;  %v499_v55 = vpop.f32.mrb[1].mxu0  ;;  %v540_v56 = vpop.f32.mrb[1].mxu1 }
 0x116   : > { %v500_v57 = vadd.f32 %v499_v55, %v450_v49  ;;  %v541_v58 = vadd.f32 %v540_v56, %v458_v50  ;;  %v501_v59 = vpop.f32.mrb[2].mxu0  ;;  %v542_v60 = vpop.f32.mrb[2].mxu1 }
 0x117   : > { %v549_v61 = vmul.f32 0.044715, %v498_v53  ;;  %v551_v62 = vmul.f32 0.044715, %v539_v54  ;;  %v502_v3 = vpop.f32.mrb[3].mxu0  ;;  %v543_v4 = vpop.f32.mrb[3].mxu1 }
 0x118   : > { %v550_v63 = vmul.f32 0.044715, %v500_v57  ;;  %v552_v0 = vmul.f32 0.044715, %v541_v58  ;;  %v545_v23 = vmul.f32 0.5, %v498_v53  ;;  %v547_v28 = vmul.f32 0.5, %v539_v54 }
 0x119   : > { %v553_v1 = vmul.f32 %v549_v61, %v498_v53  ;;  %v555_v2 = vmul.f32 %v551_v62, %v539_v54  ;;  %v546_v33 = vmul.f32 0.5, %v500_v57  ;;  %v548_v36 = vmul.f32 0.5, %v541_v58 }
 0x11a   : > { %v554_v5 = vmul.f32 %v550_v63, %v500_v57  ;;  %v556_v6 = vmul.f32 %v552_v0, %v541_v58 }
 0x11b   : > { %v557_v7 = vmul.f32 %v553_v1, %v498_v53  ;;  %v559_v8 = vmul.f32 %v555_v2, %v539_v54 }
 0x11c   : > { %v558_v9 = vmul.f32 %v554_v5, %v500_v57  ;;  %v560_v10 = vmul.f32 %v556_v6, %v541_v58 }
 0x11d   : > { %v561_v11 = vadd.f32 %v557_v7, %v498_v53  ;;  %v563_v12 = vadd.f32 %v559_v8, %v539_v54 }
 0x11e   : > { %v562_v13 = vadd.f32 %v558_v9, %v500_v57  ;;  %v564_v14 = vadd.f32 %v560_v10, %v541_v58 }
 0x11f   : > { %v565_v15 = vmul.f32 0.7978846, %v561_v11  ;;  %v567_v16 = vmul.f32 0.7978846, %v563_v12 }
 0x120   : > { %v566_v17 = vmul.f32 0.7978846, %v562_v13  ;;  %v568_v18 = vmul.f32 0.7978846, %v564_v14 }
 0x121   : > { %852 = vtanh.f32 %v565_v15 }
 0x122   : > { %854 = vtanh.f32 %v567_v16 }
 0x123   : > { %856 = vtanh.f32 %v566_v17 }
 0x124   : > { %858 = vtanh.f32 %v568_v18 }
 0x12b   : > { %v853_v21 = vpop.eup %852 }
 0x12c   : > { %v855_v22 = vpop.eup %854  ;;  %v573_v24 = vadd.f32 1.0, %v853_v21 }
 0x12d   : > { %v857_v27 = vpop.eup %856  ;;  %v575_v29 = vadd.f32 1.0, %v855_v22 }
 0x12e   : > { %v859_v31 = vpop.eup %858  ;;  %v577_v32 = vmul.f32 %v573_v24, %v545_v23  ;;  %v574_v34 = vadd.f32 1.0, %v857_v27 }
 0x12f   : > { %v579_v35 = vmul.f32 %v575_v29, %v547_v28  ;;  %v576_v37 = vadd.f32 1.0, %v859_v31 }
 0x130   : > { %v578_v38 = vmul.f32 %v574_v34, %v546_v33 }
 0x131   : > { %v580_v40 = vmul.f32 %v576_v37, %v548_v36 }
 0x132   : > { %v763_v42 = vpack.c.bf16 %v578_v38, %v577_v32 }
 0x133   : > { %v764_v43 = vpack.c.bf16 %v580_v40, %v579_v35 }
 0x134   : > { %v597_v44 = vrot.slane %v763_v42, %v596_v39 }
 0x135   : > { %v604_v45 = vrot.slane %v764_v43, %v596_v39 }
 0x137   : > { %v605_v41 = vcombine.low %v597_v44, %v604_v45 }
 0x139   : > { %v612_v47 = vrot.slane %v605_v41, %v596_v39 }
 0x13b   : > { %v630_v48 = vsel %vm628_vm14, %v612_v47, %v629_v46 }
 0x13c   : > { %631 = vst [vmem:[%s236_s11] sm:$0xf] %v630_v48 }
 0x13d PF: > { %s15_s17 = sadd.s32 1, %s901_s17   ;;  %s1124_s15 = smov %s897_s16 }
 0x13e   : > { %p12_p2 = scmp.ge.s32.totalorder %s15_s17, 4   ;;  %s1125_s16 = smov %s1127_s19 }
 0x140   :  { %14 = sbr.rel (!%p12_p2) target bundleno = 2 (0x2), region = 71 }
 0x147   :  { %659 = vsyncpa [#allocation3], 1 }
 0x148   :  { %661 = vsyncpa [#allocation3 + $0x1], 1 }

// kernel: as_mlp_forward.103
= control target key start
LH: loop header
LB: loop body
LE: loop exit
PB: predicated region body
PF: predicated region fallthrough
CT: control target
= control target key end

     0   :  { %v511_v22 = vmov 1966171168   ;;  %v102_v24 = vlaneseq  ;;  %s645_s1 = inlined_call_operand.vmem [shape: bf16[512,128], index: 1, kind: input, shape index: {}]   ;;  %s646_s0 = inlined_call_operand.vmem [shape: bf16[2,512], index: 0, kind: input, shape index: {}]   ;;  %s647_s2 = inlined_call_operand.vmem [shape: f32[1,128], index: 2, kind: input, shape index: {}]   ;;  %s648_s3 = inlined_call_operand.vmem [shape: bf16[2,128], index: 3, kind: input, shape index: {}]   ;;  %s649_s4 = inlined_call_operand.vmem [shape: bf16[2,128], index: 4, kind: output, shape index: {}]  }
   0x1   :  { %v479_v0 = vld [vmem:[%s645_s1 + $0x40] sm:$0xff]   ;;  %v483_v4 = vld [vmem:[%s645_s1 + $0x48] sm:$0xff]   ;;  %v487_v8 = vld [vmem:[%s645_s1 + $0x50] sm:$0xff]   ;;  %v100_v23 = vunpack.c.l.s4 %v511_v22 }
   0x2   :  { %v480_v1 = vld [vmem:[%s645_s1 + $0xc0] sm:$0xff]   ;;  %434 = vmatprep.subr.bf16.mxu0 %v479_v0  ;;  %v484_v5 = vld [vmem:[%s645_s1 + $0xc8] sm:$0xff]   ;;  %v488_v9 = vld [vmem:[%s645_s1 + $0xd0] sm:$0xff]   ;;  %v103_v30 = vshrl.u32 %v102_v24, 7 }
   0x3   :  { %v481_v2 = vld [vmem:[%s645_s1] sm:$0xff]   ;;  %456 = vmatprep.subr.bf16.mxu1 %v480_v1  ;;  %v485_v6 = vld [vmem:[%s645_s1 + $0x8] sm:$0xff]   ;;  %v489_v10 = vld [vmem:[%s645_s1 + $0x10] sm:$0xff]   ;;  %v101_v29 = vunpack.c.0.s8 %v100_v23 }
   0x4   :  { %v482_v3 = vld [vmem:[%s645_s1 + $0x80] sm:$0xff]   ;;  %435 = vmatpush3.bf16.msra.mxu0 %v481_v2  ;;  %v486_v7 = vld [vmem:[%s645_s1 + $0x88] sm:$0xff]   ;;  %v490_v11 = vld [vmem:[%s645_s1 + $0x90] sm:$0xff]  }
   0x5   :  { %457 = vmatpush3.bf16.msra.mxu1 %v482_v3  ;;  %436 = vmatprep.subr.bf16.mxu0 %v483_v4  ;;  %v491_v12 = vld [vmem:[%s645_s1 + $0x58] sm:$0xff]   ;;  %v495_v16 = vld [vmem:[%s645_s1 + $0x60] sm:$0xff]   ;;  %v499_v20 = vld [vmem:[%s645_s1 + $0x68] sm:$0xff]   ;;  %v104_v35 = vsub.s32 %v101_v29, %v103_v30 }
   0x6   :  { %458 = vmatprep.subr.bf16.mxu1 %v484_v5  ;;  %v492_v13 = vld [vmem:[%s645_s1 + $0xd8] sm:$0xff]   ;;  %v496_v17 = vld [vmem:[%s645_s1 + $0xe0] sm:$0xff]   ;;  %v500_v21 = vld [vmem:[%s645_s1 + $0xe8] sm:$0xff]  }
   0x7   :  { %v493_v14 = vld [vmem:[%s645_s1 + $0x18] sm:$0xff]   ;;  %v497_v18 = vld [vmem:[%s645_s1 + $0x20] sm:$0xff]   ;;  %v501_v25 = vld [vmem:[%s645_s1 + $0x28] sm:$0xff]  }
   0x8   :  { %437 = vmatpush3.bf16.msra.mxu0 %v485_v6  ;;  %v494_v15 = vld [vmem:[%s645_s1 + $0x98] sm:$0xff]   ;;  %v498_v19 = vld [vmem:[%s645_s1 + $0xa0] sm:$0xff]   ;;  %v502_v26 = vld [vmem:[%s645_s1 + $0xa8] sm:$0xff]  }
   0x9   :  { %459 = vmatpush3.bf16.msra.mxu1 %v486_v7  ;;  %438 = vmatprep.subr.bf16.mxu0 %v487_v8  ;;  %v503_v27 = vld [vmem:[%s645_s1 + $0x70] sm:$0xff]   ;;  %v507_v33 = vld [vmem:[%s645_s1 + $0x78] sm:$0xff]   ;;  %v401_v38 = vld.sshfl [vmem:[%s646_s0] sm:$0x33 pattern:$0x75316420] }
   0xa   :  { %460 = vmatprep.subr.bf16.mxu1 %v488_v9  ;;  %v504_v28 = vld [vmem:[%s645_s1 + $0xf0] sm:$0xff]   ;;  %v508_v34 = vld [vmem:[%s645_s1 + $0xf8] sm:$0xff]   ;;  %v98_v39 = vcombine.high %v401_v38, %v401_v38  ;;  %v105_v40 = vrot.slane %v401_v38, %v104_v35  ;;  %v400_v45 = vld [vmem:[%s647_s2] ss:$0 sm:$0xff] }
   0xb   :  { %v505_v31 = vld [vmem:[%s645_s1 + $0x30] sm:$0xff]   ;;  %v509_v36 = vld [vmem:[%s645_s1 + $0x38] sm:$0xff]   ;;  %v391_v47 = vld [vmem:[%s648_s3] sm:$0x1] }
   0xc   :  { %439 = vmatpush3.bf16.msra.mxu0 %v489_v10  ;;  %v506_v32 = vld [vmem:[%s645_s1 + $0xb0] sm:$0xff]   ;;  %v510_v37 = vld [vmem:[%s645_s1 + $0xb8] sm:$0xff]   ;;  %v112_v41 = vrot.slane %v98_v39, %v104_v35  ;;  %v113_v42 = vcombine.high %v105_v40, %v105_v40  ;;  %v392_v55 = vunpack.c.l.bf16 %v391_v47 }
   0xd   :  { %461 = vmatpush3.bf16.msra.mxu1 %v490_v11  ;;  %440 = vmatprep.subr.bf16.mxu0 %v491_v12 }
   0xe   :  { %462 = vmatprep.subr.bf16.mxu1 %v492_v13  ;;  %343 = vmatprep.mubr.bf16.mxu0 %v112_v41  ;;  %v114_v43 = vcombine.high %v112_v41, %v112_v41 }
  0x10   :  { %441 = vmatpush3.bf16.msra.mxu0 %v493_v14  ;;  %383 = vmatprep.mubr.bf16.mxu1 %v114_v43 }
  0x11   :  { %463 = vmatpush3.bf16.msra.mxu1 %v494_v15  ;;  %442 = vmatprep.subr.bf16.mxu0 %v495_v16 }
  0x12   :  { %464 = vmatprep.subr.bf16.mxu1 %v496_v17 }
  0x14   :  { %443 = vmatpush3.bf16.msra.mxu0 %v497_v18 }
  0x15   :  { %465 = vmatpush3.bf16.msra.mxu1 %v498_v19  ;;  %444 = vmatprep.subr.bf16.mxu0 %v499_v20 }
  0x16   :  { %466 = vmatprep.subr.bf16.mxu1 %v500_v21 }
  0x18   :  { %445 = vmatpush3.bf16.msra.mxu0 %v501_v25 }
  0x19   :  { %467 = vmatpush3.bf16.msra.mxu1 %v502_v26  ;;  %446 = vmatprep.subr.bf16.mxu0 %v503_v27 }
  0x1a   :  { %468 = vmatprep.subr.bf16.mxu1 %v504_v28 }
  0x1c   :  { %447 = vmatpush3.bf16.msra.mxu0 %v505_v31 }
  0x1d   :  { %469 = vmatpush3.bf16.msra.mxu1 %v506_v32  ;;  %448 = vmatprep.subr.bf16.mxu0 %v507_v33 }
  0x1e   :  { %470 = vmatprep.subr.bf16.mxu1 %v508_v34 }
  0x20   :  { %449 = vmatpush3.bf16.msra.mxu0 %v509_v36 }
  0x21   :  { %471 = vmatpush3.bf16.msra.mxu1 %v510_v37 }
  0x23   :  { %344 = vmatmul.mubr.bf16.vlgmr.msra.gmra.mrb[0].mxu0 %v105_v40 }
  0x24   :  { %384 = vmatmul.mubr.bf16.vlgmr.msra.gmra.mrb[0].mxu1 %v113_v42 }
  0xf6   :  { %v450_v44 = vpop.f32.mrb[0].mxu0 }
  0xf7   :  { %v451_v46 = vpop.f32.mrb[1].mxu0  ;;  %v472_v48 = vpop.f32.mrb[0].mxu1 }
  0xf8   :  { %v452_v49 = vadd.f32 %v451_v46, %v450_v44  ;;  %v453_v50 = vpop.f32.mrb[2].mxu0  ;;  %v473_v51 = vpop.f32.mrb[1].mxu1 }
  0xf9   :  { %v454_v52 = vpop.f32.mrb[3].mxu0  ;;  %v474_v54 = vadd.f32 %v473_v51, %v472_v48  ;;  %v475_v56 = vpop.f32.mrb[2].mxu1 }
  0xfa   :  { %v346_v53 = vadd.f32 %v452_v49, %v400_v45  ;;  %v476_v57 = vpop.f32.mrb[3].mxu1 }
  0xfc   :  { %v386_v58 = vadd.f32 %v474_v54, %v346_v53 }
  0xfe   :  { %v393_v59 = vadd.f32 %v392_v55, %v386_v58 }
 0x100   :  { %v394_v60 = vpack.c.bf16 %v393_v59, %v393_v59 }
 0x102   :  { %395 = vst [vmem:[%s649_s4] sm:$0x1] %v394_v60 }

</bundles_post_ra>
